<compile_context>
chip_gen: v6e
topology: v6e:2x2x1
jax: 0.10.0
libtpu: 0.0.40
codegen_flags: <defaults>
</compile_context>

<pallas_src>
import jax
import jax.numpy as jnp
from jax.experimental import pallas as pl
from jax.experimental.pallas import tpu as pltpu

LEAKY_SLOPE = 0.01  # PyTorch nn.LeakyReLU default
LN_EPS = 1e-5       # PyTorch nn.LayerNorm default
SEG_ALIGN = 128     # lane alignment for the fused-projection segments


def _round_up(v, m):
    return ((v + m - 1) // m) * m


def _ln_leaky(h, gamma, beta):
    """LayerNorm over last axis (biased variance, matches PyTorch) + LeakyReLU. All f32."""
    mu = jnp.mean(h, axis=-1, keepdims=True)
    diff = h - mu
    var = jnp.mean(diff * diff, axis=-1, keepdims=True)
    y = diff * jax.lax.rsqrt(var + LN_EPS)
    y = y * gamma + beta
    return jnp.where(y >= 0, y, LEAKY_SLOPE * y)


def _make_kernel(num_inter_layers: int, intermediate_dim: int, out_dim: int):
    """Build the fused-MLP kernel body for a fixed layer count."""
    D = intermediate_dim
    seg = _round_up(D, SEG_ALIGN)  # 128-lane-aligned stride of per-layer projection segments

    def kernel(xc_ref, wbd_ref, wh_ref, wouth_ref, lnp_ref, bout_ref, out_ref):
        cdt = wbd_ref.dtype  # MXU input dtype (bf16 default / f32); accumulation is f32

        # xc arrives already in the compute dtype (single wrapper-side concat+cast) -> no
        # in-kernel re-cast of the activations.
        xc = xc_ref[...]

        # One hoisted matmul against the block-diagonal weight:
        #   cols [0:D)                     = x @ W1                 (first layer)
        #   cols [(1+l)*seg : ... + D)     = c @ Wl[D:, :]          (intermediate layer l)
        #   cols [(1+L)*seg : ... + out)   = c @ Wout[D:, :]        (output layer)
        # Every slice below starts on a 128-lane boundary -> free views.
        proj = jnp.dot(xc, wbd_ref[...], preferred_element_type=jnp.float32)

        lnp = lnp_ref[...]  # [3, L+1, D] f32: (bias, gamma, beta)

        # ---- first layer: Linear -> LayerNorm -> LeakyReLU ----
        h = _ln_leaky(proj[:, 0:D] + lnp[0, 0:1, :], lnp[1, 0:1, :], lnp[2, 0:1, :])

        # ---- intermediate layers (residual concat == split matmul) ----
        for l in range(num_inter_layers):
            base = (1 + l) * seg
            z = jnp.dot(h.astype(cdt), wh_ref[l], preferred_element_type=jnp.float32)
            z = z + proj[:, base:base + D] + lnp[0, l + 1:l + 2, :]
            h = _ln_leaky(z, lnp[1, l + 1:l + 2, :], lnp[2, l + 1:l + 2, :])

        # ---- output layer: Linear on cat([h, c]) ----
        base = (1 + num_inter_layers) * seg
        out = jnp.dot(h.astype(cdt), wouth_ref[...], preferred_element_type=jnp.float32)
        out = out + proj[:, base:base + out_dim] + bout_ref[...]
        out_ref[...] = out.astype(out_ref.dtype)

    return kernel


def _full_spec(p):
    nd = p.ndim
    return pl.BlockSpec(p.shape, lambda i, _nd=nd: (0,) * _nd)


def _pick_tile_m(n, tile_m):
    """Shrink tile_m so the grid has >= 2 steps (v7x: two TensorCores), floor 256 rows."""
    tile_m = max(8, (tile_m // 8) * 8)
    while tile_m > 256 and pl.cdiv(n, tile_m) < 2:
        tile_m //= 2
    return tile_m


def pack_params(params, *, intermediate_dim, compute_dtype=jnp.bfloat16):
    """Repack the flat PyTorch-style param list into MXU-friendly fused/stacked arrays.

    params: [W1, b1, g1, be1, (Wi, bi, gi, bei)*, Wout, bout] with W stored as [in, out]
            (PyTorch W.T), biases / LN affine as [1, features].
    """
    D = intermediate_dim
    num_inter = (len(params) - 6) // 4
    assert num_inter >= 1, "num_layers must be >= 2 for the residual-concat path"

    w1 = params[0]
    in_dim = w1.shape[0]
    wo, bout = params[-2], params[-1]
    out_dim = wo.shape[1]
    color_dim = wo.shape[0] - D

    seg = _round_up(D, SEG_ALIGN)
    seg_out = _round_up(out_dim, SEG_ALIGN)
    total_cols = (1 + num_inter) * seg + seg_out

    # Block-diagonal fused weight: first-layer block uses rows [:in_dim], color blocks use
    # rows [in_dim:]. Zero cross-blocks keep the split-matmul identity exact.
    w_bd = jnp.zeros((in_dim + color_dim, total_cols), jnp.float32)
    w_bd = w_bd.at[:in_dim, 0:D].set(w1)

    b_rows, g_rows, be_rows = [params[1]], [params[2]], [params[3]]
    wh_list = []
    idx = 4
    for l in range(num_inter):
        w = params[idx]
        wh_list.append(w[:D, :])                                          # h-side columns
        w_bd = w_bd.at[in_dim:, (1 + l) * seg:(1 + l) * seg + D].set(w[D:, :])  # color-side
        b_rows.append(params[idx + 1])
        g_rows.append(params[idx + 2])
        be_rows.append(params[idx + 3])
        idx += 4
    w_bd = w_bd.at[in_dim:, (1 + num_inter) * seg:(1 + num_inter) * seg + out_dim].set(wo[D:, :])

    lnp = jnp.stack([jnp.concatenate(b_rows, axis=0),
                     jnp.concatenate(g_rows, axis=0),
                     jnp.concatenate(be_rows, axis=0)], axis=0).astype(jnp.float32)  # [3,L+1,D]

    packed = (
        w_bd.astype(compute_dtype),                         # [in+color, (L+2)*seg]
        jnp.stack(wh_list, axis=0).astype(compute_dtype),   # [L, D, D]
        wo[:D, :].astype(compute_dtype),                    # [D, out_dim]
        lnp,                                                # [3, L+1, D] f32
        bout.astype(jnp.float32),                           # [1, out_dim] f32
    )
    return packed, num_inter, out_dim


def custom_mlp_pallas(x, color_embedding, params, *, intermediate_dim,
                      tile_m=1024, compute_dtype=jnp.bfloat16):
    """Fused CustomMLP forward.

    x:               [N, input_dim]  float32
    color_embedding: [N, color_dim]  float32
    """
    n = x.shape[0]
    packed, num_inter, out_dim = pack_params(params, intermediate_dim=intermediate_dim,
                                             compute_dtype=compute_dtype)
    w_bd, wh_stack, wout_h, lnp, bout = packed

    # Single fused wrapper-side producer: concat + cast (one pass). The kernel reads this
    # directly -- no separate astype of x / color_embedding and no in-kernel activation cast.
    xc = jnp.concatenate([x, color_embedding], axis=1).astype(compute_dtype)

    tile_m = _pick_tile_m(n, tile_m)
    grid = (pl.cdiv(n, tile_m),)  # ragged last block: Pallas masks its loads/stores

    kernel = _make_kernel(num_inter, intermediate_dim, out_dim)

    in_specs = [
        pl.BlockSpec((tile_m, xc.shape[1]), lambda i: (i, 0)),
        _full_spec(w_bd),
        _full_spec(wh_stack),
        _full_spec(wout_h),
        _full_spec(lnp),
        _full_spec(bout),
    ]
    out_spec = pl.BlockSpec((tile_m, out_dim), lambda i: (i, 0))

    fn = pl.pallas_call(
        kernel,
        out_shape=jax.ShapeDtypeStruct((n, out_dim), jnp.float32),
        grid=grid,
        in_specs=in_specs,
        out_specs=out_spec,
        compiler_params=pltpu.CompilerParams(
            dimension_semantics=("parallel",)),
    )
    return fn(xc, w_bd, wh_stack, wout_h, lnp, bout)


def init_params(key, input_dim, intermediate_dim, output_dim, num_layers, color_dim):
    """Deterministic synthetic parameter init (shapes match the PyTorch module)."""
    ext = intermediate_dim + color_dim
    params = []
    k = key

    def nxt():
        nonlocal k
        k, sub = jax.random.split(k)
        return sub

    # first layer
    params.append(jax.random.normal(nxt(), (input_dim, intermediate_dim), jnp.float32) * 0.1)
    params.append(jax.random.normal(nxt(), (1, intermediate_dim), jnp.float32) * 0.01)
    params.append(1.0 + 0.1 * jax.random.normal(nxt(), (1, intermediate_dim), jnp.float32))  # gamma
    params.append(0.1 * jax.random.normal(nxt(), (1, intermediate_dim), jnp.float32))        # beta
    # intermediate layers
    for _ in range(num_layers - 1):
        params.append(jax.random.normal(nxt(), (ext, intermediate_dim), jnp.float32) * 0.1)
        params.append(jax.random.normal(nxt(), (1, intermediate_dim), jnp.float32) * 0.01)
        params.append(1.0 + 0.1 * jax.random.normal(nxt(), (1, intermediate_dim), jnp.float32))
        params.append(0.1 * jax.random.normal(nxt(), (1, intermediate_dim), jnp.float32))
    # output layer
    params.append(jax.random.normal(nxt(), (ext, output_dim), jnp.float32) * 0.1)
    params.append(jax.random.normal(nxt(), (1, output_dim), jnp.float32) * 0.01)
    return params


def reference_forward(x, c, params, intermediate_dim):
    """Plain-JAX reference mirroring the PyTorch forward (explicit concat semantics)."""
    def ln_leaky(h, g, b):
        mu = jnp.mean(h, axis=-1, keepdims=True)
        var = jnp.mean((h - mu) ** 2, axis=-1, keepdims=True)
        y = (h - mu) / jnp.sqrt(var + LN_EPS) * g + b
        return jnp.where(y >= 0, y, LEAKY_SLOPE * y)

    num_inter_layers = (len(params) - 6) // 4
    h = ln_leaky(x @ params[0] + params[1], params[2], params[3])
    idx = 4
    for _ in range(num_inter_layers):
        w, b, g, be = params[idx:idx + 4]
        idx += 4
        h = jnp.concatenate([h, c], axis=1)
        h = ln_leaky(h @ w + b, g, be)
    h = jnp.concatenate([h, c], axis=1)
    return h @ params[idx] + params[idx + 1]


if __name__ == "__main__":
    # Small, module-consistent shapes (NeRF samples x features).
    batch = 1024              # default tile_m auto-halves to 512 -> grid of 2 (both v7x TCs busy)
    input_dim = 32
    intermediate_dim = 64
    output_dim = 16
    num_layers = 3            # 1 first layer + 2 intermediate layers + output
    color_dim = 16            # use_residual_concat=True path

    key = jax.random.PRNGKey(0)
    k_x, k_c, k_p = jax.random.split(key, 3)
    x = jax.random.normal(k_x, (batch, input_dim), jnp.float32)
    color_emb = jax.random.normal(k_c, (batch, color_dim), jnp.float32)
    params = init_params(k_p, input_dim, intermediate_dim, output_dim,
                         num_layers, color_dim)

    ref = reference_forward(x, color_emb, params, intermediate_dim)

    # f32 MXU path: exact-ish check vs reference (block-diag zeros keep the identity exact).
    out_f32 = custom_mlp_pallas(x, color_emb, params,
                                intermediate_dim=intermediate_dim,
                                compute_dtype=jnp.float32)
    out_f32 = jax.block_until_ready(out_f32)
    assert out_f32.shape == (batch, output_dim)
    assert jnp.allclose(out_f32, ref, atol=1e-4, rtol=1e-4), "f32 mismatch vs reference"

    # Default bf16-MXU path (f32 accumulation / LN on every generation, incl. v5e).
    # Tolerance tightened from the previous 2.5e-1 (observed error is ~1e-2 level).
    out_bf16 = custom_mlp_pallas(x, color_emb, params,
                                 intermediate_dim=intermediate_dim)
    out_bf16 = jax.block_until_ready(out_bf16)
    assert out_bf16.shape == (batch, output_dim)
    assert bool(jnp.all(jnp.isfinite(out_bf16)))
    assert jnp.allclose(out_bf16, ref, atol=1e-1, rtol=1e-1), "bf16 mismatch vs reference"

    # Ragged batch exercises the masked last-tile path (no full-array pad / copy).
    out_r = custom_mlp_pallas(x[:777], color_emb[:777], params,
                              intermediate_dim=intermediate_dim,
                              compute_dtype=jnp.float32)
    out_r = jax.block_until_ready(out_r)
    assert out_r.shape == (777, output_dim)
    assert jnp.allclose(out_r, ref[:777], atol=1e-4, rtol=1e-4), "ragged mismatch vs reference"

    print("KERNEL_OK")
</pallas_src>

<mosaic_0001>
module attributes {stable_mosaic.version = 11 : i64} {
  func.func @kernel(%arg0: i32, %arg1: memref<512x48xf32, #tpu.memory_space<vmem>>, %arg2: memref<48x512xf32, #tpu.memory_space<vmem>>, %arg3: memref<2x64x64xf32, #tpu.memory_space<vmem>>, %arg4: memref<64x16xf32, #tpu.memory_space<vmem>>, %arg5: memref<3x3x64xf32, #tpu.memory_space<vmem>>, %arg6: memref<1x16xf32, #tpu.memory_space<vmem>>, %arg7: memref<512x16xf32, #tpu.memory_space<vmem>>) attributes {dimension_semantics = [#tpu.dimension_semantics<parallel>], iteration_bounds = array<i64: 2>, scalar_prefetch = 0 : i64, scratch_operands = 0 : i64, tpu.core_type = #tpu.core_type<tc>, window_params = [{transform_indices = @transform_0, window_bounds = array<i64: 512, 48>}, {pipeline_mode = #tpu.pipeline_mode<synchronous>, transform_indices = @transform_1, window_bounds = array<i64: 48, 512>}, {pipeline_mode = #tpu.pipeline_mode<synchronous>, transform_indices = @transform_2, window_bounds = array<i64: 2, 64, 64>}, {pipeline_mode = #tpu.pipeline_mode<synchronous>, transform_indices = @transform_3, window_bounds = array<i64: 64, 16>}, {pipeline_mode = #tpu.pipeline_mode<synchronous>, transform_indices = @transform_4, window_bounds = array<i64: 3, 3, 64>}, {pipeline_mode = #tpu.pipeline_mode<synchronous>, transform_indices = @transform_5, window_bounds = array<i64: 1, 16>}, {transform_indices = @transform_6, window_bounds = array<i64: 512, 16>}]} {
    %c0 = arith.constant 0 : index
    %c0_0 = arith.constant 0 : index
    %0 = vector.load %arg1[%c0, %c0_0] : memref<512x48xf32, #tpu.memory_space<vmem>>, vector<512x48xf32>
    %c0_1 = arith.constant 0 : index
    %c0_2 = arith.constant 0 : index
    %1 = vector.load %arg2[%c0_1, %c0_2] : memref<48x512xf32, #tpu.memory_space<vmem>>, vector<48x512xf32>
    %cst = arith.constant dense<0.000000e+00> : vector<512x512xf32>
    %2 = tpu.matmul %0, %1, %cst {dimension_numbers = #tpu.dot_dimension_numbers<[1], [0], [0], [1], [0, 0, 1, 1], [], []>} : vector<512x48xf32>, vector<48x512xf32>, vector<512x512xf32> -> vector<512x512xf32>
    %c0_3 = arith.constant 0 : index
    %c0_4 = arith.constant 0 : index
    %c0_5 = arith.constant 0 : index
    %3 = vector.load %arg5[%c0_3, %c0_4, %c0_5] : memref<3x3x64xf32, #tpu.memory_space<vmem>>, vector<3x3x64xf32>
    %4 = vector.extract_strided_slice %2 {offsets = [0, 0], sizes = [512, 64], strides = [1, 1]} : vector<512x512xf32> to vector<512x64xf32>
    %5 = vector.extract_strided_slice %3 {offsets = [0, 0, 0], sizes = [1, 1, 64], strides = [1, 1, 1]} : vector<3x3x64xf32> to vector<1x1x64xf32>
    %6 = vector.shape_cast %5 : vector<1x1x64xf32> to vector<1x64xf32>
    %7 = vector.broadcast %6 : vector<1x64xf32> to vector<512x64xf32>
    %8 = arith.addf %4, %7 : vector<512x64xf32>
    %9 = vector.extract_strided_slice %3 {offsets = [1, 0, 0], sizes = [1, 1, 64], strides = [1, 1, 1]} : vector<3x3x64xf32> to vector<1x1x64xf32>
    %10 = vector.shape_cast %9 : vector<1x1x64xf32> to vector<1x64xf32>
    %11 = vector.extract_strided_slice %3 {offsets = [2, 0, 0], sizes = [1, 1, 64], strides = [1, 1, 1]} : vector<3x3x64xf32> to vector<1x1x64xf32>
    %12 = vector.shape_cast %11 : vector<1x1x64xf32> to vector<1x64xf32>
    %cst_6 = arith.constant dense<0.000000e+00> : vector<512xf32>
    %13 = vector.multi_reduction <add>, %8, %cst_6 [1] : vector<512x64xf32> to vector<512xf32>
    %14 = vector.shape_cast %13 : vector<512xf32> to vector<512x1xf32>
    %cst_7 = arith.constant 6.400000e+01 : f32
    %15 = vector.broadcast %cst_7 : f32 to vector<512x1xf32>
    %16 = arith.divf %14, %15 : vector<512x1xf32>
    %17 = vector.broadcast %16 : vector<512x1xf32> to vector<512x64xf32>
    %18 = arith.subf %8, %17 : vector<512x64xf32>
    %19 = arith.mulf %18, %18 : vector<512x64xf32>
    %cst_8 = arith.constant dense<0.000000e+00> : vector<512xf32>
    %20 = vector.multi_reduction <add>, %19, %cst_8 [1] : vector<512x64xf32> to vector<512xf32>
    %21 = vector.shape_cast %20 : vector<512xf32> to vector<512x1xf32>
    %cst_9 = arith.constant 6.400000e+01 : f32
    %22 = vector.broadcast %cst_9 : f32 to vector<512x1xf32>
    %23 = arith.divf %21, %22 : vector<512x1xf32>
    %cst_10 = arith.constant 9.99999974E-6 : f32
    %24 = vector.broadcast %cst_10 : f32 to vector<512x1xf32>
    %25 = arith.addf %23, %24 : vector<512x1xf32>
    %26 = math.rsqrt %25 : vector<512x1xf32>
    %27 = vector.broadcast %26 : vector<512x1xf32> to vector<512x64xf32>
    %28 = arith.mulf %18, %27 : vector<512x64xf32>
    %29 = vector.broadcast %10 : vector<1x64xf32> to vector<512x64xf32>
    %30 = arith.mulf %28, %29 : vector<512x64xf32>
    %31 = vector.broadcast %12 : vector<1x64xf32> to vector<512x64xf32>
    %32 = arith.addf %30, %31 : vector<512x64xf32>
    %cst_11 = arith.constant 0.000000e+00 : f32
    %33 = vector.broadcast %cst_11 : f32 to vector<512x64xf32>
    %34 = arith.cmpf oge, %32, %33 : vector<512x64xf32>
    %cst_12 = arith.constant 0.00999999977 : f32
    %35 = vector.broadcast %cst_12 : f32 to vector<512x64xf32>
    %36 = arith.mulf %35, %32 : vector<512x64xf32>
    %37 = arith.select %34, %32, %36 : vector<512x64xi1>, vector<512x64xf32>
    %c0_13 = arith.constant 0 : index
    %c0_14 = arith.constant 0 : index
    %c0_15 = arith.constant 0 : index
    %38 = vector.load %arg3[%c0_13, %c0_14, %c0_15] : memref<2x64x64xf32, #tpu.memory_space<vmem>>, vector<1x64x64xf32>
    %39 = vector.shape_cast %38 : vector<1x64x64xf32> to vector<64x64xf32>
    %cst_16 = arith.constant dense<0.000000e+00> : vector<512x64xf32>
    %40 = tpu.matmul %37, %39, %cst_16 {dimension_numbers = #tpu.dot_dimension_numbers<[1], [0], [0], [1], [0, 0, 1, 1], [], []>} : vector<512x64xf32>, vector<64x64xf32>, vector<512x64xf32> -> vector<512x64xf32>
    %41 = vector.extract_strided_slice %2 {offsets = [0, 128], sizes = [512, 64], strides = [1, 1]} : vector<512x512xf32> to vector<512x64xf32>
    %42 = arith.addf %40, %41 : vector<512x64xf32>
    %43 = vector.extract_strided_slice %3 {offsets = [0, 1, 0], sizes = [1, 1, 64], strides = [1, 1, 1]} : vector<3x3x64xf32> to vector<1x1x64xf32>
    %44 = vector.shape_cast %43 : vector<1x1x64xf32> to vector<1x64xf32>
    %45 = vector.broadcast %44 : vector<1x64xf32> to vector<512x64xf32>
    %46 = arith.addf %42, %45 : vector<512x64xf32>
    %47 = vector.extract_strided_slice %3 {offsets = [1, 1, 0], sizes = [1, 1, 64], strides = [1, 1, 1]} : vector<3x3x64xf32> to vector<1x1x64xf32>
    %48 = vector.shape_cast %47 : vector<1x1x64xf32> to vector<1x64xf32>
    %49 = vector.extract_strided_slice %3 {offsets = [2, 1, 0], sizes = [1, 1, 64], strides = [1, 1, 1]} : vector<3x3x64xf32> to vector<1x1x64xf32>
    %50 = vector.shape_cast %49 : vector<1x1x64xf32> to vector<1x64xf32>
    %cst_17 = arith.constant dense<0.000000e+00> : vector<512xf32>
    %51 = vector.multi_reduction <add>, %46, %cst_17 [1] : vector<512x64xf32> to vector<512xf32>
    %52 = vector.shape_cast %51 : vector<512xf32> to vector<512x1xf32>
    %cst_18 = arith.constant 6.400000e+01 : f32
    %53 = vector.broadcast %cst_18 : f32 to vector<512x1xf32>
    %54 = arith.divf %52, %53 : vector<512x1xf32>
    %55 = vector.broadcast %54 : vector<512x1xf32> to vector<512x64xf32>
    %56 = arith.subf %46, %55 : vector<512x64xf32>
    %57 = arith.mulf %56, %56 : vector<512x64xf32>
    %cst_19 = arith.constant dense<0.000000e+00> : vector<512xf32>
    %58 = vector.multi_reduction <add>, %57, %cst_19 [1] : vector<512x64xf32> to vector<512xf32>
    %59 = vector.shape_cast %58 : vector<512xf32> to vector<512x1xf32>
    %cst_20 = arith.constant 6.400000e+01 : f32
    %60 = vector.broadcast %cst_20 : f32 to vector<512x1xf32>
    %61 = arith.divf %59, %60 : vector<512x1xf32>
    %cst_21 = arith.constant 9.99999974E-6 : f32
    %62 = vector.broadcast %cst_21 : f32 to vector<512x1xf32>
    %63 = arith.addf %61, %62 : vector<512x1xf32>
    %64 = math.rsqrt %63 : vector<512x1xf32>
    %65 = vector.broadcast %64 : vector<512x1xf32> to vector<512x64xf32>
    %66 = arith.mulf %56, %65 : vector<512x64xf32>
    %67 = vector.broadcast %48 : vector<1x64xf32> to vector<512x64xf32>
    %68 = arith.mulf %66, %67 : vector<512x64xf32>
    %69 = vector.broadcast %50 : vector<1x64xf32> to vector<512x64xf32>
    %70 = arith.addf %68, %69 : vector<512x64xf32>
    %cst_22 = arith.constant 0.000000e+00 : f32
    %71 = vector.broadcast %cst_22 : f32 to vector<512x64xf32>
    %72 = arith.cmpf oge, %70, %71 : vector<512x64xf32>
    %cst_23 = arith.constant 0.00999999977 : f32
    %73 = vector.broadcast %cst_23 : f32 to vector<512x64xf32>
    %74 = arith.mulf %73, %70 : vector<512x64xf32>
    %75 = arith.select %72, %70, %74 : vector<512x64xi1>, vector<512x64xf32>
    %c1 = arith.constant 1 : index
    %c0_24 = arith.constant 0 : index
    %c0_25 = arith.constant 0 : index
    %76 = vector.load %arg3[%c1, %c0_24, %c0_25] : memref<2x64x64xf32, #tpu.memory_space<vmem>>, vector<1x64x64xf32>
    %77 = vector.shape_cast %76 : vector<1x64x64xf32> to vector<64x64xf32>
    %cst_26 = arith.constant dense<0.000000e+00> : vector<512x64xf32>
    %78 = tpu.matmul %75, %77, %cst_26 {dimension_numbers = #tpu.dot_dimension_numbers<[1], [0], [0], [1], [0, 0, 1, 1], [], []>} : vector<512x64xf32>, vector<64x64xf32>, vector<512x64xf32> -> vector<512x64xf32>
    %79 = vector.extract_strided_slice %2 {offsets = [0, 256], sizes = [512, 64], strides = [1, 1]} : vector<512x512xf32> to vector<512x64xf32>
    %80 = arith.addf %78, %79 : vector<512x64xf32>
    %81 = vector.extract_strided_slice %3 {offsets = [0, 2, 0], sizes = [1, 1, 64], strides = [1, 1, 1]} : vector<3x3x64xf32> to vector<1x1x64xf32>
    %82 = vector.shape_cast %81 : vector<1x1x64xf32> to vector<1x64xf32>
    %83 = vector.broadcast %82 : vector<1x64xf32> to vector<512x64xf32>
    %84 = arith.addf %80, %83 : vector<512x64xf32>
    %85 = vector.extract_strided_slice %3 {offsets = [1, 2, 0], sizes = [1, 1, 64], strides = [1, 1, 1]} : vector<3x3x64xf32> to vector<1x1x64xf32>
    %86 = vector.shape_cast %85 : vector<1x1x64xf32> to vector<1x64xf32>
    %87 = vector.extract_strided_slice %3 {offsets = [2, 2, 0], sizes = [1, 1, 64], strides = [1, 1, 1]} : vector<3x3x64xf32> to vector<1x1x64xf32>
    %88 = vector.shape_cast %87 : vector<1x1x64xf32> to vector<1x64xf32>
    %cst_27 = arith.constant dense<0.000000e+00> : vector<512xf32>
    %89 = vector.multi_reduction <add>, %84, %cst_27 [1] : vector<512x64xf32> to vector<512xf32>
    %90 = vector.shape_cast %89 : vector<512xf32> to vector<512x1xf32>
    %cst_28 = arith.constant 6.400000e+01 : f32
    %91 = vector.broadcast %cst_28 : f32 to vector<512x1xf32>
    %92 = arith.divf %90, %91 : vector<512x1xf32>
    %93 = vector.broadcast %92 : vector<512x1xf32> to vector<512x64xf32>
    %94 = arith.subf %84, %93 : vector<512x64xf32>
    %95 = arith.mulf %94, %94 : vector<512x64xf32>
    %cst_29 = arith.constant dense<0.000000e+00> : vector<512xf32>
    %96 = vector.multi_reduction <add>, %95, %cst_29 [1] : vector<512x64xf32> to vector<512xf32>
    %97 = vector.shape_cast %96 : vector<512xf32> to vector<512x1xf32>
    %cst_30 = arith.constant 6.400000e+01 : f32
    %98 = vector.broadcast %cst_30 : f32 to vector<512x1xf32>
    %99 = arith.divf %97, %98 : vector<512x1xf32>
    %cst_31 = arith.constant 9.99999974E-6 : f32
    %100 = vector.broadcast %cst_31 : f32 to vector<512x1xf32>
    %101 = arith.addf %99, %100 : vector<512x1xf32>
    %102 = math.rsqrt %101 : vector<512x1xf32>
    %103 = vector.broadcast %102 : vector<512x1xf32> to vector<512x64xf32>
    %104 = arith.mulf %94, %103 : vector<512x64xf32>
    %105 = vector.broadcast %86 : vector<1x64xf32> to vector<512x64xf32>
    %106 = arith.mulf %104, %105 : vector<512x64xf32>
    %107 = vector.broadcast %88 : vector<1x64xf32> to vector<512x64xf32>
    %108 = arith.addf %106, %107 : vector<512x64xf32>
    %cst_32 = arith.constant 0.000000e+00 : f32
    %109 = vector.broadcast %cst_32 : f32 to vector<512x64xf32>
    %110 = arith.cmpf oge, %108, %109 : vector<512x64xf32>
    %cst_33 = arith.constant 0.00999999977 : f32
    %111 = vector.broadcast %cst_33 : f32 to vector<512x64xf32>
    %112 = arith.mulf %111, %108 : vector<512x64xf32>
    %113 = arith.select %110, %108, %112 : vector<512x64xi1>, vector<512x64xf32>
    %c0_34 = arith.constant 0 : index
    %c0_35 = arith.constant 0 : index
    %114 = vector.load %arg4[%c0_34, %c0_35] : memref<64x16xf32, #tpu.memory_space<vmem>>, vector<64x16xf32>
    %cst_36 = arith.constant dense<0.000000e+00> : vector<512x16xf32>
    %115 = tpu.matmul %113, %114, %cst_36 {dimension_numbers = #tpu.dot_dimension_numbers<[1], [0], [0], [1], [0, 0, 1, 1], [], []>} : vector<512x64xf32>, vector<64x16xf32>, vector<512x16xf32> -> vector<512x16xf32>
    %116 = vector.extract_strided_slice %2 {offsets = [0, 384], sizes = [512, 16], strides = [1, 1]} : vector<512x512xf32> to vector<512x16xf32>
    %117 = arith.addf %115, %116 : vector<512x16xf32>
    %c0_37 = arith.constant 0 : index
    %c0_38 = arith.constant 0 : index
    %118 = vector.load %arg6[%c0_37, %c0_38] : memref<1x16xf32, #tpu.memory_space<vmem>>, vector<1x16xf32>
    %119 = vector.broadcast %118 : vector<1x16xf32> to vector<512x16xf32>
    %120 = arith.addf %117, %119 : vector<512x16xf32>
    %c0_39 = arith.constant 0 : index
    %c0_40 = arith.constant 0 : index
    %121 = vector.load %arg7[%c0_39, %c0_40] : memref<512x16xf32, #tpu.memory_space<vmem>>, vector<512x16xf32>
    tpu.vector_store %arg7[%c0_39, %c0_40], %120 {strides = array<i32>} : memref<512x16xf32, #tpu.memory_space<vmem>>, vector<512x16xf32>,
    return
  }
  func.func @transform_0(%arg0: i32) -> (i32, i32) {
    %c0_i32 = arith.constant 0 : i32
    %c0_i32_0 = arith.constant 0 : i32
    return %arg0, %c0_i32 : i32, i32
  }
  func.func @transform_1(%arg0: i32) -> (i32, i32) {
    %c0_i32 = arith.constant 0 : i32
    %c0_i32_0 = arith.constant 0 : i32
    %c0_i32_1 = arith.constant 0 : i32
    return %c0_i32, %c0_i32_0 : i32, i32
  }
  func.func @transform_2(%arg0: i32) -> (i32, i32, i32) {
    %c0_i32 = arith.constant 0 : i32
    %c0_i32_0 = arith.constant 0 : i32
    %c0_i32_1 = arith.constant 0 : i32
    %c0_i32_2 = arith.constant 0 : i32
    return %c0_i32, %c0_i32_0, %c0_i32_1 : i32, i32, i32
  }
  func.func @transform_3(%arg0: i32) -> (i32, i32) {
    %c0_i32 = arith.constant 0 : i32
    %c0_i32_0 = arith.constant 0 : i32
    %c0_i32_1 = arith.constant 0 : i32
    return %c0_i32, %c0_i32_0 : i32, i32
  }
  func.func @transform_4(%arg0: i32) -> (i32, i32, i32) {
    %c0_i32 = arith.constant 0 : i32
    %c0_i32_0 = arith.constant 0 : i32
    %c0_i32_1 = arith.constant 0 : i32
    %c0_i32_2 = arith.constant 0 : i32
    return %c0_i32, %c0_i32_0, %c0_i32_1 : i32, i32, i32
  }
  func.func @transform_5(%arg0: i32) -> (i32, i32) {
    %c0_i32 = arith.constant 0 : i32
    %c0_i32_0 = arith.constant 0 : i32
    %c0_i32_1 = arith.constant 0 : i32
    return %c0_i32, %c0_i32_0 : i32, i32
  }
  func.func @transform_6(%arg0: i32) -> (i32, i32) {
    %c0_i32 = arith.constant 0 : i32
    %c0_i32_0 = arith.constant 0 : i32
    return %arg0, %c0_i32 : i32, i32
  }
}

</mosaic_0001>

<bundles_post_ra>
// kernel: tpu_custom_call.1
= control target key start
LH: loop header
LB: loop body
LE: loop exit
PB: predicated region body
PF: predicated region fallthrough
CT: control target
= control target key end

     0   :  { %s8482_s21 = smov 0   ;;  %s12826_s0 = inlined_call_operand.vmem [shape: f32[1024,48], index: 0, kind: input, shape index: {}]   ;;  %s12827_s1 = inlined_call_operand.vmem [shape: f32[48,512], index: 1, kind: input, shape index: {}]   ;;  %s12828_s2 = inlined_call_operand.vmem [shape: f32[2,64,64], index: 2, kind: input, shape index: {}]   ;;  %s12829_s3 = inlined_call_operand.vmem [shape: f32[64,16], index: 3, kind: input, shape index: {}]   ;;  %s12830_s4 = inlined_call_operand.vmem [shape: f32[3,3,64], index: 4, kind: input, shape index: {}]   ;;  %s12831_s5 = inlined_call_operand.vmem [shape: f32[1,16], index: 5, kind: input, shape index: {}]   ;;  %s12832_s6 = inlined_call_operand.vmem [shape: f32[1024,16], index: 6, kind: output, shape index: {}]  }
   0x1 LB: > { %s7071_s22 = sadd.s32 4294967295, %s8444_s21   ;;  %p7075_p0 = scmp.ge.s32.totalorder %s8444_s21, 1  ;;  %s8444_s21 = sphi %s8482_s21, %s16_s21  }
   0x2   : > { %p213_p1 = scmp.lt.s32.totalorder %s8444_s21, 3 }
   0x4   : > { %p214_p2 = pnand %p7075_p0, %p213_p1 }
   0x6   : > { %217 = sbr.rel (%p214_p2) target bundleno = 1995 (0x7cb), region = 44 }
   0xb   : > { %v340_v0 = vld [vmem:[%s12827_s1 + $0xa8] sm:$0xff]  ;;  %v339_v1 = vld [vmem:[%s12827_s1 + $0xa0] sm:$0xff]  ;;  %s7076_s29 = sshll.u32 %s7071_s22, 6  ;;  %vm343_vm0 = vcmask 392192   ;;  %v12833_v14 = vmov 0.0   ;;  %vm1505_vm1 = vcmask 523264  }
   0xc   : > { %v336_v2 = vld [vmem:[%s12827_s1 + $0x88] sm:$0xff]  ;;  %556 = vmatprep.subr.mxu0 %v340_v0  ;;  %7963 = vmatprep.subr.mxu1 %v340_v0  ;;  %v335_v3 = vld [vmem:[%s12827_s1 + $0x80] sm:$0xff]  ;;  %p244_p3 = scmp.lt.s32.totalorder %s7076_s29, 127 }
   0xd   : > { %557 = vmatpush1.msra.mxu0 %v339_v1  ;;  %7969 = vmatpush1.msra.mxu1 %v339_v1  ;;  %v332_v4 = vld [vmem:[%s12827_s1 + $0x68] sm:$0xff]  ;;  %v331_v5 = vld [vmem:[%s12827_s1 + $0x60] sm:$0xff] }
   0xe   : > { %558 = vmatprep.subr.mxu0 %v336_v2  ;;  %7964 = vmatprep.subr.mxu1 %v336_v2  ;;  %s13462_s29 = smov (!%p244_p3, %s7076_s29), 127  ;;  %v328_v6 = vld [vmem:[%s12827_s1 + $0x48] sm:$0xff]  ;;  %v327_v7 = vld [vmem:[%s12827_s1 + $0x40] sm:$0xff] }
   0xf   : > { %559 = vmatpush1.msra.mxu0 %v335_v3  ;;  %7970 = vmatpush1.msra.mxu1 %v335_v3  ;;  %s7077_s16 = sshll.u32 %s13462_s29, 3  ;;  %v324_v8 = vld [vmem:[%s12827_s1 + $0x28] sm:$0xff]  ;;  %v323_v9 = vld [vmem:[%s12827_s1 + $0x20] sm:$0xff] }
  0x10   : > { %560 = vmatprep.subr.mxu0 %v332_v4  ;;  %7965 = vmatprep.subr.mxu1 %v332_v4  ;;  %v320_v10 = vld [vmem:[%s12827_s1 + $0x8] sm:$0xff]  ;;  %s8531_s26 = scalar_lea.vmem %s12826_s0, %s7077_s16  ;;  %v319_v11 = vld [vmem:[%s12827_s1] sm:$0xff]  ;;  %s12513_s19 = scalar_lea.vmem %s12832_s6, %s7077_s16 }
  0x11   : > { %561 = vmatpush1.msra.mxu0 %v331_v5  ;;  %7971 = vmatpush1.msra.mxu1 %v331_v5  ;;  %v255_v12 = vld [vmem:[%s8531_s26] sm:$0xff]  ;;  %v256_v15 = vld [vmem:[%s8531_s26 + $0x8] sm:$0xff]  ;;  %v257_v17 = vld [vmem:[%s8531_s26 + $0x10] sm:$0xff] }
  0x12   : > { %562 = vmatprep.subr.mxu0 %v328_v6  ;;  %7966 = vmatprep.subr.mxu1 %v328_v6  ;;  %v303_v13 = vld [vmem:[%s8531_s26 + $0x180] sm:$0xff]  ;;  %v304_v16 = vld [vmem:[%s8531_s26 + $0x188] sm:$0xff]  ;;  %v305_v18 = vld [vmem:[%s8531_s26 + $0x190] sm:$0xff] }
  0x13   : > { %563 = vmatpush1.msra.mxu0 %v327_v7  ;;  %7972 = vmatpush1.msra.mxu1 %v327_v7  ;;  %v258_v19 = vld [vmem:[%s8531_s26 + $0x18] sm:$0xff]  ;;  %v259_v21 = vld [vmem:[%s8531_s26 + $0x20] sm:$0xff]  ;;  %v260_v23 = vld [vmem:[%s8531_s26 + $0x28] sm:$0xff] }
  0x14   : > { %564 = vmatprep.subr.mxu0 %v324_v8  ;;  %7967 = vmatprep.subr.mxu1 %v324_v8  ;;  %v306_v20 = vld [vmem:[%s8531_s26 + $0x198] sm:$0xff]  ;;  %v307_v22 = vld [vmem:[%s8531_s26 + $0x1a0] sm:$0xff]  ;;  %v308_v24 = vld [vmem:[%s8531_s26 + $0x1a8] sm:$0xff] }
  0x15   : > { %565 = vmatpush1.msra.mxu0 %v323_v9  ;;  %7973 = vmatpush1.msra.mxu1 %v323_v9  ;;  %v261_v25 = vld [vmem:[%s8531_s26 + $0x30] sm:$0xff]  ;;  %v262_v27 = vld [vmem:[%s8531_s26 + $0x38] sm:$0xff]  ;;  %v263_v29 = vld [vmem:[%s8531_s26 + $0x40] sm:$0xff] }
  0x16   : > { %566 = vmatprep.subr.mxu0 %v320_v10  ;;  %7968 = vmatprep.subr.mxu1 %v320_v10  ;;  %v309_v26 = vld [vmem:[%s8531_s26 + $0x1b0] sm:$0xff]  ;;  %v310_v28 = vld [vmem:[%s8531_s26 + $0x1b8] sm:$0xff]  ;;  %v311_v30 = vld [vmem:[%s8531_s26 + $0x1c0] sm:$0xff] }
  0x17   : > { %567 = vmatpush1.msra.mxu0 %v319_v11  ;;  %7974 = vmatpush1.msra.mxu1 %v319_v11  ;;  %v264_v31 = vld [vmem:[%s8531_s26 + $0x48] sm:$0xff]  ;;  %v265_v33 = vld [vmem:[%s8531_s26 + $0x50] sm:$0xff]  ;;  %v266_v35 = vld [vmem:[%s8531_s26 + $0x58] sm:$0xff]  ;;  %v1437_v11 = vlaneseq }
  0x18   : > { %600 = vmatprep.mubr.f32.mxu0 %v12833_v14  ;;  %888 = vmatprep.mubr.f32.mxu1 %v12833_v14  ;;  %v312_v32 = vld [vmem:[%s8531_s26 + $0x1c8] sm:$0xff]  ;;  %v313_v34 = vld [vmem:[%s8531_s26 + $0x1d0] sm:$0xff]  ;;  %v314_v36 = vld [vmem:[%s8531_s26 + $0x1d8] sm:$0xff] }
  0x19   : > { %7080 = vmatmul.mubr.msk.f32.vlgmr.msra.gmra.mxu0 %vm343_vm0, %v255_v12  ;;  %7128 = vmatmul.mubr.msk.f32.vlgmr.msra.gmra.mxu1 %vm343_vm0, %v303_v13  ;;  %v267_v37 = vld [vmem:[%s8531_s26 + $0x60] sm:$0xff]  ;;  %v268_v39 = vld [vmem:[%s8531_s26 + $0x68] sm:$0xff]  ;;  %v269_v41 = vld [vmem:[%s8531_s26 + $0x70] sm:$0xff]  ;;  %v8725_v13 = vshrl.u32 %v1437_v11, 7 }
  0x1a   : > { %606 = vmatprep.mubr.f32.mxu0 %v12833_v14  ;;  %894 = vmatprep.mubr.f32.mxu1 %v12833_v14  ;;  %v315_v38 = vld [vmem:[%s8531_s26 + $0x1e0] sm:$0xff]  ;;  %v316_v40 = vld [vmem:[%s8531_s26 + $0x1e8] sm:$0xff]  ;;  %v270_v42 = vld [vmem:[%s8531_s26 + $0x78] sm:$0xff] }
  0x1b   : > { %v317_v43 = vld [vmem:[%s8531_s26 + $0x1f0] sm:$0xff]  ;;  %v318_v44 = vld [vmem:[%s8531_s26 + $0x1f8] sm:$0xff]  ;;  %v271_v45 = vld [vmem:[%s8531_s26 + $0x80] sm:$0xff]  ;;  %12923 = vst [vmem:[#allocation2_spill] sm:$0xff] %v8725_v13 }
  0x1c   : > { %v272_v46 = vld [vmem:[%s8531_s26 + $0x88] sm:$0xff]  ;;  %v273_v47 = vld [vmem:[%s8531_s26 + $0x90] sm:$0xff]  ;;  %v274_v48 = vld [vmem:[%s8531_s26 + $0x98] sm:$0xff] }
  0x1d   : > { %7081 = vmatmul.mubr.msk.f32.gmra.mxu0 %vm343_vm0, %v256_v15  ;;  %7129 = vmatmul.mubr.msk.f32.gmra.mxu1 %vm343_vm0, %v304_v16  ;;  %v275_v49 = vld [vmem:[%s8531_s26 + $0xa0] sm:$0xff]  ;;  %v276_v50 = vld [vmem:[%s8531_s26 + $0xa8] sm:$0xff]  ;;  %v277_v51 = vld [vmem:[%s8531_s26 + $0xb0] sm:$0xff]  ;;  %v8731_v16 = vsub.s32 0, %v8725_v13 }
  0x1e   : > { %612 = vmatprep.mubr.f32.mxu0 %v12833_v14  ;;  %900 = vmatprep.mubr.f32.mxu1 %v12833_v14  ;;  %v278_v52 = vld [vmem:[%s8531_s26 + $0xb8] sm:$0xff]  ;;  %v279_v53 = vld [vmem:[%s8531_s26 + $0xc0] sm:$0xff]  ;;  %v280_v54 = vld [vmem:[%s8531_s26 + $0xc8] sm:$0xff] }
  0x1f   : > { %v281_v55 = vld [vmem:[%s8531_s26 + $0xd0] sm:$0xff]  ;;  %v282_v56 = vld [vmem:[%s8531_s26 + $0xd8] sm:$0xff]  ;;  %v283_v57 = vld [vmem:[%s8531_s26 + $0xe0] sm:$0xff] }
  0x20   : > { %v284_v58 = vld [vmem:[%s8531_s26 + $0xe8] sm:$0xff]  ;;  %v285_v59 = vld [vmem:[%s8531_s26 + $0xf0] sm:$0xff]  ;;  %v286_v60 = vld [vmem:[%s8531_s26 + $0xf8] sm:$0xff] }
  0x21   : > { %7082 = vmatmul.mubr.msk.f32.gmra.mxu0 %vm343_vm0, %v257_v17  ;;  %7130 = vmatmul.mubr.msk.f32.gmra.mxu1 %vm343_vm0, %v305_v18  ;;  %v287_v61 = vld [vmem:[%s8531_s26 + $0x100] sm:$0xff]  ;;  %v288_v62 = vld [vmem:[%s8531_s26 + $0x108] sm:$0xff]  ;;  %v289_v63 = vld [vmem:[%s8531_s26 + $0x110] sm:$0xff] }
  0x22   : > { %618 = vmatprep.mubr.f32.mxu0 %v12833_v14  ;;  %906 = vmatprep.mubr.f32.mxu1 %v12833_v14  ;;  %v290_v0 = vld [vmem:[%s8531_s26 + $0x118] sm:$0xff]  ;;  %v291_v1 = vld [vmem:[%s8531_s26 + $0x120] sm:$0xff]  ;;  %v292_v2 = vld [vmem:[%s8531_s26 + $0x128] sm:$0xff] }
  0x23   : > { %v293_v3 = vld [vmem:[%s8531_s26 + $0x130] sm:$0xff]  ;;  %v294_v4 = vld [vmem:[%s8531_s26 + $0x138] sm:$0xff]  ;;  %v295_v5 = vld [vmem:[%s8531_s26 + $0x140] sm:$0xff] }
  0x24   : > { %v296_v6 = vld [vmem:[%s8531_s26 + $0x148] sm:$0xff]  ;;  %v297_v7 = vld [vmem:[%s8531_s26 + $0x150] sm:$0xff]  ;;  %v298_v8 = vld [vmem:[%s8531_s26 + $0x158] sm:$0xff] }
  0x25   : > { %7083 = vmatmul.mubr.msk.f32.gmra.mxu0 %vm343_vm0, %v258_v19  ;;  %7131 = vmatmul.mubr.msk.f32.gmra.mxu1 %vm343_vm0, %v306_v20  ;;  %v299_v9 = vld [vmem:[%s8531_s26 + $0x160] sm:$0xff]  ;;  %v300_v10 = vld [vmem:[%s8531_s26 + $0x168] sm:$0xff]  ;;  %v301_v12 = vld [vmem:[%s8531_s26 + $0x170] sm:$0xff] }
  0x26   : > { %624 = vmatprep.mubr.f32.mxu0 %v12833_v14  ;;  %912 = vmatprep.mubr.f32.mxu1 %v12833_v14  ;;  %v302_v15 = vld [vmem:[%s8531_s26 + $0x178] sm:$0xff]  ;;  %v1434_v17 = vld [vmem:[%s12830_s4] sm:$0x7] }
  0x27   : > { %v8738_v18 = vrot.slane %v1434_v17, %v8731_v16 }
  0x29   : > { %7084 = vmatmul.mubr.msk.f32.gmra.mxu0 %vm343_vm0, %v259_v21  ;;  %7132 = vmatmul.mubr.msk.f32.gmra.mxu1 %vm343_vm0, %v307_v22 }
  0x2a   : > { %630 = vmatprep.mubr.f32.mxu0 %v12833_v14  ;;  %918 = vmatprep.mubr.f32.mxu1 %v12833_v14 }
  0x2d   : > { %7085 = vmatmul.mubr.msk.f32.gmra.mxu0 %vm343_vm0, %v260_v23  ;;  %7133 = vmatmul.mubr.msk.f32.gmra.mxu1 %vm343_vm0, %v308_v24 }
  0x2e   : > { %636 = vmatprep.mubr.f32.mxu0 %v12833_v14  ;;  %924 = vmatprep.mubr.f32.mxu1 %v12833_v14 }
  0x31   : > { %7086 = vmatmul.mubr.msk.f32.gmra.mxu0 %vm343_vm0, %v261_v25  ;;  %7134 = vmatmul.mubr.msk.f32.gmra.mxu1 %vm343_vm0, %v309_v26 }
  0x32   : > { %642 = vmatprep.mubr.f32.mxu0 %v12833_v14  ;;  %930 = vmatprep.mubr.f32.mxu1 %v12833_v14 }
  0x35   : > { %7087 = vmatmul.mubr.msk.f32.gmra.mxu0 %vm343_vm0, %v262_v27  ;;  %7135 = vmatmul.mubr.msk.f32.gmra.mxu1 %vm343_vm0, %v310_v28 }
  0x36   : > { %648 = vmatprep.mubr.f32.mxu0 %v12833_v14  ;;  %936 = vmatprep.mubr.f32.mxu1 %v12833_v14 }
  0x39   : > { %7088 = vmatmul.mubr.msk.f32.gmra.mxu0 %vm343_vm0, %v263_v29  ;;  %7136 = vmatmul.mubr.msk.f32.gmra.mxu1 %vm343_vm0, %v311_v30  ;;  %v2674_v30 = vld [vmem:[%s12828_s2 + $0x38] sm:$0xff] }
  0x3a   : > { %654 = vmatprep.mubr.f32.mxu0 %v12833_v14  ;;  %942 = vmatprep.mubr.f32.mxu1 %v12833_v14 }
  0x3b   : > { %7627 = vmatprep.subr.mxu0 %v2674_v30 }
  0x3c   : > { %7628 = vmatpush3.msra.mxu0 %v2674_v30 }
  0x3d   : > { %7089 = vmatmul.mubr.msk.f32.gmra.mxu0 %vm343_vm0, %v264_v31  ;;  %7137 = vmatmul.mubr.msk.f32.gmra.mxu1 %vm343_vm0, %v312_v32 }
  0x3e   : > { %660 = vmatprep.mubr.f32.mxu0 %v12833_v14  ;;  %948 = vmatprep.mubr.f32.mxu1 %v12833_v14 }
  0x41   : > { %7090 = vmatmul.mubr.msk.f32.gmra.mxu0 %vm343_vm0, %v265_v33  ;;  %7138 = vmatmul.mubr.msk.f32.gmra.mxu1 %vm343_vm0, %v313_v34 }
  0x42   : > { %666 = vmatprep.mubr.f32.mxu0 %v12833_v14  ;;  %954 = vmatprep.mubr.f32.mxu1 %v12833_v14 }
  0x45   : > { %7091 = vmatmul.mubr.msk.f32.gmra.mxu0 %vm343_vm0, %v266_v35  ;;  %7139 = vmatmul.mubr.msk.f32.gmra.mxu1 %vm343_vm0, %v314_v36 }
  0x46   : > { %672 = vmatprep.mubr.f32.mxu0 %v12833_v14  ;;  %960 = vmatprep.mubr.f32.mxu1 %v12833_v14 }
  0x49   : > { %7092 = vmatmul.mubr.msk.f32.gmra.mxu0 %vm343_vm0, %v267_v37  ;;  %7140 = vmatmul.mubr.msk.f32.gmra.mxu1 %vm343_vm0, %v315_v38 }
  0x4a   : > { %678 = vmatprep.mubr.f32.mxu0 %v12833_v14  ;;  %966 = vmatprep.mubr.f32.mxu1 %v12833_v14 }
  0x4d   : > { %7093 = vmatmul.mubr.msk.f32.gmra.mxu0 %vm343_vm0, %v268_v39  ;;  %7141 = vmatmul.mubr.msk.f32.gmra.mxu1 %vm343_vm0, %v316_v40 }
  0x4e   : > { %684 = vmatprep.mubr.f32.mxu0 %v12833_v14  ;;  %972 = vmatprep.mubr.f32.mxu1 %v12833_v14 }
  0x51   : > { %7094 = vmatmul.mubr.msk.f32.gmra.mxu0 %vm343_vm0, %v269_v41  ;;  %7142 = vmatmul.mubr.msk.f32.gmra.mxu1 %vm343_vm0, %v317_v43 }
  0x52   : > { %690 = vmatprep.mubr.f32.mxu0 %v12833_v14  ;;  %978 = vmatprep.mubr.f32.mxu1 %v12833_v14 }
  0x55   : > { %7095 = vmatmul.mubr.msk.f32.gmra.mxu0 %vm343_vm0, %v270_v42  ;;  %7143 = vmatmul.mubr.msk.f32.gmra.mxu1 %vm343_vm0, %v318_v44 }
  0x56   : > { %696 = vmatprep.mubr.f32.mxu0 %v12833_v14  ;;  %1049 = vmatprep.mubr.f32.mxu1 %v12833_v14 }
  0x59   : > { %7096 = vmatmul.mubr.msk.f32.gmra.mxu0 %vm343_vm0, %v271_v45 }
  0x5a   : > { %702 = vmatprep.mubr.f32.mxu0 %v12833_v14 }
  0x5d   : > { %7097 = vmatmul.mubr.msk.f32.gmra.mxu0 %vm343_vm0, %v272_v46 }
  0x5e   : > { %708 = vmatprep.mubr.f32.mxu0 %v12833_v14 }
  0x61   : > { %7098 = vmatmul.mubr.msk.f32.gmra.mxu0 %vm343_vm0, %v273_v47 }
  0x62   : > { %714 = vmatprep.mubr.f32.mxu0 %v12833_v14 }
  0x65   : > { %7099 = vmatmul.mubr.msk.f32.gmra.mxu0 %vm343_vm0, %v274_v48 }
  0x66   : > { %720 = vmatprep.mubr.f32.mxu0 %v12833_v14 }
  0x69   : > { %7100 = vmatmul.mubr.msk.f32.gmra.mxu0 %vm343_vm0, %v275_v49 }
  0x6a   : > { %726 = vmatprep.mubr.f32.mxu0 %v12833_v14 }
  0x6d   : > { %7101 = vmatmul.mubr.msk.f32.gmra.mxu0 %vm343_vm0, %v276_v50 }
  0x6e   : > { %732 = vmatprep.mubr.f32.mxu0 %v12833_v14 }
  0x71   : > { %7102 = vmatmul.mubr.msk.f32.gmra.mxu0 %vm343_vm0, %v277_v51 }
  0x72   : > { %738 = vmatprep.mubr.f32.mxu0 %v12833_v14 }
  0x75   : > { %7103 = vmatmul.mubr.msk.f32.gmra.mxu0 %vm343_vm0, %v278_v52 }
  0x76   : > { %744 = vmatprep.mubr.f32.mxu0 %v12833_v14 }
  0x79   : > { %7104 = vmatmul.mubr.msk.f32.gmra.mxu0 %vm343_vm0, %v279_v53 }
  0x7a   : > { %750 = vmatprep.mubr.f32.mxu0 %v12833_v14 }
  0x7d   : > { %7105 = vmatmul.mubr.msk.f32.gmra.mxu0 %vm343_vm0, %v280_v54 }
  0x7e   : > { %756 = vmatprep.mubr.f32.mxu0 %v12833_v14 }
  0x81   : > { %7106 = vmatmul.mubr.msk.f32.gmra.mxu0 %vm343_vm0, %v281_v55 }
  0x82   : > { %762 = vmatprep.mubr.f32.mxu0 %v12833_v14 }
  0x85   : > { %7107 = vmatmul.mubr.msk.f32.gmra.mxu0 %vm343_vm0, %v282_v56 }
  0x86   : > { %768 = vmatprep.mubr.f32.mxu0 %v12833_v14 }
  0x89   : > { %7108 = vmatmul.mubr.msk.f32.gmra.mxu0 %vm343_vm0, %v283_v57 }
  0x8a   : > { %774 = vmatprep.mubr.f32.mxu0 %v12833_v14 }
  0x8d   : > { %7109 = vmatmul.mubr.msk.f32.gmra.mxu0 %vm343_vm0, %v284_v58 }
  0x8e   : > { %780 = vmatprep.mubr.f32.mxu0 %v12833_v14 }
  0x91   : > { %7110 = vmatmul.mubr.msk.f32.gmra.mxu0 %vm343_vm0, %v285_v59 }
  0x92   : > { %786 = vmatprep.mubr.f32.mxu0 %v12833_v14 }
  0x95   : > { %7111 = vmatmul.mubr.msk.f32.gmra.mxu0 %vm343_vm0, %v286_v60 }
  0x96   : > { %792 = vmatprep.mubr.f32.mxu0 %v12833_v14 }
  0x99   : > { %7112 = vmatmul.mubr.msk.f32.gmra.mxu0 %vm343_vm0, %v287_v61 }
  0x9a   : > { %798 = vmatprep.mubr.f32.mxu0 %v12833_v14 }
  0x9d   : > { %7113 = vmatmul.mubr.msk.f32.gmra.mxu0 %vm343_vm0, %v288_v62 }
  0x9e   : > { %804 = vmatprep.mubr.f32.mxu0 %v12833_v14 }
  0xa1   : > { %7114 = vmatmul.mubr.msk.f32.gmra.mxu0 %vm343_vm0, %v289_v63 }
  0xa2   : > { %810 = vmatprep.mubr.f32.mxu0 %v12833_v14 }
  0xa5   : > { %7115 = vmatmul.mubr.msk.f32.gmra.mxu0 %vm343_vm0, %v290_v0 }
  0xa6   : > { %816 = vmatprep.mubr.f32.mxu0 %v12833_v14 }
  0xa9   : > { %7116 = vmatmul.mubr.msk.f32.gmra.mxu0 %vm343_vm0, %v291_v1 }
  0xaa   : > { %822 = vmatprep.mubr.f32.mxu0 %v12833_v14 }
  0xad   : > { %7117 = vmatmul.mubr.msk.f32.gmra.mxu0 %vm343_vm0, %v292_v2 }
  0xae   : > { %828 = vmatprep.mubr.f32.mxu0 %v12833_v14 }
  0xb1   : > { %7118 = vmatmul.mubr.msk.f32.gmra.mxu0 %vm343_vm0, %v293_v3 }
  0xb2   : > { %834 = vmatprep.mubr.f32.mxu0 %v12833_v14 }
  0xb5   : > { %7119 = vmatmul.mubr.msk.f32.gmra.mxu0 %vm343_vm0, %v294_v4 }
  0xb6   : > { %840 = vmatprep.mubr.f32.mxu0 %v12833_v14 }
  0xb9   : > { %7120 = vmatmul.mubr.msk.f32.gmra.mxu0 %vm343_vm0, %v295_v5 }
  0xba   : > { %846 = vmatprep.mubr.f32.mxu0 %v12833_v14 }
  0xbd   : > { %7121 = vmatmul.mubr.msk.f32.gmra.mxu0 %vm343_vm0, %v296_v6 }
  0xbe   : > { %852 = vmatprep.mubr.f32.mxu0 %v12833_v14 }
  0xc1   : > { %7122 = vmatmul.mubr.msk.f32.gmra.mxu0 %vm343_vm0, %v297_v7 }
  0xc2   : > { %858 = vmatprep.mubr.f32.mxu0 %v12833_v14 }
  0xc5   : > { %7123 = vmatmul.mubr.msk.f32.gmra.mxu0 %vm343_vm0, %v298_v8 }
  0xc6   : > { %864 = vmatprep.mubr.f32.mxu0 %v12833_v14 }
  0xc9   : > { %7124 = vmatmul.mubr.msk.f32.gmra.mxu0 %vm343_vm0, %v299_v9 }
  0xca   : > { %870 = vmatprep.mubr.f32.mxu0 %v12833_v14 }
  0xcd   : > { %7125 = vmatmul.mubr.msk.f32.gmra.mxu0 %vm343_vm0, %v300_v10 }
  0xce   : > { %876 = vmatprep.mubr.f32.mxu0 %v12833_v14 }
  0xd1   : > { %7126 = vmatmul.mubr.msk.f32.gmra.mxu0 %vm343_vm0, %v301_v12 }
  0xd2   : > { %882 = vmatprep.mubr.f32.mxu0 %v12833_v14 }
  0xd5   : > { %7127 = vmatmul.mubr.msk.f32.gmra.mxu0 %vm343_vm0, %v302_v15 }
  0xd9   : > { %v602_v19 = vpop.f32.mrf.mxu0  ;;  %v890_v20 = vpop.f32.mrf.mxu1 }
  0xda   : > { %v8741_v21 = vadd.f32 %v8738_v18, %v602_v19  ;;  %v8744_v22 = vadd.f32 %v8738_v18, %v890_v20  ;;  %v2673_v20 = vld [vmem:[%s12828_s2 + $0x30] sm:$0xff] }
  0xdb   : > { %v8746_v23 = vpop.f32.mrf.mxu0  ;;  %v8748_v24 = vpop.f32.mrf.mxu1  ;;  %7629 = vmatprep.subr.mxu0 %v2673_v20 }
  0xdc   : > { %12924 = vst [vmem:[#allocation3_spill] sm:$0xff] %v8746_v23  ;;  %12925 = vst [vmem:[#allocation4_spill] sm:$0xff] %v8748_v24  ;;  %v1506_v25 = vsel %vm1505_vm1, %v8741_v21, 0.0  ;;  %v1650_v29 = vsel %vm1505_vm1, %v8744_v22, 0.0  ;;  %7630 = vmatpush3.msra.mxu0 %v2673_v20 }
  0xdd   : > { %v896_v26 = vpop.f32.mrf.mxu1  ;;  %1507 = vadd.xlane.f32.xlu0 %v1506_v25  ;;  %v608_v27 = vpop.f32.mrf.mxu0 }
  0xde   : > { %v8753_v28 = vadd.f32 %v8738_v18, %v896_v26  ;;  %v8765_v33 = vadd.f32 %v8738_v18, %v608_v27 }
  0xdf   : > { %v8760_v31 = vpop.f32.mrf.mxu0  ;;  %v8762_v32 = vpop.f32.mrf.mxu1 }
  0xe0   : > { %12926 = vst [vmem:[#allocation5_spill] sm:$0xff] %v8760_v31  ;;  %12927 = vst [vmem:[#allocation6_spill] sm:$0xff] %v8762_v32  ;;  %v1653_v34 = vsel %vm1505_vm1, %v8753_v28, 0.0  ;;  %v1509_v41 = vsel %vm1505_vm1, %v8765_v33, 0.0 }
  0xe1   : > { %1654 = vadd.xlane.f32.xlu1 %v1653_v34  ;;  %1651 = vadd.xlane.f32.xlu0 %v1650_v29  ;;  %v614_v35 = vpop.f32.mrf.mxu0  ;;  %v902_v36 = vpop.f32.mrf.mxu1 }
  0xe2   : > { %v8770_v37 = vadd.f32 %v8738_v18, %v614_v35  ;;  %v8773_v38 = vadd.f32 %v8738_v18, %v902_v36 }
  0xe3   : > { %v8775_v39 = vpop.f32.mrf.mxu0  ;;  %v8777_v40 = vpop.f32.mrf.mxu1 }
  0xe4   : > { %12928 = vst [vmem:[#allocation7_spill] sm:$0xff] %v8775_v39  ;;  %12929 = vst [vmem:[#allocation8_spill] sm:$0xff] %v8777_v40  ;;  %v1512_v42 = vsel %vm1505_vm1, %v8770_v37, 0.0  ;;  %v1656_v47 = vsel %vm1505_vm1, %v8773_v38, 0.0 }
  0xe5   : > { %1510 = vadd.xlane.f32.xlu0 %v1509_v41  ;;  %1513 = vadd.xlane.f32.xlu1 %v1512_v42  ;;  %v620_v43 = vpop.f32.mrf.mxu0  ;;  %v908_v44 = vpop.f32.mrf.mxu1 }
  0xe6   : > { %v8784_v45 = vadd.f32 %v8738_v18, %v620_v43  ;;  %v8787_v46 = vadd.f32 %v8738_v18, %v908_v44 }
  0xe7   : > { %v8791_v48 = vpop.f32.mrf.mxu0  ;;  %v8793_v49 = vpop.f32.mrf.mxu1 }
  0xe8   : > { %12930 = vst [vmem:[#allocation9_spill] sm:$0xff] %v8787_v46  ;;  %12931 = vst [vmem:[#allocation10_spill] sm:$0xff] %v8791_v48  ;;  %v1515_v50 = vsel %vm1505_vm1, %v8784_v45, 0.0  ;;  %v1659_v55 = vsel %vm1505_vm1, %v8787_v46, 0.0 }
  0xe9   : > { %12932 = vst [vmem:[#allocation11_spill] sm:$0xff] %v8793_v49  ;;  %1657 = vadd.xlane.f32.xlu0 %v1656_v47  ;;  %1516 = vadd.xlane.f32.xlu1 %v1515_v50  ;;  %v626_v51 = vpop.f32.mrf.mxu0  ;;  %v914_v52 = vpop.f32.mrf.mxu1 }
  0xea   : > { %v8798_v53 = vadd.f32 %v8738_v18, %v626_v51  ;;  %v8801_v54 = vadd.f32 %v8738_v18, %v914_v52 }
  0xeb   : > { %v8805_v56 = vpop.f32.mrf.mxu0  ;;  %v8807_v57 = vpop.f32.mrf.mxu1 }
  0xec   : > { %12933 = vst [vmem:[#allocation12_spill] sm:$0xff] %v8801_v54  ;;  %12934 = vst [vmem:[#allocation13_spill] sm:$0xff] %v8805_v56  ;;  %v1518_v58 = vsel %vm1505_vm1, %v8798_v53, 0.0  ;;  %v1662_v63 = vsel %vm1505_vm1, %v8801_v54, 0.0 }
  0xed   : > { %12935 = vst [vmem:[#allocation14_spill] sm:$0xff] %v8807_v57  ;;  %1660 = vadd.xlane.f32.xlu1 %v1659_v55  ;;  %1519 = vadd.xlane.f32.xlu0 %v1518_v58  ;;  %v632_v59 = vpop.f32.mrf.mxu0  ;;  %v920_v60 = vpop.f32.mrf.mxu1 }
  0xee   : > { %v8812_v61 = vadd.f32 %v8738_v18, %v632_v59  ;;  %v8815_v62 = vadd.f32 %v8738_v18, %v920_v60 }
  0xef   : > { %v8819_v0 = vpop.f32.mrf.mxu0  ;;  %v8821_v1 = vpop.f32.mrf.mxu1 }
  0xf0   : > { %12936 = vst [vmem:[#allocation15_spill] sm:$0xff] %v8815_v62  ;;  %12937 = vst [vmem:[#allocation16_spill] sm:$0xff] %v8819_v0  ;;  %v1521_v2 = vsel %vm1505_vm1, %v8812_v61, 0.0  ;;  %v1665_v7 = vsel %vm1505_vm1, %v8815_v62, 0.0 }
  0xf1   : > { %12938 = vst [vmem:[#allocation17_spill] sm:$0xff] %v8821_v1  ;;  %1663 = vadd.xlane.f32.xlu0 %v1662_v63  ;;  %1522 = vadd.xlane.f32.xlu1 %v1521_v2  ;;  %v638_v3 = vpop.f32.mrf.mxu0  ;;  %v926_v4 = vpop.f32.mrf.mxu1 }
  0xf2   : > { %v8826_v5 = vadd.f32 %v8738_v18, %v638_v3  ;;  %v8829_v6 = vadd.f32 %v8738_v18, %v926_v4 }
  0xf3   : > { %v8833_v8 = vpop.f32.mrf.mxu0  ;;  %v8835_v9 = vpop.f32.mrf.mxu1 }
  0xf4   : > { %12939 = vst [vmem:[#allocation18_spill] sm:$0xff] %v8829_v6  ;;  %12940 = vst [vmem:[#allocation19_spill] sm:$0xff] %v8833_v8  ;;  %v1524_v10 = vsel %vm1505_vm1, %v8826_v5, 0.0  ;;  %v1668_v19 = vsel %vm1505_vm1, %v8829_v6, 0.0 }
  0xf5   : > { %12941 = vst [vmem:[#allocation20_spill] sm:$0xff] %v8835_v9  ;;  %1666 = vadd.xlane.f32.xlu1 %v1665_v7  ;;  %1525 = vadd.xlane.f32.xlu0 %v1524_v10  ;;  %v644_v11 = vpop.f32.mrf.mxu0  ;;  %v932_v12 = vpop.f32.mrf.mxu1 }
  0xf6   : > { %v8840_v15 = vadd.f32 %v8738_v18, %v644_v11  ;;  %v8843_v17 = vadd.f32 %v8738_v18, %v932_v12 }
  0xf7   : > { %v8850_v25 = vpop.f32.mrf.mxu0  ;;  %v8852_v26 = vpop.f32.mrf.mxu1 }
  0xf8   : > { %12942 = vst [vmem:[#allocation21_spill] sm:$0xff] %v8843_v17  ;;  %12943 = vst [vmem:[#allocation22_spill] sm:$0xff] %v8850_v25  ;;  %v1527_v27 = vsel %vm1505_vm1, %v8840_v15, 0.0  ;;  %v1671_v36 = vsel %vm1505_vm1, %v8843_v17, 0.0 }
  0xf9   : > { %12944 = vst [vmem:[#allocation23_spill] sm:$0xff] %v8852_v26  ;;  %1669 = vadd.xlane.f32.xlu0 %v1668_v19  ;;  %1528 = vadd.xlane.f32.xlu1 %v1527_v27  ;;  %v650_v29 = vpop.f32.mrf.mxu0  ;;  %v938_v30 = vpop.f32.mrf.mxu1 }
  0xfa   : > { %v8857_v34 = vadd.f32 %v8738_v18, %v650_v29  ;;  %v8860_v35 = vadd.f32 %v8738_v18, %v938_v30 }
  0xfb   : > { %v8864_v41 = vpop.f32.mrf.mxu0  ;;  %v8866_v42 = vpop.f32.mrf.mxu1 }
  0xfc   : > { %12945 = vst [vmem:[#allocation24_spill] sm:$0xff] %v8860_v35  ;;  %12946 = vst [vmem:[#allocation25_spill] sm:$0xff] %v8864_v41  ;;  %v1530_v43 = vsel %vm1505_vm1, %v8857_v34, 0.0  ;;  %v1674_v52 = vsel %vm1505_vm1, %v8860_v35, 0.0 }
  0xfd   : > { %12947 = vst [vmem:[#allocation26_spill] sm:$0xff] %v8866_v42  ;;  %1672 = vadd.xlane.f32.xlu1 %v1671_v36  ;;  %1531 = vadd.xlane.f32.xlu0 %v1530_v43  ;;  %v656_v44 = vpop.f32.mrf.mxu0  ;;  %v944_v47 = vpop.f32.mrf.mxu1 }
  0xfe   : > { %v8871_v50 = vadd.f32 %v8738_v18, %v656_v44  ;;  %v8874_v51 = vadd.f32 %v8738_v18, %v944_v47 }
  0xff   : > { %v8878_v55 = vpop.f32.mrf.mxu0  ;;  %v8880_v58 = vpop.f32.mrf.mxu1 }
 0x100   : > { %12948 = vst [vmem:[#allocation27_spill] sm:$0xff] %v8874_v51  ;;  %12949 = vst [vmem:[#allocation28_spill] sm:$0xff] %v8878_v55  ;;  %v1533_v59 = vsel %vm1505_vm1, %v8871_v50, 0.0  ;;  %v1677_v4 = vsel %vm1505_vm1, %v8874_v51, 0.0 }
 0x101   : > { %12950 = vst [vmem:[#allocation29_spill] sm:$0xff] %v8880_v58  ;;  %1675 = vadd.xlane.f32.xlu0 %v1674_v52  ;;  %1534 = vadd.xlane.f32.xlu1 %v1533_v59  ;;  %v662_v60 = vpop.f32.mrf.mxu0  ;;  %v950_v63 = vpop.f32.mrf.mxu1 }
 0x102   : > { %v8885_v2 = vadd.f32 %v8738_v18, %v662_v60  ;;  %v8888_v3 = vadd.f32 %v8738_v18, %v950_v63 }
 0x103   : > { %v8892_v7 = vpop.f32.mrf.mxu0  ;;  %v8894_v10 = vpop.f32.mrf.mxu1 }
 0x104   : > { %12951 = vst [vmem:[#allocation30_spill] sm:$0xff] %v8888_v3  ;;  %12952 = vst [vmem:[#allocation31_spill] sm:$0xff] %v8892_v7  ;;  %v1536_v11 = vsel %vm1505_vm1, %v8885_v2, 0.0  ;;  %v1680_v29 = vsel %vm1505_vm1, %v8888_v3, 0.0 }
 0x105   : > { %12953 = vst [vmem:[#allocation32_spill] sm:$0xff] %v8894_v10  ;;  %1678 = vadd.xlane.f32.xlu1 %v1677_v4  ;;  %1537 = vadd.xlane.f32.xlu0 %v1536_v11  ;;  %v668_v12 = vpop.f32.mrf.mxu0  ;;  %v956_v19 = vpop.f32.mrf.mxu1 }
 0x106   : > { %v8899_v20 = vadd.f32 %v8738_v18, %v668_v12  ;;  %v8902_v27 = vadd.f32 %v8738_v18, %v956_v19 }
 0x107   : > { %v8906_v30 = vpop.f32.mrf.mxu0  ;;  %v8908_v36 = vpop.f32.mrf.mxu1 }
 0x108   : > { %12954 = vst [vmem:[#allocation33_spill] sm:$0xff] %v8902_v27  ;;  %12955 = vst [vmem:[#allocation34_spill] sm:$0xff] %v8906_v30  ;;  %v1539_v43 = vsel %vm1505_vm1, %v8899_v20, 0.0  ;;  %v1683_v60 = vsel %vm1505_vm1, %v8902_v27, 0.0 }
 0x109   : > { %12956 = vst [vmem:[#allocation35_spill] sm:$0xff] %v8908_v36  ;;  %1681 = vadd.xlane.f32.xlu0 %v1680_v29  ;;  %1540 = vadd.xlane.f32.xlu1 %v1539_v43  ;;  %v674_v44 = vpop.f32.mrf.mxu0  ;;  %v962_v47 = vpop.f32.mrf.mxu1 }
 0x10a   : > { %v8913_v52 = vadd.f32 %v8738_v18, %v674_v44  ;;  %v8916_v59 = vadd.f32 %v8738_v18, %v962_v47  ;;  %v2672_v47 = vld [vmem:[%s12828_s2 + $0x28] sm:$0xff] }
 0x10b   : > { %v8920_v63 = vpop.f32.mrf.mxu0  ;;  %v8922_v4 = vpop.f32.mrf.mxu1  ;;  %7631 = vmatprep.subr.mxu0 %v2672_v47 }
 0x10c   : > { %12957 = vst [vmem:[#allocation36_spill] sm:$0xff] %v8916_v59  ;;  %12958 = vst [vmem:[#allocation37_spill] sm:$0xff] %v8920_v63  ;;  %v1542_v11 = vsel %vm1505_vm1, %v8913_v52, 0.0  ;;  %v1686_v44 = vsel %vm1505_vm1, %v8916_v59, 0.0  ;;  %7632 = vmatpush3.msra.mxu0 %v2672_v47 }
 0x10d   : > { %12959 = vst [vmem:[#allocation38_spill] sm:$0xff] %v8922_v4  ;;  %1684 = vadd.xlane.f32.xlu1 %v1683_v60  ;;  %1543 = vadd.xlane.f32.xlu0 %v1542_v11  ;;  %v680_v12 = vpop.f32.mrf.mxu0  ;;  %v968_v19 = vpop.f32.mrf.mxu1 }
 0x10e   : > { %v8927_v29 = vadd.f32 %v8738_v18, %v680_v12  ;;  %v8930_v43 = vadd.f32 %v8738_v18, %v968_v19 }
 0x10f   : > { %v8937_v14 = vpop.f32.mrf.mxu0 }
 0x110   : > { %12960 = vst [vmem:[#allocation39_spill] sm:$0xff] %v8930_v43  ;;  %12961 = vst [vmem:[#allocation40_spill] sm:$0xff] %v8937_v14  ;;  %v1545_v60 = vsel %vm1505_vm1, %v8927_v29, 0.0  ;;  %v1689_v19 = vsel %vm1505_vm1, %v8930_v43, 0.0 }
 0x111   : > { %1687 = vadd.xlane.f32.xlu0 %v1686_v44  ;;  %1546 = vadd.xlane.f32.xlu1 %v1545_v60  ;;  %v686_v11 = vpop.f32.mrf.mxu0 }
 0x112   : > { %v8942_v12 = vadd.f32 %v8738_v18, %v686_v11 }
 0x113   : > { %v8946_v4 = vpop.f32.mrf.mxu0 }
 0x114   : > { %12962 = vst [vmem:[#allocation41_spill] sm:$0xff] %v8946_v4  ;;  %v1548_v10 = vsel %vm1505_vm1, %v8942_v12, 0.0 }
 0x115   : > { %1690 = vadd.xlane.f32.xlu1 %v1689_v19  ;;  %1549 = vadd.xlane.f32.xlu0 %v1548_v10  ;;  %v692_v36 = vpop.f32.mrf.mxu0 }
 0x116   : > { %v8951_v42 = vadd.f32 %v8738_v18, %v692_v36 }
 0x117   : > { %v8953_v44 = vpop.f32.mrf.mxu0 }
 0x118   : > { %12963 = vst [vmem:[#allocation42_spill] sm:$0xff] %v8953_v44  ;;  %v1551_v47 = vsel %vm1505_vm1, %v8951_v42, 0.0 }
 0x119   : > { %1552 = vadd.xlane.f32.xlu1 %v1551_v47  ;;  %v698_v60 = vpop.f32.mrf.mxu0 }
 0x11a   : > { %v8958_v11 = vadd.f32 %v8738_v18, %v698_v60 }
 0x11b   : > { %v8960_v58 = vpop.f32.mrf.mxu0 }
 0x11c   : > { %12964 = vst [vmem:[#allocation43_spill] sm:$0xff] %v8960_v58  ;;  %v1554_v19 = vsel %vm1505_vm1, %v8958_v11, 0.0 }
 0x11d   : > { %1555 = vadd.xlane.f32.xlu0 %v1554_v19  ;;  %v704_v10 = vpop.f32.mrf.mxu0 }
 0x11e   : > { %v8965_v36 = vadd.f32 %v8738_v18, %v704_v10  ;;  %v2671_v10 = vld [vmem:[%s12828_s2 + $0x20] sm:$0xff] }
 0x11f   : > { %v8967_v9 = vpop.f32.mrf.mxu0  ;;  %7633 = vmatprep.subr.mxu0 %v2671_v10 }
 0x120   : > { %12965 = vst [vmem:[#allocation44_spill] sm:$0xff] %v8967_v9  ;;  %v1557_v26 = vsel %vm1505_vm1, %v8965_v36, 0.0  ;;  %7634 = vmatpush3.msra.mxu0 %v2671_v10 }
 0x121   : > { %1558 = vadd.xlane.f32.xlu1 %v1557_v26  ;;  %v710_v47 = vpop.f32.mrf.mxu0 }
 0x122   : > { %v8972_v60 = vadd.f32 %v8738_v18, %v710_v47 }
 0x123   : > { %v8974_v57 = vpop.f32.mrf.mxu0 }
 0x124   : > { %12966 = vst [vmem:[#allocation45_spill] sm:$0xff] %v8974_v57  ;;  %v1560_v1 = vsel %vm1505_vm1, %v8972_v60, 0.0 }
 0x125   : > { %1561 = vadd.xlane.f32.xlu0 %v1560_v1  ;;  %v716_v19 = vpop.f32.mrf.mxu0 }
 0x126   : > { %v8982_v40 = vadd.f32 %v8738_v18, %v716_v19 }
 0x127   : > { %v8984_v26 = vpop.f32.mrf.mxu0 }
 0x128   : > { %12967 = vst [vmem:[#allocation46_spill] sm:$0xff] %v8984_v26  ;;  %v1563_v47 = vsel %vm1505_vm1, %v8982_v40, 0.0 }
 0x129   : > { %1564 = vadd.xlane.f32.xlu1 %v1563_v47  ;;  %v722_v49 = vpop.f32.mrf.mxu0 }
 0x12a   : > { %v8989_v24 = vadd.f32 %v8738_v18, %v722_v49 }
 0x12b   : > { %v8991_v1 = vpop.f32.mrf.mxu0 }
 0x12c   : > { %12968 = vst [vmem:[#allocation47_spill] sm:$0xff] %v8991_v1  ;;  %v1566_v32 = vsel %vm1505_vm1, %v8989_v24, 0.0 }
 0x12d   : > { %1567 = vadd.xlane.f32.xlu0 %v1566_v32  ;;  %v728_v19 = vpop.f32.mrf.mxu0 }
 0x12e   : > { %v8996_v57 = vadd.f32 %v8738_v18, %v728_v19 }
 0x12f   : > { %v8998_v26 = vpop.f32.mrf.mxu0 }
 0x130   : > { %12969 = vst [vmem:[#allocation48_spill] sm:$0xff] %v8998_v26  ;;  %v1569_v10 = vsel %vm1505_vm1, %v8996_v57, 0.0 }
 0x131   : > { %1570 = vadd.xlane.f32.xlu1 %v1569_v10  ;;  %v734_v47 = vpop.f32.mrf.mxu0 }
 0x132   : > { %v9003_v49 = vadd.f32 %v8738_v18, %v734_v47 }
 0x133   : > { %v9005_v58 = vpop.f32.mrf.mxu0 }
 0x134   : > { %12970 = vst [vmem:[#allocation49_spill] sm:$0xff] %v9005_v58  ;;  %v1572_v1 = vsel %vm1505_vm1, %v9003_v49, 0.0 }
 0x135   : > { %1573 = vadd.xlane.f32.xlu0 %v1572_v1  ;;  %v740_v32 = vpop.f32.mrf.mxu0 }
 0x136   : > { %v9010_v19 = vadd.f32 %v8738_v18, %v740_v32  ;;  %v2670_v32 = vld [vmem:[%s12828_s2 + $0x18] sm:$0xff] }
 0x137   : > { %v9012_v9 = vpop.f32.mrf.mxu0  ;;  %7635 = vmatprep.subr.mxu0 %v2670_v32 }
 0x138   : > { %12971 = vst [vmem:[#allocation50_spill] sm:$0xff] %v9012_v9  ;;  %v1575_v26 = vsel %vm1505_vm1, %v9010_v19, 0.0  ;;  %7636 = vmatpush3.msra.mxu0 %v2670_v32 }
 0x139   : > { %1576 = vadd.xlane.f32.xlu1 %v1575_v26  ;;  %v746_v10 = vpop.f32.mrf.mxu0 }
 0x13a   : > { %v9017_v47 = vadd.f32 %v8738_v18, %v746_v10 }
 0x13b   : > { %v9019_v4 = vpop.f32.mrf.mxu0 }
 0x13c   : > { %12972 = vst [vmem:[#allocation51_spill] sm:$0xff] %v9019_v4  ;;  %v1578_v58 = vsel %vm1505_vm1, %v9017_v47, 0.0 }
 0x13d   : > { %1579 = vadd.xlane.f32.xlu0 %v1578_v58  ;;  %v752_v1 = vpop.f32.mrf.mxu0 }
 0x13e   : > { %v9027_v9 = vadd.f32 %v8738_v18, %v752_v1 }
 0x13f   : > { %v9029_v26 = vpop.f32.mrf.mxu0 }
 0x140   : > { %12973 = vst [vmem:[#allocation52_spill] sm:$0xff] %v9029_v26  ;;  %v1581_v10 = vsel %vm1505_vm1, %v9027_v9, 0.0 }
 0x141   : > { %1582 = vadd.xlane.f32.xlu1 %v1581_v10  ;;  %v758_v4 = vpop.f32.mrf.mxu0 }
 0x142   : > { %v9034_v44 = vadd.f32 %v8738_v18, %v758_v4 }
 0x143   : > { %v9036_v58 = vpop.f32.mrf.mxu0 }
 0x144   : > { %12974 = vst [vmem:[#allocation53_spill] sm:$0xff] %v9036_v58  ;;  %v1584_v63 = vsel %vm1505_vm1, %v9034_v44, 0.0 }
 0x145   : > { %1585 = vadd.xlane.f32.xlu0 %v1584_v63  ;;  %v764_v1 = vpop.f32.mrf.mxu0 }
 0x146   : > { %v9041_v14 = vadd.f32 %v8738_v18, %v764_v1 }
 0x147   : > { %v9043_v26 = vpop.f32.mrf.mxu0 }
 0x148   : > { %12975 = vst [vmem:[#allocation54_spill] sm:$0xff] %v9043_v26  ;;  %v1587_v32 = vsel %vm1505_vm1, %v9041_v14, 0.0 }
 0x149   : > { %1588 = vadd.xlane.f32.xlu1 %v1587_v32  ;;  %v770_v10 = vpop.f32.mrf.mxu0 }
 0x14a   : > { %v9048_v4 = vadd.f32 %v8738_v18, %v770_v10 }
 0x14b   : > { %v9050_v7 = vpop.f32.mrf.mxu0 }
 0x14c   : > { %12976 = vst [vmem:[#allocation55_spill] sm:$0xff] %v9050_v7  ;;  %v1590_v58 = vsel %vm1505_vm1, %v9048_v4, 0.0 }
 0x14d   : > { %1591 = vadd.xlane.f32.xlu0 %v1590_v58  ;;  %v776_v63 = vpop.f32.mrf.mxu0 }
 0x14e   : > { %v9055_v1 = vadd.f32 %v8738_v18, %v776_v63  ;;  %v2669_v63 = vld [vmem:[%s12828_s2 + $0x10] sm:$0xff] }
 0x14f   : > { %v9057_v30 = vpop.f32.mrf.mxu0  ;;  %7637 = vmatprep.subr.mxu0 %v2669_v63 }
 0x150   : > { %12977 = vst [vmem:[#allocation56_spill] sm:$0xff] %v9057_v30  ;;  %v1593_v26 = vsel %vm1505_vm1, %v9055_v1, 0.0  ;;  %7638 = vmatpush3.msra.mxu0 %v2669_v63 }
 0x151   : > { %1594 = vadd.xlane.f32.xlu1 %v1593_v26  ;;  %v782_v32 = vpop.f32.mrf.mxu0 }
 0x152   : > { %v9062_v10 = vadd.f32 %v8738_v18, %v782_v32 }
 0x153   : > { %v9064_v41 = vpop.f32.mrf.mxu0 }
 0x154   : > { %12978 = vst [vmem:[#allocation57_spill] sm:$0xff] %v9064_v41  ;;  %v1596_v7 = vsel %vm1505_vm1, %v9062_v10, 0.0 }
 0x155   : > { %1597 = vadd.xlane.f32.xlu0 %v1596_v7  ;;  %v788_v58 = vpop.f32.mrf.mxu0 }
 0x156   : > { %v9072_v30 = vadd.f32 %v8738_v18, %v788_v58 }
 0x157   : > { %v9074_v26 = vpop.f32.mrf.mxu0 }
 0x158   : > { %12979 = vst [vmem:[#allocation58_spill] sm:$0xff] %v9074_v26  ;;  %v1599_v32 = vsel %vm1505_vm1, %v9072_v30, 0.0 }
 0x159   : > { %1600 = vadd.xlane.f32.xlu1 %v1599_v32  ;;  %v794_v41 = vpop.f32.mrf.mxu0 }
 0x15a   : > { %v9079_v55 = vadd.f32 %v8738_v18, %v794_v41 }
 0x15b   : > { %v9081_v7 = vpop.f32.mrf.mxu0 }
 0x15c   : > { %12980 = vst [vmem:[#allocation59_spill] sm:$0xff] %v9081_v7  ;;  %v1602_v8 = vsel %vm1505_vm1, %v9079_v55, 0.0 }
 0x15d   : > { %1603 = vadd.xlane.f32.xlu0 %v1602_v8  ;;  %v800_v58 = vpop.f32.mrf.mxu0 }
 0x15e   : > { %v9086_v25 = vadd.f32 %v8738_v18, %v800_v58 }
 0x15f   : > { %v9088_v26 = vpop.f32.mrf.mxu0 }
 0x160   : > { %12981 = vst [vmem:[#allocation60_spill] sm:$0xff] %v9088_v26  ;;  %v1605_v63 = vsel %vm1505_vm1, %v9086_v25, 0.0 }
 0x161   : > { %1606 = vadd.xlane.f32.xlu1 %v1605_v63  ;;  %v806_v32 = vpop.f32.mrf.mxu0 }
 0x162   : > { %v9093_v41 = vadd.f32 %v8738_v18, %v806_v32 }
 0x163   : > { %v9095_v56 = vpop.f32.mrf.mxu0 }
 0x164   : > { %12982 = vst [vmem:[#allocation61_spill] sm:$0xff] %v9095_v56  ;;  %v1608_v7 = vsel %vm1505_vm1, %v9093_v41, 0.0 }
 0x165   : > { %1609 = vadd.xlane.f32.xlu0 %v1608_v7  ;;  %v812_v8 = vpop.f32.mrf.mxu0 }
 0x166   : > { %v9100_v58 = vadd.f32 %v8738_v18, %v812_v8  ;;  %v1508_v0 = vpop.xlane.xlu0 %1507 }
 0x167   : > { %v1699_v26 = vmul.f32 0.015625, %v1508_v0  ;;  %v9102_v39 = vpop.f32.mrf.mxu0 }
 0x168   : > { %12983 = vst [vmem:[#allocation62_spill] sm:$0xff] %v9102_v39  ;;  %v1611_v63 = vsel %vm1505_vm1, %v9100_v58, 0.0 }
 0x169   : > { %v9107_v32 = vsub.f32 %v8741_v21, %v1699_v26  ;;  %1612 = vadd.xlane.f32.xlu1 %v1611_v63  ;;  %v818_v56 = vpop.f32.mrf.mxu0  ;;  %v2668_v26 = vld [vmem:[%s12828_s2 + $0x8] sm:$0xff] }
 0x16a   : > { %v9110_v48 = vadd.f32 %v8738_v18, %v818_v56  ;;  %v9112_v7 = vpop.xlane.xlu1 %1654  ;;  %v9114_v23 = vpop.xlane.xlu0 %1651  ;;  %7639 = vmatprep.subr.mxu0 %v2668_v26 }
 0x16b   : > { %v9116_v8 = vpop.f32.mrf.mxu0  ;;  %v1827_v39 = vmul.f32 %v9107_v32, %v9107_v32  ;;  %7640 = vmatpush3.msra.mxu0 %v2668_v26 }
 0x16c   : > { %12984 = vst [vmem:[#allocation63_spill] sm:$0xff] %v9116_v8  ;;  %v1614_v0 = vsel %vm1505_vm1, %v9110_v48, 0.0 }
 0x16d   : > { %1615 = vadd.xlane.f32.xlu0 %v1614_v0  ;;  %v824_v21 = vpop.f32.mrf.mxu0  ;;  %v1891_v59 = vsel %vm1505_vm1, %v1827_v39, 0.0 }
 0x16e   : > { %v9126_v56 = vadd.f32 %v8738_v18, %v824_v21  ;;  %v1511_v63 = vpop.xlane.xlu0 %1510  ;;  %v1514_v31 = vpop.xlane.xlu1 %1513 }
 0x16f   : > { %v1700_v13 = vmul.f32 0.015625, %v1511_v63  ;;  %v1701_v8 = vmul.f32 0.015625, %v1514_v31  ;;  %v9128_v43 = vpop.f32.mrf.mxu0 }
 0x170   : > { %12985 = vst [vmem:[#allocation64_spill] sm:$0xff] %v9128_v43  ;;  %v1617_v0 = vsel %vm1505_vm1, %v9126_v56, 0.0 }
 0x171   : > { %v9134_v27 = vsub.f32 %v8765_v33, %v1700_v13  ;;  %v9137_v51 = vsub.f32 %v8770_v37, %v1701_v8  ;;  %1892 = vadd.xlane.f32.xlu0 %v1891_v59  ;;  %1618 = vadd.xlane.f32.xlu1 %v1617_v0  ;;  %v830_v21 = vpop.f32.mrf.mxu0 }
 0x172   : > { %v9140_v63 = vadd.f32 %v8738_v18, %v830_v21  ;;  %v9142_v31 = vpop.xlane.xlu0 %1657  ;;  %v1517_v26 = vpop.xlane.xlu1 %1516 }
 0x173   : > { %v1702_v43 = vmul.f32 0.015625, %v1517_v26  ;;  %v9144_v39 = vpop.f32.mrf.mxu0  ;;  %v1828_v3 = vmul.f32 %v9134_v27, %v9134_v27  ;;  %v1829_v33 = vmul.f32 %v9137_v51, %v9137_v51 }
 0x174   : > { %12986 = vst [vmem:[#allocation65_spill] sm:$0xff] %v9144_v39  ;;  %v1620_v13 = vsel %vm1505_vm1, %v9140_v63, 0.0 }
 0x175   : > { %v9153_v37 = vsub.f32 %v8784_v45, %v1702_v43  ;;  %1621 = vadd.xlane.f32.xlu0 %v1620_v13  ;;  %v836_v59 = vpop.f32.mrf.mxu0  ;;  %v1894_v8 = vsel %vm1505_vm1, %v1828_v3, 0.0  ;;  %v1897_v17 = vsel %vm1505_vm1, %v1829_v33, 0.0 }
 0x176   : > { %v9157_v0 = vadd.f32 %v8738_v18, %v836_v59  ;;  %v9159_v21 = vpop.xlane.xlu1 %1660  ;;  %v1520_v26 = vpop.xlane.xlu0 %1519  ;;  %1895 = vadd.xlane.f32.xlu1 %v1894_v8 }
 0x177   : > { %v1703_v39 = vmul.f32 0.015625, %v1520_v26  ;;  %v9161_v35 = vpop.f32.mrf.mxu0  ;;  %v1830_v13 = vmul.f32 %v9153_v37, %v9153_v37 }
 0x178   : > { %12987 = vst [vmem:[#allocation66_spill] sm:$0xff] %v9161_v35  ;;  %v1623_v45 = vsel %vm1505_vm1, %v9157_v0, 0.0 }
 0x179   : > { %v9167_v43 = vsub.f32 %v8798_v53, %v1703_v39  ;;  %1898 = vadd.xlane.f32.xlu0 %v1897_v17  ;;  %v842_v3 = vpop.f32.mrf.mxu0 }
 0x17a   : > { %v9172_v59 = vadd.f32 %v8738_v18, %v842_v3  ;;  %v9174_v8 = vpop.xlane.xlu0 %1663  ;;  %v1523_v26 = vpop.xlane.xlu1 %1522  ;;  %1624 = vadd.xlane.f32.xlu1 %v1623_v45  ;;  %v1900_v3 = vsel %vm1505_vm1, %v1830_v13, 0.0 }
 0x17b   : > { %12988 = vst [vmem:[#allocation67_spill] sm:$0xff] %v9174_v8  ;;  %v1704_v35 = vmul.f32 0.015625, %v1523_v26  ;;  %v9176_v33 = vpop.f32.mrf.mxu0  ;;  %v1831_v53 = vmul.f32 %v9167_v43, %v9167_v43 }
 0x17c   : > { %12989 = vst [vmem:[#allocation68_spill] sm:$0xff] %v9176_v33  ;;  %v1626_v6 = vsel %vm1505_vm1, %v9172_v59, 0.0 }
 0x17d   : > { %v9183_v17 = vsub.f32 %v8812_v61, %v1704_v35  ;;  %1627 = vadd.xlane.f32.xlu0 %v1626_v6  ;;  %v848_v39 = vpop.f32.mrf.mxu0  ;;  %v1903_v46 = vsel %vm1505_vm1, %v1831_v53, 0.0 }
 0x17e   : > { %v9187_v62 = vadd.f32 %v8738_v18, %v848_v39  ;;  %v9189_v45 = vpop.xlane.xlu1 %1666  ;;  %v1526_v26 = vpop.xlane.xlu0 %1525  ;;  %1901 = vadd.xlane.f32.xlu1 %v1900_v3 }
 0x17f   : > { %12990 = vst [vmem:[#allocation69_spill] sm:$0xff] %v9183_v17  ;;  %12991 = vst [vmem:[#allocation70_spill] sm:$0xff] %v9189_v45  ;;  %v1705_v33 = vmul.f32 0.015625, %v1526_v26  ;;  %v9191_v54 = vpop.f32.mrf.mxu0  ;;  %v1832_v13 = vmul.f32 %v9183_v17, %v9183_v17 }
 0x180   : > { %12992 = vst [vmem:[#allocation71_spill] sm:$0xff] %v9191_v54  ;;  %v1629_v61 = vsel %vm1505_vm1, %v9187_v62, 0.0 }
 0x181   : > { %v9197_v6 = vsub.f32 %v8826_v5, %v1705_v33  ;;  %1904 = vadd.xlane.f32.xlu0 %v1903_v46  ;;  %v854_v35 = vpop.f32.mrf.mxu0 }
 0x182   : > { %v9202_v39 = vadd.f32 %v8738_v18, %v854_v35  ;;  %v9204_v3 = vpop.xlane.xlu0 %1669  ;;  %v1529_v26 = vpop.xlane.xlu1 %1528  ;;  %1630 = vadd.xlane.f32.xlu1 %v1629_v61  ;;  %v1906_v35 = vsel %vm1505_vm1, %v1832_v13, 0.0 }
 0x183   : > { %12993 = vst [vmem:[#allocation72_spill] sm:$0xff] %v9197_v6  ;;  %12994 = vst [vmem:[#allocation73_spill] sm:$0xff] %v9204_v3  ;;  %v1706_v54 = vmul.f32 0.015625, %v1529_v26  ;;  %v9206_v53 = vpop.f32.mrf.mxu0  ;;  %v1833_v46 = vmul.f32 %v9197_v6, %v9197_v6 }
 0x184   : > { %12995 = vst [vmem:[#allocation74_spill] sm:$0xff] %v9206_v53  ;;  %v1632_v45 = vsel %vm1505_vm1, %v9202_v39, 0.0 }
 0x185   : > { %v9213_v5 = vsub.f32 %v8840_v15, %v1706_v54  ;;  %1633 = vadd.xlane.f32.xlu0 %v1632_v45  ;;  %v860_v33 = vpop.f32.mrf.mxu0  ;;  %v1909_v8 = vsel %vm1505_vm1, %v1833_v46, 0.0 }
 0x186   : > { %v9217_v3 = vadd.f32 %v8738_v18, %v860_v33  ;;  %v9219_v61 = vpop.xlane.xlu1 %1672  ;;  %v1532_v26 = vpop.xlane.xlu0 %1531  ;;  %1907 = vadd.xlane.f32.xlu1 %v1906_v35 }
 0x187   : > { %12996 = vst [vmem:[#allocation75_spill] sm:$0xff] %v9213_v5  ;;  %12997 = vst [vmem:[#allocation76_spill] sm:$0xff] %v9219_v61  ;;  %v1707_v53 = vmul.f32 0.015625, %v1532_v26  ;;  %v9221_v17 = vpop.f32.mrf.mxu0  ;;  %v1834_v13 = vmul.f32 %v9213_v5, %v9213_v5 }
 0x188   : > { %12998 = vst [vmem:[#allocation77_spill] sm:$0xff] %v9221_v17  ;;  %v1635_v54 = vsel %vm1505_vm1, %v9217_v3, 0.0  ;;  %v9236_v17 = vpop.f32.mrf.mxu1 }
 0x189   : > { %v9227_v15 = vsub.f32 %v8857_v34, %v1707_v53  ;;  %1910 = vadd.xlane.f32.xlu0 %v1909_v8  ;;  %v866_v45 = vpop.f32.mrf.mxu0  ;;  %13001 = vst [vmem:[#allocation80_spill] sm:$0xff] %v9236_v17  ;;  %v1912_v5 = vsel %vm1505_vm1, %v1834_v13, 0.0 }
 0x18a   : > { %v9232_v33 = vadd.f32 %v8738_v18, %v866_v45  ;;  %v9234_v35 = vpop.xlane.xlu0 %1675  ;;  %v1535_v26 = vpop.xlane.xlu1 %1534  ;;  %1636 = vadd.xlane.f32.xlu1 %v1635_v54 }
 0x18b   : > { %12999 = vst [vmem:[#allocation78_spill] sm:$0xff] %v9227_v15  ;;  %13000 = vst [vmem:[#allocation79_spill] sm:$0xff] %v9234_v35  ;;  %v1708_v46 = vmul.f32 0.015625, %v1535_v26  ;;  %v9238_v61 = vpop.f32.mrf.mxu0  ;;  %v1835_v8 = vmul.f32 %v9227_v15, %v9227_v15  ;;  %v974_v35 = vpop.f32.mrf.mxu1 }
 0x18c   : > { %13002 = vst [vmem:[#allocation81_spill] sm:$0xff] %v9238_v61  ;;  %v1638_v34 = vsel %vm1505_vm1, %v9232_v33, 0.0 }
 0x18d   : > { %v9245_v53 = vsub.f32 %v8871_v50, %v1708_v46  ;;  %1639 = vadd.xlane.f32.xlu0 %v1638_v34  ;;  %v872_v45 = vpop.f32.mrf.mxu0  ;;  %v1915_v15 = vsel %vm1505_vm1, %v1835_v8, 0.0  ;;  %v9258_v34 = vpop.f32.mrf.mxu1 }
 0x18e   : > { %v9249_v54 = vadd.f32 %v8738_v18, %v872_v45  ;;  %v9251_v26 = vpop.xlane.xlu1 %1678  ;;  %v1538_v17 = vpop.xlane.xlu0 %1537  ;;  %1913 = vadd.xlane.f32.xlu1 %v1912_v5  ;;  %13007 = vst [vmem:[#allocation86_spill] sm:$0xff] %v9258_v34 }
 0x18f   : > { %13003 = vst [vmem:[#allocation82_spill] sm:$0xff] %v9245_v53  ;;  %13005 = vst [vmem:[#allocation84_spill] sm:$0xff] %v9251_v26  ;;  %v9253_v61 = vpop.f32.mrf.mxu0  ;;  %v1709_v6 = vmul.f32 0.015625, %v1538_v17  ;;  %v1836_v13 = vmul.f32 %v9245_v53, %v9245_v53  ;;  %v9268_v17 = vadd.f32 %v8738_v18, %v974_v35  ;;  %v980_v53 = vpop.f32.mrf.mxu1 }
 0x190   : > { %13004 = vst [vmem:[#allocation83_spill] sm:$0xff] %v9249_v54  ;;  %13006 = vst [vmem:[#allocation85_spill] sm:$0xff] %v9253_v61  ;;  %v1641_v50 = vsel %vm1505_vm1, %v9249_v54, 0.0 }
 0x191   : > { %1916 = vadd.xlane.f32.xlu0 %v1915_v15  ;;  %v878_v46 = vpop.f32.mrf.mxu0  ;;  %13010 = vst [vmem:[#allocation89_spill] sm:$0xff] %v9268_v17  ;;  %v2667_v15 = vld [vmem:[%s12828_s2] sm:$0xff]  ;;  %v9276_v34 = vsub.f32 %v8885_v2, %v1709_v6  ;;  %v1918_v35 = vsel %vm1505_vm1, %v1836_v13, 0.0  ;;  %v1692_v2 = vsel %vm1505_vm1, %v9268_v17, 0.0 }
 0x192   : > { %v9263_v45 = vadd.f32 %v8738_v18, %v878_v46  ;;  %v9265_v26 = vpop.xlane.xlu0 %1681  ;;  %v1541_v5 = vpop.xlane.xlu1 %1540  ;;  %1642 = vadd.xlane.f32.xlu1 %v1641_v50  ;;  %7641 = vmatprep.subr.mxu0 %v2667_v15 }
 0x193   : > { %13009 = vst [vmem:[#allocation88_spill] sm:$0xff] %v9265_v26  ;;  %v9273_v8 = vpop.f32.mrf.mxu0  ;;  %7642 = vmatpush3.msra.mxu0 %v2667_v15  ;;  %v1710_v61 = vmul.f32 0.015625, %v1541_v5  ;;  %v1837_v13 = vmul.f32 %v9276_v34, %v9276_v34 }
 0x194   : > { %13008 = vst [vmem:[#allocation87_spill] sm:$0xff] %v9263_v45  ;;  %13011 = vst [vmem:[#allocation90_spill] sm:$0xff] %v9273_v8  ;;  %v1644_v46 = vsel %vm1505_vm1, %v9263_v45, 0.0  ;;  %v9289_v45 = vadd.f32 %v8738_v18, %v980_v53 }
 0x195   : > { %1645 = vadd.xlane.f32.xlu0 %v1644_v46  ;;  %v884_v50 = vpop.f32.mrf.mxu0  ;;  %v9296_v15 = vsub.f32 %v8899_v20, %v1710_v61  ;;  %v1921_v53 = vsel %vm1505_vm1, %v1837_v13, 0.0 }
 0x196   : > { %v9282_v26 = vadd.f32 %v8738_v18, %v884_v50  ;;  %v9284_v54 = vpop.xlane.xlu1 %1684  ;;  %v1544_v8 = vpop.xlane.xlu0 %1543  ;;  %1919 = vadd.xlane.f32.xlu1 %v1918_v35  ;;  %13012 = vst [vmem:[#allocation91_spill] sm:$0xff] %v9289_v45  ;;  %v1695_v18 = vsel %vm1505_vm1, %v9289_v45, 0.0 }
 0x197   : > { %v1711_v6 = vmul.f32 0.015625, %v1544_v8 }
 0x198   : > { %v1647_v5 = vsel %vm1505_vm1, %v9282_v26, 0.0 }
 0x199   : > { %v9299_v46 = vsub.f32 %v8913_v52, %v1711_v6  ;;  %1693 = vadd.xlane.f32.xlu0 %v1692_v2  ;;  %v1838_v52 = vmul.f32 %v9296_v15, %v9296_v15 }
 0x19a   : > { %v9301_v50 = vpop.xlane.xlu0 %1687  ;;  %v1547_v35 = vpop.xlane.xlu1 %1546  ;;  %1648 = vadd.xlane.f32.xlu1 %v1647_v5 }
 0x19b   : > { %v1712_v8 = vmul.f32 0.015625, %v1547_v35  ;;  %v1839_v17 = vmul.f32 %v9299_v46, %v9299_v46  ;;  %v1924_v13 = vsel %vm1505_vm1, %v1838_v52, 0.0 }
 0x19d   : > { %v9309_v20 = vsub.f32 %v8927_v29, %v1712_v8  ;;  %1922 = vadd.xlane.f32.xlu0 %v1921_v53  ;;  %v1927_v5 = vsel %vm1505_vm1, %v1839_v17, 0.0 }
 0x19e   : > { %v9313_v61 = vpop.xlane.xlu1 %1690  ;;  %v1550_v2 = vpop.xlane.xlu0 %1549  ;;  %1696 = vadd.xlane.f32.xlu1 %v1695_v18 }
 0x19f   : > { %v1713_v6 = vmul.f32 0.015625, %v1550_v2  ;;  %v1840_v29 = vmul.f32 %v9309_v20, %v9309_v20 }
 0x1a1   : > { %v9317_v35 = vsub.f32 %v8942_v12, %v1713_v6  ;;  %1928 = vadd.xlane.f32.xlu0 %v1927_v5  ;;  %v1930_v12 = vsel %vm1505_vm1, %v1840_v29, 0.0 }
 0x1a2   : > { %v1553_v8 = vpop.xlane.xlu1 %1552  ;;  %1925 = vadd.xlane.f32.xlu1 %v1924_v13 }
 0x1a3   : > { %v1714_v53 = vmul.f32 0.015625, %v1553_v8  ;;  %v1841_v45 = vmul.f32 %v9317_v35, %v9317_v35 }
 0x1a5   : > { %v9325_v18 = vsub.f32 %v8951_v42, %v1714_v53  ;;  %v1933_v17 = vsel %vm1505_vm1, %v1841_v45, 0.0 }
 0x1a6   : > { %v1556_v2 = vpop.xlane.xlu0 %1555  ;;  %1934 = vadd.xlane.f32.xlu0 %v1933_v17  ;;  %1931 = vadd.xlane.f32.xlu1 %v1930_v12 }
 0x1a7   : > { %v1715_v52 = vmul.f32 0.015625, %v1556_v2  ;;  %v1842_v6 = vmul.f32 %v9325_v18, %v9325_v18 }
 0x1a9   : > { %v9332_v5 = vsub.f32 %v8958_v11, %v1715_v52  ;;  %v1936_v13 = vsel %vm1505_vm1, %v1842_v6, 0.0 }
 0x1aa   : > { %v1559_v8 = vpop.xlane.xlu1 %1558  ;;  %1937 = vadd.xlane.f32.xlu1 %v1936_v13 }
 0x1ab   : > { %v1716_v42 = vmul.f32 0.015625, %v1559_v8  ;;  %v1843_v45 = vmul.f32 %v9332_v5, %v9332_v5 }
 0x1ad   : > { %v9338_v29 = vsub.f32 %v8965_v36, %v1716_v42  ;;  %v1939_v53 = vsel %vm1505_vm1, %v1843_v45, 0.0 }
 0x1ae   : > { %v1562_v17 = vpop.xlane.xlu0 %1561  ;;  %1940 = vadd.xlane.f32.xlu0 %v1939_v53 }
 0x1af   : > { %v1717_v12 = vmul.f32 0.015625, %v1562_v17  ;;  %v1844_v11 = vmul.f32 %v9338_v29, %v9338_v29 }
 0x1b1   : > { %v9344_v2 = vsub.f32 %v8972_v60, %v1717_v12  ;;  %v1942_v52 = vsel %vm1505_vm1, %v1844_v11, 0.0 }
 0x1b2   : > { %v1565_v6 = vpop.xlane.xlu1 %1564  ;;  %1943 = vadd.xlane.f32.xlu1 %v1942_v52 }
 0x1b3   : > { %v1718_v13 = vmul.f32 0.015625, %v1565_v6  ;;  %v1845_v36 = vmul.f32 %v9344_v2, %v9344_v2 }
 0x1b5   : > { %v9350_v8 = vsub.f32 %v8982_v40, %v1718_v13  ;;  %v1945_v42 = vsel %vm1505_vm1, %v1845_v36, 0.0 }
 0x1b6   : > { %v1568_v45 = vpop.xlane.xlu0 %1567  ;;  %1946 = vadd.xlane.f32.xlu0 %v1945_v42 }
 0x1b7   : > { %v1719_v53 = vmul.f32 0.015625, %v1568_v45  ;;  %v1846_v60 = vmul.f32 %v9350_v8, %v9350_v8 }
 0x1b9   : > { %v9356_v17 = vsub.f32 %v8989_v24, %v1719_v53  ;;  %v1948_v12 = vsel %vm1505_vm1, %v1846_v60, 0.0 }
 0x1ba   : > { %v1571_v11 = vpop.xlane.xlu1 %1570  ;;  %1949 = vadd.xlane.f32.xlu1 %v1948_v12 }
 0x1bb   : > { %v1720_v52 = vmul.f32 0.015625, %v1571_v11  ;;  %v1847_v40 = vmul.f32 %v9356_v17, %v9356_v17 }
 0x1bd   : > { %v9362_v6 = vsub.f32 %v8996_v57, %v1720_v52  ;;  %v1951_v13 = vsel %vm1505_vm1, %v1847_v40, 0.0 }
 0x1be   : > { %v1574_v36 = vpop.xlane.xlu0 %1573  ;;  %1952 = vadd.xlane.f32.xlu0 %v1951_v13 }
 0x1bf   : > { %v1721_v42 = vmul.f32 0.015625, %v1574_v36  ;;  %v1848_v24 = vmul.f32 %v9362_v6, %v9362_v6 }
 0x1c1   : > { %v9368_v45 = vsub.f32 %v9003_v49, %v1721_v42  ;;  %v1954_v53 = vsel %vm1505_vm1, %v1848_v24, 0.0 }
 0x1c2   : > { %v1577_v60 = vpop.xlane.xlu1 %1576  ;;  %1955 = vadd.xlane.f32.xlu1 %v1954_v53 }
 0x1c3   : > { %v1722_v12 = vmul.f32 0.015625, %v1577_v60  ;;  %v1849_v57 = vmul.f32 %v9368_v45, %v9368_v45 }
 0x1c5   : > { %v9374_v11 = vsub.f32 %v9010_v19, %v1722_v12  ;;  %v1957_v52 = vsel %vm1505_vm1, %v1849_v57, 0.0 }
 0x1c6   : > { %v1580_v40 = vpop.xlane.xlu0 %1579  ;;  %1958 = vadd.xlane.f32.xlu0 %v1957_v52 }
 0x1c7   : > { %v1723_v13 = vmul.f32 0.015625, %v1580_v40  ;;  %v1850_v49 = vmul.f32 %v9374_v11, %v9374_v11 }
 0x1c9   : > { %v9380_v36 = vsub.f32 %v9017_v47, %v1723_v13  ;;  %v1960_v42 = vsel %vm1505_vm1, %v1850_v49, 0.0 }
 0x1ca   : > { %v1583_v24 = vpop.xlane.xlu1 %1582  ;;  %1961 = vadd.xlane.f32.xlu1 %v1960_v42 }
 0x1cb   : > { %v1724_v53 = vmul.f32 0.015625, %v1583_v24  ;;  %v1851_v19 = vmul.f32 %v9380_v36, %v9380_v36 }
 0x1cd   : > { %v9386_v60 = vsub.f32 %v9027_v9, %v1724_v53  ;;  %v1963_v12 = vsel %vm1505_vm1, %v1851_v19, 0.0 }
 0x1ce   : > { %v1586_v57 = vpop.xlane.xlu0 %1585  ;;  %1964 = vadd.xlane.f32.xlu0 %v1963_v12 }
 0x1cf   : > { %v1725_v52 = vmul.f32 0.015625, %v1586_v57  ;;  %v1852_v47 = vmul.f32 %v9386_v60, %v9386_v60 }
 0x1d1   : > { %v9392_v40 = vsub.f32 %v9034_v44, %v1725_v52  ;;  %v1966_v13 = vsel %vm1505_vm1, %v1852_v47, 0.0 }
 0x1d2   : > { %v1589_v49 = vpop.xlane.xlu1 %1588  ;;  %1967 = vadd.xlane.f32.xlu1 %v1966_v13 }
 0x1d3   : > { %v1726_v42 = vmul.f32 0.015625, %v1589_v49  ;;  %v1853_v9 = vmul.f32 %v9392_v40, %v9392_v40 }
 0x1d5   : > { %v9398_v24 = vsub.f32 %v9041_v14, %v1726_v42  ;;  %v1969_v53 = vsel %vm1505_vm1, %v1853_v9, 0.0 }
 0x1d6   : > { %v1592_v19 = vpop.xlane.xlu0 %1591  ;;  %1970 = vadd.xlane.f32.xlu0 %v1969_v53 }
 0x1d7   : > { %v1727_v12 = vmul.f32 0.015625, %v1592_v19  ;;  %v1854_v44 = vmul.f32 %v9398_v24, %v9398_v24 }
 0x1d9   : > { %v9404_v57 = vsub.f32 %v9048_v4, %v1727_v12  ;;  %v1972_v52 = vsel %vm1505_vm1, %v1854_v44, 0.0 }
 0x1da   : > { %v1595_v47 = vpop.xlane.xlu1 %1594  ;;  %1973 = vadd.xlane.f32.xlu1 %v1972_v52 }
 0x1db   : > { %v1728_v13 = vmul.f32 0.015625, %v1595_v47  ;;  %v1855_v14 = vmul.f32 %v9404_v57, %v9404_v57 }
 0x1dd   : > { %v9410_v49 = vsub.f32 %v9055_v1, %v1728_v13  ;;  %v1975_v42 = vsel %vm1505_vm1, %v1855_v14, 0.0 }
 0x1de   : > { %v1598_v9 = vpop.xlane.xlu0 %1597  ;;  %1976 = vadd.xlane.f32.xlu0 %v1975_v42 }
 0x1df   : > { %v1729_v53 = vmul.f32 0.015625, %v1598_v9  ;;  %v1856_v4 = vmul.f32 %v9410_v49, %v9410_v49 }
 0x1e1   : > { %v9416_v19 = vsub.f32 %v9062_v10, %v1729_v53  ;;  %v1978_v12 = vsel %vm1505_vm1, %v1856_v4, 0.0 }
 0x1e2   : > { %v1601_v44 = vpop.xlane.xlu1 %1600  ;;  %1979 = vadd.xlane.f32.xlu1 %v1978_v12 }
 0x1e3   : > { %v1730_v52 = vmul.f32 0.015625, %v1601_v44  ;;  %v1857_v1 = vmul.f32 %v9416_v19, %v9416_v19 }
 0x1e5   : > { %v9422_v47 = vsub.f32 %v9072_v30, %v1730_v52  ;;  %v1981_v13 = vsel %vm1505_vm1, %v1857_v1, 0.0 }
 0x1e6   : > { %v1604_v14 = vpop.xlane.xlu0 %1603  ;;  %1982 = vadd.xlane.f32.xlu0 %v1981_v13 }
 0x1e7   : > { %v1731_v42 = vmul.f32 0.015625, %v1604_v14  ;;  %v1858_v10 = vmul.f32 %v9422_v47, %v9422_v47 }
 0x1e9   : > { %v9428_v9 = vsub.f32 %v9079_v55, %v1731_v42  ;;  %v1984_v53 = vsel %vm1505_vm1, %v1858_v10, 0.0 }
 0x1ea   : > { %v1607_v4 = vpop.xlane.xlu1 %1606  ;;  %1985 = vadd.xlane.f32.xlu1 %v1984_v53 }
 0x1eb   : > { %v1732_v12 = vmul.f32 0.015625, %v1607_v4  ;;  %v1859_v30 = vmul.f32 %v9428_v9, %v9428_v9 }
 0x1ed   : > { %v9434_v44 = vsub.f32 %v9086_v25, %v1732_v12  ;;  %v1987_v52 = vsel %vm1505_vm1, %v1859_v30, 0.0 }
 0x1ee   : > { %v1610_v1 = vpop.xlane.xlu0 %1609  ;;  %1988 = vadd.xlane.f32.xlu0 %v1987_v52 }
 0x1ef   : > { %v1733_v13 = vmul.f32 0.015625, %v1610_v1  ;;  %v1860_v55 = vmul.f32 %v9434_v44, %v9434_v44 }
 0x1f1   : > { %v9440_v14 = vsub.f32 %v9093_v41, %v1733_v13  ;;  %v1990_v42 = vsel %vm1505_vm1, %v1860_v55, 0.0 }
 0x1f2   : > { %v1613_v10 = vpop.xlane.xlu1 %1612  ;;  %1991 = vadd.xlane.f32.xlu1 %v1990_v42 }
 0x1f3   : > { %13013 = vst [vmem:[#allocation92_spill] sm:$0xff] %v9440_v14  ;;  %v1734_v53 = vmul.f32 0.015625, %v1613_v10  ;;  %v1861_v25 = vmul.f32 %v9440_v14, %v9440_v14 }
 0x1f5   : > { %v9446_v4 = vsub.f32 %v9100_v58, %v1734_v53  ;;  %v1993_v12 = vsel %vm1505_vm1, %v1861_v25, 0.0 }
 0x1f6   : > { %v1616_v30 = vpop.xlane.xlu0 %1615  ;;  %1994 = vadd.xlane.f32.xlu0 %v1993_v12 }
 0x1f7   : > { %v1735_v52 = vmul.f32 0.015625, %v1616_v30  ;;  %v1862_v41 = vmul.f32 %v9446_v4, %v9446_v4 }
 0x1f9   : > { %v9452_v1 = vsub.f32 %v9110_v48, %v1735_v52  ;;  %v1996_v13 = vsel %vm1505_vm1, %v1862_v41, 0.0 }
 0x1fa   : > { %v1893_v55 = vpop.xlane.xlu0 %1892  ;;  %v1619_v42 = vpop.xlane.xlu1 %1618  ;;  %1997 = vadd.xlane.f32.xlu1 %v1996_v13 }
 0x1fb   : > { %13014 = vst [vmem:[#allocation93_spill] sm:$0xff] %v9452_v1  ;;  %v2083_v10 = vmul.f32 0.015625, %v1893_v55  ;;  %v1736_v14 = vmul.f32 0.015625, %v1619_v42  ;;  %v1863_v58 = vmul.f32 %v9452_v1, %v9452_v1 }
 0x1fd   : > { %v2147_v53 = vadd.f32 1e-05, %v2083_v10  ;;  %v9458_v25 = vsub.f32 %v9126_v56, %v1736_v14  ;;  %v1999_v12 = vsel %vm1505_vm1, %v1863_v58, 0.0 }
 0x1fe   : > { %v1622_v30 = vpop.xlane.xlu0 %1621  ;;  %2000 = vadd.xlane.f32.xlu0 %v1999_v12 }
 0x1ff   : > { %7984 = vrsqrt.f32 %v2147_v53  ;;  %v1737_v48 = vmul.f32 0.015625, %v1622_v30  ;;  %v1896_v52 = vpop.xlane.xlu1 %1895  ;;  %v1864_v41 = vmul.f32 %v9458_v25, %v9458_v25 }
 0x200   : > { %v2084_v13 = vmul.f32 0.015625, %v1896_v52 }
 0x201   : > { %v9464_v55 = vsub.f32 %v9140_v63, %v1737_v48  ;;  %v2002_v42 = vsel %vm1505_vm1, %v1864_v41, 0.0 }
 0x202   : > { %v2148_v10 = vadd.f32 1e-05, %v2084_v13  ;;  %v1899_v1 = vpop.xlane.xlu0 %1898  ;;  %2003 = vadd.xlane.f32.xlu1 %v2002_v42  ;;  %v1435_v42 = vld [vmem:[%s12830_s4 + $0x4] sm:$0x7] }
 0x203   : > { %13015 = vst [vmem:[#allocation94_spill] sm:$0xff] %v9464_v55  ;;  %v2085_v56 = vmul.f32 0.015625, %v1899_v1  ;;  %v1625_v14 = vpop.xlane.xlu1 %1624  ;;  %v1865_v58 = vmul.f32 %v9464_v55, %v9464_v55 }
 0x204   : > { %7986 = vrsqrt.f32 %v2148_v10  ;;  %v1738_v53 = vmul.f32 0.015625, %v1625_v14 }
 0x205   : > { %v2149_v12 = vadd.f32 1e-05, %v2085_v56  ;;  %v2005_v30 = vsel %vm1505_vm1, %v1865_v58, 0.0  ;;  %v1436_v58 = vld [vmem:[%s12830_s4 + $0x8] sm:$0x7] }
 0x206   : > { %v9471_v52 = vsub.f32 %v9157_v0, %v1738_v53  ;;  %v1628_v63 = vpop.xlane.xlu0 %1627  ;;  %2006 = vadd.xlane.f32.xlu0 %v2005_v30 }
 0x207   : > { %7988 = vrsqrt.f32 %v2149_v12  ;;  %v1739_v48 = vmul.f32 0.015625, %v1628_v63  ;;  %v1902_v41 = vpop.xlane.xlu1 %1901  ;;  %v9488_v63 = vrot.slane %v1435_v42, %v8731_v16 }
 0x208   : > { %13016 = vst [vmem:[#allocation95_spill] sm:$0xff] %v9471_v52  ;;  %v2086_v13 = vmul.f32 0.015625, %v1902_v41  ;;  %v1866_v1 = vmul.f32 %v9471_v52, %v9471_v52  ;;  %v9493_v52 = vrot.slane %v1436_v58, %v8731_v16  ;;  %v1748_v16 = vmul.f32 0.015625, %v9112_v7 }
 0x209   : > { %v9479_v10 = vsub.f32 %v9172_v59, %v1739_v48 }
 0x20a   : > { %v2150_v56 = vadd.f32 1e-05, %v2086_v13  ;;  %v1905_v14 = vpop.xlane.xlu0 %1904  ;;  %v2008_v0 = vsel %vm1505_vm1, %v1866_v1, 0.0 }
 0x20b   : > { %13017 = vst [vmem:[#allocation96_spill] sm:$0xff] %v9479_v10  ;;  %v2087_v53 = vmul.f32 0.015625, %v1905_v14  ;;  %v1631_v12 = vpop.xlane.xlu1 %1630  ;;  %2009 = vadd.xlane.f32.xlu1 %v2008_v0  ;;  %v1867_v30 = vmul.f32 %v9479_v10, %v9479_v10  ;;  %v1747_v14 = vmul.f32 0.015625, %v9114_v23 }
 0x20c   : > { %v7985_v41 = vpop.eup %7984  ;;  %7990 = vrsqrt.f32 %v2150_v56  ;;  %v1740_v59 = vmul.f32 0.015625, %v1631_v12 }
 0x20d   : > { %v2151_v48 = vadd.f32 1e-05, %v2087_v53  ;;  %v2011_v13 = vsel %vm1505_vm1, %v1867_v30, 0.0  ;;  %v2275_v1 = vmul.f32 %v7985_v41, %v9107_v32 }
 0x20e   : > { %v9497_v0 = vsub.f32 %v9187_v62, %v1740_v59  ;;  %v1634_v10 = vpop.xlane.xlu0 %1633  ;;  %2012 = vadd.xlane.f32.xlu0 %v2011_v13  ;;  %v9508_v62 = vsub.f32 %v8744_v22, %v1747_v14 }
 0x20f   : > { %7992 = vrsqrt.f32 %v2151_v48  ;;  %v1741_v42 = vmul.f32 0.015625, %v1634_v10  ;;  %v1908_v55 = vpop.xlane.xlu1 %1907  ;;  %v2343_v56 = vmul.f32 %v9488_v63, %v2275_v1  ;;  %v1749_v1 = vmul.f32 0.015625, %v9142_v31 }
 0x210   : > { %v2088_v53 = vmul.f32 0.015625, %v1908_v55  ;;  %v1868_v12 = vmul.f32 %v9497_v0, %v9497_v0  ;;  %13018 = vst [vmem:[#allocation97_spill] sm:$0xff] %v9508_v62  ;;  %v9524_v31 = vsub.f32 %v8753_v28, %v1748_v16  ;;  %v1875_v16 = vmul.f32 %v9508_v62, %v9508_v62 }
 0x211   : > { %v7987_v32 = vpop.eup %7986  ;;  %v9504_v58 = vsub.f32 %v9202_v39, %v1741_v42  ;;  %v2411_v23 = vadd.f32 %v9493_v52, %v2343_v56 }
 0x212   : > { %v2276_v10 = vmul.f32 %v7987_v32, %v9134_v27  ;;  %v2152_v30 = vadd.f32 1e-05, %v2088_v53  ;;  %v1911_v41 = vpop.xlane.xlu0 %1910  ;;  %v2014_v55 = vsel %vm1505_vm1, %v1868_v12, 0.0  ;;  %13019 = vst [vmem:[#allocation98_spill] sm:$0xff] %v9524_v31 }
 0x213   : > { %v2089_v59 = vmul.f32 0.015625, %v1911_v41  ;;  %v1637_v48 = vpop.xlane.xlu1 %1636  ;;  %2015 = vadd.xlane.f32.xlu1 %v2014_v55  ;;  %vm2475_vm2 = vcmp.ge.f32.partialorder %v2411_v23, 0.0  ;;  %v2539_v13 = vmul.f32 0.01, %v2411_v23  ;;  %v1869_v7 = vmul.f32 %v9504_v58, %v9504_v58 }
 0x214   : > { %v7989_v39 = vpop.eup %7988  ;;  %7994 = vrsqrt.f32 %v2152_v30  ;;  %v1742_v22 = vmul.f32 0.015625, %v1637_v48  ;;  %v2344_v14 = vmul.f32 %v9488_v63, %v2276_v10  ;;  %v9530_v48 = vsub.f32 %v8773_v38, %v1749_v1 }
 0x215   : > { %v2153_v27 = vadd.f32 1e-05, %v2089_v59  ;;  %v2603_v42 = vsel %vm2475_vm2, %v2411_v23, %v2539_v13  ;;  %v2017_v56 = vsel %vm1505_vm1, %v1869_v7, 0.0  ;;  %v2277_v53 = vmul.f32 %v7989_v39, %v9137_v51 }
 0x216   : > { %v9519_v12 = vsub.f32 %v9217_v3, %v1742_v22  ;;  %7643 = vmatprep.mubr.msk.f32.mxu0 %vm1505_vm1, %v2603_v42  ;;  %v1640_v32 = vpop.xlane.xlu0 %1639  ;;  %2018 = vadd.xlane.f32.xlu0 %v2017_v56  ;;  %v2412_v41 = vadd.f32 %v9493_v52, %v2344_v14  ;;  %13020 = vst [vmem:[#allocation99_spill] sm:$0xff] %v9530_v48 }
 0x217   : > { %7996 = vrsqrt.f32 %v2153_v27  ;;  %v1743_v10 = vmul.f32 0.015625, %v1640_v32  ;;  %v1914_v30 = vpop.xlane.xlu1 %1913  ;;  %v2345_v23 = vmul.f32 %v9488_v63, %v2277_v53  ;;  %v1750_v53 = vmul.f32 0.015625, %v9159_v21 }
 0x218   : > { %v2090_v55 = vmul.f32 0.015625, %v1914_v30  ;;  %vm2476_vm3 = vcmp.ge.f32.partialorder %v2412_v41, 0.0  ;;  %v2540_v51 = vmul.f32 0.01, %v2412_v41  ;;  %v1870_v3 = vmul.f32 %v9519_v12, %v9519_v12 }
 0x219   : > { %v7991_v59 = vpop.eup %7990  ;;  %v9533_v13 = vsub.f32 %v9232_v33, %v1743_v10  ;;  %v2413_v28 = vadd.f32 %v9493_v52, %v2345_v23  ;;  %v2035_v21 = vsel %vm1505_vm1, %v1875_v16, 0.0  ;;  %v13026_v16 = vld [vmem:[#allocation87_spill] sm:$0xff] }
 0x21a   : > { %v2154_v7 = vadd.f32 1e-05, %v2090_v55  ;;  %v1917_v39 = vpop.xlane.xlu0 %1916  ;;  %v2604_v22 = vsel %vm2476_vm3, %v2412_v41, %v2540_v51  ;;  %v2020_v14 = vsel %vm1505_vm1, %v1870_v3, 0.0  ;;  %v2278_v27 = vmul.f32 %v7991_v59, %v9153_v37  ;;  %v13021_v55 = vld [vmem:[#allocation83_spill] sm:$0xff] }
 0x21b   : > { %v2091_v42 = vmul.f32 0.015625, %v1917_v39  ;;  %7644 = vmatmul.mubr.msk.f32.vlgmr.msra.gmra.mxu0 %vm1505_vm1, %v2604_v22  ;;  %v1643_v38 = vpop.xlane.xlu1 %1642  ;;  %2021 = vadd.xlane.f32.xlu1 %v2020_v14  ;;  %vm2477_vm4 = vcmp.ge.f32.partialorder %v2413_v28, 0.0  ;;  %v2541_v33 = vmul.f32 0.01, %v2413_v28  ;;  %v1871_v1 = vmul.f32 %v9533_v13, %v9533_v13  ;;  %v13023_v39 = vld [vmem:[#allocation67_spill] sm:$0xff] }
 0x21c   : > { %v7993_v56 = vpop.eup %7992  ;;  %7998 = vrsqrt.f32 %v2154_v7  ;;  %v1744_v32 = vmul.f32 0.015625, %v1643_v38  ;;  %v2346_v41 = vmul.f32 %v9488_v63, %v2278_v27  ;;  %v1876_v7 = vmul.f32 %v9524_v31, %v9524_v31 }
 0x21d   : > { %v2155_v10 = vadd.f32 1e-05, %v2091_v42  ;;  %v2605_v30 = vsel %vm2477_vm4, %v2413_v28, %v2541_v33  ;;  %v2023_v37 = vsel %vm1505_vm1, %v1871_v1, 0.0  ;;  %v2279_v23 = vmul.f32 %v7993_v56, %v9167_v43  ;;  %v13024_v1 = vld [vmem:[#allocation9_spill] sm:$0xff] }
 0x21e   : > { %v9548_v51 = vsub.f32 %v13021_v55, %v1744_v32  ;;  %7646 = vmatprep.mubr.msk.f32.mxu0 %vm1505_vm1, %v2605_v30  ;;  %2024 = vadd.xlane.f32.xlu0 %v2023_v37  ;;  %v1646_v3 = vpop.xlane.xlu0 %1645  ;;  %v2414_v59 = vadd.f32 %v9493_v52, %v2346_v41  ;;  %v1751_v28 = vmul.f32 0.015625, %v13023_v39  ;;  %v9560_v56 = vsub.f32 %v13024_v1, %v1750_v53  ;;  %v13031_v1 = vld [vmem:[#allocation70_spill] sm:$0xff] }
 0x21f   : > { %8000 = vrsqrt.f32 %v2155_v10  ;;  %v1745_v22 = vmul.f32 0.015625, %v1646_v3  ;;  %v1920_v14 = vpop.xlane.xlu1 %1919  ;;  %v2347_v43 = vmul.f32 %v9488_v63, %v2279_v23  ;;  %v1877_v10 = vmul.f32 %v9530_v48, %v9530_v48  ;;  %v13028_v3 = vld [vmem:[#allocation69_spill] sm:$0xff] }
 0x220   : > { %13022 = vst [vmem:[#allocation83_spill] sm:$0xff] %v9548_v51  ;;  %v2092_v27 = vmul.f32 0.015625, %v1920_v14  ;;  %vm2478_vm5 = vcmp.ge.f32.partialorder %v2414_v59, 0.0  ;;  %v2542_v42 = vmul.f32 0.01, %v2414_v59  ;;  %v1872_v38 = vmul.f32 %v9548_v51, %v9548_v51  ;;  %13025 = vst [vmem:[#allocation67_spill] sm:$0xff] %v9560_v56 }
 0x221   : > { %v7995_v33 = vpop.eup %7994  ;;  %v9563_v32 = vsub.f32 %v13026_v16, %v1745_v22  ;;  %v2415_v41 = vadd.f32 %v9493_v52, %v2347_v43  ;;  %v13029_v14 = vld [vmem:[#allocation12_spill] sm:$0xff]  ;;  %v1752_v16 = vmul.f32 0.015625, %v13031_v1 }
 0x222   : > { %v2156_v30 = vadd.f32 1e-05, %v2092_v27  ;;  %v9568_v37 = vpop.xlane.xlu0 %1693  ;;  %v2606_v23 = vsel %vm2478_vm5, %v2414_v59, %v2542_v42  ;;  %v2026_v55 = vsel %vm1505_vm1, %v1872_v38, 0.0  ;;  %v2280_v39 = vmul.f32 %v7995_v33, %v13028_v3  ;;  %v13032_v38 = vld [vmem:[#allocation73_spill] sm:$0xff] }
 0x223   : > { %13027 = vst [vmem:[#allocation9_spill] sm:$0xff] %v9563_v32  ;;  %v9573_v31 = vsub.f32 %v13029_v14, %v1751_v28  ;;  %7647 = vmatmul.mubr.msk.f32.gmra.mxu0 %vm1505_vm1, %v2606_v23  ;;  %2027 = vadd.xlane.f32.xlu1 %v2026_v55  ;;  %v1649_v53 = vpop.xlane.xlu1 %1648  ;;  %vm2479_vm6 = vcmp.ge.f32.partialorder %v2415_v41, 0.0  ;;  %v2543_v22 = vmul.f32 0.01, %v2415_v41  ;;  %v1873_v43 = vmul.f32 %v9563_v32, %v9563_v32  ;;  %v13033_v23 = vld [vmem:[#allocation72_spill] sm:$0xff]  ;;  %v13040_v32 = vld [vmem:[#allocation75_spill] sm:$0xff] }
 0x224   : > { %v7997_v27 = vpop.eup %7996  ;;  %8002 = vrsqrt.f32 %v2156_v30  ;;  %v1746_v59 = vmul.f32 0.015625, %v1649_v53  ;;  %v2348_v42 = vmul.f32 %v9488_v63, %v2280_v39  ;;  %v1753_v33 = vmul.f32 0.015625, %v13032_v38 }
 0x225   : > { %13030 = vst [vmem:[#allocation87_spill] sm:$0xff] %v9573_v31  ;;  %v2607_v28 = vsel %vm2479_vm6, %v2415_v41, %v2543_v22  ;;  %v2029_v3 = vsel %vm1505_vm1, %v1873_v43, 0.0  ;;  %v2281_v55 = vmul.f32 %v7997_v27, %v13033_v23  ;;  %v2041_v30 = vsel %vm1505_vm1, %v1877_v10, 0.0  ;;  %v13035_v43 = vld [vmem:[#allocation15_spill] sm:$0xff] }
 0x226   : > { %v9584_v14 = vsub.f32 %v9282_v26, %v1746_v59  ;;  %7649 = vmatprep.mubr.msk.f32.mxu0 %vm1505_vm1, %v2607_v28  ;;  %2030 = vadd.xlane.f32.xlu0 %v2029_v3  ;;  %v1923_v48 = vpop.xlane.xlu0 %1922  ;;  %v2416_v1 = vadd.f32 %v9493_v52, %v2348_v42  ;;  %v2038_v39 = vsel %vm1505_vm1, %v1876_v7, 0.0  ;;  %v1879_v22 = vmul.f32 %v9573_v31, %v9573_v31  ;;  %v13038_v28 = vld [vmem:[#allocation76_spill] sm:$0xff]  ;;  %v13039_v31 = vld [vmem:[#allocation79_spill] sm:$0xff] }
 0x227   : > { %v2093_v53 = vmul.f32 0.015625, %v1923_v48  ;;  %v9590_v38 = vpop.xlane.xlu1 %1696  ;;  %v2349_v41 = vmul.f32 %v9488_v63, %v2281_v55  ;;  %v1878_v26 = vmul.f32 %v9560_v56, %v9560_v56  ;;  %v9598_v27 = vsub.f32 %v13035_v43, %v1752_v16  ;;  %v13036_v48 = vld [vmem:[#allocation18_spill] sm:$0xff] }
 0x228   : > { %13034 = vst [vmem:[#allocation69_spill] sm:$0xff] %v9584_v14  ;;  %vm2480_vm7 = vcmp.ge.f32.partialorder %v2416_v1, 0.0  ;;  %v2544_v59 = vmul.f32 0.01, %v2416_v1  ;;  %v1874_v10 = vmul.f32 %v9584_v14, %v9584_v14  ;;  %v9603_v42 = vsub.f32 %v13036_v48, %v1753_v33 }
 0x229   : > { %v7999_v7 = vpop.eup %7998  ;;  %v1754_v3 = vmul.f32 0.015625, %v13038_v28  ;;  %v2157_v23 = vadd.f32 1e-05, %v2093_v53  ;;  %v2417_v55 = vadd.f32 %v9493_v52, %v2349_v41  ;;  %v1755_v62 = vmul.f32 0.015625, %v13039_v31 }
 0x22a   : > { %13037 = vst [vmem:[#allocation12_spill] sm:$0xff] %v9603_v42  ;;  %2036 = vadd.xlane.f32.xlu0 %v2035_v21  ;;  %v1929_v56 = vpop.xlane.xlu0 %1928  ;;  %v2608_v16 = vsel %vm2480_vm7, %v2416_v1, %v2544_v59  ;;  %v2032_v43 = vsel %vm1505_vm1, %v1874_v10, 0.0  ;;  %v2282_v51 = vmul.f32 %v7999_v7, %v13040_v32  ;;  %v2047_v41 = vsel %vm1505_vm1, %v1879_v22, 0.0  ;;  %v13041_v1 = vld [vmem:[#allocation88_spill] sm:$0xff]  ;;  %v13042_v7 = vld [vmem:[#allocation78_spill] sm:$0xff]  ;;  %v13043_v22 = vld [vmem:[#allocation21_spill] sm:$0xff] }
 0x22b   : > { %8004 = vrsqrt.f32 %v2157_v23  ;;  %v2095_v14 = vmul.f32 0.015625, %v1929_v56  ;;  %7650 = vmatmul.mubr.msk.f32.gmra.mxu0 %vm1505_vm1, %v2608_v16  ;;  %2033 = vadd.xlane.f32.xlu1 %v2032_v43  ;;  %v1926_v33 = vpop.xlane.xlu1 %1925  ;;  %vm2481_vm8 = vcmp.ge.f32.partialorder %v2417_v55, 0.0  ;;  %v2545_v48 = vmul.f32 0.01, %v2417_v55 }
 0x22c   : > { %v8001_v53 = vpop.eup %8000  ;;  %v2094_v28 = vmul.f32 0.015625, %v1926_v33  ;;  %v2350_v31 = vmul.f32 %v9488_v63, %v2282_v51  ;;  %v2044_v21 = vsel %vm1505_vm1, %v1878_v26, 0.0  ;;  %v1757_v59 = vmul.f32 0.015625, %v13041_v1  ;;  %v13044_v33 = vld [vmem:[#allocation24_spill] sm:$0xff] }
 0x22d   : > { %v2159_v10 = vadd.f32 1e-05, %v2095_v14  ;;  %v2609_v32 = vsel %vm2481_vm8, %v2417_v55, %v2545_v48  ;;  %v2283_v56 = vmul.f32 %v8001_v53, %v13042_v7  ;;  %v1881_v43 = vmul.f32 %v9603_v42, %v9603_v42  ;;  %v13045_v1 = vld [vmem:[#allocation84_spill] sm:$0xff]  ;;  %v13046_v7 = vld [vmem:[#allocation30_spill] sm:$0xff] }
 0x22e   : > { %v2158_v23 = vadd.f32 1e-05, %v2094_v28  ;;  %7652 = vmatprep.mubr.msk.f32.mxu0 %vm1505_vm1, %v2609_v32  ;;  %2042 = vadd.xlane.f32.xlu0 %v2041_v30  ;;  %v2418_v16 = vadd.f32 %v9493_v52, %v2350_v31  ;;  %v1880_v51 = vmul.f32 %v9598_v27, %v9598_v27  ;;  %v9623_v26 = vsub.f32 %v13043_v22, %v1754_v3 }
 0x22f   : > { %v9626_v14 = vsub.f32 %v13044_v33, %v1755_v62  ;;  %8006 = vrsqrt.f32 %v2159_v10  ;;  %v1935_v55 = vpop.xlane.xlu0 %1934  ;;  %2039 = vadd.xlane.f32.xlu1 %v2038_v39  ;;  %v1932_v48 = vpop.xlane.xlu1 %1931  ;;  %v2351_v30 = vmul.f32 %v9488_v63, %v2283_v56  ;;  %v1756_v32 = vmul.f32 0.015625, %v13045_v1  ;;  %v13047_v33 = vld [vmem:[#allocation82_spill] sm:$0xff] }
 0x230   : > { %8008 = vrsqrt.f32 %v2158_v23  ;;  %v2097_v53 = vmul.f32 0.015625, %v1935_v55  ;;  %v2096_v28 = vmul.f32 0.015625, %v1932_v48  ;;  %vm2482_vm9 = vcmp.ge.f32.partialorder %v2418_v16, 0.0 }
 0x231   : > { %v8003_v31 = vpop.eup %8002  ;;  %v9631_v42 = vsub.f32 %v13046_v7, %v1757_v59  ;;  %v2546_v3 = vmul.f32 0.01, %v2418_v16  ;;  %v2419_v62 = vadd.f32 %v9493_v52, %v2351_v30  ;;  %v1758_v10 = vmul.f32 0.015625, %v9284_v54  ;;  %v13049_v7 = vld [vmem:[#allocation33_spill] sm:$0xff] }
 0x232   : > { %v2161_v22 = vadd.f32 1e-05, %v2097_v53  ;;  %v2160_v39 = vadd.f32 1e-05, %v2096_v28  ;;  %2048 = vadd.xlane.f32.xlu0 %v2047_v41  ;;  %v2284_v56 = vmul.f32 %v8003_v31, %v13047_v33  ;;  %v1759_v23 = vmul.f32 0.015625, %v9301_v50 }
 0x233   : > { %v2610_v55 = vsel %vm2482_vm9, %v2418_v16, %v2546_v3  ;;  %2045 = vadd.xlane.f32.xlu1 %v2044_v21  ;;  %v1938_v48 = vpop.xlane.xlu1 %1937  ;;  %vm2483_vm10 = vcmp.ge.f32.partialorder %v2419_v62, 0.0  ;;  %v2547_v1 = vmul.f32 0.01, %v2419_v62  ;;  %v2050_v30 = vsel %vm1505_vm1, %v1880_v51, 0.0  ;;  %v13048_v16 = vld [vmem:[#allocation27_spill] sm:$0xff] }
 0x234   : > { %8010 = vrsqrt.f32 %v2161_v22  ;;  %7653 = vmatmul.mubr.msk.f32.gmra.mxu0 %vm1505_vm1, %v2610_v55  ;;  %v2098_v59 = vmul.f32 0.015625, %v1938_v48  ;;  %v2352_v54 = vmul.f32 %v9488_v63, %v2284_v56  ;;  %v2053_v41 = vsel %vm1505_vm1, %v1881_v43, 0.0 }
 0x235   : > { %8012 = vrsqrt.f32 %v2160_v39  ;;  %v2611_v53 = vsel %vm2483_vm10, %v2419_v62, %v2547_v1  ;;  %v1883_v50 = vmul.f32 %v9626_v14, %v9626_v14  ;;  %v9644_v21 = vsub.f32 %v13048_v16, %v1756_v32  ;;  %v13050_v62 = vld [vmem:[#allocation36_spill] sm:$0xff] }
 0x236   : > { %v2162_v28 = vadd.f32 1e-05, %v2098_v59  ;;  %7655 = vmatprep.mubr.msk.f32.mxu0 %vm1505_vm1, %v2611_v53  ;;  %2054 = vadd.xlane.f32.xlu0 %v2053_v41  ;;  %v2420_v31 = vadd.f32 %v9493_v52, %v2352_v54  ;;  %v1882_v51 = vmul.f32 %v9623_v26, %v9623_v26  ;;  %v9651_v3 = vsub.f32 %v13049_v7, %v1758_v10  ;;  %v13052_v7 = vld [vmem:[#allocation89_spill] sm:$0xff] }
 0x237   : > { %v9654_v43 = vsub.f32 %v13050_v62, %v1759_v23  ;;  %v1941_v22 = vpop.xlane.xlu0 %1940  ;;  %2051 = vadd.xlane.f32.xlu1 %v2050_v30  ;;  %v1885_v32 = vmul.f32 %v9631_v42, %v9631_v42  ;;  %v1760_v55 = vmul.f32 0.015625, %v9313_v61  ;;  %v1761_v48 = vmul.f32 0.015625, %v9568_v37 }
 0x238   : > { %v8005_v39 = vpop.eup %8004  ;;  %8014 = vrsqrt.f32 %v2162_v28  ;;  %v2099_v33 = vmul.f32 0.015625, %v1941_v22  ;;  %vm2484_vm11 = vcmp.ge.f32.partialorder %v2420_v31, 0.0  ;;  %v2548_v56 = vmul.f32 0.01, %v2420_v31 }
 0x239   : > { %v2059_v10 = vsel %vm1505_vm1, %v1883_v50, 0.0  ;;  %v2285_v1 = vmul.f32 %v8005_v39, %v9276_v34  ;;  %v2056_v30 = vsel %vm1505_vm1, %v1882_v51, 0.0  ;;  %v1884_v54 = vmul.f32 %v9644_v21, %v9644_v21 }
 0x23a   : > { %v2163_v23 = vadd.f32 1e-05, %v2099_v33  ;;  %2060 = vadd.xlane.f32.xlu0 %v2059_v10  ;;  %v2612_v59 = vsel %vm2484_vm11, %v2420_v31, %v2548_v56  ;;  %v1886_v37 = vmul.f32 %v9651_v3, %v9651_v3  ;;  %v2065_v50 = vsel %vm1505_vm1, %v1885_v32, 0.0  ;;  %v13051_v31 = vld [vmem:[#allocation39_spill] sm:$0xff] }
 0x23b   : > { %7656 = vmatmul.mubr.msk.f32.gmra.mxu0 %vm1505_vm1, %v2612_v59  ;;  %2057 = vadd.xlane.f32.xlu1 %v2056_v30  ;;  %v1944_v53 = vpop.xlane.xlu1 %1943  ;;  %v2353_v61 = vmul.f32 %v9488_v63, %v2285_v1  ;;  %v1887_v16 = vmul.f32 %v9654_v43, %v9654_v43  ;;  %v9673_v51 = vsub.f32 %v13051_v31, %v1760_v55  ;;  %v1762_v33 = vmul.f32 0.015625, %v9590_v38 }
 0x23c   : > { %v8007_v41 = vpop.eup %8006  ;;  %8016 = vrsqrt.f32 %v2163_v23  ;;  %v2100_v34 = vmul.f32 0.015625, %v1944_v53  ;;  %v9676_v62 = vsub.f32 %v13052_v7, %v1761_v48  ;;  %v2062_v32 = vsel %vm1505_vm1, %v1884_v54, 0.0 }
 0x23d   : > { %v8009_v28 = vpop.eup %8008  ;;  %v2421_v22 = vadd.f32 %v9493_v52, %v2353_v61  ;;  %v2287_v39 = vmul.f32 %v8007_v41, %v9299_v46  ;;  %v2068_v23 = vsel %vm1505_vm1, %v1886_v37, 0.0  ;;  %v2071_v46 = vsel %vm1505_vm1, %v1887_v16, 0.0  ;;  %v13053_v37 = vld [vmem:[#allocation91_spill] sm:$0xff] }
 0x23e   : > { %v2164_v56 = vadd.f32 1e-05, %v2100_v34  ;;  %2066 = vadd.xlane.f32.xlu0 %v2065_v50  ;;  %v2286_v10 = vmul.f32 %v8009_v28, %v9296_v15  ;;  %v1889_v54 = vmul.f32 %v9676_v62, %v9676_v62  ;;  %v1888_v15 = vmul.f32 %v9673_v51, %v9673_v51 }
 0x23f   : > { %v1947_v1 = vpop.xlane.xlu0 %1946  ;;  %2063 = vadd.xlane.f32.xlu1 %v2062_v32  ;;  %vm2485_vm12 = vcmp.ge.f32.partialorder %v2421_v22, 0.0  ;;  %v2549_v55 = vmul.f32 0.01, %v2421_v22  ;;  %v2355_v48 = vmul.f32 %v9488_v63, %v2287_v39  ;;  %v9693_v34 = vsub.f32 %v13053_v37, %v1762_v33 }
 0x240   : > { %8018 = vrsqrt.f32 %v2164_v56  ;;  %v2101_v59 = vmul.f32 0.015625, %v1947_v1  ;;  %v2354_v38 = vmul.f32 %v9488_v63, %v2286_v10  ;;  %v2077_v32 = vsel %vm1505_vm1, %v1889_v54, 0.0 }
 0x241   : > { %v8011_v30 = vpop.eup %8010  ;;  %v2613_v53 = vsel %vm2485_vm12, %v2421_v22, %v2549_v55  ;;  %v2423_v61 = vadd.f32 %v9493_v52, %v2355_v48  ;;  %v2074_v10 = vsel %vm1505_vm1, %v1888_v15, 0.0  ;;  %v1890_v48 = vmul.f32 %v9693_v34, %v9693_v34 }
 0x242   : > { %v8013_v41 = vpop.eup %8012  ;;  %v2165_v50 = vadd.f32 1e-05, %v2101_v59  ;;  %2072 = vadd.xlane.f32.xlu0 %v2071_v46  ;;  %7658 = vmatprep.mubr.msk.f32.mxu0 %vm1505_vm1, %v2613_v53  ;;  %v2422_v16 = vadd.f32 %v9493_v52, %v2354_v38  ;;  %v2289_v28 = vmul.f32 %v8011_v30, %v9317_v35 }
 0x243   : > { %2069 = vadd.xlane.f32.xlu1 %v2068_v23  ;;  %v1950_v31 = vpop.xlane.xlu1 %1949  ;;  %vm2487_vm13 = vcmp.ge.f32.partialorder %v2423_v61, 0.0  ;;  %v2551_v7 = vmul.f32 0.01, %v2423_v61  ;;  %v2288_v22 = vmul.f32 %v8013_v41, %v9309_v20 }
 0x244   : > { %8020 = vrsqrt.f32 %v2165_v50  ;;  %v2102_v39 = vmul.f32 0.015625, %v1950_v31  ;;  %vm2486_vm14 = vcmp.ge.f32.partialorder %v2422_v16, 0.0  ;;  %v2550_v56 = vmul.f32 0.01, %v2422_v16 }
 0x245   : > { %v8015_v33 = vpop.eup %8014  ;;  %v2356_v1 = vmul.f32 %v9488_v63, %v2288_v22  ;;  %v2357_v55 = vmul.f32 %v9488_v63, %v2289_v28  ;;  %v2615_v46 = vsel %vm2487_vm13, %v2423_v61, %v2551_v7  ;;  %v2080_v50 = vsel %vm1505_vm1, %v1890_v48, 0.0 }
 0x246   : > { %v2166_v35 = vadd.f32 1e-05, %v2102_v39  ;;  %2078 = vadd.xlane.f32.xlu0 %v2077_v32  ;;  %v2614_v23 = vsel %vm2486_vm14, %v2422_v16, %v2550_v56  ;;  %v2290_v20 = vmul.f32 %v8015_v33, %v9325_v18 }
 0x247   : > { %v1953_v59 = vpop.xlane.xlu0 %1952  ;;  %2075 = vadd.xlane.f32.xlu1 %v2074_v10  ;;  %7659 = vmatmul.mubr.msk.f32.gmra.mxu0 %vm1505_vm1, %v2614_v23  ;;  %v2424_v38 = vadd.f32 %v9493_v52, %v2356_v1  ;;  %v2425_v30 = vadd.f32 %v9493_v52, %v2357_v55 }
 0x248   : > { %8022 = vrsqrt.f32 %v2166_v35  ;;  %v2103_v53 = vmul.f32 0.015625, %v1953_v59  ;;  %7661 = vmatprep.mubr.msk.f32.mxu0 %vm1505_vm1, %v2615_v46  ;;  %v2358_v54 = vmul.f32 %v9488_v63, %v2290_v20 }
 0x249   : > { %v8017_v15 = vpop.eup %8016  ;;  %vm2488_vm15 = vcmp.ge.f32.partialorder %v2424_v38, 0.0  ;;  %v2552_v41 = vmul.f32 0.01, %v2424_v38  ;;  %vm2489_vm2 = vcmp.ge.f32.partialorder %v2425_v30, 0.0  ;;  %v2553_v18 = vmul.f32 0.01, %v2425_v30 }
 0x24a   : > { %v2167_v37 = vadd.f32 1e-05, %v2103_v53  ;;  %v2426_v61 = vadd.f32 %v9493_v52, %v2358_v54  ;;  %v2291_v16 = vmul.f32 %v8017_v15, %v9332_v5 }
 0x24b   : > { %2081 = vadd.xlane.f32.xlu1 %v2080_v50  ;;  %v2616_v28 = vsel %vm2488_vm15, %v2424_v38, %v2552_v41  ;;  %v1956_v31 = vpop.xlane.xlu1 %1955  ;;  %v2617_v7 = vsel %vm2489_vm2, %v2425_v30, %v2553_v18 }
 0x24c   : > { %8024 = vrsqrt.f32 %v2167_v37  ;;  %7662 = vmatmul.mubr.msk.f32.gmra.mxu0 %vm1505_vm1, %v2616_v28  ;;  %v2104_v22 = vmul.f32 0.015625, %v1956_v31  ;;  %vm2490_vm3 = vcmp.ge.f32.partialorder %v2426_v61, 0.0  ;;  %v2554_v39 = vmul.f32 0.01, %v2426_v61 }
 0x24d   : > { %v8019_v56 = vpop.eup %8018  ;;  %7664 = vmatprep.mubr.msk.f32.mxu0 %vm1505_vm1, %v2617_v7  ;;  %v2359_v33 = vmul.f32 %v9488_v63, %v2291_v16 }
 0x24e   : > { %v2168_v32 = vadd.f32 1e-05, %v2104_v22  ;;  %v2618_v10 = vsel %vm2490_vm3, %v2426_v61, %v2554_v39  ;;  %v2292_v1 = vmul.f32 %v8019_v56, %v9338_v29 }
 0x24f   : > { %v1959_v5 = vpop.xlane.xlu0 %1958  ;;  %v2427_v55 = vadd.f32 %v9493_v52, %v2359_v33 }
 0x250   : > { %8026 = vrsqrt.f32 %v2168_v32  ;;  %v2105_v35 = vmul.f32 0.015625, %v1959_v5  ;;  %7665 = vmatmul.mubr.msk.f32.gmra.mxu0 %vm1505_vm1, %v2618_v10  ;;  %v2360_v23 = vmul.f32 %v9488_v63, %v2292_v1 }
 0x251   : > { %v8021_v48 = vpop.eup %8020  ;;  %vm2491_vm4 = vcmp.ge.f32.partialorder %v2427_v55, 0.0  ;;  %v2555_v20 = vmul.f32 0.01, %v2427_v55 }
 0x252   : > { %v2169_v59 = vadd.f32 1e-05, %v2105_v35  ;;  %v2428_v46 = vadd.f32 %v9493_v52, %v2360_v23  ;;  %v2293_v38 = vmul.f32 %v8021_v48, %v9344_v2  ;;  %v342_v48 = vld [vmem:[%s12827_s1 + $0xb8] sm:$0xff] }
 0x253   : > { %v2619_v30 = vsel %vm2491_vm4, %v2427_v55, %v2555_v20  ;;  %v1962_v53 = vpop.xlane.xlu1 %1961  ;;  %1005 = vmatprep.subr.mxu1 %v342_v48 }
 0x254   : > { %8028 = vrsqrt.f32 %v2169_v59  ;;  %7667 = vmatprep.mubr.msk.f32.mxu0 %vm1505_vm1, %v2619_v30  ;;  %v2106_v29 = vmul.f32 0.015625, %v1962_v53  ;;  %vm2492_vm5 = vcmp.ge.f32.partialorder %v2428_v46, 0.0  ;;  %v2556_v54 = vmul.f32 0.01, %v2428_v46 }
 0x255   : > { %v8023_v15 = vpop.eup %8022  ;;  %v2361_v41 = vmul.f32 %v9488_v63, %v2293_v38 }
 0x256   : > { %v2170_v18 = vadd.f32 1e-05, %v2106_v29  ;;  %v2620_v37 = vsel %vm2492_vm5, %v2428_v46, %v2556_v54  ;;  %v2294_v50 = vmul.f32 %v8023_v15, %v9350_v8 }
 0x257   : > { %v1965_v61 = vpop.xlane.xlu0 %1964  ;;  %7668 = vmatmul.mubr.msk.f32.gmra.mxu0 %vm1505_vm1, %v2620_v37  ;;  %v2429_v2 = vadd.f32 %v9493_v52, %v2361_v41 }
 0x258   : > { %8030 = vrsqrt.f32 %v2170_v18  ;;  %v2107_v16 = vmul.f32 0.015625, %v1965_v61  ;;  %v2362_v28 = vmul.f32 %v9488_v63, %v2294_v50 }
 0x259   : > { %v8025_v31 = vpop.eup %8024  ;;  %vm2493_vm6 = vcmp.ge.f32.partialorder %v2429_v2, 0.0  ;;  %v2557_v7 = vmul.f32 0.01, %v2429_v2 }
 0x25a   : > { %v2171_v22 = vadd.f32 1e-05, %v2107_v16  ;;  %v2430_v39 = vadd.f32 %v9493_v52, %v2362_v28  ;;  %v2295_v56 = vmul.f32 %v8025_v31, %v9356_v17  ;;  %v341_v17 = vld [vmem:[%s12827_s1 + $0xb0] sm:$0xff]  ;;  %v338_v31 = vld [vmem:[%s12827_s1 + $0x98] sm:$0xff] }
 0x25b   : > { %v2621_v33 = vsel %vm2493_vm6, %v2429_v2, %v2557_v7  ;;  %v1968_v32 = vpop.xlane.xlu1 %1967  ;;  %1006 = vmatpush1.msra.mxu1 %v341_v17 }
 0x25c   : > { %8032 = vrsqrt.f32 %v2171_v22  ;;  %7670 = vmatprep.mubr.msk.f32.mxu0 %vm1505_vm1, %v2621_v33  ;;  %v2108_v8 = vmul.f32 0.015625, %v1968_v32  ;;  %vm2494_vm7 = vcmp.ge.f32.partialorder %v2430_v39, 0.0  ;;  %v2558_v10 = vmul.f32 0.01, %v2430_v39  ;;  %1007 = vmatprep.subr.mxu1 %v338_v31 }
 0x25d   : > { %v8027_v1 = vpop.eup %8026  ;;  %v2363_v5 = vmul.f32 %v9488_v63, %v2295_v56 }
 0x25e   : > { %v2172_v55 = vadd.f32 1e-05, %v2108_v8  ;;  %v2622_v35 = vsel %vm2494_vm7, %v2430_v39, %v2558_v10  ;;  %v2296_v23 = vmul.f32 %v8027_v1, %v9362_v6 }
 0x25f   : > { %v1971_v20 = vpop.xlane.xlu0 %1970  ;;  %7671 = vmatmul.mubr.msk.f32.gmra.mxu0 %vm1505_vm1, %v2622_v35  ;;  %v2431_v59 = vadd.f32 %v9493_v52, %v2363_v5 }
 0x260   : > { %8034 = vrsqrt.f32 %v2172_v55  ;;  %v2109_v46 = vmul.f32 0.015625, %v1971_v20  ;;  %v2364_v38 = vmul.f32 %v9488_v63, %v2296_v23 }
 0x261   : > { %v8029_v6 = vpop.eup %8028  ;;  %vm2495_vm8 = vcmp.ge.f32.partialorder %v2431_v59, 0.0  ;;  %v2559_v30 = vmul.f32 0.01, %v2431_v59 }
 0x262   : > { %v2173_v53 = vadd.f32 1e-05, %v2109_v46  ;;  %v2432_v29 = vadd.f32 %v9493_v52, %v2364_v38  ;;  %v2297_v54 = vmul.f32 %v8029_v6, %v9368_v45 }
 0x263   : > { %v2623_v15 = vsel %vm2495_vm8, %v2431_v59, %v2559_v30  ;;  %v1974_v41 = vpop.xlane.xlu1 %1973 }
 0x264   : > { %8036 = vrsqrt.f32 %v2173_v53  ;;  %7673 = vmatprep.mubr.msk.f32.mxu0 %vm1505_vm1, %v2623_v15  ;;  %v2110_v18 = vmul.f32 0.015625, %v1974_v41  ;;  %vm2496_vm9 = vcmp.ge.f32.partialorder %v2432_v29, 0.0  ;;  %v2560_v37 = vmul.f32 0.01, %v2432_v29 }
 0x265   : > { %v8031_v50 = vpop.eup %8030  ;;  %v2365_v61 = vmul.f32 %v9488_v63, %v2297_v54 }
 0x266   : > { %v2174_v2 = vadd.f32 1e-05, %v2110_v18  ;;  %v2624_v16 = vsel %vm2496_vm9, %v2432_v29, %v2560_v37  ;;  %v2298_v28 = vmul.f32 %v8031_v50, %v9374_v11  ;;  %v337_v11 = vld [vmem:[%s12827_s1 + $0x90] sm:$0xff]  ;;  %v334_v29 = vld [vmem:[%s12827_s1 + $0x78] sm:$0xff] }
 0x267   : > { %v1977_v45 = vpop.xlane.xlu0 %1976  ;;  %7674 = vmatmul.mubr.msk.f32.gmra.mxu0 %vm1505_vm1, %v2624_v16  ;;  %v2433_v7 = vadd.f32 %v9493_v52, %v2365_v61  ;;  %1008 = vmatpush1.msra.mxu1 %v337_v11 }
 0x268   : > { %8038 = vrsqrt.f32 %v2174_v2  ;;  %v2111_v22 = vmul.f32 0.015625, %v1977_v45  ;;  %v2366_v39 = vmul.f32 %v9488_v63, %v2298_v28  ;;  %1009 = vmatprep.subr.mxu1 %v334_v29 }
 0x269   : > { %v8033_v56 = vpop.eup %8032  ;;  %vm2497_vm10 = vcmp.ge.f32.partialorder %v2433_v7, 0.0  ;;  %v2561_v33 = vmul.f32 0.01, %v2433_v7 }
 0x26a   : > { %v2175_v32 = vadd.f32 1e-05, %v2111_v22  ;;  %v2434_v8 = vadd.f32 %v9493_v52, %v2366_v39  ;;  %v2299_v10 = vmul.f32 %v8033_v56, %v9380_v36 }
 0x26b   : > { %v2625_v1 = vsel %vm2497_vm10, %v2433_v7, %v2561_v33  ;;  %v1980_v5 = vpop.xlane.xlu1 %1979  ;;  %v333_v7 = vld [vmem:[%s12827_s1 + $0x70] sm:$0xff] }
 0x26c   : > { %8040 = vrsqrt.f32 %v2175_v32  ;;  %7676 = vmatprep.mubr.msk.f32.mxu0 %vm1505_vm1, %v2625_v1  ;;  %v2112_v55 = vmul.f32 0.015625, %v1980_v5  ;;  %vm2498_vm11 = vcmp.ge.f32.partialorder %v2434_v8, 0.0  ;;  %v2562_v35 = vmul.f32 0.01, %v2434_v8  ;;  %1010 = vmatpush1.msra.mxu1 %v333_v7 }
 0x26d   : > { %v8035_v23 = vpop.eup %8034  ;;  %v2367_v48 = vmul.f32 %v9488_v63, %v2299_v10 }
 0x26e   : > { %v2176_v17 = vadd.f32 1e-05, %v2112_v55  ;;  %v2626_v20 = vsel %vm2498_vm11, %v2434_v8, %v2562_v35  ;;  %v2300_v59 = vmul.f32 %v8035_v23, %v9386_v60 }
 0x26f   : > { %v1983_v46 = vpop.xlane.xlu0 %1982  ;;  %7677 = vmatmul.mubr.msk.f32.gmra.mxu0 %vm1505_vm1, %v2626_v20  ;;  %v2435_v36 = vadd.f32 %v9493_v52, %v2367_v48  ;;  %v330_v20 = vld [vmem:[%s12827_s1 + $0x58] sm:$0xff] }
 0x270   : > { %8042 = vrsqrt.f32 %v2176_v17  ;;  %v2113_v38 = vmul.f32 0.015625, %v1983_v46  ;;  %v2368_v6 = vmul.f32 %v9488_v63, %v2300_v59  ;;  %1011 = vmatprep.subr.mxu1 %v330_v20 }
 0x271   : > { %v8037_v30 = vpop.eup %8036  ;;  %vm2499_vm12 = vcmp.ge.f32.partialorder %v2435_v36, 0.0  ;;  %v2563_v53 = vmul.f32 0.01, %v2435_v36 }
 0x272   : > { %v2177_v54 = vadd.f32 1e-05, %v2113_v38  ;;  %v2436_v15 = vadd.f32 %v9493_v52, %v2368_v6  ;;  %v2301_v60 = vmul.f32 %v8037_v30, %v9392_v40 }
 0x273   : > { %v2627_v41 = vsel %vm2499_vm12, %v2435_v36, %v2563_v53  ;;  %v1986_v18 = vpop.xlane.xlu1 %1985 }
 0x274   : > { %8044 = vrsqrt.f32 %v2177_v54  ;;  %7679 = vmatprep.mubr.msk.f32.mxu0 %vm1505_vm1, %v2627_v41  ;;  %v2114_v37 = vmul.f32 0.015625, %v1986_v18  ;;  %vm2500_vm13 = vcmp.ge.f32.partialorder %v2436_v15, 0.0  ;;  %v2564_v50 = vmul.f32 0.01, %v2436_v15 }
 0x275   : > { %v8039_v61 = vpop.eup %8038  ;;  %v2369_v2 = vmul.f32 %v9488_v63, %v2301_v60 }
 0x276   : > { %v2178_v16 = vadd.f32 1e-05, %v2114_v37  ;;  %v2628_v28 = vsel %vm2500_vm13, %v2436_v15, %v2564_v50  ;;  %v2302_v31 = vmul.f32 %v8039_v61, %v9398_v24 }
 0x277   : > { %v1989_v45 = vpop.xlane.xlu0 %1988  ;;  %7680 = vmatmul.mubr.msk.f32.gmra.mxu0 %vm1505_vm1, %v2628_v28  ;;  %v2437_v40 = vadd.f32 %v9493_v52, %v2369_v2 }
 0x278   : > { %8046 = vrsqrt.f32 %v2178_v16  ;;  %v2115_v22 = vmul.f32 0.015625, %v1989_v45  ;;  %v2370_v39 = vmul.f32 %v9488_v63, %v2302_v31 }
 0x279   : > { %v8041_v56 = vpop.eup %8040  ;;  %vm2501_vm14 = vcmp.ge.f32.partialorder %v2437_v40, 0.0  ;;  %v2565_v33 = vmul.f32 0.01, %v2437_v40 }
 0x27a   : > { %v2179_v11 = vadd.f32 1e-05, %v2115_v22  ;;  %v2438_v24 = vadd.f32 %v9493_v52, %v2370_v39  ;;  %v2303_v32 = vmul.f32 %v8041_v56, %v9404_v57  ;;  %v329_v57 = vld [vmem:[%s12827_s1 + $0x50] sm:$0xff] }
 0x27b   : > { %v2629_v8 = vsel %vm2501_vm14, %v2437_v40, %v2565_v33  ;;  %v1992_v10 = vpop.xlane.xlu1 %1991  ;;  %1012 = vmatpush1.msra.mxu1 %v329_v57  ;;  %v325_v56 = vld [vmem:[%s12827_s1 + $0x30] sm:$0xff] }
 0x27c   : > { %8048 = vrsqrt.f32 %v2179_v11  ;;  %7682 = vmatprep.mubr.msk.f32.mxu0 %vm1505_vm1, %v2629_v8  ;;  %v2116_v1 = vmul.f32 0.015625, %v1992_v10  ;;  %vm2502_vm15 = vcmp.ge.f32.partialorder %v2438_v24, 0.0  ;;  %v2566_v5 = vmul.f32 0.01, %v2438_v24 }
 0x27d   : > { %v8043_v55 = vpop.eup %8042  ;;  %v2371_v35 = vmul.f32 %v9488_v63, %v2303_v32 }
 0x27e   : > { %v2180_v23 = vadd.f32 1e-05, %v2116_v1  ;;  %v2630_v48 = vsel %vm2502_vm15, %v2438_v24, %v2566_v5  ;;  %v2304_v17 = vmul.f32 %v8043_v55, %v9410_v49 }
 0x27f   : > { %v1995_v59 = vpop.xlane.xlu0 %1994  ;;  %7683 = vmatmul.mubr.msk.f32.gmra.mxu0 %vm1505_vm1, %v2630_v48  ;;  %v2439_v46 = vadd.f32 %v9493_v52, %v2371_v35 }
 0x280   : > { %8050 = vrsqrt.f32 %v2180_v23  ;;  %v2117_v36 = vmul.f32 0.015625, %v1995_v59  ;;  %v2372_v38 = vmul.f32 %v9488_v63, %v2304_v17 }
 0x281   : > { %v8045_v49 = vpop.eup %8044  ;;  %vm2503_vm2 = vcmp.ge.f32.partialorder %v2439_v46, 0.0  ;;  %v2567_v6 = vmul.f32 0.01, %v2439_v46 }
 0x282   : > { %v2181_v30 = vadd.f32 1e-05, %v2117_v36  ;;  %v2440_v53 = vadd.f32 %v9493_v52, %v2372_v38  ;;  %v2305_v29 = vmul.f32 %v8045_v49, %v9416_v19 }
 0x283   : > { %v2631_v54 = vsel %vm2503_vm2, %v2439_v46, %v2567_v6  ;;  %v1998_v15 = vpop.xlane.xlu1 %1997  ;;  %v13054_v46 = vld [vmem:[#allocation92_spill] sm:$0xff] }
 0x284   : > { %8052 = vrsqrt.f32 %v2181_v30  ;;  %7685 = vmatprep.mubr.msk.f32.mxu0 %vm1505_vm1, %v2631_v54  ;;  %v2118_v60 = vmul.f32 0.015625, %v1998_v15  ;;  %vm2504_vm3 = vcmp.ge.f32.partialorder %v2440_v53, 0.0  ;;  %v2568_v41 = vmul.f32 0.01, %v2440_v53 }
 0x285   : > { %v8047_v18 = vpop.eup %8046  ;;  %v2373_v37 = vmul.f32 %v9488_v63, %v2305_v29 }
 0x286   : > { %v2182_v50 = vadd.f32 1e-05, %v2118_v60  ;;  %v2632_v61 = vsel %vm2504_vm3, %v2440_v53, %v2568_v41  ;;  %v2306_v2 = vmul.f32 %v8047_v18, %v9422_v47  ;;  %v326_v47 = vld [vmem:[%s12827_s1 + $0x38] sm:$0xff]  ;;  %v321_v53 = vld [vmem:[%s12827_s1 + $0x10] sm:$0xff]  ;;  %v8368_v18 = vld [vmem:[%s8531_s26] sm:$0xff] }
 0x287   : > { %v2001_v16 = vpop.xlane.xlu0 %2000  ;;  %7686 = vmatmul.mubr.msk.f32.gmra.mxu0 %vm1505_vm1, %v2632_v61  ;;  %v2441_v19 = vadd.f32 %v9493_v52, %v2373_v37  ;;  %1013 = vmatprep.subr.mxu1 %v326_v47  ;;  %v13055_v61 = vmov 0.0  }
 0x288   : > { %8054 = vrsqrt.f32 %v2182_v50  ;;  %v2119_v28 = vmul.f32 0.015625, %v2001_v16  ;;  %v2374_v31 = vmul.f32 %v9488_v63, %v2306_v2  ;;  %1014 = vmatpush1.msra.mxu1 %v325_v56 }
 0x289   : > { %v8049_v45 = vpop.eup %8048  ;;  %vm2505_vm4 = vcmp.ge.f32.partialorder %v2441_v19, 0.0  ;;  %v2569_v40 = vmul.f32 0.01, %v2441_v19 }
 0x28a   : > { %v2183_v7 = vadd.f32 1e-05, %v2119_v28  ;;  %v2442_v22 = vadd.f32 %v9493_v52, %v2374_v31  ;;  %v2307_v39 = vmul.f32 %v8049_v45, %v9428_v9 }
 0x28b   : > { %v2633_v33 = vsel %vm2505_vm4, %v2441_v19, %v2569_v40  ;;  %v2004_v11 = vpop.xlane.xlu1 %2003  ;;  %v13056_v40 = vld [vmem:[#allocation93_spill] sm:$0xff] }
 0x28c   : > { %8056 = vrsqrt.f32 %v2183_v7  ;;  %7688 = vmatprep.mubr.msk.f32.mxu0 %vm1505_vm1, %v2633_v33  ;;  %v2120_v24 = vmul.f32 0.015625, %v2004_v11  ;;  %vm2506_vm5 = vcmp.ge.f32.partialorder %v2442_v22, 0.0  ;;  %v2570_v32 = vmul.f32 0.01, %v2442_v22  ;;  %v7279_v33 = vld [vmem:[%s12828_s2 + $0x78] sm:$0xff] }
 0x28d   : > { %v8051_v8 = vpop.eup %8050  ;;  %v2375_v9 = vmul.f32 %v9488_v63, %v2307_v39 }
 0x28e   : > { %v2184_v10 = vadd.f32 1e-05, %v2120_v24  ;;  %v2634_v1 = vsel %vm2506_vm5, %v2442_v22, %v2570_v32  ;;  %v2308_v5 = vmul.f32 %v8051_v8, %v9434_v44  ;;  %v322_v44 = vld [vmem:[%s12827_s1 + $0x18] sm:$0xff]  ;;  %v8369_v22 = vld [vmem:[%s8531_s26 + $0x8] sm:$0xff] }
 0x28f   : > { %v2007_v55 = vpop.xlane.xlu0 %2006  ;;  %7689 = vmatmul.mubr.msk.f32.gmra.mxu0 %vm1505_vm1, %v2634_v1  ;;  %v2443_v35 = vadd.f32 %v9493_v52, %v2375_v9  ;;  %1015 = vmatprep.subr.mxu1 %v322_v44 }
 0x290   : > { %8058 = vrsqrt.f32 %v2184_v10  ;;  %v2121_v23 = vmul.f32 0.015625, %v2007_v55  ;;  %v2376_v48 = vmul.f32 %v9488_v63, %v2308_v5  ;;  %1016 = vmatpush1.msra.mxu1 %v321_v53  ;;  %v8370_v5 = vld [vmem:[%s8531_s26 + $0x10] sm:$0xff] }
 0x291   : > { %v8053_v17 = vpop.eup %8052  ;;  %vm2507_vm6 = vcmp.ge.f32.partialorder %v2443_v35, 0.0  ;;  %v2571_v20 = vmul.f32 0.01, %v2443_v35  ;;  %7144 = vmatmul.mubr.msk.f32.vlgmr.msra.gmra.mxu1 %vm343_vm0, %v8368_v18  ;;  %7739 = vmatprep.subr.mxu1 %v7279_v33 }
 0x292   : > { %v2185_v57 = vadd.f32 1e-05, %v2121_v23  ;;  %v2444_v59 = vadd.f32 %v9493_v52, %v2376_v48  ;;  %v2309_v36 = vmul.f32 %v8053_v17, %v13054_v46  ;;  %1055 = vmatprep.mubr.f32.mxu1 %v13055_v61  ;;  %7740 = vmatpush3.msra.mxu1 %v7279_v33  ;;  %v8371_v46 = vld [vmem:[%s8531_s26 + $0x18] sm:$0xff] }
 0x293   : > { %v2635_v38 = vsel %vm2507_vm6, %v2443_v35, %v2571_v20 }
 0x294   : > { %8060 = vrsqrt.f32 %v2185_v57  ;;  %7691 = vmatprep.mubr.msk.f32.mxu0 %vm1505_vm1, %v2635_v38  ;;  %v2010_v49 = vpop.xlane.xlu1 %2009  ;;  %vm2508_vm7 = vcmp.ge.f32.partialorder %v2444_v59, 0.0  ;;  %v2572_v6 = vmul.f32 0.01, %v2444_v59  ;;  %v2377_v30 = vmul.f32 %v9488_v63, %v2309_v36  ;;  %v13057_v57 = vld [vmem:[#allocation94_spill] sm:$0xff] }
 0x295   : > { %v8055_v29 = vpop.eup %8054  ;;  %v2122_v54 = vmul.f32 0.015625, %v2010_v49  ;;  %7145 = vmatmul.mubr.msk.f32.gmra.mxu1 %vm343_vm0, %v8369_v22 }
 0x296   : > { %v2636_v15 = vsel %vm2508_vm7, %v2444_v59, %v2572_v6  ;;  %v2445_v60 = vadd.f32 %v9493_v52, %v2377_v30  ;;  %v2310_v41 = vmul.f32 %v8055_v29, %v9446_v4  ;;  %1061 = vmatprep.mubr.f32.mxu1 %v13055_v61 }
 0x297   : > { %v2186_v37 = vadd.f32 1e-05, %v2122_v54  ;;  %v2013_v50 = vpop.xlane.xlu0 %2012  ;;  %7692 = vmatmul.mubr.msk.f32.gmra.mxu0 %vm1505_vm1, %v2636_v15  ;;  %v13058_v15 = vld [vmem:[#allocation95_spill] sm:$0xff] }
 0x298   : > { %v2123_v2 = vmul.f32 0.015625, %v2013_v50  ;;  %vm2509_vm8 = vcmp.ge.f32.partialorder %v2445_v60, 0.0  ;;  %v2573_v16 = vmul.f32 0.01, %v2445_v60  ;;  %v2378_v19 = vmul.f32 %v9488_v63, %v2310_v41  ;;  %v8372_v41 = vld [vmem:[%s8531_s26 + $0x20] sm:$0xff] }
 0x299   : > { %v8057_v28 = vpop.eup %8056  ;;  %8062 = vrsqrt.f32 %v2186_v37  ;;  %7146 = vmatmul.mubr.msk.f32.gmra.mxu1 %vm343_vm0, %v8370_v5 }
 0x29a   : > { %v2187_v31 = vadd.f32 1e-05, %v2123_v2  ;;  %v2637_v45 = vsel %vm2509_vm8, %v2445_v60, %v2573_v16  ;;  %v2446_v4 = vadd.f32 %v9493_v52, %v2378_v19  ;;  %v2311_v7 = vmul.f32 %v8057_v28, %v13056_v40  ;;  %1067 = vmatprep.mubr.f32.mxu1 %v13055_v61  ;;  %v13059_v28 = vld [vmem:[#allocation96_spill] sm:$0xff] }
 0x29b   : > { %7694 = vmatprep.mubr.msk.f32.mxu0 %vm1505_vm1, %v2637_v45 }
 0x29c   : > { %8064 = vrsqrt.f32 %v2187_v31  ;;  %v2016_v39 = vpop.xlane.xlu1 %2015  ;;  %vm2510_vm9 = vcmp.ge.f32.partialorder %v2446_v4, 0.0  ;;  %v2574_v47 = vmul.f32 0.01, %v2446_v4  ;;  %v2379_v56 = vmul.f32 %v9488_v63, %v2311_v7 }
 0x29d   : > { %v8059_v11 = vpop.eup %8058  ;;  %v2124_v24 = vmul.f32 0.015625, %v2016_v39  ;;  %7147 = vmatmul.mubr.msk.f32.gmra.mxu1 %vm343_vm0, %v8371_v46 }
 0x29e   : > { %v2638_v32 = vsel %vm2510_vm9, %v2446_v4, %v2574_v47  ;;  %v2447_v8 = vadd.f32 %v9493_v52, %v2379_v56  ;;  %v2312_v9 = vmul.f32 %v8059_v11, %v9458_v25  ;;  %1073 = vmatprep.mubr.f32.mxu1 %v13055_v61  ;;  %v8373_v4 = vld [vmem:[%s8531_s26 + $0x28] sm:$0xff] }
 0x29f   : > { %v2188_v10 = vadd.f32 1e-05, %v2124_v24  ;;  %v2019_v1 = vpop.xlane.xlu0 %2018  ;;  %7695 = vmatmul.mubr.msk.f32.gmra.mxu0 %vm1505_vm1, %v2638_v32 }
 0x2a0   : > { %v2125_v55 = vmul.f32 0.015625, %v2019_v1  ;;  %vm2511_vm10 = vcmp.ge.f32.partialorder %v2447_v8, 0.0  ;;  %v2575_v35 = vmul.f32 0.01, %v2447_v8  ;;  %v2380_v23 = vmul.f32 %v9488_v63, %v2312_v9 }
 0x2a1   : > { %v8061_v48 = vpop.eup %8060  ;;  %8066 = vrsqrt.f32 %v2188_v10  ;;  %7148 = vmatmul.mubr.msk.f32.gmra.mxu1 %vm343_vm0, %v8372_v41 }
 0x2a2   : > { %v2189_v17 = vadd.f32 1e-05, %v2125_v55  ;;  %v2639_v25 = vsel %vm2511_vm10, %v2447_v8, %v2575_v35  ;;  %v2448_v20 = vadd.f32 %v9493_v52, %v2380_v23  ;;  %v2313_v59 = vmul.f32 %v8061_v48, %v13057_v57  ;;  %1079 = vmatprep.mubr.f32.mxu1 %v13055_v61  ;;  %v8374_v8 = vld [vmem:[%s8531_s26 + $0x30] sm:$0xff] }
 0x2a3   : > { %7697 = vmatprep.mubr.msk.f32.mxu0 %vm1505_vm1, %v2639_v25 }
 0x2a4   : > { %8068 = vrsqrt.f32 %v2189_v17  ;;  %v2022_v36 = vpop.xlane.xlu1 %2021  ;;  %vm2512_vm11 = vcmp.ge.f32.partialorder %v2448_v20, 0.0  ;;  %v2576_v38 = vmul.f32 0.01, %v2448_v20  ;;  %v2381_v44 = vmul.f32 %v9488_v63, %v2313_v59  ;;  %v8375_v17 = vld [vmem:[%s8531_s26 + $0x38] sm:$0xff] }
 0x2a5   : > { %v2126_v49 = vmul.f32 0.015625, %v2022_v36  ;;  %7149 = vmatmul.mubr.msk.f32.gmra.mxu1 %vm343_vm0, %v8373_v4 }
 0x2a6   : > { %v8063_v6 = vpop.eup %8062  ;;  %v2640_v30 = vsel %vm2512_vm11, %v2448_v20, %v2576_v38  ;;  %v2449_v53 = vadd.f32 %v9493_v52, %v2381_v44  ;;  %1085 = vmatprep.mubr.f32.mxu1 %v13055_v61 }
 0x2a7   : > { %v2190_v29 = vadd.f32 1e-05, %v2126_v49  ;;  %v2025_v54 = vpop.xlane.xlu0 %2024  ;;  %7698 = vmatmul.mubr.msk.f32.gmra.mxu0 %vm1505_vm1, %v2640_v30  ;;  %v2314_v60 = vmul.f32 %v8063_v6, %v13058_v15 }
 0x2a8   : > { %v2127_v18 = vmul.f32 0.015625, %v2025_v54  ;;  %vm2513_vm12 = vcmp.ge.f32.partialorder %v2449_v53, 0.0  ;;  %v2577_v37 = vmul.f32 0.01, %v2449_v53 }
 0x2a9   : > { %v8065_v50 = vpop.eup %8064  ;;  %8070 = vrsqrt.f32 %v2190_v29  ;;  %v2382_v2 = vmul.f32 %v9488_v63, %v2314_v60  ;;  %7150 = vmatmul.mubr.msk.f32.gmra.mxu1 %vm343_vm0, %v8374_v8  ;;  %v8378_v8 = vld [vmem:[%s8531_s26 + $0x50] sm:$0xff] }
 0x2aa   : > { %v2191_v16 = vadd.f32 1e-05, %v2127_v18  ;;  %v2641_v19 = vsel %vm2513_vm12, %v2449_v53, %v2577_v37  ;;  %v2315_v31 = vmul.f32 %v8065_v50, %v13059_v28  ;;  %1091 = vmatprep.mubr.f32.mxu1 %v13055_v61  ;;  %v8376_v53 = vld [vmem:[%s8531_s26 + $0x40] sm:$0xff]  ;;  %v8377_v28 = vld [vmem:[%s8531_s26 + $0x48] sm:$0xff] }
 0x2ab   : > { %7700 = vmatprep.mubr.msk.f32.mxu0 %vm1505_vm1, %v2641_v19  ;;  %v2450_v45 = vadd.f32 %v9493_v52, %v2382_v2 }
 0x2ac   : > { %8072 = vrsqrt.f32 %v2191_v16  ;;  %v2028_v40 = vpop.xlane.xlu1 %2027  ;;  %v2383_v7 = vmul.f32 %v9488_v63, %v2315_v31 }
 0x2ad   : > { %v2128_v22 = vmul.f32 0.015625, %v2028_v40  ;;  %vm2514_vm13 = vcmp.ge.f32.partialorder %v2450_v45, 0.0  ;;  %v2578_v39 = vmul.f32 0.01, %v2450_v45  ;;  %7151 = vmatmul.mubr.msk.f32.gmra.mxu1 %vm343_vm0, %v8375_v17  ;;  %v7278_v40 = vld [vmem:[%s12828_s2 + $0x70] sm:$0xff] }
 0x2ae   : > { %v8067_v47 = vpop.eup %8066  ;;  %v2451_v56 = vadd.f32 %v9493_v52, %v2383_v7  ;;  %1097 = vmatprep.mubr.f32.mxu1 %v13055_v61  ;;  %7741 = vmatprep.subr.mxu1 %v7278_v40 }
 0x2af   : > { %v2192_v33 = vadd.f32 1e-05, %v2128_v22  ;;  %v2031_v11 = vpop.xlane.xlu0 %2030  ;;  %v2642_v24 = vsel %vm2514_vm13, %v2450_v45, %v2578_v39  ;;  %v2316_v32 = vmul.f32 %v8067_v47, %v9497_v0  ;;  %7742 = vmatpush3.msra.mxu1 %v7278_v40 }
 0x2b0   : > { %v2129_v9 = vmul.f32 0.015625, %v2031_v11  ;;  %7701 = vmatmul.mubr.msk.f32.gmra.mxu0 %vm1505_vm1, %v2642_v24  ;;  %vm2515_vm14 = vcmp.ge.f32.partialorder %v2451_v56, 0.0  ;;  %v2579_v10 = vmul.f32 0.01, %v2451_v56  ;;  %v13060_v24 = vld [vmem:[#allocation83_spill] sm:$0xff] }
 0x2b1   : > { %v8069_v1 = vpop.eup %8068  ;;  %8074 = vrsqrt.f32 %v2192_v33  ;;  %v2384_v5 = vmul.f32 %v9488_v63, %v2316_v32  ;;  %7152 = vmatmul.mubr.msk.f32.gmra.mxu1 %vm343_vm0, %v8376_v53 }
 0x2b2   : > { %v2193_v55 = vadd.f32 1e-05, %v2129_v9  ;;  %v2643_v35 = vsel %vm2515_vm14, %v2451_v56, %v2579_v10  ;;  %v2317_v23 = vmul.f32 %v8069_v1, %v9504_v58  ;;  %1103 = vmatprep.mubr.f32.mxu1 %v13055_v61 }
 0x2b3   : > { %v2037_v0 = vpop.xlane.xlu0 %2036  ;;  %7703 = vmatprep.mubr.msk.f32.mxu0 %vm1505_vm1, %v2643_v35  ;;  %v2452_v48 = vadd.f32 %v9493_v52, %v2384_v5 }
 0x2b4   : > { %8076 = vrsqrt.f32 %v2193_v55  ;;  %v2131_v25 = vmul.f32 0.015625, %v2037_v0  ;;  %v2034_v20 = vpop.xlane.xlu1 %2033  ;;  %v2385_v57 = vmul.f32 %v9488_v63, %v2317_v23 }
 0x2b5   : > { %v2130_v59 = vmul.f32 0.015625, %v2034_v20  ;;  %vm2516_vm15 = vcmp.ge.f32.partialorder %v2452_v48, 0.0  ;;  %v2580_v46 = vmul.f32 0.01, %v2452_v48  ;;  %7153 = vmatmul.mubr.msk.f32.gmra.mxu1 %vm343_vm0, %v8377_v28 }
 0x2b6   : > { %v8071_v58 = vpop.eup %8070  ;;  %v2195_v36 = vadd.f32 1e-05, %v2131_v25  ;;  %v2453_v38 = vadd.f32 %v9493_v52, %v2385_v57  ;;  %1109 = vmatprep.mubr.f32.mxu1 %v13055_v61 }
 0x2b7   : > { %v2194_v44 = vadd.f32 1e-05, %v2130_v59  ;;  %v2043_v49 = vpop.xlane.xlu0 %2042  ;;  %v2644_v6 = vsel %vm2516_vm15, %v2452_v48, %v2580_v46  ;;  %v2318_v30 = vmul.f32 %v8071_v58, %v9519_v12  ;;  %v13061_v48 = vld [vmem:[#allocation9_spill] sm:$0xff] }
 0x2b8   : > { %8078 = vrsqrt.f32 %v2195_v36  ;;  %v2133_v29 = vmul.f32 0.015625, %v2043_v49  ;;  %7704 = vmatmul.mubr.msk.f32.gmra.mxu0 %vm1505_vm1, %v2644_v6  ;;  %v2040_v54 = vpop.xlane.xlu1 %2039  ;;  %vm2517_vm2 = vcmp.ge.f32.partialorder %v2453_v38, 0.0  ;;  %v2581_v15 = vmul.f32 0.01, %v2453_v38  ;;  %v8379_v59 = vld [vmem:[%s8531_s26 + $0x58] sm:$0xff] }
 0x2b9   : > { %v8073_v60 = vpop.eup %8072  ;;  %8080 = vrsqrt.f32 %v2194_v44  ;;  %v2132_v41 = vmul.f32 0.015625, %v2040_v54  ;;  %v2386_v18 = vmul.f32 %v9488_v63, %v2318_v30  ;;  %7154 = vmatmul.mubr.msk.f32.gmra.mxu1 %vm343_vm0, %v8378_v8 }
 0x2ba   : > { %v2197_v37 = vadd.f32 1e-05, %v2133_v29  ;;  %v2645_v12 = vsel %vm2517_vm2, %v2453_v38, %v2581_v15  ;;  %v2319_v50 = vmul.f32 %v8073_v60, %v9533_v13  ;;  %1115 = vmatprep.mubr.f32.mxu1 %v13055_v61  ;;  %v13062_v29 = vld [vmem:[#allocation97_spill] sm:$0xff] }
 0x2bb   : > { %v2196_v2 = vadd.f32 1e-05, %v2132_v41  ;;  %v2049_v16 = vpop.xlane.xlu0 %2048  ;;  %7706 = vmatprep.mubr.msk.f32.mxu0 %vm1505_vm1, %v2645_v12  ;;  %v2454_v19 = vadd.f32 %v9493_v52, %v2386_v18  ;;  %v13063_v18 = vld [vmem:[#allocation69_spill] sm:$0xff]  ;;  %v8380_v12 = vld [vmem:[%s8531_s26 + $0x60] sm:$0xff] }
 0x2bc   : > { %8082 = vrsqrt.f32 %v2197_v37  ;;  %v2135_v31 = vmul.f32 0.015625, %v2049_v16  ;;  %v2046_v45 = vpop.xlane.xlu1 %2045  ;;  %v2387_v4 = vmul.f32 %v9488_v63, %v2319_v50 }
 0x2bd   : > { %8084 = vrsqrt.f32 %v2196_v2  ;;  %v2134_v13 = vmul.f32 0.015625, %v2046_v45  ;;  %vm2518_vm3 = vcmp.ge.f32.partialorder %v2454_v19, 0.0  ;;  %v2582_v7 = vmul.f32 0.01, %v2454_v19  ;;  %7155 = vmatmul.mubr.msk.f32.gmra.mxu1 %vm343_vm0, %v8379_v59 }
 0x2be   : > { %v8075_v22 = vpop.eup %8074  ;;  %v2455_v39 = vadd.f32 %v9493_v52, %v2387_v4  ;;  %v2199_v47 = vadd.f32 1e-05, %v2135_v31  ;;  %1121 = vmatprep.mubr.f32.mxu1 %v13055_v61 }
 0x2bf   : > { %v2198_v56 = vadd.f32 1e-05, %v2134_v13  ;;  %v2055_v33 = vpop.xlane.xlu0 %2054  ;;  %v2646_v11 = vsel %vm2518_vm3, %v2454_v19, %v2582_v7  ;;  %v2320_v32 = vmul.f32 %v8075_v22, %v13060_v24  ;;  %v13064_v7 = vld [vmem:[#allocation99_spill] sm:$0xff] }
 0x2c0   : > { %v2137_v9 = vmul.f32 0.015625, %v2055_v33  ;;  %7707 = vmatmul.mubr.msk.f32.gmra.mxu0 %vm1505_vm1, %v2646_v11  ;;  %v2052_v10 = vpop.xlane.xlu1 %2051  ;;  %vm2519_vm4 = vcmp.ge.f32.partialorder %v2455_v39, 0.0  ;;  %v2583_v1 = vmul.f32 0.01, %v2455_v39  ;;  %v13065_v11 = vld [vmem:[#allocation98_spill] sm:$0xff] }
 0x2c1   : > { %v8077_v5 = vpop.eup %8076  ;;  %8086 = vrsqrt.f32 %v2198_v56  ;;  %v2136_v55 = vmul.f32 0.015625, %v2052_v10  ;;  %v2388_v35 = vmul.f32 %v9488_v63, %v2320_v32  ;;  %7156 = vmatmul.mubr.msk.f32.gmra.mxu1 %vm343_vm0, %v8380_v12  ;;  %v8381_v32 = vld [vmem:[%s8531_s26 + $0x68] sm:$0xff] }
 0x2c2   : > { %v2201_v23 = vadd.f32 1e-05, %v2137_v9  ;;  %v2647_v0 = vsel %vm2519_vm4, %v2455_v39, %v2583_v1  ;;  %v2321_v17 = vmul.f32 %v8077_v5, %v13061_v48  ;;  %8088 = vrsqrt.f32 %v2199_v47  ;;  %1127 = vmatprep.mubr.f32.mxu1 %v13055_v61  ;;  %v13066_v1 = vld [vmem:[#allocation2_spill] sm:$0xff] }
 0x2c3   : > { %v2200_v25 = vadd.f32 1e-05, %v2136_v55  ;;  %v2061_v20 = vpop.xlane.xlu0 %2060  ;;  %7709 = vmatprep.mubr.msk.f32.mxu0 %vm1505_vm1, %v2647_v0  ;;  %v2456_v57 = vadd.f32 %v9493_v52, %v2388_v35  ;;  %v9934_v5 = vsub.s32 1, %v13066_v1 }
 0x2c4   : > { %8090 = vrsqrt.f32 %v2201_v23  ;;  %v2139_v46 = vmul.f32 0.015625, %v2061_v20  ;;  %v2058_v58 = vpop.xlane.xlu1 %2057  ;;  %v2389_v36 = vmul.f32 %v9488_v63, %v2321_v17 }
 0x2c5   : > { %v8079_v38 = vpop.eup %8078  ;;  %8092 = vrsqrt.f32 %v2200_v25  ;;  %v2138_v44 = vmul.f32 0.015625, %v2058_v58  ;;  %vm2520_vm5 = vcmp.ge.f32.partialorder %v2456_v57, 0.0  ;;  %v2584_v49 = vmul.f32 0.01, %v2456_v57  ;;  %7157 = vmatmul.mubr.msk.f32.gmra.mxu1 %vm343_vm0, %v8381_v32 }
 0x2c6   : > { %v8081_v6 = vpop.eup %8080  ;;  %v2203_v30 = vadd.f32 1e-05, %v2139_v46  ;;  %v2457_v53 = vadd.f32 %v9493_v52, %v2389_v36  ;;  %v2323_v54 = vmul.f32 %v8079_v38, %v13062_v29  ;;  %1133 = vmatprep.mubr.f32.mxu1 %v13055_v61  ;;  %v13067_v46 = vld [vmem:[#allocation67_spill] sm:$0xff]  ;;  %v8382_v36 = vld [vmem:[%s8531_s26 + $0x70] sm:$0xff] }
 0x2c7   : > { %v2202_v15 = vadd.f32 1e-05, %v2138_v44  ;;  %v2067_v60 = vpop.xlane.xlu0 %2066  ;;  %v2648_v41 = vsel %vm2520_vm5, %v2456_v57, %v2584_v49  ;;  %v2322_v37 = vmul.f32 %v8081_v6, %v13063_v18 }
 0x2c8   : > { %8094 = vrsqrt.f32 %v2203_v30  ;;  %v2141_v50 = vmul.f32 0.015625, %v2067_v60  ;;  %7710 = vmatmul.mubr.msk.f32.gmra.mxu0 %vm1505_vm1, %v2648_v41  ;;  %v2064_v2 = vpop.xlane.xlu1 %2063  ;;  %vm2521_vm6 = vcmp.ge.f32.partialorder %v2457_v53, 0.0  ;;  %v2585_v16 = vmul.f32 0.01, %v2457_v53 }
 0x2c9   : > { %v8083_v19 = vpop.eup %8082  ;;  %8096 = vrsqrt.f32 %v2202_v15  ;;  %v2140_v28 = vmul.f32 0.015625, %v2064_v2  ;;  %v2390_v31 = vmul.f32 %v9488_v63, %v2322_v37  ;;  %v2391_v45 = vmul.f32 %v9488_v63, %v2323_v54  ;;  %7158 = vmatmul.mubr.msk.f32.gmra.mxu1 %vm343_vm0, %v8382_v36 }
 0x2ca   : > { %v8085_v4 = vpop.eup %8084  ;;  %v2205_v40 = vadd.f32 1e-05, %v2141_v50  ;;  %v2649_v13 = vsel %vm2521_vm6, %v2457_v53, %v2585_v16  ;;  %v2325_v22 = vmul.f32 %v8083_v19, %v13064_v7  ;;  %1139 = vmatprep.mubr.f32.mxu1 %v13055_v61  ;;  %v13068_v50 = vld [vmem:[#allocation87_spill] sm:$0xff]  ;;  %v8383_v19 = vld [vmem:[%s8531_s26 + $0x78] sm:$0xff] }
 0x2cb   : > { %v2204_v39 = vadd.f32 1e-05, %v2140_v28  ;;  %v2073_v47 = vpop.xlane.xlu0 %2072  ;;  %7712 = vmatprep.mubr.msk.f32.mxu0 %vm1505_vm1, %v2649_v13  ;;  %v2458_v56 = vadd.f32 %v9493_v52, %v2390_v31  ;;  %v2459_v33 = vadd.f32 %v9493_v52, %v2391_v45  ;;  %v2324_v24 = vmul.f32 %v8085_v4, %v13065_v11  ;;  %v13069_v4 = vld [vmem:[#allocation12_spill] sm:$0xff] }
 0x2cc   : > { %8098 = vrsqrt.f32 %v2205_v40  ;;  %v2143_v8 = vmul.f32 0.015625, %v2073_v47  ;;  %v2070_v9 = vpop.xlane.xlu1 %2069  ;;  %v2393_v10 = vmul.f32 %v9488_v63, %v2325_v22 }
 0x2cd   : > { %8100 = vrsqrt.f32 %v2204_v39  ;;  %v2142_v55 = vmul.f32 0.015625, %v2070_v9  ;;  %vm2522_vm7 = vcmp.ge.f32.partialorder %v2458_v56, 0.0  ;;  %v2586_v35 = vmul.f32 0.01, %v2458_v56  ;;  %7159 = vmatmul.mubr.msk.f32.gmra.mxu1 %vm343_vm0, %v8383_v19  ;;  %v8384_v9 = vld [vmem:[%s8531_s26 + $0x80] sm:$0xff] }
 0x2ce   : > { %v8087_v23 = vpop.eup %8086  ;;  %v2207_v0 = vadd.f32 1e-05, %v2143_v8  ;;  %vm2523_vm8 = vcmp.ge.f32.partialorder %v2459_v33, 0.0  ;;  %v2587_v48 = vmul.f32 0.01, %v2459_v33  ;;  %v2392_v17 = vmul.f32 %v9488_v63, %v2324_v24  ;;  %1145 = vmatprep.mubr.f32.mxu1 %v13055_v61 }
 0x2cf   : > { %v2206_v25 = vadd.f32 1e-05, %v2142_v55  ;;  %v2079_v20 = vpop.xlane.xlu0 %2078  ;;  %v2650_v57 = vsel %vm2522_vm7, %v2458_v56, %v2586_v35  ;;  %v2461_v59 = vadd.f32 %v9493_v52, %v2393_v10  ;;  %v2326_v58 = vmul.f32 %v8087_v23, %v13067_v46  ;;  %v8089_v38 = vpop.eup %8088  ;;  %v8385_v55 = vld [vmem:[%s12830_s4] sm:$0x7] }
 0x2d0   : > { %8102 = vrsqrt.f32 %v2207_v0  ;;  %v2145_v44 = vmul.f32 0.015625, %v2079_v20  ;;  %7713 = vmatmul.mubr.msk.f32.gmra.mxu0 %vm1505_vm1, %v2650_v57  ;;  %v2076_v49 = vpop.xlane.xlu1 %2075  ;;  %v2651_v6 = vsel %vm2523_vm8, %v2459_v33, %v2587_v48  ;;  %v2460_v30 = vadd.f32 %v9493_v52, %v2392_v17  ;;  %v9974_v48 = vpop.f32.mrf.mxu0 }
 0x2d1   : > { %v8091_v53 = vpop.eup %8090  ;;  %8104 = vrsqrt.f32 %v2206_v25  ;;  %v2144_v29 = vmul.f32 0.015625, %v2076_v49  ;;  %7715 = vmatprep.mubr.msk.f32.mxu0 %vm1505_vm1, %v2651_v6  ;;  %vm2525_vm9 = vcmp.ge.f32.partialorder %v2461_v59, 0.0  ;;  %v2589_v54 = vmul.f32 0.01, %v2461_v59  ;;  %7160 = vmatmul.mubr.msk.f32.gmra.mxu1 %vm343_vm0, %v8384_v9  ;;  %v13070_v49 = vld [vmem:[#allocation5_spill] sm:$0xff] }
 0x2d2   : > { %v8093_v15 = vpop.eup %8092  ;;  %v2209_v60 = vadd.f32 1e-05, %v2145_v44  ;;  %vm2524_vm10 = vcmp.ge.f32.partialorder %v2460_v30, 0.0  ;;  %v2588_v41 = vmul.f32 0.01, %v2460_v30  ;;  %v2394_v18 = vmul.f32 %v9488_v63, %v2326_v58  ;;  %1151 = vmatprep.mubr.f32.mxu1 %v13055_v61  ;;  %v8386_v44 = vld [vmem:[%s8531_s26 + $0x88] sm:$0xff] }
 0x2d3   : > { %v2208_v37 = vadd.f32 1e-05, %v2144_v29  ;;  %v2653_v12 = vsel %vm2525_vm9, %v2461_v59, %v2589_v54  ;;  %v2327_v2 = vmul.f32 %v8089_v38, %v13068_v50  ;;  %v2328_v16 = vmul.f32 %v8093_v15, %v9598_v27  ;;  %v7277_v54 = vld [vmem:[%s12828_s2 + $0x68] sm:$0xff] }
 0x2d4   : > { %8106 = vrsqrt.f32 %v2209_v60  ;;  %v2652_v28 = vsel %vm2524_vm10, %v2460_v30, %v2588_v41  ;;  %v2082_v31 = vpop.xlane.xlu1 %2081  ;;  %v2462_v45 = vadd.f32 %v9493_v52, %v2394_v18  ;;  %v2329_v40 = vmul.f32 %v8091_v53, %v13069_v4  ;;  %7743 = vmatprep.subr.mxu1 %v7277_v54 }
 0x2d5   : > { %v8095_v13 = vpop.eup %8094  ;;  %8108 = vrsqrt.f32 %v2208_v37  ;;  %7716 = vmatmul.mubr.msk.f32.gmra.mxu0 %vm1505_vm1, %v2652_v28  ;;  %v2146_v7 = vmul.f32 0.015625, %v2082_v31  ;;  %v2395_v27 = vmul.f32 %v9488_v63, %v2327_v2  ;;  %v2396_v22 = vmul.f32 %v9488_v63, %v2328_v16  ;;  %7161 = vmatmul.mubr.msk.f32.gmra.mxu1 %vm343_vm0, %v8386_v44 }
 0x2d6   : > { %v8097_v39 = vpop.eup %8096  ;;  %7718 = vmatprep.mubr.msk.f32.mxu0 %vm1505_vm1, %v2653_v12  ;;  %vm2526_vm11 = vcmp.ge.f32.partialorder %v2462_v45, 0.0  ;;  %v2590_v47 = vmul.f32 0.01, %v2462_v45  ;;  %v2397_v56 = vmul.f32 %v9488_v63, %v2329_v40  ;;  %v2331_v33 = vmul.f32 %v8095_v13, %v9626_v14  ;;  %v13071_v12 = vld [vmem:[#allocation3_spill] sm:$0xff]  ;;  %7744 = vmatpush3.msra.mxu1 %v7277_v54 }
 0x2d7   : > { %v2210_v11 = vadd.f32 1e-05, %v2146_v7  ;;  %v2463_v24 = vadd.f32 %v9493_v52, %v2395_v27  ;;  %v2464_v32 = vadd.f32 %v9493_v52, %v2396_v22  ;;  %v2330_v8 = vmul.f32 %v8097_v39, %v9623_v26  ;;  %1157 = vmatprep.mubr.f32.mxu1 %v13055_v61  ;;  %v8387_v7 = vld [vmem:[%s8531_s26 + $0x90] sm:$0xff] }
 0x2d8   : > { %v2654_v10 = vsel %vm2526_vm11, %v2462_v45, %v2590_v47  ;;  %v9969_v35 = vrot.slane %v8385_v55, %v9934_v5  ;;  %v2465_v14 = vadd.f32 %v9493_v52, %v2397_v56  ;;  %v2399_v23 = vmul.f32 %v9488_v63, %v2331_v33 }
 0x2d9   : > { %v8099_v0 = vpop.eup %8098  ;;  %8110 = vrsqrt.f32 %v2210_v11  ;;  %7719 = vmatmul.mubr.msk.f32.gmra.mxu0 %vm1505_vm1, %v2654_v10  ;;  %vm2527_vm12 = vcmp.ge.f32.partialorder %v2463_v24, 0.0  ;;  %v2591_v26 = vmul.f32 0.01, %v2463_v24  ;;  %vm2528_vm13 = vcmp.ge.f32.partialorder %v2464_v32, 0.0  ;;  %7162 = vmatmul.mubr.msk.f32.gmra.mxu1 %vm343_vm0, %v8387_v7  ;;  %v8392_v7 = vld [vmem:[%s8531_s26 + $0xb8] sm:$0xff] }
 0x2da   : > { %v8101_v17 = vpop.eup %8100  ;;  %v2592_v25 = vmul.f32 0.01, %v2464_v32  ;;  %vm2529_vm14 = vcmp.ge.f32.partialorder %v2465_v14, 0.0  ;;  %v2593_v20 = vmul.f32 0.01, %v2465_v14  ;;  %v2398_v57 = vmul.f32 %v9488_v63, %v2330_v8  ;;  %1163 = vmatprep.mubr.f32.mxu1 %v13055_v61  ;;  %v13072_v8 = vld [vmem:[#allocation10_spill] sm:$0xff] }
 0x2db   : > { %v2655_v59 = vsel %vm2527_vm12, %v2463_v24, %v2591_v26  ;;  %v7645_v46 = vpop.f32.mrf.mxu0  ;;  %v2467_v58 = vadd.f32 %v9493_v52, %v2399_v23  ;;  %v2332_v36 = vmul.f32 %v8101_v17, %v9644_v21  ;;  %v2333_v38 = vmul.f32 %v8099_v0, %v9631_v42  ;;  %v8388_v23 = vld [vmem:[%s8531_s26 + $0x98] sm:$0xff] }
 0x2dc   : > { %7721 = vmatprep.mubr.msk.f32.mxu0 %vm1505_vm1, %v2655_v59  ;;  %v2939_v6 = vadd.f32 %v7645_v46, %v13070_v49  ;;  %v2656_v30 = vsel %vm2528_vm13, %v2464_v32, %v2592_v25  ;;  %v2657_v53 = vsel %vm2529_vm14, %v2465_v14, %v2593_v20  ;;  %v2466_v29 = vadd.f32 %v9493_v52, %v2398_v57  ;;  %v13073_v25 = vld [vmem:[#allocation7_spill] sm:$0xff] }
 0x2dd   : > { %v8103_v15 = vpop.eup %8102  ;;  %7722 = vmatmul.mubr.msk.f32.gmra.mxu0 %vm1505_vm1, %v2656_v30  ;;  %v2933_v21 = vpop.f32.mrf.mxu0  ;;  %vm2531_vm15 = vcmp.ge.f32.partialorder %v2467_v58, 0.0  ;;  %v2595_v42 = vmul.f32 0.01, %v2467_v58  ;;  %v2400_v60 = vmul.f32 %v9488_v63, %v2332_v36  ;;  %v2401_v41 = vmul.f32 %v9488_v63, %v2333_v38  ;;  %7163 = vmatmul.mubr.msk.f32.gmra.mxu1 %vm343_vm0, %v8388_v23  ;;  %v13079_v23 = vld [vmem:[#allocation25_spill] sm:$0xff] }
 0x2de   : > { %v8105_v18 = vpop.eup %8104  ;;  %v9993_v37 = vadd.f32 %v9969_v35, %v2939_v6  ;;  %v2934_v50 = vadd.f32 %v2933_v21, %v13071_v12  ;;  %7724 = vmatprep.mubr.msk.f32.mxu0 %vm1505_vm1, %v2657_v53  ;;  %vm2530_vm2 = vcmp.ge.f32.partialorder %v2466_v29, 0.0  ;;  %v2594_v2 = vmul.f32 0.01, %v2466_v29  ;;  %1169 = vmatprep.mubr.f32.mxu1 %v13055_v61  ;;  %v8389_v6 = vld [vmem:[%s8531_s26 + $0xa0] sm:$0xff] }
 0x2df   : > { %v2659_v16 = vsel %vm2531_vm15, %v2467_v58, %v2595_v42  ;;  %v2468_v19 = vadd.f32 %v9493_v52, %v2400_v60  ;;  %v2469_v28 = vadd.f32 %v9493_v52, %v2401_v41  ;;  %v2334_v31 = vmul.f32 %v8105_v18, %v9651_v3  ;;  %v13074_v42 = vld [vmem:[#allocation16_spill] sm:$0xff]  ;;  %v8390_v18 = vld [vmem:[%s8531_s26 + $0xa8] sm:$0xff] }
 0x2e0   : > { %v2658_v45 = vsel %vm2530_vm2, %v2466_v29, %v2594_v2  ;;  %v3323_v4 = vsel %vm1505_vm1, %v9993_v37, 0.0  ;;  %v10004_v40 = vadd.f32 %v9969_v35, %v2934_v50  ;;  %v2335_v13 = vmul.f32 %v8103_v15, %v9654_v43  ;;  %v13075_v2 = vld [vmem:[#allocation13_spill] sm:$0xff] }
 0x2e1   : > { %v8107_v27 = vpop.eup %8106  ;;  %7725 = vmatmul.mubr.msk.f32.gmra.mxu0 %vm1505_vm1, %v2658_v45  ;;  %3324 = vadd.xlane.f32.xlu1 %v3323_v4  ;;  %vm2532_vm3 = vcmp.ge.f32.partialorder %v2468_v19, 0.0  ;;  %v2596_v3 = vmul.f32 0.01, %v2468_v19  ;;  %vm2533_vm4 = vcmp.ge.f32.partialorder %v2469_v28, 0.0  ;;  %v2597_v22 = vmul.f32 0.01, %v2469_v28 }
 0x2e2   : > { %v8109_v39 = vpop.eup %8108  ;;  %7727 = vmatprep.mubr.msk.f32.mxu0 %vm1505_vm1, %v2659_v16  ;;  %v3320_v47 = vsel %vm1505_vm1, %v10004_v40, 0.0  ;;  %v2402_v43 = vmul.f32 %v9488_v63, %v2334_v31  ;;  %v2403_v56 = vmul.f32 %v9488_v63, %v2335_v13  ;;  %v2337_v33 = vmul.f32 %v8107_v27, %v9676_v62  ;;  %7164 = vmatmul.mubr.msk.f32.gmra.mxu1 %vm343_vm0, %v8389_v6  ;;  %v8391_v45 = vld [vmem:[%s8531_s26 + $0xb0] sm:$0xff]  ;;  %v13076_v27 = vld [vmem:[#allocation22_spill] sm:$0xff]  ;;  %v13081_v6 = vld [vmem:[#allocation31_spill] sm:$0xff] }
 0x2e3   : > { %v7648_v11 = vpop.f32.mrf.mxu0  ;;  %3321 = vadd.xlane.f32.xlu0 %v3320_v47  ;;  %v2660_v24 = vsel %vm2532_vm3, %v2468_v19, %v2596_v3  ;;  %v2336_v32 = vmul.f32 %v8109_v39, %v9673_v51  ;;  %v2661_v0 = vsel %vm2533_vm4, %v2469_v28, %v2597_v22  ;;  %1175 = vmatprep.mubr.f32.mxu1 %v13055_v61  ;;  %v13077_v47 = vld [vmem:[#allocation19_spill] sm:$0xff] }
 0x2e4   : > { %v2949_v9 = vadd.f32 %v7648_v11, %v13072_v8  ;;  %v2470_v10 = vadd.f32 %v9493_v52, %v2402_v43  ;;  %v2471_v55 = vadd.f32 %v9493_v52, %v2403_v56  ;;  %v2405_v14 = vmul.f32 %v9488_v63, %v2337_v33  ;;  %v8393_v56 = vld [vmem:[%s8531_s26 + $0xc0] sm:$0xff]  ;;  %v13078_v8 = vld [vmem:[#allocation28_spill] sm:$0xff] }
 0x2e5   : > { %7728 = vmatmul.mubr.msk.f32.gmra.mxu0 %vm1505_vm1, %v2660_v24  ;;  %v2943_v62 = vpop.f32.mrf.mxu0  ;;  %v2404_v26 = vmul.f32 %v9488_v63, %v2336_v32 }
 0x2e6   : > { %v8111_v51 = vpop.eup %8110  ;;  %v10029_v17 = vadd.f32 %v9969_v35, %v2949_v9  ;;  %v2944_v20 = vadd.f32 %v2943_v62, %v13073_v25  ;;  %7730 = vmatprep.mubr.msk.f32.mxu0 %vm1505_vm1, %v2661_v0  ;;  %vm2534_vm5 = vcmp.ge.f32.partialorder %v2470_v10, 0.0  ;;  %v2598_v57 = vmul.f32 0.01, %v2470_v10  ;;  %7165 = vmatmul.mubr.msk.f32.gmra.mxu1 %vm343_vm0, %v8390_v18  ;;  %v7276_v0 = vld [vmem:[%s12828_s2 + $0x60] sm:$0xff]  ;;  %v8395_v25 = vld [vmem:[%s8531_s26 + $0xd0] sm:$0xff]  ;;  %v13083_v18 = vld [vmem:[#allocation37_spill] sm:$0xff] }
 0x2e7   : > { %vm2535_vm6 = vcmp.ge.f32.partialorder %v2471_v55, 0.0  ;;  %v2599_v59 = vmul.f32 0.01, %v2471_v55  ;;  %v2472_v46 = vadd.f32 %v9493_v52, %v2404_v26  ;;  %v2473_v58 = vadd.f32 %v9493_v52, %v2405_v14  ;;  %1181 = vmatprep.mubr.f32.mxu1 %v13055_v61  ;;  %7745 = vmatprep.subr.mxu1 %v7276_v0 }
 0x2e8   : > { %v2662_v36 = vsel %vm2534_vm5, %v2470_v10, %v2598_v57  ;;  %v3329_v38 = vsel %vm1505_vm1, %v10029_v17, 0.0  ;;  %v10038_v44 = vadd.f32 %v9969_v35, %v2944_v20  ;;  %v2338_v49 = vmul.f32 %v8111_v51, %v9693_v34  ;;  %v8394_v10 = vld [vmem:[%s8531_s26 + $0xc8] sm:$0xff]  ;;  %7746 = vmatpush3.msra.mxu1 %v7276_v0  ;;  %v8396_v57 = vld [vmem:[%s8531_s26 + $0xd8] sm:$0xff] }
 0x2e9   : > { %7731 = vmatmul.mubr.msk.f32.gmra.mxu0 %vm1505_vm1, %v2662_v36  ;;  %v2663_v30 = vsel %vm2535_vm6, %v2471_v55, %v2599_v59  ;;  %3330 = vadd.xlane.f32.xlu1 %v3329_v38  ;;  %vm2536_vm7 = vcmp.ge.f32.partialorder %v2472_v46, 0.0  ;;  %v2600_v53 = vmul.f32 0.01, %v2472_v46  ;;  %vm2537_vm8 = vcmp.ge.f32.partialorder %v2473_v58, 0.0  ;;  %v8397_v36 = vld [vmem:[%s8531_s26 + $0xe0] sm:$0xff]  ;;  %v8402_v0 = vld [vmem:[%s8531_s26 + $0x108] sm:$0xff] }
 0x2ea   : > { %7733 = vmatprep.mubr.msk.f32.mxu0 %vm1505_vm1, %v2663_v30  ;;  %v3326_v29 = vsel %vm1505_vm1, %v10038_v44, 0.0  ;;  %v2601_v54 = vmul.f32 0.01, %v2473_v58  ;;  %v2406_v15 = vmul.f32 %v9488_v63, %v2338_v49  ;;  %7166 = vmatmul.mubr.msk.f32.gmra.mxu1 %vm343_vm0, %v8391_v45 }
 0x2eb   : > { %v7651_v34 = vpop.f32.mrf.mxu0  ;;  %3327 = vadd.xlane.f32.xlu0 %v3326_v29  ;;  %v2664_v21 = vsel %vm2536_vm7, %v2472_v46, %v2600_v53  ;;  %1187 = vmatprep.mubr.f32.mxu1 %v13055_v61  ;;  %v13080_v46 = vld [vmem:[#allocation34_spill] sm:$0xff] }
 0x2ec   : > { %v2959_v60 = vadd.f32 %v7651_v34, %v13074_v42  ;;  %v2474_v41 = vadd.f32 %v9493_v52, %v2406_v15  ;;  %v2665_v50 = vsel %vm2537_vm8, %v2473_v58, %v2601_v54  ;;  %v8398_v15 = vld [vmem:[%s8531_s26 + $0xe8] sm:$0xff]  ;;  %v13082_v34 = vld [vmem:[#allocation40_spill] sm:$0xff] }
 0x2ed   : > { %7734 = vmatmul.mubr.msk.f32.gmra.mxu0 %vm1505_vm1, %v2664_v21  ;;  %v2953_v12 = vpop.f32.mrf.mxu0 }
 0x2ee   : > { %v10056_v63 = vadd.f32 %v9969_v35, %v2959_v60  ;;  %v2954_v16 = vadd.f32 %v2953_v12, %v13075_v2  ;;  %7736 = vmatprep.mubr.msk.f32.mxu0 %vm1505_vm1, %v2665_v50  ;;  %vm2538_vm9 = vcmp.ge.f32.partialorder %v2474_v41, 0.0  ;;  %v2602_v19 = vmul.f32 0.01, %v2474_v41  ;;  %7167 = vmatmul.mubr.msk.f32.gmra.mxu1 %vm343_vm0, %v8392_v7  ;;  %v8399_v2 = vld [vmem:[%s8531_s26 + $0xf0] sm:$0xff] }
 0x2ef   : > { %1193 = vmatprep.mubr.f32.mxu1 %v13055_v61 }
 0x2f0   : > { %v2666_v52 = vsel %vm2538_vm9, %v2474_v41, %v2602_v19  ;;  %v3335_v28 = vsel %vm1505_vm1, %v10056_v63, 0.0  ;;  %v10063_v31 = vadd.f32 %v9969_v35, %v2954_v16  ;;  %v13084_v16 = vld [vmem:[#allocation42_spill] sm:$0xff] }
 0x2f1   : > { %7737 = vmatmul.mubr.msk.f32.gmra.mxu0 %vm1505_vm1, %v2666_v52  ;;  %3336 = vadd.xlane.f32.xlu1 %v3335_v28 }
 0x2f2   : > { %v3332_v4 = vsel %vm1505_vm1, %v10063_v31, 0.0  ;;  %7168 = vmatmul.mubr.msk.f32.gmra.mxu1 %vm343_vm0, %v8393_v56 }
 0x2f3   : > { %3333 = vadd.xlane.f32.xlu0 %v3332_v4  ;;  %1199 = vmatprep.mubr.f32.mxu1 %v13055_v61 }
 0x2f4   : > { %v7654_v13 = vpop.f32.mrf.mxu0 }
 0x2f5   : > { %v2969_v3 = vadd.f32 %v7654_v13, %v13076_v27  ;;  %v13085_v13 = vld [vmem:[#allocation41_spill] sm:$0xff] }
 0x2f6   : > { %v2963_v22 = vpop.f32.mrf.mxu0  ;;  %7169 = vmatmul.mubr.msk.f32.gmra.mxu1 %vm343_vm0, %v8394_v10  ;;  %v13087_v10 = vld [vmem:[#allocation43_spill] sm:$0xff] }
 0x2f7   : > { %v10076_v39 = vadd.f32 %v9969_v35, %v2969_v3  ;;  %v2964_v43 = vadd.f32 %v2963_v22, %v13077_v47  ;;  %1205 = vmatprep.mubr.f32.mxu1 %v13055_v61  ;;  %v8400_v3 = vld [vmem:[%s8531_s26 + $0xf8] sm:$0xff] }
 0x2f9   : > { %v3341_v33 = vsel %vm1505_vm1, %v10076_v39, 0.0  ;;  %v10084_v11 = vadd.f32 %v9969_v35, %v2964_v43 }
 0x2fa   : > { %3342 = vadd.xlane.f32.xlu1 %v3341_v33  ;;  %7170 = vmatmul.mubr.msk.f32.gmra.mxu1 %vm343_vm0, %v8395_v25  ;;  %v13086_v33 = vld [vmem:[#allocation44_spill] sm:$0xff] }
 0x2fb   : > { %v7657_v24 = vpop.f32.mrf.mxu0  ;;  %v3338_v32 = vsel %vm1505_vm1, %v10084_v11, 0.0  ;;  %1211 = vmatprep.mubr.f32.mxu1 %v13055_v61 }
 0x2fc   : > { %v2979_v9 = vadd.f32 %v7657_v24, %v13078_v8  ;;  %3339 = vadd.xlane.f32.xlu0 %v3338_v32  ;;  %v8401_v32 = vld [vmem:[%s8531_s26 + $0x100] sm:$0xff] }
 0x2fd   : > { %v2973_v55 = vpop.f32.mrf.mxu0 }
 0x2fe   : > { %v10094_v14 = vadd.f32 %v9969_v35, %v2979_v9  ;;  %v2974_v62 = vadd.f32 %v2973_v55, %v13079_v23  ;;  %7171 = vmatmul.mubr.msk.f32.gmra.mxu1 %vm343_vm0, %v8396_v57 }
 0x2ff   : > { %1217 = vmatprep.mubr.f32.mxu1 %v13055_v61 }
 0x300   : > { %v3347_v26 = vsel %vm1505_vm1, %v10094_v14, 0.0  ;;  %v10103_v51 = vadd.f32 %v9969_v35, %v2974_v62 }
 0x301   : > { %3348 = vadd.xlane.f32.xlu1 %v3347_v26 }
 0x302   : > { %v3344_v20 = vsel %vm1505_vm1, %v10103_v51, 0.0  ;;  %7172 = vmatmul.mubr.msk.f32.gmra.mxu1 %vm343_vm0, %v8397_v36 }
 0x303   : > { %3345 = vadd.xlane.f32.xlu0 %v3344_v20  ;;  %1223 = vmatprep.mubr.f32.mxu1 %v13055_v61  ;;  %v13088_v20 = vld [vmem:[#allocation46_spill] sm:$0xff] }
 0x306   : > { %7173 = vmatmul.mubr.msk.f32.gmra.mxu1 %vm343_vm0, %v8398_v15 }
 0x307   : > { %v7660_v59 = vpop.f32.mrf.mxu0  ;;  %1229 = vmatprep.mubr.f32.mxu1 %v13055_v61 }
 0x308   : > { %v2989_v58 = vadd.f32 %v7660_v59, %v13080_v46  ;;  %v7275_v59 = vld [vmem:[%s12828_s2 + $0x58] sm:$0xff]  ;;  %v8403_v46 = vld [vmem:[%s8531_s26 + $0x110] sm:$0xff] }
 0x309   : > { %v2983_v38 = vpop.f32.mrf.mxu0  ;;  %7747 = vmatprep.subr.mxu1 %v7275_v59 }
 0x30a   : > { %v10118_v49 = vadd.f32 %v9969_v35, %v2989_v58  ;;  %v2984_v30 = vadd.f32 %v2983_v38, %v13081_v6  ;;  %7174 = vmatmul.mubr.msk.f32.gmra.mxu1 %vm343_vm0, %v8399_v2  ;;  %v13089_v38 = vld [vmem:[#allocation45_spill] sm:$0xff] }
 0x30b   : > { %1235 = vmatprep.mubr.f32.mxu1 %v13055_v61  ;;  %7748 = vmatpush3.msra.mxu1 %v7275_v59 }
 0x30c   : > { %v7663_v53 = vpop.f32.mrf.mxu0  ;;  %v3353_v29 = vsel %vm1505_vm1, %v10118_v49, 0.0  ;;  %v10124_v54 = vadd.f32 %v9969_v35, %v2984_v30 }
 0x30d   : > { %v2999_v21 = vadd.f32 %v7663_v53, %v13082_v34  ;;  %3354 = vadd.xlane.f32.xlu1 %v3353_v29  ;;  %v8404_v29 = vld [vmem:[%s8531_s26 + $0x118] sm:$0xff] }
 0x30e   : > { %v2993_v42 = vpop.f32.mrf.mxu0  ;;  %v3350_v60 = vsel %vm1505_vm1, %v10124_v54, 0.0  ;;  %7175 = vmatmul.mubr.msk.f32.gmra.mxu1 %vm343_vm0, %v8400_v3  ;;  %v8407_v3 = vld [vmem:[%s8531_s26 + $0x130] sm:$0xff] }
 0x30f   : > { %v10133_v41 = vadd.f32 %v9969_v35, %v2999_v21  ;;  %v2994_v12 = vadd.f32 %v2993_v42, %v13083_v18  ;;  %3351 = vadd.xlane.f32.xlu0 %v3350_v60  ;;  %1241 = vmatprep.mubr.f32.mxu1 %v13055_v61  ;;  %v13090_v21 = vld [vmem:[#allocation48_spill] sm:$0xff]  ;;  %v8405_v60 = vld [vmem:[%s8531_s26 + $0x120] sm:$0xff] }
 0x310   : > { %v7666_v50 = vpop.f32.mrf.mxu0 }
 0x311   : > { %v3009_v19 = vadd.f32 %v7666_v50, %v13084_v16  ;;  %v3359_v52 = vsel %vm1505_vm1, %v10133_v41, 0.0  ;;  %v10142_v28 = vadd.f32 %v9969_v35, %v2994_v12  ;;  %v13091_v50 = vld [vmem:[#allocation47_spill] sm:$0xff] }
 0x312   : > { %3360 = vadd.xlane.f32.xlu1 %v3359_v52  ;;  %v3003_v45 = vpop.f32.mrf.mxu0  ;;  %7176 = vmatmul.mubr.msk.f32.gmra.mxu1 %vm343_vm0, %v8401_v32  ;;  %v8406_v52 = vld [vmem:[%s8531_s26 + $0x128] sm:$0xff] }
 0x313   : > { %v10146_v4 = vadd.f32 %v9969_v35, %v3009_v19  ;;  %v3004_v7 = vadd.f32 %v3003_v45, %v13085_v13  ;;  %v3356_v27 = vsel %vm1505_vm1, %v10142_v28, 0.0  ;;  %1247 = vmatprep.mubr.f32.mxu1 %v13055_v61 }
 0x314   : > { %3357 = vadd.xlane.f32.xlu0 %v3356_v27 }
 0x315   : > { %v3365_v22 = vsel %vm1505_vm1, %v10146_v4, 0.0  ;;  %v10156_v47 = vadd.f32 %v9969_v35, %v3004_v7  ;;  %v13092_v7 = vld [vmem:[#allocation50_spill] sm:$0xff] }
 0x316   : > { %3366 = vadd.xlane.f32.xlu1 %v3365_v22  ;;  %7177 = vmatmul.mubr.msk.f32.gmra.mxu1 %vm343_vm0, %v8402_v0 }
 0x317   : > { %v7669_v43 = vpop.f32.mrf.mxu0  ;;  %v3362_v56 = vsel %vm1505_vm1, %v10156_v47, 0.0  ;;  %1253 = vmatprep.mubr.f32.mxu1 %v13055_v61 }
 0x318   : > { %v3019_v24 = vadd.f32 %v7669_v43, %v13086_v33  ;;  %3363 = vadd.xlane.f32.xlu0 %v3362_v56  ;;  %v13093_v56 = vld [vmem:[#allocation49_spill] sm:$0xff] }
 0x319   : > { %v3013_v8 = vpop.f32.mrf.mxu0 }
 0x31a   : > { %v10166_v9 = vadd.f32 %v9969_v35, %v3019_v24  ;;  %v3014_v55 = vadd.f32 %v3013_v8, %v13087_v10  ;;  %7178 = vmatmul.mubr.msk.f32.gmra.mxu1 %vm343_vm0, %v8403_v46  ;;  %v8408_v8 = vld [vmem:[%s8531_s26 + $0x138] sm:$0xff] }
 0x31b   : > { %1259 = vmatprep.mubr.f32.mxu1 %v13055_v61 }
 0x31c   : > { %v10170_v23 = vadd.f32 %v9969_v35, %v3014_v55  ;;  %v3371_v62 = vsel %vm1505_vm1, %v10166_v9, 0.0 }
 0x31d   : > { %3372 = vadd.xlane.f32.xlu1 %v3371_v62  ;;  %v13094_v62 = vld [vmem:[#allocation52_spill] sm:$0xff] }
 0x31e   : > { %v3368_v26 = vsel %vm1505_vm1, %v10170_v23, 0.0  ;;  %7179 = vmatmul.mubr.msk.f32.gmra.mxu1 %vm343_vm0, %v8404_v29 }
 0x31f   : > { %v7672_v25 = vpop.f32.mrf.mxu0  ;;  %3369 = vadd.xlane.f32.xlu0 %v3368_v26  ;;  %1265 = vmatprep.mubr.f32.mxu1 %v13055_v61  ;;  %v8409_v26 = vld [vmem:[%s8531_s26 + $0x140] sm:$0xff] }
 0x320   : > { %v3029_v57 = vadd.f32 %v7672_v25, %v13088_v20 }
 0x321   : > { %v3023_v58 = vpop.f32.mrf.mxu0 }
 0x322   : > { %v10187_v36 = vadd.f32 %v9969_v35, %v3029_v57  ;;  %v3024_v6 = vadd.f32 %v3023_v58, %v13089_v38  ;;  %7180 = vmatmul.mubr.msk.f32.gmra.mxu1 %vm343_vm0, %v8405_v60  ;;  %v13095_v57 = vld [vmem:[#allocation51_spill] sm:$0xff]  ;;  %v7274_v38 = vld [vmem:[%s12828_s2 + $0x50] sm:$0xff] }
 0x323   : > { %1271 = vmatprep.mubr.f32.mxu1 %v13055_v61  ;;  %7749 = vmatprep.subr.mxu1 %v7274_v38 }
 0x324   : > { %v10191_v30 = vadd.f32 %v9969_v35, %v3024_v6  ;;  %v3377_v53 = vsel %vm1505_vm1, %v10187_v36, 0.0  ;;  %v8410_v6 = vld [vmem:[%s8531_s26 + $0x148] sm:$0xff]  ;;  %7750 = vmatpush3.msra.mxu1 %v7274_v38  ;;  %v13101_v38 = vld [vmem:[#allocation57_spill] sm:$0xff] }
 0x325   : > { %3378 = vadd.xlane.f32.xlu1 %v3377_v53 }
 0x326   : > { %v3374_v15 = vsel %vm1505_vm1, %v10191_v30, 0.0  ;;  %7181 = vmatmul.mubr.msk.f32.gmra.mxu1 %vm343_vm0, %v8406_v52  ;;  %v8412_v52 = vld [vmem:[%s8531_s26 + $0x158] sm:$0xff] }
 0x327   : > { %v7675_v34 = vpop.f32.mrf.mxu0  ;;  %3375 = vadd.xlane.f32.xlu0 %v3374_v15  ;;  %1277 = vmatprep.mubr.f32.mxu1 %v13055_v61  ;;  %v13096_v15 = vld [vmem:[#allocation54_spill] sm:$0xff] }
 0x328   : > { %v3039_v42 = vadd.f32 %v7675_v34, %v13090_v21  ;;  %v8411_v21 = vld [vmem:[%s8531_s26 + $0x150] sm:$0xff] }
 0x329   : > { %v3033_v18 = vpop.f32.mrf.mxu0 }
 0x32a   : > { %v10205_v12 = vadd.f32 %v9969_v35, %v3039_v42  ;;  %v3034_v2 = vadd.f32 %v3033_v18, %v13091_v50  ;;  %7182 = vmatmul.mubr.msk.f32.gmra.mxu1 %vm343_vm0, %v8407_v3  ;;  %v13097_v18 = vld [vmem:[#allocation53_spill] sm:$0xff]  ;;  %v8413_v3 = vld [vmem:[%s8531_s26 + $0x160] sm:$0xff] }
 0x32b   : > { %1283 = vmatprep.mubr.f32.mxu1 %v13055_v61 }
 0x32c   : > { %v10209_v16 = vadd.f32 %v9969_v35, %v3034_v2  ;;  %v3383_v19 = vsel %vm1505_vm1, %v10205_v12, 0.0 }
 0x32d   : > { %3384 = vadd.xlane.f32.xlu1 %v3383_v19 }
 0x32e   : > { %v3380_v45 = vsel %vm1505_vm1, %v10209_v16, 0.0  ;;  %7183 = vmatmul.mubr.msk.f32.gmra.mxu1 %vm343_vm0, %v8408_v8 }
 0x32f   : > { %v7678_v13 = vpop.f32.mrf.mxu0  ;;  %3381 = vadd.xlane.f32.xlu0 %v3380_v45  ;;  %1289 = vmatprep.mubr.f32.mxu1 %v13055_v61 }
 0x330   : > { %v3049_v27 = vadd.f32 %v7678_v13, %v13092_v7  ;;  %v13098_v7 = vld [vmem:[#allocation56_spill] sm:$0xff] }
 0x331   : > { %v3043_v22 = vpop.f32.mrf.mxu0 }
 0x332   : > { %v10223_v43 = vadd.f32 %v9969_v35, %v3049_v27  ;;  %v3044_v33 = vadd.f32 %v3043_v22, %v13093_v56  ;;  %7184 = vmatmul.mubr.msk.f32.gmra.mxu1 %vm343_vm0, %v8409_v26  ;;  %v13100_v26 = vld [vmem:[#allocation58_spill] sm:$0xff] }
 0x333   : > { %1295 = vmatprep.mubr.f32.mxu1 %v13055_v61 }
 0x334   : > { %v10227_v24 = vadd.f32 %v9969_v35, %v3044_v33  ;;  %v3389_v32 = vsel %vm1505_vm1, %v10223_v43, 0.0  ;;  %v13099_v33 = vld [vmem:[#allocation55_spill] sm:$0xff] }
 0x335   : > { %3390 = vadd.xlane.f32.xlu1 %v3389_v32 }
 0x336   : > { %v3386_v10 = vsel %vm1505_vm1, %v10227_v24, 0.0  ;;  %7185 = vmatmul.mubr.msk.f32.gmra.mxu1 %vm343_vm0, %v8410_v6 }
 0x337   : > { %v7681_v55 = vpop.f32.mrf.mxu0  ;;  %3387 = vadd.xlane.f32.xlu0 %v3386_v10  ;;  %1301 = vmatprep.mubr.f32.mxu1 %v13055_v61 }
 0x338   : > { %v3059_v0 = vadd.f32 %v7681_v55, %v13094_v62  ;;  %v8414_v55 = vld [vmem:[%s8531_s26 + $0x168] sm:$0xff] }
 0x339   : > { %v3053_v25 = vpop.f32.mrf.mxu0 }
 0x33a   : > { %v10241_v20 = vadd.f32 %v9969_v35, %v3059_v0  ;;  %v3054_v59 = vadd.f32 %v3053_v25, %v13095_v57  ;;  %7186 = vmatmul.mubr.msk.f32.gmra.mxu1 %vm343_vm0, %v8411_v21  ;;  %v8415_v57 = vld [vmem:[%s8531_s26 + $0x170] sm:$0xff] }
 0x33b   : > { %1307 = vmatprep.mubr.f32.mxu1 %v13055_v61 }
 0x33c   : > { %v10245_v46 = vadd.f32 %v9969_v35, %v3054_v59  ;;  %v3395_v58 = vsel %vm1505_vm1, %v10241_v20, 0.0 }
 0x33d   : > { %3396 = vadd.xlane.f32.xlu1 %v3395_v58 }
 0x33e   : > { %v3392_v53 = vsel %vm1505_vm1, %v10245_v46, 0.0  ;;  %7187 = vmatmul.mubr.msk.f32.gmra.mxu1 %vm343_vm0, %v8412_v52 }
 0x33f   : > { %v7684_v29 = vpop.f32.mrf.mxu0  ;;  %3393 = vadd.xlane.f32.xlu0 %v3392_v53  ;;  %1313 = vmatprep.mubr.f32.mxu1 %v13055_v61 }
 0x340   : > { %v3069_v34 = vadd.f32 %v7684_v29, %v13096_v15  ;;  %v8416_v15 = vld [vmem:[%s8531_s26 + $0x178] sm:$0xff] }
 0x341   : > { %v3063_v42 = vpop.f32.mrf.mxu0 }
 0x342   : > { %v10262_v60 = vadd.f32 %v9969_v35, %v3069_v34  ;;  %v3064_v50 = vadd.f32 %v3063_v42, %v13097_v18  ;;  %7188 = vmatmul.mubr.msk.f32.gmra.mxu1 %vm343_vm0, %v8413_v3  ;;  %v13102_v42 = vld [vmem:[#allocation60_spill] sm:$0xff] }
 0x343   : > { %1319 = vmatprep.mubr.f32.mxu1 %v13055_v61 }
 0x344   : > { %v10266_v2 = vadd.f32 %v9969_v35, %v3064_v50  ;;  %v3401_v19 = vsel %vm1505_vm1, %v10262_v60, 0.0  ;;  %v8417_v50 = vld [vmem:[%s8531_s26 + $0x180] sm:$0xff] }
 0x345   : > { %3402 = vadd.xlane.f32.xlu1 %v3401_v19  ;;  %v10314_v19 = vpop.f32.mrf.mxu1 }
 0x346   : > { %v3398_v45 = vsel %vm1505_vm1, %v10266_v2, 0.0  ;;  %7189 = vmatmul.mubr.msk.f32.gmra.mxu1 %vm343_vm0, %v8414_v55 }
 0x347   : > { %v7687_v13 = vpop.f32.mrf.mxu0  ;;  %3399 = vadd.xlane.f32.xlu0 %v3398_v45  ;;  %1325 = vmatprep.mubr.f32.mxu1 %v13055_v61 }
 0x348   : > { %v3079_v27 = vadd.f32 %v7687_v13, %v13098_v7  ;;  %v13103_v13 = vld [vmem:[#allocation59_spill] sm:$0xff] }
 0x349   : > { %v3073_v22 = vpop.f32.mrf.mxu0 }
 0x34a   : > { %v10280_v56 = vadd.f32 %v9969_v35, %v3079_v27  ;;  %v3074_v32 = vadd.f32 %v3073_v22, %v13099_v33  ;;  %7190 = vmatmul.mubr.msk.f32.gmra.mxu1 %vm343_vm0, %v8415_v57  ;;  %v7273_v33 = vld [vmem:[%s12828_s2 + $0x48] sm:$0xff]  ;;  %v8419_v57 = vld [vmem:[%s8531_s26 + $0x190] sm:$0xff] }
 0x34b   : > { %1331 = vmatprep.mubr.f32.mxu1 %v13055_v61  ;;  %7751 = vmatprep.subr.mxu1 %v7273_v33 }
 0x34c   : > { %v10284_v8 = vadd.f32 %v9969_v35, %v3074_v32  ;;  %v3407_v10 = vsel %vm1505_vm1, %v10280_v56, 0.0  ;;  %v8418_v32 = vld [vmem:[%s8531_s26 + $0x188] sm:$0xff]  ;;  %7752 = vmatpush3.msra.mxu1 %v7273_v33 }
 0x34d   : > { %3408 = vadd.xlane.f32.xlu1 %v3407_v10 }
 0x34e   : > { %v3404_v62 = vsel %vm1505_vm1, %v10284_v8, 0.0  ;;  %7191 = vmatmul.mubr.msk.f32.gmra.mxu1 %vm343_vm0, %v8416_v15 }
 0x34f   : > { %v7690_v0 = vpop.f32.mrf.mxu0  ;;  %3405 = vadd.xlane.f32.xlu0 %v3404_v62  ;;  %1337 = vmatprep.mubr.f32.mxu1 %v13055_v61 }
 0x350   : > { %v3089_v25 = vadd.f32 %v7690_v0, %v13100_v26  ;;  %v13107_v26 = vld [vmem:[#allocation62_spill] sm:$0xff] }
 0x351   : > { %v3083_v59 = vpop.f32.mrf.mxu0  ;;  %v10321_v27 = vpop.f32.mrf.mxu1 }
 0x352   : > { %v10298_v58 = vadd.f32 %v9969_v35, %v3089_v25  ;;  %v3084_v6 = vadd.f32 %v3083_v59, %v13101_v38  ;;  %7192 = vmatmul.mubr.msk.f32.gmra.mxu1 %vm343_vm0, %v8417_v50  ;;  %13104 = vst [vmem:[#allocation70_spill] sm:$0xff] %v10321_v27  ;;  %v13139_v27 = vld [vmem:[#allocation81_spill] sm:$0xff] }
 0x353   : > { %1343 = vmatprep.mubr.f32.mxu1 %v13055_v61  ;;  %v10333_v10 = vpop.f32.mrf.mxu1 }
 0x354   : > { %v10302_v53 = vadd.f32 %v9969_v35, %v3084_v6  ;;  %v3413_v29 = vsel %vm1505_vm1, %v10298_v58, 0.0  ;;  %13105 = vst [vmem:[#allocation73_spill] sm:$0xff] %v10333_v10 }
 0x355   : > { %3414 = vadd.xlane.f32.xlu1 %v3413_v29  ;;  %v10338_v0 = vpop.f32.mrf.mxu1  ;;  %v13109_v29 = vld [vmem:[#allocation61_spill] sm:$0xff] }
 0x356   : > { %v3410_v34 = vsel %vm1505_vm1, %v10302_v53, 0.0  ;;  %7193 = vmatmul.mubr.msk.f32.gmra.mxu1 %vm343_vm0, %v8418_v32  ;;  %13106 = vst [vmem:[#allocation72_spill] sm:$0xff] %v10338_v0  ;;  %v8421_v32 = vld [vmem:[%s8531_s26 + $0x1a0] sm:$0xff] }
 0x357   : > { %v7693_v21 = vpop.f32.mrf.mxu0  ;;  %3411 = vadd.xlane.f32.xlu0 %v3410_v34  ;;  %1349 = vmatprep.mubr.f32.mxu1 %v13055_v61  ;;  %v10343_v38 = vpop.f32.mrf.mxu1 }
 0x358   : > { %v3099_v18 = vadd.f32 %v7693_v21, %v13102_v42  ;;  %13108 = vst [vmem:[#allocation15_spill] sm:$0xff] %v10343_v38  ;;  %v8424_v38 = vld [vmem:[%s8531_s26 + $0x1b8] sm:$0xff] }
 0x359   : > { %v3093_v52 = vpop.f32.mrf.mxu0  ;;  %v10350_v34 = vpop.f32.mrf.mxu1 }
 0x35a   : > { %v10318_v45 = vadd.f32 %v9969_v35, %v3099_v18  ;;  %v3094_v7 = vadd.f32 %v3093_v52, %v13103_v13  ;;  %7194 = vmatmul.mubr.msk.f32.gmra.mxu1 %vm343_vm0, %v8419_v57  ;;  %13110 = vst [vmem:[#allocation18_spill] sm:$0xff] %v10350_v34  ;;  %v8420_v18 = vld [vmem:[%s8531_s26 + $0x198] sm:$0xff] }
 0x35b   : > { %1355 = vmatprep.mubr.f32.mxu1 %v13055_v61  ;;  %v10359_v50 = vpop.f32.mrf.mxu1 }
 0x35c   : > { %v10324_v3 = vadd.f32 %v9969_v35, %v3094_v7  ;;  %v3419_v22 = vsel %vm1505_vm1, %v10318_v45, 0.0  ;;  %13111 = vst [vmem:[#allocation76_spill] sm:$0xff] %v10359_v50 }
 0x35d   : > { %3420 = vadd.xlane.f32.xlu1 %v3419_v22  ;;  %v10364_v7 = vpop.f32.mrf.mxu1  ;;  %v13113_v22 = vld [vmem:[#allocation64_spill] sm:$0xff] }
 0x35e   : > { %v3416_v55 = vsel %vm1505_vm1, %v10324_v3, 0.0  ;;  %7195 = vmatmul.mubr.msk.f32.gmra.mxu1 %vm343_vm0, %v8420_v18  ;;  %13112 = vst [vmem:[#allocation79_spill] sm:$0xff] %v10364_v7 }
 0x35f   : > { %v7696_v62 = vpop.f32.mrf.mxu0  ;;  %3417 = vadd.xlane.f32.xlu0 %v3416_v55  ;;  %1361 = vmatprep.mubr.f32.mxu1 %v13055_v61 }
 0x360   : > { %v3109_v25 = vadd.f32 %v7696_v62, %v13107_v26  ;;  %v10369_v62 = vpop.f32.mrf.mxu1 }
 0x361   : > { %v3103_v59 = vpop.f32.mrf.mxu0  ;;  %13114 = vst [vmem:[#allocation75_spill] sm:$0xff] %v10369_v62 }
 0x362   : > { %v10347_v6 = vadd.f32 %v9969_v35, %v3109_v25  ;;  %v3104_v15 = vadd.f32 %v3103_v59, %v13109_v29  ;;  %7196 = vmatmul.mubr.msk.f32.gmra.mxu1 %vm343_vm0, %v8421_v32  ;;  %v13115_v25 = vld [vmem:[#allocation63_spill] sm:$0xff] }
 0x363   : > { %1367 = vmatprep.mubr.f32.mxu1 %v13055_v61 }
 0x364   : > { %v10353_v21 = vadd.f32 %v9969_v35, %v3104_v15  ;;  %v3425_v42 = vsel %vm1505_vm1, %v10347_v6, 0.0  ;;  %v10376_v15 = vpop.f32.mrf.mxu1 }
 0x365   : > { %3426 = vadd.xlane.f32.xlu1 %v3425_v42  ;;  %13116 = vst [vmem:[#allocation88_spill] sm:$0xff] %v10376_v15  ;;  %v13127_v15 = vld [vmem:[#allocation68_spill] sm:$0xff] }
 0x366   : > { %v3422_v52 = vsel %vm1505_vm1, %v10353_v21, 0.0  ;;  %v10388_v32 = vpop.f32.mrf.mxu1 }
 0x367   : > { %v7699_v13 = vpop.f32.mrf.mxu0  ;;  %3423 = vadd.xlane.f32.xlu0 %v3422_v52  ;;  %13117 = vst [vmem:[#allocation78_spill] sm:$0xff] %v10388_v32 }
 0x368   : > { %v3119_v33 = vadd.f32 %v7699_v13, %v13113_v22  ;;  %v8422_v13 = vld [vmem:[%s8531_s26 + $0x1a8] sm:$0xff] }
 0x369   : > { %v3113_v55 = vpop.f32.mrf.mxu0  ;;  %7197 = vmatmul.mubr.msk.f32.gmra.mxu1 %vm343_vm0, %v8422_v13 }
 0x36a   : > { %v10373_v26 = vadd.f32 %v9969_v35, %v3119_v33  ;;  %v3114_v57 = vadd.f32 %v3113_v55, %v13115_v25  ;;  %v3325_v59 = vpop.xlane.xlu1 %3324  ;;  %1373 = vmatprep.mubr.f32.mxu1 %v13055_v61 }
 0x36b   : > { %v3513_v29 = vmul.f32 0.015625, %v3325_v59  ;;  %v10398_v59 = vpop.f32.mrf.mxu1 }
 0x36c   : > { %v10379_v42 = vadd.f32 %v9969_v35, %v3114_v57  ;;  %v3322_v18 = vpop.xlane.xlu0 %3321  ;;  %v3431_v52 = vsel %vm1505_vm1, %v10373_v26, 0.0  ;;  %13118 = vst [vmem:[#allocation21_spill] sm:$0xff] %v10398_v59 }
 0x36d   : > { %v10386_v22 = vsub.f32 %v9993_v37, %v3513_v29  ;;  %v3512_v33 = vmul.f32 0.015625, %v3322_v18  ;;  %3432 = vadd.xlane.f32.xlu1 %v3431_v52  ;;  %v8423_v29 = vld [vmem:[%s8531_s26 + $0x1b0] sm:$0xff]  ;;  %v13119_v18 = vld [vmem:[#allocation66_spill] sm:$0xff] }
 0x36e   : > { %v3428_v55 = vsel %vm1505_vm1, %v10379_v42, 0.0  ;;  %7198 = vmatmul.mubr.msk.f32.gmra.mxu1 %vm343_vm0, %v8423_v29  ;;  %v13121_v29 = vld [vmem:[#allocation65_spill] sm:$0xff] }
 0x36f   : > { %v10394_v25 = vsub.f32 %v10004_v40, %v3512_v33  ;;  %3429 = vadd.xlane.f32.xlu0 %v3428_v55  ;;  %v3641_v57 = vmul.f32 %v10386_v22, %v10386_v22  ;;  %v10406_v40 = vpop.f32.mrf.mxu1  ;;  %1379 = vmatprep.mubr.f32.mxu1 %v13055_v61 }
 0x370   : > { %v7702_v37 = vpop.f32.mrf.mxu0  ;;  %13120 = vst [vmem:[#allocation24_spill] sm:$0xff] %v10406_v40 }
 0x371   : > { %v3129_v52 = vadd.f32 %v7702_v37, %v13119_v18  ;;  %v3707_v13 = vsel %vm1505_vm1, %v3641_v57, 0.0  ;;  %v3640_v32 = vmul.f32 %v10394_v25, %v10394_v25  ;;  %v10414_v18 = vpop.f32.mrf.mxu1 }
 0x372   : > { %v3331_v33 = vpop.xlane.xlu1 %3330  ;;  %3708 = vadd.xlane.f32.xlu1 %v3707_v13  ;;  %v3123_v55 = vpop.f32.mrf.mxu0  ;;  %13122 = vst [vmem:[#allocation84_spill] sm:$0xff] %v10414_v18  ;;  %7199 = vmatmul.mubr.msk.f32.gmra.mxu1 %vm343_vm0, %v8424_v38 }
 0x373   : > { %v10410_v50 = vadd.f32 %v9969_v35, %v3129_v52  ;;  %v3515_v62 = vmul.f32 0.015625, %v3331_v33  ;;  %v3124_v10 = vadd.f32 %v3123_v55, %v13121_v29  ;;  %v3704_v37 = vsel %vm1505_vm1, %v3640_v32, 0.0  ;;  %v10426_v55 = vpop.f32.mrf.mxu1  ;;  %1385 = vmatprep.mubr.f32.mxu1 %v13055_v61  ;;  %v8425_v29 = vld [vmem:[%s8531_s26 + $0x1c0] sm:$0xff] }
 0x374   : > { %3705 = vadd.xlane.f32.xlu0 %v3704_v37  ;;  %v3328_v57 = vpop.xlane.xlu0 %3327  ;;  %13123 = vst [vmem:[#allocation30_spill] sm:$0xff] %v10426_v55  ;;  %v13125_v37 = vld [vmem:[#allocation71_spill] sm:$0xff] }
 0x375   : > { %v10419_v40 = vsub.f32 %v10029_v17, %v3515_v62  ;;  %v10422_v13 = vadd.f32 %v9969_v35, %v3124_v10  ;;  %v3514_v52 = vmul.f32 0.015625, %v3328_v57  ;;  %v3437_v33 = vsel %vm1505_vm1, %v10410_v50, 0.0  ;;  %v10436_v10 = vpop.f32.mrf.mxu1 }
 0x376   : > { %3438 = vadd.xlane.f32.xlu1 %v3437_v33  ;;  %13124 = vst [vmem:[#allocation82_spill] sm:$0xff] %v10436_v10  ;;  %7200 = vmatmul.mubr.msk.f32.gmra.mxu1 %vm343_vm0, %v8425_v29 }
 0x377   : > { %v10430_v32 = vsub.f32 %v10038_v44, %v3514_v52  ;;  %v3434_v38 = vsel %vm1505_vm1, %v10422_v13, 0.0  ;;  %v3643_v17 = vmul.f32 %v10419_v40, %v10419_v40  ;;  %v10444_v52 = vpop.f32.mrf.mxu1  ;;  %1391 = vmatprep.mubr.f32.mxu1 %v13055_v61 }
 0x378   : > { %v7705_v62 = vpop.f32.mrf.mxu0  ;;  %3435 = vadd.xlane.f32.xlu0 %v3434_v38  ;;  %13126 = vst [vmem:[#allocation27_spill] sm:$0xff] %v10444_v52 }
 0x379   : > { %v3139_v57 = vadd.f32 %v7705_v62, %v13125_v37  ;;  %v3713_v33 = vsel %vm1505_vm1, %v3643_v17, 0.0  ;;  %v3642_v44 = vmul.f32 %v10430_v32, %v10430_v32  ;;  %v8426_v37 = vld [vmem:[%s8531_s26 + $0x1c8] sm:$0xff] }
 0x37a   : > { %v3337_v55 = vpop.xlane.xlu1 %3336  ;;  %3714 = vadd.xlane.f32.xlu1 %v3713_v33  ;;  %v3133_v18 = vpop.f32.mrf.mxu0  ;;  %7201 = vmatmul.mubr.msk.f32.gmra.mxu1 %vm343_vm0, %v8426_v37 }
 0x37b   : > { %v10448_v38 = vadd.f32 %v9969_v35, %v3139_v57  ;;  %v3517_v10 = vmul.f32 0.015625, %v3337_v55  ;;  %v3134_v29 = vadd.f32 %v3133_v18, %v13127_v15  ;;  %v3710_v62 = vsel %vm1505_vm1, %v3642_v44, 0.0  ;;  %v10462_v57 = vpop.f32.mrf.mxu1  ;;  %1397 = vmatprep.mubr.f32.mxu1 %v13055_v61  ;;  %v8427_v44 = vld [vmem:[%s8531_s26 + $0x1d0] sm:$0xff] }
 0x37c   : > { %3711 = vadd.xlane.f32.xlu0 %v3710_v62  ;;  %v3334_v17 = vpop.xlane.xlu0 %3333  ;;  %13128 = vst [vmem:[#allocation33_spill] sm:$0xff] %v10462_v57  ;;  %v13131_v57 = vld [vmem:[#allocation74_spill] sm:$0xff] }
 0x37d   : > { %v10455_v52 = vsub.f32 %v10056_v63, %v3517_v10  ;;  %v10458_v33 = vadd.f32 %v9969_v35, %v3134_v29  ;;  %v3516_v59 = vmul.f32 0.015625, %v3334_v17  ;;  %v3443_v55 = vsel %vm1505_vm1, %v10448_v38, 0.0  ;;  %v13129_v29 = vld [vmem:[#allocation77_spill] sm:$0xff] }
 0x37e   : > { %3444 = vadd.xlane.f32.xlu1 %v3443_v55  ;;  %7202 = vmatmul.mubr.msk.f32.gmra.mxu1 %vm343_vm0, %v8427_v44 }
 0x37f   : > { %v10466_v15 = vsub.f32 %v10063_v31, %v3516_v59  ;;  %v3440_v18 = vsel %vm1505_vm1, %v10458_v33, 0.0  ;;  %v3645_v63 = vmul.f32 %v10455_v52, %v10455_v52  ;;  %v10478_v59 = vpop.f32.mrf.mxu1  ;;  %1403 = vmatprep.mubr.f32.mxu1 %v13055_v61 }
 0x380   : > { %v7708_v10 = vpop.f32.mrf.mxu0  ;;  %3441 = vadd.xlane.f32.xlu0 %v3440_v18  ;;  %13130 = vst [vmem:[#allocation36_spill] sm:$0xff] %v10478_v59 }
 0x381   : > { %v3149_v62 = vadd.f32 %v7708_v10, %v13129_v29  ;;  %v3719_v17 = vsel %vm1505_vm1, %v3645_v63, 0.0  ;;  %v3644_v31 = vmul.f32 %v10466_v15, %v10466_v15  ;;  %v10486_v10 = vpop.f32.mrf.mxu1  ;;  %v8428_v29 = vld [vmem:[%s8531_s26 + $0x1d8] sm:$0xff] }
 0x382   : > { %3720 = vadd.xlane.f32.xlu1 %v3719_v17  ;;  %v3143_v37 = vpop.f32.mrf.mxu0  ;;  %13132 = vst [vmem:[#allocation39_spill] sm:$0xff] %v10486_v10  ;;  %7203 = vmatmul.mubr.msk.f32.gmra.mxu1 %vm343_vm0, %v8428_v29 }
 0x383   : > { %v10482_v55 = vadd.f32 %v9969_v35, %v3149_v62  ;;  %v3343_v18 = vpop.xlane.xlu1 %3342  ;;  %v3144_v34 = vadd.f32 %v3143_v37, %v13131_v57  ;;  %v3716_v44 = vsel %vm1505_vm1, %v3644_v31, 0.0  ;;  %v10495_v7 = vpop.f32.mrf.mxu1  ;;  %1409 = vmatprep.mubr.f32.mxu1 %v13055_v61 }
 0x384   : > { %v3519_v63 = vmul.f32 0.015625, %v3343_v18  ;;  %3717 = vadd.xlane.f32.xlu0 %v3716_v44  ;;  %13133 = vst [vmem:[#allocation89_spill] sm:$0xff] %v10495_v7  ;;  %v8429_v7 = vld [vmem:[%s8531_s26 + $0x1e0] sm:$0xff] }
 0x385   : > { %v10491_v59 = vadd.f32 %v9969_v35, %v3144_v34  ;;  %v3340_v17 = vpop.xlane.xlu0 %3339  ;;  %v3449_v62 = vsel %vm1505_vm1, %v10482_v55, 0.0  ;;  %v10503_v18 = vpop.f32.mrf.mxu1 }
 0x386   : > { %v10499_v57 = vsub.f32 %v10076_v39, %v3519_v63  ;;  %v3518_v31 = vmul.f32 0.015625, %v3340_v17  ;;  %3450 = vadd.xlane.f32.xlu1 %v3449_v62  ;;  %13135 = vst [vmem:[#allocation92_spill] sm:$0xff] %v10503_v18  ;;  %7204 = vmatmul.mubr.msk.f32.gmra.mxu1 %vm343_vm0, %v8429_v7  ;;  %v13137_v39 = vld [vmem:[#allocation85_spill] sm:$0xff] }
 0x387   : > { %v3446_v37 = vsel %vm1505_vm1, %v10491_v59, 0.0  ;;  %v10513_v17 = vpop.f32.mrf.mxu1  ;;  %1415 = vmatprep.mubr.f32.mxu1 %v13055_v61 }
 0x388   : > { %13134 = vst [vmem:[#allocation91_spill] sm:$0xff] %v10499_v57  ;;  %v10506_v34 = vsub.f32 %v10084_v11, %v3518_v31  ;;  %v7711_v44 = vpop.f32.mrf.mxu0  ;;  %3447 = vadd.xlane.f32.xlu0 %v3446_v37  ;;  %v3647_v29 = vmul.f32 %v10499_v57, %v10499_v57  ;;  %13138 = vst [vmem:[#allocation94_spill] sm:$0xff] %v10513_v17  ;;  %v8430_v17 = vld [vmem:[%s8531_s26 + $0x1e8] sm:$0xff] }
 0x389   : > { %v3159_v63 = vadd.f32 %v7711_v44, %v13137_v39  ;;  %v10523_v0 = vpop.f32.mrf.mxu1 }
 0x38a   : > { %13136 = vst [vmem:[#allocation93_spill] sm:$0xff] %v10506_v34  ;;  %v3349_v62 = vpop.xlane.xlu1 %3348  ;;  %v3725_v18 = vsel %vm1505_vm1, %v3647_v29, 0.0  ;;  %v3153_v11 = vpop.f32.mrf.mxu0  ;;  %v3646_v31 = vmul.f32 %v10506_v34, %v10506_v34  ;;  %13140 = vst [vmem:[#allocation95_spill] sm:$0xff] %v10523_v0  ;;  %7205 = vmatmul.mubr.msk.f32.gmra.mxu1 %vm343_vm0, %v8430_v17  ;;  %v7272_v17 = vld [vmem:[%s12828_s2 + $0x40] sm:$0xff] }
 0x38b   : > { %v10520_v37 = vadd.f32 %v9969_v35, %v3159_v63  ;;  %v3521_v10 = vmul.f32 0.015625, %v3349_v62  ;;  %3726 = vadd.xlane.f32.xlu1 %v3725_v18  ;;  %v3154_v7 = vadd.f32 %v3153_v11, %v13139_v27  ;;  %v10536_v27 = vpop.f32.mrf.mxu1  ;;  %1421 = vmatprep.mubr.f32.mxu1 %v13055_v61 }
 0x38c   : > { %v3722_v44 = vsel %vm1505_vm1, %v3646_v31, 0.0  ;;  %v3346_v39 = vpop.xlane.xlu0 %3345  ;;  %13142 = vst [vmem:[#allocation83_spill] sm:$0xff] %v10536_v27  ;;  %7753 = vmatprep.subr.mxu1 %v7272_v17 }
 0x38d   : > { %v10529_v29 = vsub.f32 %v10094_v14, %v3521_v10  ;;  %v10532_v1 = vadd.f32 %v9969_v35, %v3154_v7  ;;  %3723 = vadd.xlane.f32.xlu0 %v3722_v44  ;;  %v3520_v63 = vmul.f32 0.015625, %v3346_v39  ;;  %v3455_v18 = vsel %vm1505_vm1, %v10520_v37, 0.0  ;;  %v10549_v11 = vpop.f32.mrf.mxu1  ;;  %7754 = vmatpush3.msra.mxu1 %v7272_v17 }
 0x38e   : > { %13144 = vst [vmem:[#allocation97_spill] sm:$0xff] %v10549_v11 }
 0x38f   : > { %13141 = vst [vmem:[#allocation96_spill] sm:$0xff] %v10529_v29  ;;  %v10543_v14 = vsub.f32 %v10103_v51, %v3520_v63  ;;  %3456 = vadd.xlane.f32.xlu1 %v3455_v18  ;;  %v3452_v10 = vsel %vm1505_vm1, %v10532_v1, 0.0  ;;  %v3649_v62 = vmul.f32 %v10529_v29, %v10529_v29  ;;  %v10555_v39 = vpop.f32.mrf.mxu1  ;;  %v8431_v63 = vld [vmem:[%s8531_s26 + $0x1f0] sm:$0xff] }
 0x390   : > { %v7714_v31 = vpop.f32.mrf.mxu0  ;;  %13145 = vst [vmem:[#allocation69_spill] sm:$0xff] %v10555_v39  ;;  %7206 = vmatmul.mubr.msk.f32.gmra.mxu1 %vm343_vm0, %v8431_v63 }
 0x391   : > { %13143 = vst [vmem:[#allocation9_spill] sm:$0xff] %v10543_v14  ;;  %v3169_v7 = vadd.f32 %v7714_v31, %v9974_v48  ;;  %3453 = vadd.xlane.f32.xlu0 %v3452_v10  ;;  %v3731_v44 = vsel %vm1505_vm1, %v3649_v62, 0.0  ;;  %v3648_v51 = vmul.f32 %v10543_v14, %v10543_v14  ;;  %1427 = vmatprep.mubr.f32.mxu1 %v13055_v61  ;;  %v13146_v48 = vld [vmem:[#allocation90_spill] sm:$0xff]  ;;  %v10565_v62 = vpop.f32.mrf.mxu1  ;;  %v8432_v61 = vld [vmem:[%s8531_s26 + $0x1f8] sm:$0xff] }
 0x392   : > { %v3163_v18 = vpop.f32.mrf.mxu0  ;;  %13147 = vst [vmem:[#allocation99_spill] sm:$0xff] %v10565_v62 }
 0x393   : > { %v10561_v27 = vadd.f32 %v9969_v35, %v3169_v7  ;;  %3732 = vadd.xlane.f32.xlu1 %v3731_v44  ;;  %v3164_v17 = vadd.f32 %v3163_v18, %v13146_v48  ;;  %v3728_v10 = vsel %vm1505_vm1, %v3648_v51, 0.0  ;;  %v10572_v11 = vpop.f32.mrf.mxu1 }
 0x394   : > { %13149 = vst [vmem:[#allocation67_spill] sm:$0xff] %v10572_v11  ;;  %7207 = vmatmul.mubr.msk.f32.gmra.mxu1 %vm343_vm0, %v8432_v61  ;;  %v13154_v61 = vld [vmem:[#allocation4_spill] sm:$0xff] }
 0x395   : > { %v10568_v31 = vadd.f32 %v9969_v35, %v3164_v17  ;;  %v7717_v39 = vpop.f32.mrf.mxu0  ;;  %3729 = vadd.xlane.f32.xlu0 %v3728_v10  ;;  %v3461_v63 = vsel %vm1505_vm1, %v10561_v27, 0.0  ;;  %v10578_v48 = vpop.f32.mrf.mxu1  ;;  %v13151_v17 = vld [vmem:[#allocation6_spill] sm:$0xff] }
 0x396   : > { %v3355_v7 = vpop.xlane.xlu1 %3354  ;;  %13150 = vst [vmem:[#allocation87_spill] sm:$0xff] %v10578_v48  ;;  %v3179_v62 = vadd.f32 %v7717_v39, %v13151_v17 }
 0x397   : > { %13148 = vst [vmem:[#allocation98_spill] sm:$0xff] %v10568_v31  ;;  %v3523_v44 = vmul.f32 0.015625, %v3355_v7  ;;  %3462 = vadd.xlane.f32.xlu1 %v3461_v63  ;;  %v3173_v18 = vpop.f32.mrf.mxu0  ;;  %v3458_v51 = vsel %vm1505_vm1, %v10568_v31, 0.0  ;;  %v10584_v29 = vpop.f32.mrf.mxu1 }
 0x398   : > { %v3352_v10 = vpop.xlane.xlu0 %3351  ;;  %13153 = vst [vmem:[#allocation5_spill] sm:$0xff] %v10584_v29  ;;  %v3174_v7 = vadd.f32 %v3173_v18, %v13154_v61  ;;  %v10593_v39 = vadd.f32 %v9969_v35, %v3179_v62  ;;  %v13161_v62 = vld [vmem:[#allocation8_spill] sm:$0xff] }
 0x399   : > { %v10582_v0 = vsub.f32 %v10118_v49, %v3523_v44  ;;  %v7720_v14 = vpop.f32.mrf.mxu0  ;;  %3459 = vadd.xlane.f32.xlu0 %v3458_v51  ;;  %v3522_v11 = vmul.f32 0.015625, %v3352_v10  ;;  %v10595_v49 = vpop.f32.mrf.mxu1  ;;  %v13158_v44 = vld [vmem:[#allocation11_spill] sm:$0xff] }
 0x39a   : > { %13156 = vst [vmem:[#allocation10_spill] sm:$0xff] %v10593_v39  ;;  %13157 = vst [vmem:[#allocation7_spill] sm:$0xff] %v10595_v49  ;;  %v3189_v51 = vadd.f32 %v7720_v14, %v13158_v44  ;;  %v10604_v61 = vadd.f32 %v9969_v35, %v3174_v7  ;;  %v3467_v7 = vsel %vm1505_vm1, %v10593_v39, 0.0 }
 0x39b   : > { %13152 = vst [vmem:[#allocation12_spill] sm:$0xff] %v10582_v0  ;;  %v10588_v63 = vsub.f32 %v10124_v54, %v3522_v11  ;;  %v3361_v34 = vpop.xlane.xlu1 %3360  ;;  %v3183_v57 = vpop.f32.mrf.mxu0  ;;  %v3651_v48 = vmul.f32 %v10582_v0, %v10582_v0 }
 0x39c   : > { %v3525_v17 = vmul.f32 0.015625, %v3361_v34  ;;  %v10601_v11 = vpop.f32.mrf.mxu1  ;;  %13160 = vst [vmem:[#allocation13_spill] sm:$0xff] %v10604_v61  ;;  %v3184_v0 = vadd.f32 %v3183_v57, %v13161_v62 }
 0x39d   : > { %13155 = vst [vmem:[#allocation3_spill] sm:$0xff] %v10588_v63  ;;  %v7723_v10 = vpop.f32.mrf.mxu0  ;;  %v3358_v29 = vpop.xlane.xlu0 %3357  ;;  %v3737_v18 = vsel %vm1505_vm1, %v3651_v48, 0.0  ;;  %v3650_v54 = vmul.f32 %v10588_v63, %v10588_v63  ;;  %13159 = vst [vmem:[#allocation16_spill] sm:$0xff] %v10601_v11  ;;  %v10611_v48 = vadd.f32 %v9969_v35, %v3189_v51  ;;  %v3464_v51 = vsel %vm1505_vm1, %v10604_v61, 0.0 }
 0x39e   : > { %3738 = vadd.xlane.f32.xlu1 %v3737_v18  ;;  %v3524_v31 = vmul.f32 0.015625, %v3358_v29  ;;  %v10608_v34 = vpop.f32.mrf.mxu1  ;;  %v10614_v44 = vsub.f32 %v10133_v41, %v3525_v17  ;;  %v10621_v57 = vadd.f32 %v9969_v35, %v3184_v0  ;;  %v13169_v17 = vld [vmem:[#allocation17_spill] sm:$0xff] }
 0x39f   : > { %v3193_v49 = vpop.f32.mrf.mxu0  ;;  %v3734_v14 = vsel %vm1505_vm1, %v3650_v54, 0.0  ;;  %13162 = vst [vmem:[#allocation22_spill] sm:$0xff] %v10608_v34  ;;  %13163 = vst [vmem:[#allocation19_spill] sm:$0xff] %v10611_v48  ;;  %v3199_v62 = vadd.f32 %v7723_v10, %v13169_v17 }
 0x3a0   : > { %3735 = vadd.xlane.f32.xlu0 %v3734_v14  ;;  %13164 = vst [vmem:[#allocation28_spill] sm:$0xff] %v10614_v44  ;;  %v10618_v11 = vpop.f32.mrf.mxu1  ;;  %13166 = vst [vmem:[#allocation34_spill] sm:$0xff] %v10621_v57  ;;  %v10624_v29 = vsub.f32 %v10142_v28, %v3524_v31  ;;  %v3653_v0 = vmul.f32 %v10614_v44, %v10614_v44  ;;  %v13171_v31 = vld [vmem:[#allocation14_spill] sm:$0xff] }
 0x3a1   : > { %v7726_v18 = vpop.f32.mrf.mxu0  ;;  %13165 = vst [vmem:[#allocation25_spill] sm:$0xff] %v10618_v11  ;;  %v3367_v11 = vpop.xlane.xlu1 %3366  ;;  %v3194_v34 = vadd.f32 %v3193_v49, %v13171_v31 }
 0x3a2   : > { %3468 = vadd.xlane.f32.xlu1 %v3467_v7  ;;  %13167 = vst [vmem:[#allocation31_spill] sm:$0xff] %v10624_v29  ;;  %v10628_v41 = vpop.f32.mrf.mxu1  ;;  %v3473_v7 = vsel %vm1505_vm1, %v10611_v48, 0.0  ;;  %v3364_v63 = vpop.xlane.xlu0 %3363  ;;  %v3652_v10 = vmul.f32 %v10624_v29, %v10624_v29  ;;  %v10645_v48 = vadd.f32 %v9969_v35, %v3199_v62  ;;  %v3527_v44 = vmul.f32 0.015625, %v3367_v11  ;;  %v13175_v29 = vld [vmem:[#allocation20_spill] sm:$0xff] }
 0x3a3   : > { %v3203_v54 = vpop.f32.mrf.mxu0  ;;  %13168 = vst [vmem:[#allocation40_spill] sm:$0xff] %v10628_v41  ;;  %v10652_v31 = vadd.f32 %v9969_v35, %v3194_v34 }
 0x3a4   : > { %3465 = vadd.xlane.f32.xlu0 %v3464_v51  ;;  %v10635_v28 = vpop.f32.mrf.mxu1  ;;  %v3470_v51 = vsel %vm1505_vm1, %v10621_v57, 0.0  ;;  %v3526_v57 = vmul.f32 0.015625, %v3364_v63  ;;  %v3204_v39 = vadd.f32 %v3203_v54, %v13175_v29  ;;  %v10659_v11 = vsub.f32 %v10146_v4, %v3527_v44 }
 0x3a5   : > { %v7729_v14 = vpop.f32.mrf.mxu0  ;;  %13170 = vst [vmem:[#allocation37_spill] sm:$0xff] %v10635_v28  ;;  %v3743_v28 = vsel %vm1505_vm1, %v3653_v0, 0.0  ;;  %v3479_v0 = vsel %vm1505_vm1, %v10645_v48, 0.0  ;;  %v3476_v54 = vsel %vm1505_vm1, %v10652_v31, 0.0 }
 0x3a6   : > { %3474 = vadd.xlane.f32.xlu1 %v3473_v7  ;;  %v10642_v41 = vpop.f32.mrf.mxu1  ;;  %v13173_v7 = vld [vmem:[#allocation23_spill] sm:$0xff]  ;;  %13177 = vst [vmem:[#allocation43_spill] sm:$0xff] %v10659_v11  ;;  %v10669_v63 = vsub.f32 %v10156_v47, %v3526_v57  ;;  %v10672_v29 = vadd.f32 %v9969_v35, %v3204_v39  ;;  %v3373_v47 = vpop.xlane.xlu1 %3372  ;;  %v13184_v39 = vld [vmem:[#allocation26_spill] sm:$0xff] }
 0x3a7   : > { %v3213_v17 = vpop.f32.mrf.mxu0  ;;  %13172 = vst [vmem:[#allocation42_spill] sm:$0xff] %v10642_v41  ;;  %v3209_v61 = vadd.f32 %v7726_v18, %v13173_v7  ;;  %v3655_v7 = vmul.f32 %v10659_v11, %v10659_v11 }
 0x3a8   : > { %3471 = vadd.xlane.f32.xlu0 %v3470_v51  ;;  %v10649_v49 = vpop.f32.mrf.mxu1  ;;  %v3740_v51 = vsel %vm1505_vm1, %v3652_v10, 0.0  ;;  %13179 = vst [vmem:[#allocation45_spill] sm:$0xff] %v10669_v63  ;;  %13180 = vst [vmem:[#allocation48_spill] sm:$0xff] %v10672_v29 }
 0x3a9   : > { %13174 = vst [vmem:[#allocation41_spill] sm:$0xff] %v10649_v49  ;;  %v7732_v41 = vpop.f32.mrf.mxu0  ;;  %v10662_v18 = vadd.f32 %v9969_v35, %v3209_v61  ;;  %v13182_v61 = vld [vmem:[#allocation29_spill] sm:$0xff]  ;;  %v3654_v49 = vmul.f32 %v10669_v63, %v10669_v63  ;;  %v13188_v63 = vld [vmem:[#allocation32_spill] sm:$0xff] }
 0x3aa   : > { %3744 = vadd.xlane.f32.xlu1 %v3743_v28  ;;  %v10656_v62 = vpop.f32.mrf.mxu1  ;;  %v3219_v28 = vadd.f32 %v7729_v14, %v13182_v61 }
 0x3ab   : > { %13176 = vst [vmem:[#allocation44_spill] sm:$0xff] %v10656_v62  ;;  %v3223_v4 = vpop.f32.mrf.mxu0  ;;  %v3485_v10 = vsel %vm1505_vm1, %v10662_v18, 0.0 }
 0x3ac   : > { %3741 = vadd.xlane.f32.xlu0 %v3740_v51  ;;  %v10666_v34 = vpop.f32.mrf.mxu1  ;;  %v3214_v51 = vadd.f32 %v3213_v17, %v13184_v39 }
 0x3ad   : > { %13178 = vst [vmem:[#allocation46_spill] sm:$0xff] %v10666_v34  ;;  %v7735_v14 = vpop.f32.mrf.mxu0  ;;  %v10693_v34 = vadd.f32 %v9969_v35, %v3219_v28 }
 0x3ae   : > { %3480 = vadd.xlane.f32.xlu1 %v3479_v0  ;;  %v10676_v44 = vpop.f32.mrf.mxu1  ;;  %v3370_v0 = vpop.xlane.xlu0 %3369  ;;  %v10700_v39 = vadd.f32 %v9969_v35, %v3214_v51 }
 0x3af   : > { %13181 = vst [vmem:[#allocation47_spill] sm:$0xff] %v10676_v44  ;;  %v3529_v44 = vmul.f32 0.015625, %v3373_v47  ;;  %v3528_v11 = vmul.f32 0.015625, %v3370_v0 }
 0x3b0   : > { %3477 = vadd.xlane.f32.xlu0 %v3476_v54  ;;  %v10683_v57 = vpop.f32.mrf.mxu1  ;;  %v3482_v54 = vsel %vm1505_vm1, %v10672_v29, 0.0  ;;  %v3224_v29 = vadd.f32 %v3223_v4, %v13188_v63  ;;  %v3488_v4 = vsel %vm1505_vm1, %v10700_v39, 0.0 }
 0x3b1   : > { %13183 = vst [vmem:[#allocation50_spill] sm:$0xff] %v10683_v57  ;;  %v3749_v57 = vsel %vm1505_vm1, %v3655_v7, 0.0  ;;  %v10707_v47 = vsub.f32 %v10166_v9, %v3529_v44  ;;  %v3491_v7 = vsel %vm1505_vm1, %v10693_v34, 0.0  ;;  %v10717_v63 = vsub.f32 %v10170_v23, %v3528_v11  ;;  %v3379_v23 = vpop.xlane.xlu1 %3378 }
 0x3b2   : > { %3486 = vadd.xlane.f32.xlu1 %v3485_v10  ;;  %v10690_v61 = vpop.f32.mrf.mxu1  ;;  %v13186_v10 = vld [vmem:[#allocation35_spill] sm:$0xff] }
 0x3b3   : > { %13185 = vst [vmem:[#allocation49_spill] sm:$0xff] %v10690_v61  ;;  %v3229_v62 = vadd.f32 %v7732_v41, %v13186_v10  ;;  %v3233_v61 = vpop.f32.mrf.mxu0  ;;  %13190 = vst [vmem:[#allocation54_spill] sm:$0xff] %v10707_v47  ;;  %v3657_v10 = vmul.f32 %v10707_v47, %v10707_v47  ;;  %v13200_v47 = vld [vmem:[#allocation86_spill] sm:$0xff] }
 0x3b4   : > { %3483 = vadd.xlane.f32.xlu0 %v3482_v54  ;;  %v10697_v17 = vpop.f32.mrf.mxu1  ;;  %v3746_v54 = vsel %vm1505_vm1, %v3654_v49, 0.0  ;;  %13192 = vst [vmem:[#allocation56_spill] sm:$0xff] %v10717_v63  ;;  %v10720_v49 = vadd.f32 %v9969_v35, %v3224_v29  ;;  %v13197_v29 = vld [vmem:[#allocation38_spill] sm:$0xff] }
 0x3b5   : > { %13187 = vst [vmem:[#allocation52_spill] sm:$0xff] %v10697_v17  ;;  %v10710_v41 = vadd.f32 %v9969_v35, %v3229_v62  ;;  %v7738_v9 = vpop.f32.mrf.mxu0  ;;  %v13195_v62 = vld [vmem:[#allocation80_spill] sm:$0xff] }
 0x3b6   : > { %3750 = vadd.xlane.f32.xlu1 %v3749_v57  ;;  %v10704_v28 = vpop.f32.mrf.mxu1  ;;  %13193 = vst [vmem:[#allocation55_spill] sm:$0xff] %v10720_v49  ;;  %v3239_v51 = vadd.f32 %v7735_v14, %v13195_v62 }
 0x3b7   : > { %13189 = vst [vmem:[#allocation51_spill] sm:$0xff] %v10704_v28  ;;  %v3497_v0 = vsel %vm1505_vm1, %v10710_v41, 0.0  ;;  %v3243_v14 = vpop.f32.mrf.mxu0  ;;  %v3531_v28 = vmul.f32 0.015625, %v3379_v23 }
 0x3b8   : > { %3747 = vadd.xlane.f32.xlu0 %v3746_v54  ;;  %v10714_v57 = vpop.f32.mrf.mxu1  ;;  %v3234_v54 = vadd.f32 %v3233_v61, %v13197_v29  ;;  %v10741_v17 = vadd.f32 %v9969_v35, %v3239_v51  ;;  %v3385_v61 = vpop.xlane.xlu1 %3384 }
 0x3b9   : > { %13191 = vst [vmem:[#allocation53_spill] sm:$0xff] %v10714_v57  ;;  %v3656_v57 = vmul.f32 %v10717_v63, %v10717_v63 }
 0x3ba   : > { %3492 = vadd.xlane.f32.xlu1 %v3491_v7  ;;  %v10724_v44 = vpop.f32.mrf.mxu1  ;;  %v3376_v7 = vpop.xlane.xlu0 %3375  ;;  %v3503_v23 = vsel %vm1505_vm1, %v10741_v17, 0.0 }
 0x3bb   : > { %13194 = vst [vmem:[#allocation58_spill] sm:$0xff] %v10724_v44  ;;  %v10748_v44 = vadd.f32 %v9969_v35, %v3234_v54  ;;  %v3530_v63 = vmul.f32 0.015625, %v3376_v7 }
 0x3bc   : > { %3489 = vadd.xlane.f32.xlu0 %v3488_v4  ;;  %v10731_v11 = vpop.f32.mrf.mxu1  ;;  %v3494_v4 = vsel %vm1505_vm1, %v10720_v49, 0.0 }
 0x3bd   : > { %13196 = vst [vmem:[#allocation57_spill] sm:$0xff] %v10731_v11  ;;  %v3755_v11 = vsel %vm1505_vm1, %v3657_v10, 0.0  ;;  %v3533_v10 = vmul.f32 0.015625, %v3385_v61 }
 0x3be   : > { %3498 = vadd.xlane.f32.xlu1 %v3497_v0  ;;  %v10738_v62 = vpop.f32.mrf.mxu1  ;;  %v3249_v0 = vadd.f32 %v7738_v9, %v10314_v19  ;;  %v3382_v49 = vpop.xlane.xlu0 %3381  ;;  %v10755_v19 = vsub.f32 %v10187_v36, %v3531_v28  ;;  %v3500_v36 = vsel %vm1505_vm1, %v10748_v44, 0.0 }
 0x3bf   : > { %13198 = vst [vmem:[#allocation60_spill] sm:$0xff] %v10738_v62  ;;  %v3752_v62 = vsel %vm1505_vm1, %v3656_v57, 0.0  ;;  %v3532_v7 = vmul.f32 0.015625, %v3382_v49 }
 0x3c0   : > { %3495 = vadd.xlane.f32.xlu0 %v3494_v4  ;;  %v10745_v29 = vpop.f32.mrf.mxu1  ;;  %v3244_v4 = vadd.f32 %v3243_v14, %v13200_v47  ;;  %v10758_v9 = vadd.f32 %v9969_v35, %v3249_v0  ;;  %v10765_v47 = vsub.f32 %v10191_v30, %v3530_v63  ;;  %v3659_v30 = vmul.f32 %v10755_v19, %v10755_v19 }
 0x3c1   : > { %13199 = vst [vmem:[#allocation59_spill] sm:$0xff] %v10745_v29  ;;  %v10784_v49 = vsub.f32 %v10209_v16, %v3532_v7 }
 0x3c2   : > { %3756 = vadd.xlane.f32.xlu1 %v3755_v11  ;;  %v10752_v51 = vpop.f32.mrf.mxu1  ;;  %v3391_v11 = vpop.xlane.xlu1 %3390  ;;  %v10768_v57 = vadd.f32 %v9969_v35, %v3244_v4  ;;  %v3509_v61 = vsel %vm1505_vm1, %v10758_v9, 0.0 }
 0x3c3   : > { %13201 = vst [vmem:[#allocation62_spill] sm:$0xff] %v10752_v51  ;;  %v3388_v28 = vpop.xlane.xlu0 %3387  ;;  %v3535_v0 = vmul.f32 0.015625, %v3391_v11 }
 0x3c4   : > { %3753 = vadd.xlane.f32.xlu0 %v3752_v62  ;;  %v10762_v54 = vpop.f32.mrf.mxu1  ;;  %v10775_v62 = vsub.f32 %v10205_v12, %v3533_v10  ;;  %v3534_v4 = vmul.f32 0.015625, %v3388_v28  ;;  %v3658_v12 = vmul.f32 %v10765_v47, %v10765_v47 }
 0x3c5   : > { %13202 = vst [vmem:[#allocation61_spill] sm:$0xff] %v10762_v54 }
 0x3c6   : > { %3504 = vadd.xlane.f32.xlu1 %v3503_v23  ;;  %v10772_v14 = vpop.f32.mrf.mxu1  ;;  %v3397_v35 = vpop.xlane.xlu1 %3396  ;;  %v3506_v23 = vsel %vm1505_vm1, %v10768_v57, 0.0  ;;  %v3661_v16 = vmul.f32 %v10775_v62, %v10775_v62  ;;  %v10801_v29 = vsub.f32 %v10227_v24, %v3534_v4 }
 0x3c7   : > { %13203 = vst [vmem:[#allocation64_spill] sm:$0xff] %v10772_v14 }
 0x3c8   : > { %3501 = vadd.xlane.f32.xlu0 %v3500_v36  ;;  %v10781_v63 = vpop.f32.mrf.mxu1  ;;  %v3394_v10 = vpop.xlane.xlu0 %3393  ;;  %v10793_v36 = vsub.f32 %v10223_v43, %v3535_v0  ;;  %v3660_v43 = vmul.f32 %v10784_v49, %v10784_v49 }
 0x3c9   : > { %13204 = vst [vmem:[#allocation63_spill] sm:$0xff] %v10781_v63  ;;  %v3761_v63 = vsel %vm1505_vm1, %v3659_v30, 0.0  ;;  %v3536_v54 = vmul.f32 0.015625, %v3394_v10 }
 0x3ca   : > { %3510 = vadd.xlane.f32.xlu1 %v3509_v61  ;;  %v10790_v11 = vpop.f32.mrf.mxu1  ;;  %v3537_v61 = vmul.f32 0.015625, %v3397_v35  ;;  %v3663_v24 = vmul.f32 %v10793_v36, %v10793_v36 }
 0x3cb   : > { %13205 = vst [vmem:[#allocation66_spill] sm:$0xff] %v10790_v11 }
 0x3cc   : > { %3507 = vadd.xlane.f32.xlu0 %v3506_v23  ;;  %v10798_v28 = vpop.f32.mrf.mxu1  ;;  %v3758_v23 = vsel %vm1505_vm1, %v3658_v12, 0.0  ;;  %v10809_v30 = vsub.f32 %v10241_v20, %v3537_v61  ;;  %v10817_v12 = vsub.f32 %v10245_v46, %v3536_v54 }
 0x3cd   : > { %13206 = vst [vmem:[#allocation65_spill] sm:$0xff] %v10798_v28  ;;  %v3662_v28 = vmul.f32 %v10801_v29, %v10801_v29 }
 0x3ce   : > { %v3403_v7 = vpop.xlane.xlu1 %3402  ;;  %3762 = vadd.xlane.f32.xlu1 %v3761_v63  ;;  %v10806_v35 = vpop.f32.mrf.mxu1  ;;  %v3767_v63 = vsel %vm1505_vm1, %v3661_v16, 0.0  ;;  %v3773_v16 = vsel %vm1505_vm1, %v3663_v24, 0.0 }
 0x3cf   : > { %13207 = vst [vmem:[#allocation71_spill] sm:$0xff] %v10806_v35  ;;  %v3539_v14 = vmul.f32 0.015625, %v3403_v7  ;;  %v3665_v7 = vmul.f32 %v10809_v30, %v10809_v30 }
 0x3d0   : > { %3759 = vadd.xlane.f32.xlu0 %v3758_v23  ;;  %v3400_v0 = vpop.xlane.xlu0 %3399  ;;  %v10814_v4 = vpop.f32.mrf.mxu1  ;;  %v3764_v23 = vsel %vm1505_vm1, %v3660_v43, 0.0 }
 0x3d1   : > { %13208 = vst [vmem:[#allocation68_spill] sm:$0xff] %v10814_v4  ;;  %v3538_v10 = vmul.f32 0.015625, %v3400_v0  ;;  %v10825_v61 = vsub.f32 %v10262_v60, %v3539_v14  ;;  %v3770_v0 = vsel %vm1505_vm1, %v3662_v28, 0.0 }
 0x3d2   : > { %3768 = vadd.xlane.f32.xlu1 %v3767_v63  ;;  %v10822_v20 = vpop.f32.mrf.mxu1 }
 0x3d3   : > { %13209 = vst [vmem:[#allocation77_spill] sm:$0xff] %v10822_v20  ;;  %v10833_v54 = vsub.f32 %v10266_v2, %v3538_v10  ;;  %v3667_v2 = vmul.f32 %v10825_v61, %v10825_v61 }
 0x3d4   : > { %3765 = vadd.xlane.f32.xlu0 %v3764_v23  ;;  %v10830_v46 = vpop.f32.mrf.mxu1  ;;  %v3664_v23 = vmul.f32 %v10817_v12, %v10817_v12 }
 0x3d5   : > { %13210 = vst [vmem:[#allocation74_spill] sm:$0xff] %v10830_v46 }
 0x3d6   : > { %v3409_v63 = vpop.xlane.xlu1 %3408  ;;  %3774 = vadd.xlane.f32.xlu1 %v3773_v16  ;;  %v10838_v14 = vpop.f32.mrf.mxu1  ;;  %v3779_v16 = vsel %vm1505_vm1, %v3665_v7, 0.0 }
 0x3d7   : > { %v3541_v43 = vmul.f32 0.015625, %v3409_v63  ;;  %13211 = vst [vmem:[#allocation85_spill] sm:$0xff] %v10838_v14  ;;  %v3776_v63 = vsel %vm1505_vm1, %v3664_v23, 0.0 }
 0x3d8   : > { %3771 = vadd.xlane.f32.xlu0 %v3770_v0  ;;  %v3406_v60 = vpop.xlane.xlu0 %3405  ;;  %v10846_v10 = vpop.f32.mrf.mxu1  ;;  %v3666_v0 = vmul.f32 %v10833_v54, %v10833_v54 }
 0x3d9   : > { %v10841_v24 = vsub.f32 %v10280_v56, %v3541_v43  ;;  %v3540_v4 = vmul.f32 0.015625, %v3406_v60  ;;  %13212 = vst [vmem:[#allocation81_spill] sm:$0xff] %v10846_v10  ;;  %v3785_v43 = vsel %vm1505_vm1, %v3667_v2, 0.0 }
 0x3da   : > { %3780 = vadd.xlane.f32.xlu1 %v3779_v16  ;;  %v10854_v56 = vpop.f32.mrf.mxu1 }
 0x3db   : > { %v10849_v28 = vsub.f32 %v10284_v8, %v3540_v4  ;;  %13213 = vst [vmem:[#allocation90_spill] sm:$0xff] %v10854_v56  ;;  %v3669_v7 = vmul.f32 %v10841_v24, %v10841_v24  ;;  %v3782_v8 = vsel %vm1505_vm1, %v3666_v0, 0.0 }
 0x3dc   : > { %3777 = vadd.xlane.f32.xlu0 %v3776_v63  ;;  %v10859_v16 = vpop.f32.mrf.mxu1 }
 0x3dd   : > { %13214 = vst [vmem:[#allocation6_spill] sm:$0xff] %v10859_v16  ;;  %v3668_v4 = vmul.f32 %v10849_v28, %v10849_v28  ;;  %v3791_v14 = vsel %vm1505_vm1, %v3669_v7, 0.0 }
 0x3de   : > { %v3415_v60 = vpop.xlane.xlu1 %3414  ;;  %3786 = vadd.xlane.f32.xlu1 %v3785_v43  ;;  %v10864_v63 = vpop.f32.mrf.mxu1 }
 0x3df   : > { %v3543_v10 = vmul.f32 0.015625, %v3415_v60  ;;  %13215 = vst [vmem:[#allocation4_spill] sm:$0xff] %v10864_v63  ;;  %v3788_v0 = vsel %vm1505_vm1, %v3668_v4, 0.0 }
 0x3e0   : > { %3783 = vadd.xlane.f32.xlu0 %v3782_v8  ;;  %v3412_v23 = vpop.xlane.xlu0 %3411  ;;  %v10870_v43 = vpop.f32.mrf.mxu1 }
 0x3e1   : > { %v10867_v46 = vsub.f32 %v10298_v58, %v3543_v10  ;;  %v3542_v2 = vmul.f32 0.015625, %v3412_v23  ;;  %13216 = vst [vmem:[#allocation11_spill] sm:$0xff] %v10870_v43 }
 0x3e2   : > { %3792 = vadd.xlane.f32.xlu1 %v3791_v14  ;;  %v10878_v16 = vpop.f32.mrf.mxu1 }
 0x3e3   : > { %v10873_v60 = vsub.f32 %v10302_v53, %v3542_v2  ;;  %v3671_v8 = vmul.f32 %v10867_v46, %v10867_v46  ;;  %13217 = vst [vmem:[#allocation8_spill] sm:$0xff] %v10878_v16 }
 0x3e4   : > { %3789 = vadd.xlane.f32.xlu0 %v3788_v0  ;;  %v10883_v14 = vpop.f32.mrf.mxu1 }
 0x3e5   : > { %v3797_v58 = vsel %vm1505_vm1, %v3671_v8, 0.0  ;;  %v3670_v10 = vmul.f32 %v10873_v60, %v10873_v60  ;;  %13218 = vst [vmem:[#allocation17_spill] sm:$0xff] %v10883_v14 }
 0x3e6   : > { %v3421_v7 = vpop.xlane.xlu1 %3420  ;;  %3798 = vadd.xlane.f32.xlu1 %v3797_v58  ;;  %v10889_v43 = vpop.f32.mrf.mxu1 }
 0x3e7   : > { %v3545_v23 = vmul.f32 0.015625, %v3421_v7  ;;  %v3794_v53 = vsel %vm1505_vm1, %v3670_v10, 0.0  ;;  %13219 = vst [vmem:[#allocation14_spill] sm:$0xff] %v10889_v43 }
 0x3e8   : > { %3795 = vadd.xlane.f32.xlu0 %v3794_v53  ;;  %v3418_v4 = vpop.xlane.xlu0 %3417  ;;  %v10899_v53 = vpop.f32.mrf.mxu1 }
 0x3e9   : > { %v10887_v2 = vsub.f32 %v10318_v45, %v3545_v23  ;;  %v3544_v0 = vmul.f32 0.015625, %v3418_v4  ;;  %13220 = vst [vmem:[#allocation23_spill] sm:$0xff] %v10899_v53 }
 0x3ea   : > { %v10905_v14 = vpop.f32.mrf.mxu1 }
 0x3eb   : > { %v10892_v8 = vsub.f32 %v10324_v3, %v3544_v0  ;;  %v3673_v63 = vmul.f32 %v10887_v2, %v10887_v2  ;;  %13221 = vst [vmem:[#allocation20_spill] sm:$0xff] %v10905_v14 }
 0x3ed   : > { %v3803_v58 = vsel %vm1505_vm1, %v3673_v63, 0.0  ;;  %v3672_v7 = vmul.f32 %v10892_v8, %v10892_v8 }
 0x3ee   : > { %v3427_v10 = vpop.xlane.xlu1 %3426  ;;  %3804 = vadd.xlane.f32.xlu1 %v3803_v58 }
 0x3ef   : > { %v3547_v45 = vmul.f32 0.015625, %v3427_v10  ;;  %v3800_v23 = vsel %vm1505_vm1, %v3672_v7, 0.0 }
 0x3f0   : > { %3801 = vadd.xlane.f32.xlu0 %v3800_v23  ;;  %v3424_v4 = vpop.xlane.xlu0 %3423  ;;  %v10915_v23 = vpop.f32.mrf.mxu1 }
 0x3f1   : > { %v10903_v3 = vsub.f32 %v10347_v6, %v3547_v45  ;;  %v3546_v0 = vmul.f32 0.015625, %v3424_v4  ;;  %13222 = vst [vmem:[#allocation29_spill] sm:$0xff] %v10915_v23 }
 0x3f2   : > { %v10921_v53 = vpop.f32.mrf.mxu1 }
 0x3f3   : > { %v10908_v63 = vsub.f32 %v10353_v21, %v3546_v0  ;;  %v3675_v43 = vmul.f32 %v10903_v3, %v10903_v3  ;;  %13223 = vst [vmem:[#allocation26_spill] sm:$0xff] %v10921_v53 }
 0x3f5   : > { %v3809_v58 = vsel %vm1505_vm1, %v3675_v43, 0.0  ;;  %v3674_v10 = vmul.f32 %v10908_v63, %v10908_v63 }
 0x3f6   : > { %v3433_v7 = vpop.xlane.xlu1 %3432  ;;  %3810 = vadd.xlane.f32.xlu1 %v3809_v58 }
 0x3f7   : > { %v3549_v6 = vmul.f32 0.015625, %v3433_v7  ;;  %v3806_v45 = vsel %vm1505_vm1, %v3674_v10, 0.0 }
 0x3f8   : > { %3807 = vadd.xlane.f32.xlu0 %v3806_v45  ;;  %v3430_v4 = vpop.xlane.xlu0 %3429 }
 0x3f9   : > { %v10919_v21 = vsub.f32 %v10373_v26, %v3549_v6  ;;  %v3548_v0 = vmul.f32 0.015625, %v3430_v4  ;;  %v10931_v6 = vpop.f32.mrf.mxu1 }
 0x3fa   : > { %13224 = vst [vmem:[#allocation35_spill] sm:$0xff] %v10931_v6 }
 0x3fb   : > { %v10924_v43 = vsub.f32 %v10379_v42, %v3548_v0  ;;  %v3709_v14 = vpop.xlane.xlu1 %3708  ;;  %v3677_v58 = vmul.f32 %v10919_v21, %v10919_v21  ;;  %v10937_v35 = vpop.f32.mrf.mxu1 }
 0x3fc   : > { %v3897_v16 = vmul.f32 0.015625, %v3709_v14  ;;  %13225 = vst [vmem:[#allocation32_spill] sm:$0xff] %v10937_v35 }
 0x3fd   : > { %v3706_v23 = vpop.xlane.xlu0 %3705  ;;  %v3815_v7 = vsel %vm1505_vm1, %v3677_v58, 0.0  ;;  %v3676_v10 = vmul.f32 %v10924_v43, %v10924_v43 }
 0x3fe   : > { %v3961_v45 = vadd.f32 1e-05, %v3897_v16  ;;  %v3896_v26 = vmul.f32 0.015625, %v3706_v23  ;;  %3816 = vadd.xlane.f32.xlu1 %v3815_v7 }
 0x3ff   : > { %v3439_v4 = vpop.xlane.xlu1 %3438  ;;  %v3812_v42 = vsel %vm1505_vm1, %v3676_v10, 0.0 }
 0x400   : > { %8112 = vrsqrt.f32 %v3961_v45  ;;  %v3960_v0 = vadd.f32 1e-05, %v3896_v26  ;;  %v3551_v53 = vmul.f32 0.015625, %v3439_v4  ;;  %3813 = vadd.xlane.f32.xlu0 %v3812_v42 }
 0x401   : > { %v3436_v56 = vpop.xlane.xlu0 %3435 }
 0x402   : > { %8114 = vrsqrt.f32 %v3960_v0  ;;  %v10935_v14 = vsub.f32 %v10410_v50, %v3551_v53  ;;  %v3550_v58 = vmul.f32 0.015625, %v3436_v56  ;;  %v10947_v53 = vpop.f32.mrf.mxu1 }
 0x403   : > { %v3715_v16 = vpop.xlane.xlu1 %3714  ;;  %13226 = vst [vmem:[#allocation80_spill] sm:$0xff] %v10947_v53 }
 0x404   : > { %v10940_v23 = vsub.f32 %v10422_v13, %v3550_v58  ;;  %v3899_v7 = vmul.f32 0.015625, %v3715_v16  ;;  %v3679_v10 = vmul.f32 %v10935_v14, %v10935_v14 }
 0x405   : > { %v3712_v45 = vpop.xlane.xlu0 %3711 }
 0x406   : > { %v3963_v26 = vadd.f32 1e-05, %v3899_v7  ;;  %v3898_v4 = vmul.f32 0.015625, %v3712_v45  ;;  %v3821_v42 = vsel %vm1505_vm1, %v3679_v10, 0.0  ;;  %v3678_v50 = vmul.f32 %v10940_v23, %v10940_v23  ;;  %v10953_v10 = vpop.f32.mrf.mxu1 }
 0x407   : > { %v3445_v56 = vpop.xlane.xlu1 %3444  ;;  %3822 = vadd.xlane.f32.xlu1 %v3821_v42  ;;  %13227 = vst [vmem:[#allocation38_spill] sm:$0xff] %v10953_v10  ;;  %v8434_v10 = vld [vmem:[%s12830_s4 + $0x8] sm:$0x7] }
 0x408   : > { %8116 = vrsqrt.f32 %v3963_v26  ;;  %v3962_v0 = vadd.f32 1e-05, %v3898_v4  ;;  %v3553_v13 = vmul.f32 0.015625, %v3445_v56  ;;  %v3818_v58 = vsel %vm1505_vm1, %v3678_v50, 0.0  ;;  %v8433_v50 = vld [vmem:[%s12830_s4 + $0x4] sm:$0x7] }
 0x409   : > { %3819 = vadd.xlane.f32.xlu0 %v3818_v58  ;;  %v3442_v16 = vpop.xlane.xlu0 %3441  ;;  %v10968_v58 = vpop.f32.mrf.mxu1 }
 0x40a   : > { %8118 = vrsqrt.f32 %v3962_v0  ;;  %v10951_v7 = vsub.f32 %v10448_v38, %v3553_v13  ;;  %v3552_v45 = vmul.f32 0.015625, %v3442_v16  ;;  %v10964_v38 = vrot.slane %v8433_v50, %v9934_v5  ;;  %13229 = vst [vmem:[#allocation100_spill] sm:$0xff] %v10968_v58 }
 0x40b   : > { %v3721_v6 = vpop.xlane.xlu1 %3720  ;;  %v10976_v50 = vrot.slane %v8434_v10, %v9934_v5  ;;  %v10985_v5 = vpop.f32.mrf.mxu1 }
 0x40c   : > { %v10956_v35 = vsub.f32 %v10458_v33, %v3552_v45  ;;  %v3901_v53 = vmul.f32 0.015625, %v3721_v6  ;;  %v3681_v26 = vmul.f32 %v10951_v7, %v10951_v7  ;;  %13231 = vst [vmem:[#allocation102_spill] sm:$0xff] %v10985_v5 }
 0x40d   : > { %v8113_v4 = vpop.eup %8112  ;;  %v3718_v42 = vpop.xlane.xlu0 %3717 }
 0x40e   : > { %13228 = vst [vmem:[#allocation86_spill] sm:$0xff] %v10956_v35  ;;  %v4089_v56 = vmul.f32 %v8113_v4, %v10386_v22  ;;  %v3965_v0 = vadd.f32 1e-05, %v3901_v53  ;;  %v3900_v13 = vmul.f32 0.015625, %v3718_v42  ;;  %v3827_v33 = vsel %vm1505_vm1, %v3681_v26, 0.0 }
 0x40f   : > { %v8115_v6 = vpop.eup %8114  ;;  %v3451_v16 = vpop.xlane.xlu1 %3450  ;;  %3828 = vadd.xlane.f32.xlu1 %v3827_v33  ;;  %v3680_v45 = vmul.f32 %v10956_v35, %v10956_v35 }
 0x410   : > { %8120 = vrsqrt.f32 %v3965_v0  ;;  %v3964_v22 = vadd.f32 1e-05, %v3900_v13  ;;  %v3555_v53 = vmul.f32 0.015625, %v3451_v16  ;;  %v4088_v26 = vmul.f32 %v8115_v6, %v10394_v25 }
 0x411   : > { %v3824_v4 = vsel %vm1505_vm1, %v3680_v45, 0.0  ;;  %v3448_v42 = vpop.xlane.xlu0 %3447  ;;  %v4157_v33 = vmul.f32 %v10964_v38, %v4089_v56 }
 0x412   : > { %8122 = vrsqrt.f32 %v3964_v22  ;;  %v10982_v58 = vsub.f32 %v10482_v55, %v3555_v53  ;;  %3825 = vadd.xlane.f32.xlu0 %v3824_v4  ;;  %v3554_v20 = vmul.f32 0.015625, %v3448_v42  ;;  %v4156_v11 = vmul.f32 %v10964_v38, %v4088_v26 }
 0x413   : > { %v4225_v10 = vadd.f32 %v10976_v50, %v4157_v33 }
 0x414   : > { %13230 = vst [vmem:[#allocation101_spill] sm:$0xff] %v10982_v58  ;;  %v10989_v0 = vsub.f32 %v10491_v59, %v3554_v20  ;;  %v3727_v25 = vpop.xlane.xlu1 %3726  ;;  %v3683_v13 = vmul.f32 %v10982_v58, %v10982_v58  ;;  %v4224_v56 = vadd.f32 %v10976_v50, %v4156_v11  ;;  %v10997_v59 = vpop.f32.mrf.mxu1 }
 0x415   : > { %v8117_v6 = vpop.eup %8116  ;;  %v3903_v55 = vmul.f32 0.015625, %v3727_v25  ;;  %vm4289_vm0 = vcmp.ge.f32.partialorder %v4225_v10, 0.0  ;;  %v4353_v16 = vmul.f32 0.01, %v4225_v10  ;;  %13232 = vst [vmem:[#allocation103_spill] sm:$0xff] %v10997_v59 }
 0x416   : > { %v3724_v45 = vpop.xlane.xlu0 %3723  ;;  %v3833_v22 = vsel %vm1505_vm1, %v3683_v13, 0.0  ;;  %vm4288_vm10 = vcmp.ge.f32.partialorder %v4224_v56, 0.0  ;;  %v4352_v53 = vmul.f32 0.01, %v4224_v56  ;;  %v3682_v26 = vmul.f32 %v10989_v0, %v10989_v0 }
 0x417   : > { %v8119_v20 = vpop.eup %8118  ;;  %v3967_v4 = vadd.f32 1e-05, %v3903_v55  ;;  %v3902_v42 = vmul.f32 0.015625, %v3724_v45  ;;  %3834 = vadd.xlane.f32.xlu1 %v3833_v22  ;;  %v4091_v11 = vmul.f32 %v8117_v6, %v10419_v40  ;;  %v4417_v51 = vsel %vm4289_vm0, %v4225_v10, %v4353_v16 }
 0x418   : > { %v3457_v33 = vpop.xlane.xlu1 %3456  ;;  %v4416_v25 = vsel %vm4288_vm10, %v4224_v56, %v4352_v53  ;;  %v3830_v5 = vsel %vm1505_vm1, %v3682_v26, 0.0  ;;  %v4090_v13 = vmul.f32 %v8119_v20, %v10430_v32  ;;  %v11007_v56 = vpop.f32.mrf.mxu1 }
 0x419   : > { %8124 = vrsqrt.f32 %v3967_v4  ;;  %v3966_v58 = vadd.f32 1e-05, %v3902_v42  ;;  %v3557_v35 = vmul.f32 0.015625, %v3457_v33  ;;  %7755 = vmatprep.mubr.msk.f32.mxu1 %vm1505_vm1, %v4416_v25  ;;  %3831 = vadd.xlane.f32.xlu0 %v3830_v5  ;;  %v4159_v55 = vmul.f32 %v10964_v38, %v4091_v11  ;;  %13233 = vst [vmem:[#allocation104_spill] sm:$0xff] %v11007_v56 }
 0x41a   : > { %v3454_v45 = vpop.xlane.xlu0 %3453  ;;  %7756 = vmatmul.mubr.msk.f32.vlgmr.msra.gmra.mxu1 %vm1505_vm1, %v4417_v51  ;;  %v4158_v40 = vmul.f32 %v10964_v38, %v4090_v13  ;;  %v11020_v4 = vpop.f32.mrf.mxu1 }
 0x41b   : > { %8126 = vrsqrt.f32 %v3966_v58  ;;  %v11010_v10 = vsub.f32 %v10520_v37, %v3557_v35  ;;  %v3556_v32 = vmul.f32 0.015625, %v3454_v45  ;;  %v4227_v6 = vadd.f32 %v10976_v50, %v4159_v55  ;;  %13234 = vst [vmem:[#allocation105_spill] sm:$0xff] %v11020_v4 }
 0x41c   : > { %v3733_v16 = vpop.xlane.xlu1 %3732  ;;  %v4226_v22 = vadd.f32 %v10976_v50, %v4158_v40 }
 0x41d   : > { %v8121_v5 = vpop.eup %8120  ;;  %v11015_v53 = vsub.f32 %v10532_v1, %v3556_v32  ;;  %v3905_v26 = vmul.f32 0.015625, %v3733_v16  ;;  %v3685_v51 = vmul.f32 %v11010_v10, %v11010_v10  ;;  %vm4291_vm11 = vcmp.ge.f32.partialorder %v4227_v6, 0.0 }
 0x41e   : > { %v3730_v20 = vpop.xlane.xlu0 %3729  ;;  %vm4290_vm12 = vcmp.ge.f32.partialorder %v4226_v22, 0.0  ;;  %v4354_v58 = vmul.f32 0.01, %v4226_v22  ;;  %v4355_v37 = vmul.f32 0.01, %v4227_v6  ;;  %v4093_v35 = vmul.f32 %v8121_v5, %v10455_v52 }
 0x41f   : > { %v8123_v42 = vpop.eup %8122  ;;  %v3969_v11 = vadd.f32 1e-05, %v3905_v26  ;;  %v3904_v33 = vmul.f32 0.015625, %v3730_v20  ;;  %v3839_v25 = vsel %vm1505_vm1, %v3685_v51, 0.0  ;;  %v3684_v1 = vmul.f32 %v11015_v53, %v11015_v53 }
 0x420   : > { %v3463_v13 = vpop.xlane.xlu1 %3462  ;;  %3840 = vadd.xlane.f32.xlu1 %v3839_v25  ;;  %v4418_v55 = vsel %vm4290_vm12, %v4226_v22, %v4354_v58  ;;  %v4419_v45 = vsel %vm4291_vm11, %v4227_v6, %v4355_v37  ;;  %v4092_v40 = vmul.f32 %v8123_v42, %v10466_v15  ;;  %v4161_v32 = vmul.f32 %v10964_v38, %v4093_v35  ;;  %v11032_v6 = vpop.f32.mrf.mxu1  ;;  %v13236_v37 = vld [vmem:[#allocation98_spill] sm:$0xff] }
 0x421   : > { %8128 = vrsqrt.f32 %v3969_v11  ;;  %v3968_v52 = vadd.f32 1e-05, %v3904_v33  ;;  %v3559_v16 = vmul.f32 0.015625, %v3463_v13  ;;  %7758 = vmatprep.mubr.msk.f32.mxu1 %vm1505_vm1, %v4418_v55  ;;  %v3836_v5 = vsel %vm1505_vm1, %v3684_v1, 0.0  ;;  %13235 = vst [vmem:[#allocation106_spill] sm:$0xff] %v11032_v6 }
 0x422   : > { %3837 = vadd.xlane.f32.xlu0 %v3836_v5  ;;  %v3460_v26 = vpop.xlane.xlu0 %3459  ;;  %7759 = vmatmul.mubr.msk.f32.gmra.mxu1 %vm1505_vm1, %v4419_v45  ;;  %v4160_v51 = vmul.f32 %v10964_v38, %v4092_v40  ;;  %v4229_v22 = vadd.f32 %v10976_v50, %v4161_v32  ;;  %v11043_v1 = vpop.f32.mrf.mxu1  ;;  %v13238_v45 = vld [vmem:[#allocation91_spill] sm:$0xff] }
 0x423   : > { %8130 = vrsqrt.f32 %v3968_v52  ;;  %v11035_v15 = vsub.f32 %v10561_v27, %v3559_v16  ;;  %v3558_v20 = vmul.f32 0.015625, %v3460_v26  ;;  %13237 = vst [vmem:[#allocation98_spill] sm:$0xff] %v11043_v1 }
 0x424   : > { %v4228_v58 = vadd.f32 %v10976_v50, %v4160_v51  ;;  %v4357_v11 = vmul.f32 0.01, %v4229_v22  ;;  %vm4293_vm14 = vcmp.ge.f32.partialorder %v4229_v22, 0.0 }
 0x425   : > { %v11039_v35 = vsub.f32 %v13236_v37, %v3558_v20  ;;  %v3687_v42 = vmul.f32 %v11035_v15, %v11035_v15  ;;  %v13239_v20 = vld [vmem:[#allocation93_spill] sm:$0xff] }
 0x426   : > { %v8125_v33 = vpop.eup %8124  ;;  %vm4292_vm13 = vcmp.ge.f32.partialorder %v4228_v58, 0.0  ;;  %v4356_v25 = vmul.f32 0.01, %v4228_v58  ;;  %v4421_v51 = vsel %vm4293_vm14, %v4229_v22, %v4357_v11 }
 0x427   : > { %v3739_v13 = vpop.xlane.xlu1 %3738  ;;  %v3845_v27 = vsel %vm1505_vm1, %v3687_v42, 0.0  ;;  %v3686_v55 = vmul.f32 %v11039_v35, %v11039_v35  ;;  %v4095_v40 = vmul.f32 %v8125_v33, %v13238_v45  ;;  %v11054_v33 = vpop.f32.mrf.mxu1 }
 0x428   : > { %v8127_v32 = vpop.eup %8126  ;;  %v3907_v52 = vmul.f32 0.015625, %v3739_v13  ;;  %3846 = vadd.xlane.f32.xlu1 %v3845_v27  ;;  %v4420_v16 = vsel %vm4292_vm13, %v4228_v58, %v4356_v25  ;;  %13240 = vst [vmem:[#allocation91_spill] sm:$0xff] %v11054_v33  ;;  %v13246_v33 = vld [vmem:[#allocation19_spill] sm:$0xff] }
 0x429   : > { %7761 = vmatprep.mubr.msk.f32.mxu1 %vm1505_vm1, %v4420_v16  ;;  %v3842_v5 = vsel %vm1505_vm1, %v3686_v55, 0.0  ;;  %v3736_v26 = vpop.xlane.xlu0 %3735  ;;  %v4094_v37 = vmul.f32 %v8127_v32, %v13239_v20  ;;  %v4163_v4 = vmul.f32 %v10964_v38, %v4095_v40  ;;  %v13241_v32 = vld [vmem:[#allocation10_spill] sm:$0xff] }
 0x42a   : > { %v3971_v42 = vadd.f32 1e-05, %v3907_v52  ;;  %3843 = vadd.xlane.f32.xlu0 %v3842_v5  ;;  %v3906_v1 = vmul.f32 0.015625, %v3736_v26  ;;  %7762 = vmatmul.mubr.msk.f32.gmra.mxu1 %vm1505_vm1, %v4421_v51  ;;  %v11062_v5 = vpop.f32.mrf.mxu1 }
 0x42b   : > { %v3469_v13 = vpop.xlane.xlu1 %3468  ;;  %v4162_v58 = vmul.f32 %v10964_v38, %v4094_v37  ;;  %v4231_v25 = vadd.f32 %v10976_v50, %v4163_v4  ;;  %13242 = vst [vmem:[#allocation93_spill] sm:$0xff] %v11062_v5  ;;  %v13243_v4 = vld [vmem:[#allocation96_spill] sm:$0xff]  ;;  %v13244_v37 = vld [vmem:[#allocation13_spill] sm:$0xff] }
 0x42c   : > { %8132 = vrsqrt.f32 %v3971_v42  ;;  %v3970_v27 = vadd.f32 1e-05, %v3906_v1  ;;  %v3561_v55 = vmul.f32 0.015625, %v3469_v13 }
 0x42d   : > { %v3466_v22 = vpop.xlane.xlu0 %3465  ;;  %v4230_v11 = vadd.f32 %v10976_v50, %v4162_v58  ;;  %v4359_v45 = vmul.f32 0.01, %v4231_v25  ;;  %vm4295_vm15 = vcmp.ge.f32.partialorder %v4231_v25, 0.0 }
 0x42e   : > { %v8129_v40 = vpop.eup %8128  ;;  %8134 = vrsqrt.f32 %v3970_v27  ;;  %v11060_v52 = vsub.f32 %v13241_v32, %v3561_v55  ;;  %v3560_v16 = vmul.f32 0.015625, %v3466_v22  ;;  %v13245_v22 = vld [vmem:[#allocation9_spill] sm:$0xff] }
 0x42f   : > { %v3475_v26 = vpop.xlane.xlu1 %3474  ;;  %vm4294_vm2 = vcmp.ge.f32.partialorder %v4230_v11, 0.0  ;;  %v4358_v51 = vmul.f32 0.01, %v4230_v11  ;;  %v4097_v20 = vmul.f32 %v8129_v40, %v13243_v4  ;;  %v4423_v32 = vsel %vm4295_vm15, %v4231_v25, %v4359_v45  ;;  %v11079_v4 = vpop.f32.mrf.mxu1 }
 0x430   : > { %v8131_v1 = vpop.eup %8130  ;;  %v11066_v42 = vsub.f32 %v13244_v37, %v3560_v16  ;;  %v3563_v13 = vmul.f32 0.015625, %v3475_v26  ;;  %v3689_v58 = vmul.f32 %v11060_v52, %v11060_v52  ;;  %13247 = vst [vmem:[#allocation10_spill] sm:$0xff] %v11079_v4 }
 0x431   : > { %v4422_v27 = vsel %vm4294_vm2, %v4230_v11, %v4358_v51  ;;  %v3472_v55 = vpop.xlane.xlu0 %3471  ;;  %v4096_v59 = vmul.f32 %v8131_v1, %v13245_v22  ;;  %v4165_v5 = vmul.f32 %v10964_v38, %v4097_v20  ;;  %v11094_v22 = vpop.f32.mrf.mxu1 }
 0x432   : > { %v11073_v56 = vsub.f32 %v13246_v33, %v3563_v13  ;;  %7764 = vmatprep.mubr.msk.f32.mxu1 %vm1505_vm1, %v4422_v27  ;;  %v3562_v40 = vmul.f32 0.015625, %v3472_v55  ;;  %v3851_v16 = vsel %vm1505_vm1, %v3689_v58, 0.0  ;;  %v3688_v26 = vmul.f32 %v11066_v42, %v11066_v42  ;;  %v13248_v33 = vld [vmem:[#allocation34_spill] sm:$0xff]  ;;  %13249 = vst [vmem:[#allocation96_spill] sm:$0xff] %v11094_v22  ;;  %v13250_v22 = vld [vmem:[#allocation12_spill] sm:$0xff] }
 0x433   : > { %7765 = vmatmul.mubr.msk.f32.gmra.mxu1 %vm1505_vm1, %v4423_v32  ;;  %v3745_v25 = vpop.xlane.xlu1 %3744  ;;  %3852 = vadd.xlane.f32.xlu1 %v3851_v16  ;;  %v4164_v11 = vmul.f32 %v10964_v38, %v4096_v59  ;;  %v4233_v45 = vadd.f32 %v10976_v50, %v4165_v5 }
 0x434   : > { %v11085_v51 = vsub.f32 %v13248_v33, %v3562_v40  ;;  %v3909_v20 = vmul.f32 0.015625, %v3745_v25  ;;  %v3848_v1 = vsel %vm1505_vm1, %v3688_v26, 0.0  ;;  %v3691_v37 = vmul.f32 %v11073_v56, %v11073_v56 }
 0x435   : > { %3849 = vadd.xlane.f32.xlu0 %v3848_v1  ;;  %v3742_v13 = vpop.xlane.xlu0 %3741  ;;  %v4232_v58 = vadd.f32 %v10976_v50, %v4164_v11  ;;  %vm4297_vm3 = vcmp.ge.f32.partialorder %v4233_v45, 0.0  ;;  %v4361_v27 = vmul.f32 0.01, %v4233_v45 }
 0x436   : > { %v3973_v55 = vadd.f32 1e-05, %v3909_v20  ;;  %v3908_v32 = vmul.f32 0.015625, %v3742_v13  ;;  %v3857_v59 = vsel %vm1505_vm1, %v3691_v37, 0.0  ;;  %v3690_v5 = vmul.f32 %v11085_v51, %v11085_v51 }
 0x437   : > { %v3481_v40 = vpop.xlane.xlu1 %3480  ;;  %3858 = vadd.xlane.f32.xlu1 %v3857_v59  ;;  %vm4296_vm4 = vcmp.ge.f32.partialorder %v4232_v58, 0.0  ;;  %v4360_v16 = vmul.f32 0.01, %v4232_v58  ;;  %v4425_v37 = vsel %vm4297_vm3, %v4233_v45, %v4361_v27 }
 0x438   : > { %8136 = vrsqrt.f32 %v3973_v55  ;;  %v3972_v26 = vadd.f32 1e-05, %v3908_v32  ;;  %v3565_v25 = vmul.f32 0.015625, %v3481_v40  ;;  %v3854_v11 = vsel %vm1505_vm1, %v3690_v5, 0.0  ;;  %v11103_v55 = vpop.f32.mrf.mxu1 }
 0x439   : > { %v8133_v33 = vpop.eup %8132  ;;  %v4424_v1 = vsel %vm4296_vm4, %v4232_v58, %v4360_v16  ;;  %3855 = vadd.xlane.f32.xlu0 %v3854_v11  ;;  %v3478_v20 = vpop.xlane.xlu0 %3477  ;;  %13251 = vst [vmem:[#allocation13_spill] sm:$0xff] %v11103_v55 }
 0x43a   : > { %8138 = vrsqrt.f32 %v3972_v26  ;;  %v11099_v13 = vsub.f32 %v10645_v48, %v3565_v25  ;;  %7767 = vmatprep.mubr.msk.f32.mxu1 %vm1505_vm1, %v4424_v1  ;;  %v3564_v59 = vmul.f32 0.015625, %v3478_v20  ;;  %v4099_v4 = vmul.f32 %v8133_v33, %v13250_v22  ;;  %v13252_v48 = vld [vmem:[#allocation3_spill] sm:$0xff] }
 0x43b   : > { %v8135_v32 = vpop.eup %8134  ;;  %7768 = vmatmul.mubr.msk.f32.gmra.mxu1 %vm1505_vm1, %v4425_v37  ;;  %v3487_v5 = vpop.xlane.xlu1 %3486 }
 0x43c   : > { %v11107_v58 = vsub.f32 %v10652_v31, %v3564_v59  ;;  %v3567_v40 = vmul.f32 0.015625, %v3487_v5  ;;  %v3693_v45 = vmul.f32 %v11099_v13, %v11099_v13  ;;  %v4098_v27 = vmul.f32 %v8135_v32, %v13252_v48  ;;  %v11119_v31 = vpop.f32.mrf.mxu1  ;;  %v13254_v59 = vld [vmem:[#allocation48_spill] sm:$0xff] }
 0x43d   : > { %v3484_v16 = vpop.xlane.xlu0 %3483  ;;  %v4167_v26 = vmul.f32 %v10964_v38, %v4099_v4  ;;  %13253 = vst [vmem:[#allocation9_spill] sm:$0xff] %v11119_v31 }
 0x43e   : > { %v11114_v22 = vsub.f32 %v10662_v18, %v3567_v40  ;;  %v3566_v25 = vmul.f32 0.015625, %v3484_v16  ;;  %v3863_v11 = vsel %vm1505_vm1, %v3693_v45, 0.0  ;;  %v3692_v33 = vmul.f32 %v11107_v58, %v11107_v58 }
 0x43f   : > { %v3751_v1 = vpop.xlane.xlu1 %3750  ;;  %3864 = vadd.xlane.f32.xlu1 %v3863_v11  ;;  %v4166_v20 = vmul.f32 %v10964_v38, %v4098_v27  ;;  %v4235_v37 = vadd.f32 %v10976_v50, %v4167_v26 }
 0x440   : > { %v11124_v32 = vsub.f32 %v13254_v59, %v3566_v25  ;;  %v3911_v4 = vmul.f32 0.015625, %v3751_v1  ;;  %v3860_v18 = vsel %vm1505_vm1, %v3692_v33, 0.0  ;;  %v3695_v5 = vmul.f32 %v11114_v22, %v11114_v22  ;;  %v11133_v25 = vpop.f32.mrf.mxu1 }
 0x441   : > { %3861 = vadd.xlane.f32.xlu0 %v3860_v18  ;;  %v3748_v40 = vpop.xlane.xlu0 %3747  ;;  %v4234_v45 = vadd.f32 %v10976_v50, %v4166_v20  ;;  %vm4299_vm5 = vcmp.ge.f32.partialorder %v4235_v37, 0.0  ;;  %v4363_v48 = vmul.f32 0.01, %v4235_v37  ;;  %13255 = vst [vmem:[#allocation19_spill] sm:$0xff] %v11133_v25  ;;  %v13256_v25 = vld [vmem:[#allocation28_spill] sm:$0xff] }
 0x442   : > { %v3975_v16 = vadd.f32 1e-05, %v3911_v4  ;;  %v3910_v11 = vmul.f32 0.015625, %v3748_v40  ;;  %v3869_v27 = vsel %vm1505_vm1, %v3695_v5, 0.0  ;;  %v3694_v26 = vmul.f32 %v11124_v32, %v11124_v32 }
 0x443   : > { %v3493_v1 = vpop.xlane.xlu1 %3492  ;;  %3870 = vadd.xlane.f32.xlu1 %v3869_v27  ;;  %vm4298_vm6 = vcmp.ge.f32.partialorder %v4234_v45, 0.0  ;;  %v4362_v33 = vmul.f32 0.01, %v4234_v45  ;;  %v4427_v5 = vsel %vm4299_vm5, %v4235_v37, %v4363_v48 }
 0x444   : > { %8140 = vrsqrt.f32 %v3975_v16  ;;  %v3974_v59 = vadd.f32 1e-05, %v3910_v11  ;;  %v3569_v18 = vmul.f32 0.015625, %v3493_v1  ;;  %v3866_v20 = vsel %vm1505_vm1, %v3694_v26, 0.0  ;;  %v11142_v16 = vpop.f32.mrf.mxu1 }
 0x445   : > { %v8137_v31 = vpop.eup %8136  ;;  %v4426_v55 = vsel %vm4298_vm6, %v4234_v45, %v4362_v33  ;;  %3867 = vadd.xlane.f32.xlu0 %v3866_v20  ;;  %v3490_v4 = vpop.xlane.xlu0 %3489  ;;  %13257 = vst [vmem:[#allocation34_spill] sm:$0xff] %v11142_v16 }
 0x446   : > { %8142 = vrsqrt.f32 %v3974_v59  ;;  %v11138_v40 = vsub.f32 %v10693_v34, %v3569_v18  ;;  %7770 = vmatprep.mubr.msk.f32.mxu1 %vm1505_vm1, %v4426_v55  ;;  %v3568_v27 = vmul.f32 0.015625, %v3490_v4  ;;  %v4101_v6 = vmul.f32 %v8137_v31, %v13256_v25  ;;  %v13258_v34 = vld [vmem:[#allocation31_spill] sm:$0xff] }
 0x447   : > { %v8139_v11 = vpop.eup %8138  ;;  %7771 = vmatmul.mubr.msk.f32.gmra.mxu1 %vm1505_vm1, %v4427_v5  ;;  %v3499_v26 = vpop.xlane.xlu1 %3498 }
 0x448   : > { %v11146_v45 = vsub.f32 %v10700_v39, %v3568_v27  ;;  %v3571_v1 = vmul.f32 0.015625, %v3499_v26  ;;  %v3697_v37 = vmul.f32 %v11138_v40, %v11138_v40  ;;  %v4100_v48 = vmul.f32 %v8139_v11, %v13258_v34  ;;  %v11158_v39 = vpop.f32.mrf.mxu1  ;;  %v13260_v27 = vld [vmem:[#allocation55_spill] sm:$0xff] }
 0x449   : > { %v3496_v33 = vpop.xlane.xlu0 %3495  ;;  %v4169_v55 = vmul.f32 %v10964_v38, %v4101_v6  ;;  %13259 = vst [vmem:[#allocation12_spill] sm:$0xff] %v11158_v39 }
 0x44a   : > { %v11153_v31 = vsub.f32 %v10710_v41, %v3571_v1  ;;  %v3570_v25 = vmul.f32 0.015625, %v3496_v33  ;;  %v3875_v59 = vsel %vm1505_vm1, %v3697_v37, 0.0  ;;  %v3696_v18 = vmul.f32 %v11146_v45, %v11146_v45 }
 0x44b   : > { %v3757_v20 = vpop.xlane.xlu1 %3756  ;;  %3876 = vadd.xlane.f32.xlu1 %v3875_v59  ;;  %v4168_v4 = vmul.f32 %v10964_v38, %v4100_v48  ;;  %v4237_v5 = vadd.f32 %v10976_v50, %v4169_v55 }
 0x44c   : > { %v11163_v11 = vsub.f32 %v13260_v27, %v3570_v25  ;;  %v3913_v6 = vmul.f32 0.015625, %v3757_v20  ;;  %v3872_v41 = vsel %vm1505_vm1, %v3696_v18, 0.0  ;;  %v3699_v26 = vmul.f32 %v11153_v31, %v11153_v31  ;;  %v11172_v25 = vpop.f32.mrf.mxu1 }
 0x44d   : > { %3873 = vadd.xlane.f32.xlu0 %v3872_v41  ;;  %v3754_v1 = vpop.xlane.xlu0 %3753  ;;  %v4236_v37 = vadd.f32 %v10976_v50, %v4168_v4  ;;  %vm4301_vm7 = vcmp.ge.f32.partialorder %v4237_v5, 0.0  ;;  %v4365_v34 = vmul.f32 0.01, %v4237_v5  ;;  %13262 = vst [vmem:[#allocation48_spill] sm:$0xff] %v11172_v25  ;;  %v13263_v25 = vld [vmem:[#allocation43_spill] sm:$0xff] }
 0x44e   : > { %13261 = vst [vmem:[#allocation3_spill] sm:$0xff] %v11163_v11  ;;  %v3977_v33 = vadd.f32 1e-05, %v3913_v6  ;;  %v3912_v59 = vmul.f32 0.015625, %v3754_v1  ;;  %v3881_v48 = vsel %vm1505_vm1, %v3699_v26, 0.0  ;;  %v3698_v55 = vmul.f32 %v11163_v11, %v11163_v11 }
 0x44f   : > { %v3505_v20 = vpop.xlane.xlu1 %3504  ;;  %3882 = vadd.xlane.f32.xlu1 %v3881_v48  ;;  %vm4300_vm8 = vcmp.ge.f32.partialorder %v4236_v37, 0.0  ;;  %v4364_v18 = vmul.f32 0.01, %v4236_v37  ;;  %v4429_v26 = vsel %vm4301_vm7, %v4237_v5, %v4365_v34 }
 0x450   : > { %8144 = vrsqrt.f32 %v3977_v33  ;;  %v3976_v27 = vadd.f32 1e-05, %v3912_v59  ;;  %v3573_v41 = vmul.f32 0.015625, %v3505_v20  ;;  %v3878_v4 = vsel %vm1505_vm1, %v3698_v55, 0.0  ;;  %v11181_v33 = vpop.f32.mrf.mxu1 }
 0x451   : > { %v8141_v16 = vpop.eup %8140  ;;  %v4428_v39 = vsel %vm4300_vm8, %v4236_v37, %v4364_v18  ;;  %3879 = vadd.xlane.f32.xlu0 %v3878_v4  ;;  %v3502_v6 = vpop.xlane.xlu0 %3501  ;;  %13264 = vst [vmem:[#allocation28_spill] sm:$0xff] %v11181_v33 }
 0x452   : > { %8146 = vrsqrt.f32 %v3976_v27  ;;  %v11177_v1 = vsub.f32 %v10741_v17, %v3573_v41  ;;  %7773 = vmatprep.mubr.msk.f32.mxu1 %vm1505_vm1, %v4428_v39  ;;  %v3572_v48 = vmul.f32 0.015625, %v3502_v6  ;;  %v4103_v11 = vmul.f32 %v8141_v16, %v13263_v25  ;;  %v13265_v17 = vld [vmem:[#allocation45_spill] sm:$0xff] }
 0x453   : > { %v8143_v59 = vpop.eup %8142  ;;  %7774 = vmatmul.mubr.msk.f32.gmra.mxu1 %vm1505_vm1, %v4429_v26  ;;  %v3511_v55 = vpop.xlane.xlu1 %3510 }
 0x454   : > { %v11185_v37 = vsub.f32 %v10748_v44, %v3572_v48  ;;  %v3575_v20 = vmul.f32 0.015625, %v3511_v55  ;;  %v3701_v5 = vmul.f32 %v11177_v1, %v11177_v1  ;;  %v4102_v34 = vmul.f32 %v8143_v59, %v13265_v17  ;;  %v11197_v44 = vpop.f32.mrf.mxu1 }
 0x455   : > { %v3508_v18 = vpop.xlane.xlu0 %3507  ;;  %v4171_v39 = vmul.f32 %v10964_v38, %v4103_v11  ;;  %13266 = vst [vmem:[#allocation31_spill] sm:$0xff] %v11197_v44 }
 0x456   : > { %v11192_v16 = vsub.f32 %v10758_v9, %v3575_v20  ;;  %v3574_v25 = vmul.f32 0.015625, %v3508_v18  ;;  %v3887_v27 = vsel %vm1505_vm1, %v3701_v5, 0.0  ;;  %v3700_v41 = vmul.f32 %v11185_v37, %v11185_v37 }
 0x457   : > { %3888 = vadd.xlane.f32.xlu1 %v3887_v27  ;;  %v3763_v4 = vpop.xlane.xlu1 %3762  ;;  %v4170_v6 = vmul.f32 %v10964_v38, %v4102_v34  ;;  %v4239_v26 = vadd.f32 %v10976_v50, %v4171_v39  ;;  %v11211_v39 = vpop.f32.mrf.mxu1 }
 0x458   : > { %v11202_v48 = vsub.f32 %v10768_v57, %v3574_v25  ;;  %v3915_v11 = vmul.f32 0.015625, %v3763_v4  ;;  %v3884_v9 = vsel %vm1505_vm1, %v3700_v41, 0.0  ;;  %v3703_v59 = vmul.f32 %v11192_v16, %v11192_v16  ;;  %13268 = vst [vmem:[#allocation43_spill] sm:$0xff] %v11211_v39 }
 0x459   : > { %3885 = vadd.xlane.f32.xlu0 %v3884_v9  ;;  %v3760_v55 = vpop.xlane.xlu0 %3759  ;;  %v4238_v20 = vadd.f32 %v10976_v50, %v4170_v6  ;;  %vm4303_vm9 = vcmp.ge.f32.partialorder %v4239_v26, 0.0  ;;  %v4367_v5 = vmul.f32 0.01, %v4239_v26 }
 0x45a   : > { %13267 = vst [vmem:[#allocation55_spill] sm:$0xff] %v11202_v48  ;;  %v3979_v17 = vadd.f32 1e-05, %v3915_v11  ;;  %v3914_v18 = vmul.f32 0.015625, %v3760_v55  ;;  %v3893_v34 = vsel %vm1505_vm1, %v3703_v59, 0.0  ;;  %v3702_v57 = vmul.f32 %v11202_v48, %v11202_v48  ;;  %v11217_v48 = vpop.f32.mrf.mxu1 }
 0x45b   : > { %3894 = vadd.xlane.f32.xlu1 %v3893_v34  ;;  %v3769_v25 = vpop.xlane.xlu1 %3768  ;;  %vm4302_vm0 = vcmp.ge.f32.partialorder %v4238_v20, 0.0  ;;  %v4366_v27 = vmul.f32 0.01, %v4238_v20  ;;  %v4431_v59 = vsel %vm4303_vm9, %v4239_v26, %v4367_v5  ;;  %v13269_v34 = vld [vmem:[#allocation54_spill] sm:$0xff]  ;;  %13270 = vst [vmem:[#allocation45_spill] sm:$0xff] %v11217_v48 }
 0x45c   : > { %8148 = vrsqrt.f32 %v3979_v17  ;;  %v3978_v41 = vadd.f32 1e-05, %v3914_v18  ;;  %v3917_v4 = vmul.f32 0.015625, %v3769_v25  ;;  %v3890_v6 = vsel %vm1505_vm1, %v3702_v57, 0.0  ;;  %v13271_v25 = vld [vmem:[#allocation56_spill] sm:$0xff] }
 0x45d   : > { %v8145_v9 = vpop.eup %8144  ;;  %v4430_v44 = vsel %vm4302_vm0, %v4238_v20, %v4366_v27  ;;  %3891 = vadd.xlane.f32.xlu0 %v3890_v6  ;;  %v3766_v11 = vpop.xlane.xlu0 %3765 }
 0x45e   : > { %8150 = vrsqrt.f32 %v3978_v41  ;;  %v3981_v55 = vadd.f32 1e-05, %v3917_v4  ;;  %7776 = vmatprep.mubr.msk.f32.mxu1 %vm1505_vm1, %v4430_v44  ;;  %v3916_v39 = vmul.f32 0.015625, %v3766_v11  ;;  %v4105_v33 = vmul.f32 %v8145_v9, %v13269_v34  ;;  %v11223_v4 = vpop.f32.mrf.mxu1 }
 0x45f   : > { %v8147_v17 = vpop.eup %8146  ;;  %7777 = vmatmul.mubr.msk.f32.gmra.mxu1 %vm1505_vm1, %v4431_v59  ;;  %v3775_v18 = vpop.xlane.xlu1 %3774 }
 0x460   : > { %8152 = vrsqrt.f32 %v3981_v55  ;;  %v3980_v57 = vadd.f32 1e-05, %v3916_v39  ;;  %v3919_v20 = vmul.f32 0.015625, %v3775_v18  ;;  %v4104_v27 = vmul.f32 %v8147_v17, %v13271_v25 }
 0x461   : > { %v3772_v6 = vpop.xlane.xlu0 %3771  ;;  %v4173_v26 = vmul.f32 %v10964_v38, %v4105_v33 }
 0x462   : > { %8154 = vrsqrt.f32 %v3980_v57  ;;  %v3983_v5 = vadd.f32 1e-05, %v3919_v20  ;;  %v3918_v44 = vmul.f32 0.015625, %v3772_v6  ;;  %v4172_v41 = vmul.f32 %v10964_v38, %v4104_v27  ;;  %v11227_v57 = vpop.f32.mrf.mxu1 }
 0x463   : > { %v3781_v9 = vpop.xlane.xlu1 %3780  ;;  %v4241_v11 = vadd.f32 %v10976_v50, %v4173_v26  ;;  %13272 = vst [vmem:[#allocation54_spill] sm:$0xff] %v11227_v57 }
 0x464   : > { %8156 = vrsqrt.f32 %v3983_v5  ;;  %v3982_v59 = vadd.f32 1e-05, %v3918_v44  ;;  %v3921_v55 = vmul.f32 0.015625, %v3781_v9  ;;  %v4240_v39 = vadd.f32 %v10976_v50, %v4172_v41 }
 0x465   : > { %v3778_v34 = vpop.xlane.xlu0 %3777  ;;  %vm4305_vm10 = vcmp.ge.f32.partialorder %v4241_v11, 0.0  ;;  %v4369_v17 = vmul.f32 0.01, %v4241_v11 }
 0x466   : > { %8158 = vrsqrt.f32 %v3982_v59  ;;  %v3985_v33 = vadd.f32 1e-05, %v3921_v55  ;;  %v3920_v18 = vmul.f32 0.015625, %v3778_v34  ;;  %vm4304_vm11 = vcmp.ge.f32.partialorder %v4240_v39, 0.0  ;;  %v11231_v55 = vpop.f32.mrf.mxu1 }
 0x467   : > { %v3787_v20 = vpop.xlane.xlu1 %3786  ;;  %v4368_v25 = vmul.f32 0.01, %v4240_v39  ;;  %v4433_v9 = vsel %vm4305_vm10, %v4241_v11, %v4369_v17 }
 0x468   : > { %8160 = vrsqrt.f32 %v3985_v33  ;;  %v3984_v27 = vadd.f32 1e-05, %v3920_v18  ;;  %v3923_v6 = vmul.f32 0.015625, %v3787_v20 }
 0x469   : > { %v8149_v26 = vpop.eup %8148  ;;  %v4432_v5 = vsel %vm4304_vm11, %v4240_v39, %v4368_v25  ;;  %v3784_v44 = vpop.xlane.xlu0 %3783 }
 0x46a   : > { %8162 = vrsqrt.f32 %v3984_v27  ;;  %v3987_v41 = vadd.f32 1e-05, %v3923_v6  ;;  %7779 = vmatprep.mubr.msk.f32.mxu1 %vm1505_vm1, %v4432_v5  ;;  %v3922_v48 = vmul.f32 0.015625, %v3784_v44  ;;  %v4107_v59 = vmul.f32 %v8149_v26, %v10755_v19  ;;  %v11237_v6 = vpop.f32.mrf.mxu1 }
 0x46b   : > { %v8151_v34 = vpop.eup %8150  ;;  %7780 = vmatmul.mubr.msk.f32.gmra.mxu1 %vm1505_vm1, %v4433_v9  ;;  %v3793_v57 = vpop.xlane.xlu1 %3792  ;;  %13273 = vst [vmem:[#allocation56_spill] sm:$0xff] %v11237_v6 }
 0x46c   : > { %v3986_v33 = vadd.f32 1e-05, %v3922_v48  ;;  %v3925_v18 = vmul.f32 0.015625, %v3793_v57  ;;  %v4106_v20 = vmul.f32 %v8151_v34, %v10765_v47  ;;  %8164 = vrsqrt.f32 %v3987_v41 }
 0x46d   : > { %v8153_v39 = vpop.eup %8152  ;;  %v3790_v11 = vpop.xlane.xlu0 %3789  ;;  %v4175_v17 = vmul.f32 %v10964_v38, %v4107_v59 }
 0x46e   : > { %8166 = vrsqrt.f32 %v3986_v33  ;;  %v3989_v25 = vadd.f32 1e-05, %v3925_v18  ;;  %v3924_v27 = vmul.f32 0.015625, %v3790_v11  ;;  %v4174_v19 = vmul.f32 %v10964_v38, %v4106_v20 }
 0x46f   : > { %v8155_v26 = vpop.eup %8154  ;;  %v3799_v5 = vpop.xlane.xlu1 %3798  ;;  %v4243_v44 = vadd.f32 %v10976_v50, %v4175_v17  ;;  %v4109_v48 = vmul.f32 %v8153_v39, %v10775_v62 }
 0x470   : > { %8168 = vrsqrt.f32 %v3989_v25  ;;  %v3988_v47 = vadd.f32 1e-05, %v3924_v27  ;;  %v3927_v57 = vmul.f32 0.015625, %v3799_v5  ;;  %v4242_v9 = vadd.f32 %v10976_v50, %v4174_v19  ;;  %v11244_v17 = vpop.f32.mrf.mxu1 }
 0x471   : > { %v8157_v41 = vpop.eup %8156  ;;  %v3796_v59 = vpop.xlane.xlu0 %3795  ;;  %vm4307_vm12 = vcmp.ge.f32.partialorder %v4243_v44, 0.0  ;;  %v4371_v34 = vmul.f32 0.01, %v4243_v44  ;;  %v4108_v33 = vmul.f32 %v8155_v26, %v10784_v49  ;;  %v4177_v18 = vmul.f32 %v10964_v38, %v4109_v48 }
 0x472   : > { %8170 = vrsqrt.f32 %v3988_v47  ;;  %v3991_v20 = vadd.f32 1e-05, %v3927_v57  ;;  %v3926_v11 = vmul.f32 0.015625, %v3796_v59  ;;  %vm4306_vm13 = vcmp.ge.f32.partialorder %v4242_v9, 0.0 }
 0x473   : > { %v8159_v62 = vpop.eup %8158  ;;  %v4370_v39 = vmul.f32 0.01, %v4242_v9  ;;  %v4435_v25 = vsel %vm4307_vm12, %v4243_v44, %v4371_v34  ;;  %v4176_v27 = vmul.f32 %v10964_v38, %v4108_v33  ;;  %v4245_v19 = vadd.f32 %v10976_v50, %v4177_v18  ;;  %v11255_v33 = vpop.f32.mrf.mxu1 }
 0x474   : > { %8172 = vrsqrt.f32 %v3991_v20  ;;  %v3990_v5 = vadd.f32 1e-05, %v3926_v11  ;;  %v4110_v6 = vmul.f32 %v8159_v62, %v10801_v29  ;;  %v4111_v49 = vmul.f32 %v8157_v41, %v10793_v36  ;;  %13274 = vst [vmem:[#allocation107_spill] sm:$0xff] %v11255_v33  ;;  %v13332_v33 = vld [vmem:[#allocation26_spill] sm:$0xff] }
 0x475   : > { %v8161_v26 = vpop.eup %8160  ;;  %v4434_v48 = vsel %vm4306_vm13, %v4242_v9, %v4370_v39  ;;  %v4244_v47 = vadd.f32 %v10976_v50, %v4176_v27  ;;  %vm4309_vm14 = vcmp.ge.f32.partialorder %v4245_v19, 0.0  ;;  %v4373_v57 = vmul.f32 0.01, %v4245_v19 }
 0x476   : > { %8174 = vrsqrt.f32 %v3990_v5  ;;  %7782 = vmatprep.mubr.msk.f32.mxu1 %vm1505_vm1, %v4434_v48  ;;  %v4178_v44 = vmul.f32 %v10964_v38, %v4110_v6  ;;  %v4179_v59 = vmul.f32 %v10964_v38, %v4111_v49  ;;  %v4113_v34 = vmul.f32 %v8161_v26, %v10809_v30  ;;  %v11264_v26 = vpop.f32.mrf.mxu1 }
 0x477   : > { %v8163_v29 = vpop.eup %8162  ;;  %7783 = vmatmul.mubr.msk.f32.gmra.mxu1 %vm1505_vm1, %v4435_v25  ;;  %v3805_v36 = vpop.xlane.xlu1 %3804  ;;  %vm4308_vm15 = vcmp.ge.f32.partialorder %v4244_v47, 0.0  ;;  %v4372_v9 = vmul.f32 0.01, %v4244_v47  ;;  %v4437_v39 = vsel %vm4309_vm14, %v4245_v19, %v4373_v57 }
 0x478   : > { %v3929_v41 = vmul.f32 0.015625, %v3805_v36  ;;  %v4246_v18 = vadd.f32 %v10976_v50, %v4178_v44  ;;  %v4247_v20 = vadd.f32 %v10976_v50, %v4179_v59  ;;  %v4112_v11 = vmul.f32 %v8163_v29, %v10817_v12 }
 0x479   : > { %v4436_v6 = vsel %vm4308_vm15, %v4244_v47, %v4372_v9  ;;  %v3802_v62 = vpop.xlane.xlu0 %3801  ;;  %v4181_v30 = vmul.f32 %v10964_v38, %v4113_v34  ;;  %v8165_v27 = vpop.eup %8164 }
 0x47a   : > { %v3993_v5 = vadd.f32 1e-05, %v3929_v41  ;;  %7785 = vmatprep.mubr.msk.f32.mxu1 %vm1505_vm1, %v4436_v6  ;;  %v3928_v25 = vmul.f32 0.015625, %v3802_v62  ;;  %vm4310_vm2 = vcmp.ge.f32.partialorder %v4246_v18, 0.0  ;;  %v4374_v49 = vmul.f32 0.01, %v4246_v18  ;;  %v11275_v62 = vpop.f32.mrf.mxu1 }
 0x47b   : > { %v8167_v48 = vpop.eup %8166  ;;  %7786 = vmatmul.mubr.msk.f32.gmra.mxu1 %vm1505_vm1, %v4437_v39  ;;  %vm4311_vm3 = vcmp.ge.f32.partialorder %v4247_v20, 0.0  ;;  %v4375_v12 = vmul.f32 0.01, %v4247_v20  ;;  %v4180_v47 = vmul.f32 %v10964_v38, %v4112_v11  ;;  %v4249_v19 = vadd.f32 %v10976_v50, %v4181_v30  ;;  %13275 = vst [vmem:[#allocation108_spill] sm:$0xff] %v11275_v62  ;;  %v13329_v62 = vld [vmem:[#allocation14_spill] sm:$0xff] }
 0x47c   : > { %8176 = vrsqrt.f32 %v3993_v5  ;;  %v3992_v57 = vadd.f32 1e-05, %v3928_v25  ;;  %v4438_v44 = vsel %vm4310_vm2, %v4246_v18, %v4374_v49  ;;  %v4114_v59 = vmul.f32 %v8167_v48, %v10833_v54 }
 0x47d   : > { %v8169_v34 = vpop.eup %8168  ;;  %7788 = vmatprep.mubr.msk.f32.mxu1 %vm1505_vm1, %v4438_v44  ;;  %v4439_v29 = vsel %vm4311_vm3, %v4247_v20, %v4375_v12  ;;  %v4248_v36 = vadd.f32 %v10976_v50, %v4180_v47  ;;  %vm4313_vm4 = vcmp.ge.f32.partialorder %v4249_v19, 0.0  ;;  %v4377_v9 = vmul.f32 0.01, %v4249_v19  ;;  %v11284_v44 = vpop.f32.mrf.mxu1 }
 0x47e   : > { %8178 = vrsqrt.f32 %v3992_v57  ;;  %v4182_v41 = vmul.f32 %v10964_v38, %v4114_v59  ;;  %v4115_v11 = vmul.f32 %v8165_v27, %v10825_v61  ;;  %v4117_v6 = vmul.f32 %v8169_v34, %v10841_v24 }
 0x47f   : > { %v8171_v18 = vpop.eup %8170  ;;  %7789 = vmatmul.mubr.msk.f32.gmra.mxu1 %vm1505_vm1, %v4439_v29  ;;  %v3811_v54 = vpop.xlane.xlu1 %3810  ;;  %vm4312_vm5 = vcmp.ge.f32.partialorder %v4248_v36, 0.0  ;;  %v4376_v39 = vmul.f32 0.01, %v4248_v36  ;;  %v4441_v24 = vsel %vm4313_vm4, %v4249_v19, %v4377_v9 }
 0x480   : > { %v3931_v20 = vmul.f32 0.015625, %v3811_v54  ;;  %v4250_v30 = vadd.f32 %v10976_v50, %v4182_v41  ;;  %v4183_v5 = vmul.f32 %v10964_v38, %v4115_v11  ;;  %v4116_v25 = vmul.f32 %v8171_v18, %v10849_v28 }
 0x481   : > { %v8173_v49 = vpop.eup %8172  ;;  %v4440_v48 = vsel %vm4312_vm5, %v4248_v36, %v4376_v39  ;;  %v3808_v61 = vpop.xlane.xlu0 %3807  ;;  %v4185_v27 = vmul.f32 %v10964_v38, %v4117_v6 }
 0x482   : > { %v3995_v12 = vadd.f32 1e-05, %v3931_v20  ;;  %7791 = vmatprep.mubr.msk.f32.mxu1 %vm1505_vm1, %v4440_v48  ;;  %v3930_v47 = vmul.f32 0.015625, %v3808_v61  ;;  %vm4314_vm6 = vcmp.ge.f32.partialorder %v4250_v30, 0.0  ;;  %v4378_v57 = vmul.f32 0.01, %v4250_v30  ;;  %v11296_v39 = vpop.f32.mrf.mxu1 }
 0x483   : > { %v8175_v59 = vpop.eup %8174  ;;  %7792 = vmatmul.mubr.msk.f32.gmra.mxu1 %vm1505_vm1, %v4441_v24  ;;  %v4251_v28 = vadd.f32 %v10976_v50, %v4183_v5  ;;  %v4184_v34 = vmul.f32 %v10964_v38, %v4116_v25  ;;  %v4253_v29 = vadd.f32 %v10976_v50, %v4185_v27  ;;  %v4119_v19 = vmul.f32 %v8173_v49, %v10867_v46 }
 0x484   : > { %8180 = vrsqrt.f32 %v3995_v12  ;;  %v3994_v36 = vadd.f32 1e-05, %v3930_v47  ;;  %v4442_v9 = vsel %vm4314_vm6, %v4250_v30, %v4378_v57  ;;  %v4118_v41 = vmul.f32 %v8175_v59, %v10873_v60  ;;  %13276 = vst [vmem:[#allocation109_spill] sm:$0xff] %v11296_v39  ;;  %v11302_v57 = vpop.f32.mrf.mxu1  ;;  %v13331_v39 = vld [vmem:[#allocation32_spill] sm:$0xff] }
 0x485   : > { %7794 = vmatprep.mubr.msk.f32.mxu1 %vm1505_vm1, %v4442_v9  ;;  %vm4315_vm7 = vcmp.ge.f32.partialorder %v4251_v28, 0.0  ;;  %v4379_v11 = vmul.f32 0.01, %v4251_v28  ;;  %v4252_v6 = vadd.f32 %v10976_v50, %v4184_v34  ;;  %v4187_v54 = vmul.f32 %v10964_v38, %v4119_v19 }
 0x486   : > { %8182 = vrsqrt.f32 %v3994_v36  ;;  %v4186_v18 = vmul.f32 %v10964_v38, %v4118_v41  ;;  %v4381_v30 = vmul.f32 0.01, %v4253_v29  ;;  %vm4317_vm9 = vcmp.ge.f32.partialorder %v4253_v29, 0.0 }
 0x487   : > { %v4443_v20 = vsel %vm4315_vm7, %v4251_v28, %v4379_v11  ;;  %v3817_v46 = vpop.xlane.xlu1 %3816  ;;  %vm4316_vm8 = vcmp.ge.f32.partialorder %v4252_v6, 0.0  ;;  %v4380_v5 = vmul.f32 0.01, %v4252_v6  ;;  %v4255_v49 = vadd.f32 %v10976_v50, %v4187_v54 }
 0x488   : > { %7795 = vmatmul.mubr.msk.f32.gmra.mxu1 %vm1505_vm1, %v4443_v20  ;;  %v3933_v60 = vmul.f32 0.015625, %v3817_v46  ;;  %v4254_v25 = vadd.f32 %v10976_v50, %v4186_v18  ;;  %v4445_v28 = vsel %vm4317_vm9, %v4253_v29, %v4381_v30  ;;  %v11310_v18 = vpop.f32.mrf.mxu1 }
 0x489   : > { %v8177_v48 = vpop.eup %8176  ;;  %v4444_v61 = vsel %vm4316_vm8, %v4252_v6, %v4380_v5  ;;  %v3814_v24 = vpop.xlane.xlu0 %3813  ;;  %vm4319_vm10 = vcmp.ge.f32.partialorder %v4255_v49, 0.0  ;;  %v4383_v34 = vmul.f32 0.01, %v4255_v49  ;;  %13277 = vst [vmem:[#allocation110_spill] sm:$0xff] %v11310_v18 }
 0x48a   : > { %v3997_v27 = vadd.f32 1e-05, %v3933_v60  ;;  %7797 = vmatprep.mubr.msk.f32.mxu1 %vm1505_vm1, %v4444_v61  ;;  %v3932_v12 = vmul.f32 0.015625, %v3814_v24  ;;  %vm4318_vm0 = vcmp.ge.f32.partialorder %v4254_v25, 0.0  ;;  %v4382_v47 = vmul.f32 0.01, %v4254_v25 }
 0x48b   : > { %v8179_v59 = vpop.eup %8178  ;;  %v4121_v19 = vmul.f32 %v8177_v48, %v10887_v2  ;;  %v4447_v29 = vsel %vm4319_vm10, %v4255_v49, %v4383_v34  ;;  %v11316_v48 = vpop.f32.mrf.mxu1 }
 0x48c   : > { %8184 = vrsqrt.f32 %v3997_v27  ;;  %v3996_v36 = vadd.f32 1e-05, %v3932_v12  ;;  %7798 = vmatmul.mubr.msk.f32.gmra.mxu1 %vm1505_vm1, %v4445_v28  ;;  %v4446_v9 = vsel %vm4318_vm0, %v4254_v25, %v4382_v47  ;;  %v4120_v41 = vmul.f32 %v8179_v59, %v10892_v8 }
 0x48d   : > { %7800 = vmatprep.mubr.msk.f32.mxu1 %vm1505_vm1, %v4446_v9  ;;  %v4189_v11 = vmul.f32 %v10964_v38, %v4121_v19  ;;  %v11324_v19 = vpop.f32.mrf.mxu1 }
 0x48e   : > { %8186 = vrsqrt.f32 %v3996_v36  ;;  %v4188_v6 = vmul.f32 %v10964_v38, %v4120_v41  ;;  %13278 = vst [vmem:[#allocation111_spill] sm:$0xff] %v11324_v19 }
 0x48f   : > { %v4257_v54 = vadd.f32 %v10976_v50, %v4189_v11 }
 0x490   : > { %7801 = vmatmul.mubr.msk.f32.gmra.mxu1 %vm1505_vm1, %v4447_v29  ;;  %v3823_v2 = vpop.xlane.xlu1 %3822  ;;  %v4256_v20 = vadd.f32 %v10976_v50, %v4188_v6 }
 0x491   : > { %v8181_v46 = vpop.eup %8180  ;;  %v3935_v5 = vmul.f32 0.015625, %v3823_v2  ;;  %v4385_v8 = vmul.f32 0.01, %v4257_v54  ;;  %vm4321_vm12 = vcmp.ge.f32.partialorder %v4257_v54, 0.0 }
 0x492   : > { %v3820_v30 = vpop.xlane.xlu0 %3819  ;;  %vm4320_vm11 = vcmp.ge.f32.partialorder %v4256_v20, 0.0  ;;  %v4384_v60 = vmul.f32 0.01, %v4256_v20  ;;  %v4123_v25 = vmul.f32 %v8181_v46, %v10903_v3 }
 0x493   : > { %v8183_v61 = vpop.eup %8182  ;;  %v3999_v49 = vadd.f32 1e-05, %v3935_v5  ;;  %v3934_v24 = vmul.f32 0.015625, %v3820_v30  ;;  %v4449_v28 = vsel %vm4321_vm12, %v4257_v54, %v4385_v8  ;;  %v11328_v54 = vpop.f32.mrf.mxu1 }
 0x494   : > { %v4448_v27 = vsel %vm4320_vm11, %v4256_v20, %v4384_v60  ;;  %v4122_v12 = vmul.f32 %v8183_v61, %v10908_v63  ;;  %v4191_v47 = vmul.f32 %v10964_v38, %v4123_v25 }
 0x495   : > { %8188 = vrsqrt.f32 %v3999_v49  ;;  %v3998_v59 = vadd.f32 1e-05, %v3934_v24  ;;  %7803 = vmatprep.mubr.msk.f32.mxu1 %vm1505_vm1, %v4448_v27  ;;  %v11336_v24 = vpop.f32.mrf.mxu1 }
 0x496   : > { %7804 = vmatmul.mubr.msk.f32.gmra.mxu1 %vm1505_vm1, %v4449_v28  ;;  %v4190_v34 = vmul.f32 %v10964_v38, %v4122_v12  ;;  %v4259_v3 = vadd.f32 %v10976_v50, %v4191_v47  ;;  %13279 = vst [vmem:[#allocation112_spill] sm:$0xff] %v11336_v24  ;;  %v13324_v24 = vld [vmem:[#allocation85_spill] sm:$0xff] }
 0x497   : > { %8190 = vrsqrt.f32 %v3998_v59 }
 0x498   : > { %v3829_v36 = vpop.xlane.xlu1 %3828  ;;  %v4258_v9 = vadd.f32 %v10976_v50, %v4190_v34  ;;  %v4387_v11 = vmul.f32 0.01, %v4259_v3  ;;  %vm4323_vm14 = vcmp.ge.f32.partialorder %v4259_v3, 0.0 }
 0x499   : > { %v8185_v63 = vpop.eup %8184  ;;  %v3937_v41 = vmul.f32 0.015625, %v3829_v36 }
 0x49a   : > { %vm4322_vm13 = vcmp.ge.f32.partialorder %v4258_v9, 0.0  ;;  %v4386_v6 = vmul.f32 0.01, %v4258_v9  ;;  %v4125_v29 = vmul.f32 %v8185_v63, %v10919_v21  ;;  %v4451_v25 = vsel %vm4323_vm14, %v4259_v3, %v4387_v11  ;;  %v11339_v3 = vpop.f32.mrf.mxu1 }
 0x49b   : > { %v8187_v2 = vpop.eup %8186  ;;  %v4001_v20 = vadd.f32 1e-05, %v3937_v41  ;;  %v3826_v46 = vpop.xlane.xlu0 %3825 }
 0x49c   : > { %v3936_v5 = vmul.f32 0.015625, %v3826_v46  ;;  %v4450_v8 = vsel %vm4322_vm13, %v4258_v9, %v4386_v6  ;;  %v4124_v30 = vmul.f32 %v8187_v2, %v10924_v43  ;;  %v4193_v60 = vmul.f32 %v10964_v38, %v4125_v29  ;;  %v11346_v46 = vpop.f32.mrf.mxu1 }
 0x49d   : > { %8192 = vrsqrt.f32 %v4001_v20  ;;  %7806 = vmatprep.mubr.msk.f32.mxu1 %vm1505_vm1, %v4450_v8  ;;  %13280 = vst [vmem:[#allocation113_spill] sm:$0xff] %v11346_v46 }
 0x49e   : > { %v4000_v61 = vadd.f32 1e-05, %v3936_v5  ;;  %7807 = vmatmul.mubr.msk.f32.gmra.mxu1 %vm1505_vm1, %v4451_v25  ;;  %v4192_v21 = vmul.f32 %v10964_v38, %v4124_v30  ;;  %v4261_v49 = vadd.f32 %v10976_v50, %v4193_v60 }
 0x4a0   : > { %8194 = vrsqrt.f32 %v4000_v61  ;;  %v3835_v27 = vpop.xlane.xlu1 %3834  ;;  %v4260_v12 = vadd.f32 %v10976_v50, %v4192_v21  ;;  %v4389_v43 = vmul.f32 0.01, %v4261_v49  ;;  %vm4325_vm15 = vcmp.ge.f32.partialorder %v4261_v49, 0.0  ;;  %v11351_v21 = vpop.f32.mrf.mxu1 }
 0x4a1   : > { %v3939_v47 = vmul.f32 0.015625, %v3835_v27 }
 0x4a2   : > { %v8189_v59 = vpop.eup %8188  ;;  %v3832_v28 = vpop.xlane.xlu0 %3831  ;;  %vm4324_vm2 = vcmp.ge.f32.partialorder %v4260_v12, 0.0  ;;  %v4388_v34 = vmul.f32 0.01, %v4260_v12  ;;  %v4453_v6 = vsel %vm4325_vm15, %v4261_v49, %v4389_v43 }
 0x4a3   : > { %v4003_v36 = vadd.f32 1e-05, %v3939_v47  ;;  %v3938_v9 = vmul.f32 0.015625, %v3832_v28  ;;  %v4127_v63 = vmul.f32 %v8189_v59, %v10935_v14 }
 0x4a4   : > { %v8191_v41 = vpop.eup %8190  ;;  %v4452_v11 = vsel %vm4324_vm2, %v4260_v12, %v4388_v34 }
 0x4a5   : > { %8196 = vrsqrt.f32 %v4003_v36  ;;  %v4002_v29 = vadd.f32 1e-05, %v3938_v9  ;;  %7809 = vmatprep.mubr.msk.f32.mxu1 %vm1505_vm1, %v4452_v11  ;;  %v4126_v2 = vmul.f32 %v8191_v41, %v10940_v23  ;;  %v4195_v20 = vmul.f32 %v10964_v38, %v4127_v63  ;;  %v13281_v9 = vld [vmem:[#allocation86_spill] sm:$0xff]  ;;  %v11357_v41 = vpop.f32.mrf.mxu1 }
 0x4a6   : > { %7810 = vmatmul.mubr.msk.f32.gmra.mxu1 %vm1505_vm1, %v4453_v6  ;;  %13282 = vst [vmem:[#allocation86_spill] sm:$0xff] %v11357_v41 }
 0x4a7   : > { %8198 = vrsqrt.f32 %v4002_v29  ;;  %v4194_v5 = vmul.f32 %v10964_v38, %v4126_v2  ;;  %v4263_v14 = vadd.f32 %v10976_v50, %v4195_v20 }
 0x4a9   : > { %v3841_v8 = vpop.xlane.xlu1 %3840  ;;  %v4262_v30 = vadd.f32 %v10976_v50, %v4194_v5  ;;  %v4391_v61 = vmul.f32 0.01, %v4263_v14  ;;  %vm4327_vm4 = vcmp.ge.f32.partialorder %v4263_v14, 0.0  ;;  %v11363_v5 = vpop.f32.mrf.mxu1 }
 0x4aa   : > { %v8193_v60 = vpop.eup %8192  ;;  %v3941_v25 = vmul.f32 0.015625, %v3841_v8 }
 0x4ab   : > { %v3838_v23 = vpop.xlane.xlu0 %3837  ;;  %vm4326_vm3 = vcmp.ge.f32.partialorder %v4262_v30, 0.0  ;;  %v4390_v49 = vmul.f32 0.01, %v4262_v30  ;;  %v4129_v27 = vmul.f32 %v8193_v60, %v10951_v7  ;;  %v4455_v36 = vsel %vm4327_vm4, %v4263_v14, %v4391_v61 }
 0x4ac   : > { %v4005_v12 = vadd.f32 1e-05, %v3941_v25  ;;  %v3940_v43 = vmul.f32 0.015625, %v3838_v23 }
 0x4ad   : > { %v8195_v47 = vpop.eup %8194  ;;  %v4454_v59 = vsel %vm4326_vm3, %v4262_v30, %v4390_v49  ;;  %v4197_v28 = vmul.f32 %v10964_v38, %v4129_v27  ;;  %v13283_v30 = vld [vmem:[#allocation101_spill] sm:$0xff] }
 0x4ae   : > { %8200 = vrsqrt.f32 %v4005_v12  ;;  %v4004_v34 = vadd.f32 1e-05, %v3940_v43  ;;  %7812 = vmatprep.mubr.msk.f32.mxu1 %vm1505_vm1, %v4454_v59  ;;  %v4128_v63 = vmul.f32 %v8195_v47, %v13281_v9  ;;  %v11368_v59 = vpop.f32.mrf.mxu1 }
 0x4af   : > { %7813 = vmatmul.mubr.msk.f32.gmra.mxu1 %vm1505_vm1, %v4455_v36  ;;  %v4265_v11 = vadd.f32 %v10976_v50, %v4197_v28  ;;  %13284 = vst [vmem:[#allocation101_spill] sm:$0xff] %v11368_v59  ;;  %v13322_v59 = vld [vmem:[#allocation71_spill] sm:$0xff] }
 0x4b0   : > { %8202 = vrsqrt.f32 %v4004_v34  ;;  %v4196_v7 = vmul.f32 %v10964_v38, %v4128_v63  ;;  %v11375_v63 = vpop.f32.mrf.mxu1 }
 0x4b1   : > { %v3847_v6 = vpop.xlane.xlu1 %3846  ;;  %vm4329_vm5 = vcmp.ge.f32.partialorder %v4265_v11, 0.0  ;;  %v4393_v14 = vmul.f32 0.01, %v4265_v11 }
 0x4b2   : > { %v8197_v29 = vpop.eup %8196  ;;  %v3943_v2 = vmul.f32 0.015625, %v3847_v6  ;;  %v4264_v20 = vadd.f32 %v10976_v50, %v4196_v7 }
 0x4b3   : > { %v3844_v8 = vpop.xlane.xlu0 %3843  ;;  %v4131_v60 = vmul.f32 %v8197_v29, %v13283_v30  ;;  %v4457_v28 = vsel %vm4329_vm5, %v4265_v11, %v4393_v14 }
 0x4b4   : > { %v8199_v25 = vpop.eup %8198  ;;  %v4007_v61 = vadd.f32 1e-05, %v3943_v2  ;;  %v3942_v23 = vmul.f32 0.015625, %v3844_v8  ;;  %vm4328_vm6 = vcmp.ge.f32.partialorder %v4264_v20, 0.0  ;;  %v4392_v49 = vmul.f32 0.01, %v4264_v20 }
 0x4b5   : > { %v4130_v27 = vmul.f32 %v8199_v25, %v10989_v0  ;;  %v4199_v12 = vmul.f32 %v10964_v38, %v4131_v60 }
 0x4b6   : > { %8204 = vrsqrt.f32 %v4007_v61  ;;  %v4006_v43 = vadd.f32 1e-05, %v3942_v23  ;;  %v4456_v47 = vsel %vm4328_vm6, %v4264_v20, %v4392_v49  ;;  %v11381_v61 = vpop.f32.mrf.mxu1 }
 0x4b7   : > { %7815 = vmatprep.mubr.msk.f32.mxu1 %vm1505_vm1, %v4456_v47  ;;  %v4198_v34 = vmul.f32 %v10964_v38, %v4130_v27  ;;  %v4267_v36 = vadd.f32 %v10976_v50, %v4199_v12  ;;  %13285 = vst [vmem:[#allocation114_spill] sm:$0xff] %v11381_v61 }
 0x4b8   : > { %8206 = vrsqrt.f32 %v4006_v43  ;;  %7816 = vmatmul.mubr.msk.f32.gmra.mxu1 %vm1505_vm1, %v4457_v28 }
 0x4b9   : > { %v4266_v9 = vadd.f32 %v10976_v50, %v4198_v34  ;;  %v4395_v0 = vmul.f32 0.01, %v4267_v36  ;;  %vm4331_vm8 = vcmp.ge.f32.partialorder %v4267_v36, 0.0 }
 0x4bb   : > { %v8201_v7 = vpop.eup %8200  ;;  %vm4330_vm7 = vcmp.ge.f32.partialorder %v4266_v9, 0.0  ;;  %v4394_v6 = vmul.f32 0.01, %v4266_v9  ;;  %v4459_v30 = vsel %vm4331_vm8, %v4267_v36, %v4395_v0 }
 0x4bc   : > { %v3853_v29 = vpop.xlane.xlu1 %3852  ;;  %v4133_v2 = vmul.f32 %v8201_v7, %v11010_v10 }
 0x4bd   : > { %v8203_v11 = vpop.eup %8202  ;;  %v3945_v20 = vmul.f32 0.015625, %v3853_v29  ;;  %v4458_v8 = vsel %vm4330_vm7, %v4266_v9, %v4394_v6 }
 0x4be   : > { %7818 = vmatprep.mubr.msk.f32.mxu1 %vm1505_vm1, %v4458_v8  ;;  %v3850_v14 = vpop.xlane.xlu0 %3849  ;;  %v4132_v60 = vmul.f32 %v8203_v11, %v11015_v53  ;;  %v4201_v25 = vmul.f32 %v10964_v38, %v4133_v2  ;;  %v11387_v53 = vpop.f32.mrf.mxu1 }
 0x4bf   : > { %v4009_v23 = vadd.f32 1e-05, %v3945_v20  ;;  %v3944_v49 = vmul.f32 0.015625, %v3850_v14  ;;  %7819 = vmatmul.mubr.msk.f32.gmra.mxu1 %vm1505_vm1, %v4459_v30 }
 0x4c0   : > { %v3859_v27 = vpop.xlane.xlu1 %3858  ;;  %v4200_v10 = vmul.f32 %v10964_v38, %v4132_v60  ;;  %v4269_v12 = vadd.f32 %v10976_v50, %v4201_v25  ;;  %v11392_v30 = vpop.f32.mrf.mxu1 }
 0x4c1   : > { %8208 = vrsqrt.f32 %v4009_v23  ;;  %v4008_v43 = vadd.f32 1e-05, %v3944_v49  ;;  %v3947_v47 = vmul.f32 0.015625, %v3859_v27  ;;  %13286 = vst [vmem:[#allocation115_spill] sm:$0xff] %v11392_v30  ;;  %v13321_v30 = vld [vmem:[#allocation77_spill] sm:$0xff] }
 0x4c2   : > { %v3856_v28 = vpop.xlane.xlu0 %3855  ;;  %v4268_v34 = vadd.f32 %v10976_v50, %v4200_v10  ;;  %v4397_v7 = vmul.f32 0.01, %v4269_v12  ;;  %vm4333_vm0 = vcmp.ge.f32.partialorder %v4269_v12, 0.0 }
 0x4c3   : > { %v8205_v36 = vpop.eup %8204  ;;  %8210 = vrsqrt.f32 %v4008_v43  ;;  %v4011_v9 = vadd.f32 1e-05, %v3947_v47  ;;  %v3946_v0 = vmul.f32 0.015625, %v3856_v28  ;;  %v11399_v43 = vpop.f32.mrf.mxu1 }
 0x4c4   : > { %vm4332_vm9 = vcmp.ge.f32.partialorder %v4268_v34, 0.0  ;;  %v4396_v6 = vmul.f32 0.01, %v4268_v34  ;;  %v4135_v29 = vmul.f32 %v8205_v36, %v11035_v15  ;;  %v4461_v60 = vsel %vm4333_vm0, %v4269_v12, %v4397_v7 }
 0x4c5   : > { %v8207_v2 = vpop.eup %8206  ;;  %8212 = vrsqrt.f32 %v4011_v9  ;;  %v4010_v11 = vadd.f32 1e-05, %v3946_v0 }
 0x4c6   : > { %v4460_v20 = vsel %vm4332_vm9, %v4268_v34, %v4396_v6  ;;  %v4134_v8 = vmul.f32 %v8207_v2, %v11039_v35  ;;  %v4203_v14 = vmul.f32 %v10964_v38, %v4135_v29  ;;  %v11401_v2 = vpop.f32.mrf.mxu1 }
 0x4c7   : > { %8214 = vrsqrt.f32 %v4010_v11  ;;  %7821 = vmatprep.mubr.msk.f32.mxu1 %vm1505_vm1, %v4460_v20  ;;  %13287 = vst [vmem:[#allocation116_spill] sm:$0xff] %v11401_v2  ;;  %v13318_v2 = vld [vmem:[#allocation60_spill] sm:$0xff] }
 0x4c8   : > { %7822 = vmatmul.mubr.msk.f32.gmra.mxu1 %vm1505_vm1, %v4461_v60  ;;  %v3865_v25 = vpop.xlane.xlu1 %3864  ;;  %v4202_v23 = vmul.f32 %v10964_v38, %v4134_v8  ;;  %v4271_v15 = vadd.f32 %v10976_v50, %v4203_v14 }
 0x4c9   : > { %v3949_v49 = vmul.f32 0.015625, %v3865_v25 }
 0x4ca   : > { %v3862_v27 = vpop.xlane.xlu0 %3861  ;;  %v4270_v10 = vadd.f32 %v10976_v50, %v4202_v23  ;;  %v4399_v35 = vmul.f32 0.01, %v4271_v15  ;;  %vm4335_vm10 = vcmp.ge.f32.partialorder %v4271_v15, 0.0 }
 0x4cb   : > { %v4013_v47 = vadd.f32 1e-05, %v3949_v49  ;;  %v3948_v28 = vmul.f32 0.015625, %v3862_v27 }
 0x4cc   : > { %v3871_v34 = vpop.xlane.xlu1 %3870  ;;  %vm4334_vm11 = vcmp.ge.f32.partialorder %v4270_v10, 0.0  ;;  %v4398_v12 = vmul.f32 0.01, %v4270_v10  ;;  %v4463_v29 = vsel %vm4335_vm10, %v4271_v15, %v4399_v35  ;;  %v11408_v15 = vpop.f32.mrf.mxu1 }
 0x4cd   : > { %8216 = vrsqrt.f32 %v4013_v47  ;;  %v4012_v36 = vadd.f32 1e-05, %v3948_v28  ;;  %v3951_v9 = vmul.f32 0.015625, %v3871_v34  ;;  %v13288_v28 = vld [vmem:[#allocation2_spill] sm:$0xff] }
 0x4ce   : > { %v8209_v0 = vpop.eup %8208  ;;  %v4462_v7 = vsel %vm4334_vm11, %v4270_v10, %v4398_v12  ;;  %v3868_v6 = vpop.xlane.xlu0 %3867  ;;  %v11414_v34 = vsub.s32 2, %v13288_v28 }
 0x4cf   : > { %8218 = vrsqrt.f32 %v4012_v36  ;;  %v4015_v11 = vadd.f32 1e-05, %v3951_v9  ;;  %7824 = vmatprep.mubr.msk.f32.mxu1 %vm1505_vm1, %v4462_v7  ;;  %v3950_v20 = vmul.f32 0.015625, %v3868_v6  ;;  %v4137_v8 = vmul.f32 %v8209_v0, %v11060_v52  ;;  %v11417_v9 = vpop.f32.mrf.mxu1 }
 0x4d0   : > { %v8211_v14 = vpop.eup %8210  ;;  %7825 = vmatmul.mubr.msk.f32.gmra.mxu1 %vm1505_vm1, %v4463_v29  ;;  %13289 = vst [vmem:[#allocation2_spill] sm:$0xff] %v11414_v34  ;;  %13290 = vst [vmem:[#allocation117_spill] sm:$0xff] %v11417_v9 }
 0x4d1   : > { %8220 = vrsqrt.f32 %v4015_v11  ;;  %v4014_v60 = vadd.f32 1e-05, %v3950_v20  ;;  %v4136_v25 = vmul.f32 %v8211_v14, %v11066_v42  ;;  %v4205_v23 = vmul.f32 %v10964_v38, %v4137_v8  ;;  %v8435_v8 = vld [vmem:[%s12830_s4] sm:$0x7] }
 0x4d2   : > { %v8213_v49 = vpop.eup %8212  ;;  %v11425_v14 = vrot.slane %v8435_v8, %v11414_v34 }
 0x4d3   : > { %8222 = vrsqrt.f32 %v4014_v60  ;;  %v4204_v27 = vmul.f32 %v10964_v38, %v4136_v25  ;;  %v4273_v10 = vadd.f32 %v10976_v50, %v4205_v23  ;;  %v4139_v35 = vmul.f32 %v8213_v49, %v11073_v56 }
 0x4d4   : > { %v8215_v52 = vpop.eup %8214  ;;  %v3877_v47 = vpop.xlane.xlu1 %3876 }
 0x4d5   : > { %v3953_v12 = vmul.f32 0.015625, %v3877_v47  ;;  %v4272_v42 = vadd.f32 %v10976_v50, %v4204_v27  ;;  %vm4337_vm12 = vcmp.ge.f32.partialorder %v4273_v10, 0.0  ;;  %v4401_v0 = vmul.f32 0.01, %v4273_v10 }
 0x4d6   : > { %v3874_v36 = vpop.xlane.xlu0 %3873  ;;  %v4138_v7 = vmul.f32 %v8215_v52, %v11085_v51  ;;  %v4207_v6 = vmul.f32 %v10964_v38, %v4139_v35 }
 0x4d7   : > { %v4017_v29 = vadd.f32 1e-05, %v3953_v12  ;;  %v3952_v11 = vmul.f32 0.015625, %v3874_v36  ;;  %vm4336_vm13 = vcmp.ge.f32.partialorder %v4272_v42, 0.0  ;;  %v4400_v56 = vmul.f32 0.01, %v4272_v42 }
 0x4d8   : > { %v3883_v20 = vpop.xlane.xlu1 %3882  ;;  %v4206_v60 = vmul.f32 %v10964_v38, %v4138_v7  ;;  %v4275_v25 = vadd.f32 %v10976_v50, %v4207_v6  ;;  %v4465_v47 = vsel %vm4337_vm12, %v4273_v10, %v4401_v0  ;;  %v13291_v7 = vld [vmem:[#allocation72_spill] sm:$0xff] }
 0x4d9   : > { %8224 = vrsqrt.f32 %v4017_v29  ;;  %v4016_v51 = vadd.f32 1e-05, %v3952_v11  ;;  %v3955_v23 = vmul.f32 0.015625, %v3883_v20  ;;  %v4464_v49 = vsel %vm4336_vm13, %v4272_v42, %v4400_v56  ;;  %v13292_v20 = vld [vmem:[#allocation70_spill] sm:$0xff] }
 0x4da   : > { %v8217_v27 = vpop.eup %8216  ;;  %v7757_v35 = vpop.f32.mrf.mxu1  ;;  %7827 = vmatprep.mubr.msk.f32.mxu1 %vm1505_vm1, %v4464_v49  ;;  %v4274_v28 = vadd.f32 %v10976_v50, %v4206_v60  ;;  %vm4339_vm14 = vcmp.ge.f32.partialorder %v4275_v25, 0.0  ;;  %v4403_v12 = vmul.f32 0.01, %v4275_v25 }
 0x4db   : > { %v3880_v52 = vpop.xlane.xlu0 %3879  ;;  %8226 = vrsqrt.f32 %v4016_v51  ;;  %v4019_v36 = vadd.f32 1e-05, %v3955_v23  ;;  %v4753_v8 = vadd.f32 %v7757_v35, %v13291_v7  ;;  %7828 = vmatmul.mubr.msk.f32.gmra.mxu1 %vm1505_vm1, %v4465_v47  ;;  %v4141_v56 = vmul.f32 %v8217_v27, %v11099_v13 }
 0x4dc   : > { %v3954_v6 = vmul.f32 0.015625, %v3880_v52  ;;  %v8219_v29 = vpop.eup %8218  ;;  %v4747_v42 = vpop.f32.mrf.mxu1  ;;  %vm4338_vm15 = vcmp.ge.f32.partialorder %v4274_v28, 0.0  ;;  %v4402_v11 = vmul.f32 0.01, %v4274_v28  ;;  %v4467_v49 = vsel %vm4339_vm14, %v4275_v25, %v4403_v12 }
 0x4dd   : > { %8228 = vrsqrt.f32 %v4019_v36  ;;  %v11436_v10 = vadd.f32 %v11425_v14, %v4753_v8  ;;  %v4748_v60 = vadd.f32 %v4747_v42, %v13292_v20  ;;  %v4140_v35 = vmul.f32 %v8219_v29, %v11107_v58 }
 0x4de   : > { %v4018_v0 = vadd.f32 1e-05, %v3954_v6  ;;  %v8221_v51 = vpop.eup %8220  ;;  %v4466_v23 = vsel %vm4338_vm15, %v4274_v28, %v4402_v11  ;;  %v4209_v52 = vmul.f32 %v10964_v38, %v4141_v56 }
 0x4df   : > { %v11443_v47 = vadd.f32 %v11425_v14, %v4748_v60  ;;  %7830 = vmatprep.mubr.msk.f32.mxu1 %vm1505_vm1, %v4466_v23  ;;  %v5137_v13 = vsel %vm1505_vm1, %v11436_v10, 0.0  ;;  %v4143_v27 = vmul.f32 %v8221_v51, %v11114_v22  ;;  %v4208_v58 = vmul.f32 %v10964_v38, %v4140_v35 }
 0x4e0   : > { %8230 = vrsqrt.f32 %v4018_v0  ;;  %v8223_v36 = vpop.eup %8222  ;;  %7831 = vmatmul.mubr.msk.f32.gmra.mxu1 %vm1505_vm1, %v4467_v49  ;;  %v3889_v28 = vpop.xlane.xlu1 %3888  ;;  %5138 = vadd.xlane.f32.xlu1 %v5137_v13  ;;  %v4277_v25 = vadd.f32 %v10976_v50, %v4209_v52  ;;  %v13293_v0 = vld [vmem:[#allocation79_spill] sm:$0xff] }
 0x4e1   : > { %v3957_v12 = vmul.f32 0.015625, %v3889_v28  ;;  %v5134_v7 = vsel %vm1505_vm1, %v11443_v47, 0.0  ;;  %v4142_v8 = vmul.f32 %v8223_v36, %v11124_v32  ;;  %v4211_v6 = vmul.f32 %v10964_v38, %v4143_v27 }
 0x4e2   : > { %v7760_v29 = vpop.f32.mrf.mxu1  ;;  %5135 = vadd.xlane.f32.xlu0 %v5134_v7  ;;  %v3886_v22 = vpop.xlane.xlu0 %3885  ;;  %v4276_v42 = vadd.f32 %v10976_v50, %v4208_v58  ;;  %vm4341_vm2 = vcmp.ge.f32.partialorder %v4277_v25, 0.0  ;;  %v4405_v11 = vmul.f32 0.01, %v4277_v25  ;;  %v13294_v58 = vld [vmem:[#allocation18_spill] sm:$0xff] }
 0x4e3   : > { %v4021_v56 = vadd.f32 1e-05, %v3957_v12  ;;  %v4763_v20 = vadd.f32 %v7760_v29, %v13293_v0  ;;  %v3956_v60 = vmul.f32 0.015625, %v3886_v22  ;;  %v4210_v51 = vmul.f32 %v10964_v38, %v4142_v8 }
 0x4e4   : > { %v3895_v23 = vpop.xlane.xlu1 %3894  ;;  %v4757_v49 = vpop.f32.mrf.mxu1  ;;  %vm4340_vm3 = vcmp.ge.f32.partialorder %v4276_v42, 0.0  ;;  %v4404_v35 = vmul.f32 0.01, %v4276_v42  ;;  %v4469_v32 = vsel %vm4341_vm2, %v4277_v25, %v4405_v11  ;;  %v4279_v52 = vadd.f32 %v10976_v50, %v4211_v6 }
 0x4e5   : > { %8232 = vrsqrt.f32 %v4021_v56  ;;  %v11461_v13 = vadd.f32 %v11425_v14, %v4763_v20  ;;  %v4020_v27 = vadd.f32 1e-05, %v3956_v60  ;;  %v3959_v36 = vmul.f32 0.015625, %v3895_v23 }
 0x4e6   : > { %v8225_v28 = vpop.eup %8224  ;;  %v4758_v12 = vadd.f32 %v4757_v49, %v13294_v58  ;;  %v4468_v7 = vsel %vm4340_vm3, %v4276_v42, %v4404_v35  ;;  %v3892_v29 = vpop.xlane.xlu0 %3891  ;;  %v4278_v8 = vadd.f32 %v10976_v50, %v4210_v51  ;;  %vm4343_vm4 = vcmp.ge.f32.partialorder %v4279_v52, 0.0 }
 0x4e7   : > { %8234 = vrsqrt.f32 %v4020_v27  ;;  %v4023_v22 = vadd.f32 1e-05, %v3959_v36  ;;  %7833 = vmatprep.mubr.msk.f32.mxu1 %vm1505_vm1, %v4468_v7  ;;  %v3958_v25 = vmul.f32 0.015625, %v3892_v29  ;;  %v5143_v6 = vsel %vm1505_vm1, %v11461_v13, 0.0 }
 0x4e8   : > { %v8227_v11 = vpop.eup %8226  ;;  %v11469_v56 = vadd.f32 %v11425_v14, %v4758_v12  ;;  %7834 = vmatmul.mubr.msk.f32.gmra.mxu1 %vm1505_vm1, %v4469_v32  ;;  %5144 = vadd.xlane.f32.xlu1 %v5143_v6  ;;  %vm4342_vm5 = vcmp.ge.f32.partialorder %v4278_v8, 0.0  ;;  %v4406_v42 = vmul.f32 0.01, %v4278_v8  ;;  %v4407_v0 = vmul.f32 0.01, %v4279_v52  ;;  %v13295_v32 = vld [vmem:[#allocation21_spill] sm:$0xff] }
 0x4e9   : > { %8236 = vrsqrt.f32 %v4023_v22  ;;  %v4022_v20 = vadd.f32 1e-05, %v3958_v25  ;;  %v4144_v60 = vmul.f32 %v8227_v11, %v11146_v45  ;;  %v4145_v51 = vmul.f32 %v8225_v28, %v11138_v40  ;;  %v13297_v6 = vld [vmem:[#allocation3_spill] sm:$0xff] }
 0x4ea   : > { %v8229_v23 = vpop.eup %8228  ;;  %v7763_v49 = vpop.f32.mrf.mxu1  ;;  %v5140_v35 = vsel %vm1505_vm1, %v11469_v56, 0.0  ;;  %v4470_v27 = vsel %vm4342_vm5, %v4278_v8, %v4406_v42  ;;  %v4471_v36 = vsel %vm4343_vm4, %v4279_v52, %v4407_v0  ;;  %v13296_v52 = vld [vmem:[#allocation88_spill] sm:$0xff] }
 0x4eb   : > { %8238 = vrsqrt.f32 %v4022_v20  ;;  %v4773_v58 = vadd.f32 %v7763_v49, %v13295_v32  ;;  %5141 = vadd.xlane.f32.xlu0 %v5140_v35  ;;  %7836 = vmatprep.mubr.msk.f32.mxu1 %vm1505_vm1, %v4470_v27  ;;  %v4212_v12 = vmul.f32 %v10964_v38, %v4144_v60  ;;  %v4213_v45 = vmul.f32 %v10964_v38, %v4145_v51 }
 0x4ec   : > { %7837 = vmatmul.mubr.msk.f32.gmra.mxu1 %vm1505_vm1, %v4471_v36  ;;  %v4767_v40 = vpop.f32.mrf.mxu1  ;;  %v4147_v28 = vmul.f32 %v8229_v23, %v11153_v31 }
 0x4ed   : > { %v8231_v7 = vpop.eup %8230  ;;  %v11484_v29 = vadd.f32 %v11425_v14, %v4773_v58  ;;  %v4768_v8 = vadd.f32 %v4767_v40, %v13296_v52  ;;  %v4280_v22 = vadd.f32 %v10976_v50, %v4212_v12  ;;  %v4281_v25 = vadd.f32 %v10976_v50, %v4213_v45  ;;  %v13298_v40 = vld [vmem:[#allocation82_spill] sm:$0xff] }
 0x4ee   : > { %v4146_v11 = vmul.f32 %v8231_v7, %v13297_v6  ;;  %v4215_v42 = vmul.f32 %v10964_v38, %v4147_v28 }
 0x4ef   : > { %v11492_v0 = vadd.f32 %v11425_v14, %v4768_v8  ;;  %v5149_v20 = vsel %vm1505_vm1, %v11484_v29, 0.0  ;;  %vm4344_vm6 = vcmp.ge.f32.partialorder %v4280_v22, 0.0  ;;  %v4408_v31 = vmul.f32 0.01, %v4280_v22 }
 0x4f0   : > { %5150 = vadd.xlane.f32.xlu1 %v5149_v20  ;;  %vm4345_vm7 = vcmp.ge.f32.partialorder %v4281_v25, 0.0  ;;  %v4409_v60 = vmul.f32 0.01, %v4281_v25  ;;  %v4214_v51 = vmul.f32 %v10964_v38, %v4146_v11  ;;  %v4283_v23 = vadd.f32 %v10976_v50, %v4215_v42  ;;  %v13299_v42 = vld [vmem:[#allocation84_spill] sm:$0xff] }
 0x4f1   : > { %v5146_v49 = vsel %vm1505_vm1, %v11492_v0, 0.0  ;;  %v4472_v35 = vsel %vm4344_vm6, %v4280_v22, %v4408_v31 }
 0x4f2   : > { %v8233_v27 = vpop.eup %8232  ;;  %5147 = vadd.xlane.f32.xlu0 %v5146_v49  ;;  %7839 = vmatprep.mubr.msk.f32.mxu1 %vm1505_vm1, %v4472_v35  ;;  %v4473_v36 = vsel %vm4345_vm7, %v4281_v25, %v4409_v60  ;;  %v4282_v32 = vadd.f32 %v10976_v50, %v4214_v51  ;;  %v4411_v12 = vmul.f32 0.01, %v4283_v23  ;;  %vm4347_vm9 = vcmp.ge.f32.partialorder %v4283_v23, 0.0 }
 0x4f3   : > { %v7766_v58 = vpop.f32.mrf.mxu1  ;;  %7840 = vmatmul.mubr.msk.f32.gmra.mxu1 %vm1505_vm1, %v4473_v36  ;;  %v4149_v45 = vmul.f32 %v8233_v27, %v11177_v1 }
 0x4f4   : > { %v8235_v7 = vpop.eup %8234  ;;  %v4783_v28 = vadd.f32 %v7766_v58, %v13298_v40  ;;  %vm4346_vm8 = vcmp.ge.f32.partialorder %v4282_v32, 0.0  ;;  %v4410_v52 = vmul.f32 0.01, %v4282_v32  ;;  %v4475_v1 = vsel %vm4347_vm9, %v4283_v23, %v4411_v12 }
 0x4f5   : > { %v4777_v8 = vpop.f32.mrf.mxu1  ;;  %v4148_v22 = vmul.f32 %v8235_v7, %v11185_v37  ;;  %v4217_v6 = vmul.f32 %v10964_v38, %v4149_v45 }
 0x4f6   : > { %v8237_v25 = vpop.eup %8236  ;;  %v11508_v11 = vadd.f32 %v11425_v14, %v4783_v28  ;;  %v4778_v20 = vadd.f32 %v4777_v8, %v13299_v42  ;;  %v4474_v31 = vsel %vm4346_vm8, %v4282_v32, %v4410_v52  ;;  %v13300_v32 = vld [vmem:[#allocation55_spill] sm:$0xff] }
 0x4f7   : > { %7842 = vmatprep.mubr.msk.f32.mxu1 %vm1505_vm1, %v4474_v31  ;;  %v4216_v60 = vmul.f32 %v10964_v38, %v4148_v22  ;;  %v4285_v51 = vadd.f32 %v10976_v50, %v4217_v6  ;;  %v4151_v49 = vmul.f32 %v8237_v25, %v11192_v16  ;;  %v13301_v28 = vld [vmem:[#allocation39_spill] sm:$0xff] }
 0x4f8   : > { %v8239_v35 = vpop.eup %8238  ;;  %v11516_v37 = vadd.f32 %v11425_v14, %v4778_v20  ;;  %7843 = vmatmul.mubr.msk.f32.gmra.mxu1 %vm1505_vm1, %v4475_v1  ;;  %v5155_v27 = vsel %vm1505_vm1, %v11508_v11, 0.0  ;;  %v13302_v20 = vld [vmem:[#allocation33_spill] sm:$0xff] }
 0x4f9   : > { %5156 = vadd.xlane.f32.xlu1 %v5155_v27  ;;  %v4284_v36 = vadd.f32 %v10976_v50, %v4216_v60  ;;  %v4150_v23 = vmul.f32 %v8239_v35, %v13300_v32  ;;  %v4413_v12 = vmul.f32 0.01, %v4285_v51  ;;  %v4219_v16 = vmul.f32 %v10964_v38, %v4151_v49  ;;  %v13303_v32 = vld [vmem:[#allocation95_spill] sm:$0xff] }
 0x4fa   : > { %v5152_v58 = vsel %vm1505_vm1, %v11516_v37, 0.0  ;;  %vm4349_vm10 = vcmp.ge.f32.partialorder %v4285_v51, 0.0 }
 0x4fb   : > { %v7769_v45 = vpop.f32.mrf.mxu1  ;;  %5153 = vadd.xlane.f32.xlu0 %v5152_v58  ;;  %vm4348_vm0 = vcmp.ge.f32.partialorder %v4284_v36, 0.0  ;;  %v4412_v7 = vmul.f32 0.01, %v4284_v36  ;;  %v4218_v40 = vmul.f32 %v10964_v38, %v4150_v23  ;;  %v4287_v8 = vadd.f32 %v10976_v50, %v4219_v16  ;;  %v13304_v16 = vld [vmem:[#allocation92_spill] sm:$0xff] }
 0x4fc   : > { %v4793_v52 = vadd.f32 %v7769_v45, %v13301_v28  ;;  %v4477_v1 = vsel %vm4349_vm10, %v4285_v51, %v4413_v12 }
 0x4fd   : > { %v4787_v22 = vpop.f32.mrf.mxu1  ;;  %v4476_v6 = vsel %vm4348_vm0, %v4284_v36, %v4412_v7  ;;  %v4286_v25 = vadd.f32 %v10976_v50, %v4218_v40  ;;  %v4415_v60 = vmul.f32 0.01, %v4287_v8  ;;  %vm4351_vm12 = vcmp.ge.f32.partialorder %v4287_v8, 0.0 }
 0x4fe   : > { %v11531_v42 = vadd.f32 %v11425_v14, %v4793_v52  ;;  %v4788_v31 = vadd.f32 %v4787_v22, %v13302_v20  ;;  %7845 = vmatprep.mubr.msk.f32.mxu1 %vm1505_vm1, %v4476_v6  ;;  %v13306_v20 = vld [vmem:[#allocation97_spill] sm:$0xff] }
 0x4ff   : > { %7846 = vmatmul.mubr.msk.f32.gmra.mxu1 %vm1505_vm1, %v4477_v1  ;;  %vm4350_vm11 = vcmp.ge.f32.partialorder %v4286_v25, 0.0  ;;  %v4414_v38 = vmul.f32 0.01, %v4286_v25  ;;  %v4479_v51 = vsel %vm4351_vm12, %v4287_v8, %v4415_v60  ;;  %v13305_v8 = vld [vmem:[#allocation99_spill] sm:$0xff] }
 0x500   : > { %v11537_v49 = vadd.f32 %v11425_v14, %v4788_v31  ;;  %v5161_v50 = vsel %vm1505_vm1, %v11531_v42, 0.0 }
 0x501   : > { %5162 = vadd.xlane.f32.xlu1 %v5161_v50  ;;  %v4478_v35 = vsel %vm4350_vm11, %v4286_v25, %v4414_v38 }
 0x502   : > { %v5158_v27 = vsel %vm1505_vm1, %v11537_v49, 0.0  ;;  %7848 = vmatprep.mubr.msk.f32.mxu1 %vm1505_vm1, %v4478_v35  ;;  %v13307_v35 = vld [vmem:[#allocation7_spill] sm:$0xff] }
 0x503   : > { %5159 = vadd.xlane.f32.xlu0 %v5158_v27  ;;  %7849 = vmatmul.mubr.msk.f32.gmra.mxu1 %vm1505_vm1, %v4479_v51 }
 0x507   : > { %v7772_v36 = vpop.f32.mrf.mxu1 }
 0x508   : > { %v4803_v23 = vadd.f32 %v7772_v36, %v13303_v32  ;;  %v13308_v32 = vld [vmem:[#allocation87_spill] sm:$0xff] }
 0x509   : > { %v4797_v58 = vpop.f32.mrf.mxu1 }
 0x50a   : > { %v11547_v12 = vadd.f32 %v11425_v14, %v4803_v23  ;;  %v4798_v45 = vadd.f32 %v4797_v58, %v13304_v16 }
 0x50c   : > { %v11551_v7 = vadd.f32 %v11425_v14, %v4798_v45  ;;  %v5167_v40 = vsel %vm1505_vm1, %v11547_v12, 0.0 }
 0x50d   : > { %5168 = vadd.xlane.f32.xlu1 %v5167_v40 }
 0x50e   : > { %v5164_v28 = vsel %vm1505_vm1, %v11551_v7, 0.0 }
 0x50f   : > { %5165 = vadd.xlane.f32.xlu0 %v5164_v28  ;;  %v13309_v28 = vld [vmem:[#allocation40_spill] sm:$0xff] }
 0x513   : > { %v7775_v52 = vpop.f32.mrf.mxu1 }
 0x514   : > { %v4813_v22 = vadd.f32 %v7775_v52, %v13305_v8 }
 0x515   : > { %v4807_v6 = vpop.f32.mrf.mxu1 }
 0x516   : > { %v11559_v25 = vadd.f32 %v11425_v14, %v4813_v22  ;;  %v4808_v31 = vadd.f32 %v4807_v6, %v13306_v20  ;;  %v13310_v6 = vld [vmem:[#allocation22_spill] sm:$0xff] }
 0x518   : > { %v11563_v1 = vadd.f32 %v11425_v14, %v4808_v31  ;;  %v5173_v60 = vsel %vm1505_vm1, %v11559_v25, 0.0 }
 0x519   : > { %5174 = vadd.xlane.f32.xlu1 %v5173_v60 }
 0x51a   : > { %v5170_v38 = vsel %vm1505_vm1, %v11563_v1, 0.0 }
 0x51b   : > { %5171 = vadd.xlane.f32.xlu0 %v5170_v38 }
 0x51f   : > { %v7778_v50 = vpop.f32.mrf.mxu1 }
 0x520   : > { %v4823_v27 = vadd.f32 %v7778_v50, %v13307_v35  ;;  %v13311_v35 = vld [vmem:[#allocation44_spill] sm:$0xff] }
 0x521   : > { %v4817_v51 = vpop.f32.mrf.mxu1 }
 0x522   : > { %v11571_v36 = vadd.f32 %v11425_v14, %v4823_v27  ;;  %v4818_v23 = vadd.f32 %v4817_v51, %v13308_v32 }
 0x524   : > { %v11575_v58 = vadd.f32 %v11425_v14, %v4818_v23  ;;  %v5179_v16 = vsel %vm1505_vm1, %v11571_v36, 0.0  ;;  %v13312_v23 = vld [vmem:[#allocation42_spill] sm:$0xff] }
 0x525   : > { %5180 = vadd.xlane.f32.xlu1 %v5179_v16 }
 0x526   : > { %v5176_v45 = vsel %vm1505_vm1, %v11575_v58, 0.0 }
 0x527   : > { %5177 = vadd.xlane.f32.xlu0 %v5176_v45 }
 0x52b   : > { %v7781_v40 = vpop.f32.mrf.mxu1 }
 0x52c   : > { %v4833_v52 = vadd.f32 %v7781_v40, %v13309_v28  ;;  %v13313_v28 = vld [vmem:[#allocation49_spill] sm:$0xff] }
 0x52d   : > { %v4827_v8 = vpop.f32.mrf.mxu1 }
 0x52e   : > { %v11583_v22 = vadd.f32 %v11425_v14, %v4833_v52  ;;  %v4828_v20 = vadd.f32 %v4827_v8, %v13310_v6 }
 0x530   : > { %v11587_v31 = vadd.f32 %v11425_v14, %v4828_v20  ;;  %v5185_v60 = vsel %vm1505_vm1, %v11583_v22, 0.0 }
 0x531   : > { %5186 = vadd.xlane.f32.xlu1 %v5185_v60  ;;  %v13314_v60 = vld [vmem:[#allocation47_spill] sm:$0xff] }
 0x532   : > { %v5182_v38 = vsel %vm1505_vm1, %v11587_v31, 0.0 }
 0x533   : > { %5183 = vadd.xlane.f32.xlu0 %v5182_v38 }
 0x537   : > { %v7784_v50 = vpop.f32.mrf.mxu1 }
 0x538   : > { %v4843_v27 = vadd.f32 %v7784_v50, %v13311_v35 }
 0x539   : > { %v4837_v51 = vpop.f32.mrf.mxu1 }
 0x53a   : > { %v11595_v32 = vadd.f32 %v11425_v14, %v4843_v27  ;;  %v4838_v16 = vadd.f32 %v4837_v51, %v13312_v23  ;;  %v13315_v51 = vld [vmem:[#allocation58_spill] sm:$0xff] }
 0x53b   : > { %v7787_v45 = vpop.f32.mrf.mxu1 }
 0x53c   : > { %v11599_v40 = vadd.f32 %v11425_v14, %v4838_v16  ;;  %v4853_v52 = vadd.f32 %v7787_v45, %v13313_v28  ;;  %v5191_v8 = vsel %vm1505_vm1, %v11595_v32, 0.0 }
 0x53d   : > { %5192 = vadd.xlane.f32.xlu1 %v5191_v8  ;;  %v4847_v6 = vpop.f32.mrf.mxu1 }
 0x53e   : > { %v11605_v20 = vadd.f32 %v11425_v14, %v4853_v52  ;;  %v4848_v38 = vadd.f32 %v4847_v6, %v13314_v60  ;;  %v5188_v50 = vsel %vm1505_vm1, %v11599_v40, 0.0  ;;  %v13316_v52 = vld [vmem:[#allocation51_spill] sm:$0xff] }
 0x53f   : > { %5189 = vadd.xlane.f32.xlu0 %v5188_v50  ;;  %v7790_v35 = vpop.f32.mrf.mxu1  ;;  %v13317_v50 = vld [vmem:[#allocation62_spill] sm:$0xff] }
 0x540   : > { %v11611_v27 = vadd.f32 %v11425_v14, %v4848_v38  ;;  %v4863_v23 = vadd.f32 %v7790_v35, %v13315_v51  ;;  %v5197_v16 = vsel %vm1505_vm1, %v11605_v20, 0.0 }
 0x541   : > { %5198 = vadd.xlane.f32.xlu1 %v5197_v16  ;;  %v4857_v45 = vpop.f32.mrf.mxu1 }
 0x542   : > { %v11617_v28 = vadd.f32 %v11425_v14, %v4863_v23  ;;  %v4858_v8 = vadd.f32 %v4857_v45, %v13316_v52  ;;  %v5194_v6 = vsel %vm1505_vm1, %v11611_v27, 0.0 }
 0x543   : > { %5195 = vadd.xlane.f32.xlu0 %v5194_v6  ;;  %v7793_v60 = vpop.f32.mrf.mxu1 }
 0x544   : > { %v11623_v38 = vadd.f32 %v11425_v14, %v4858_v8  ;;  %v4873_v35 = vadd.f32 %v7793_v60, %v13317_v50  ;;  %v5203_v51 = vsel %vm1505_vm1, %v11617_v28, 0.0  ;;  %v13319_v50 = vld [vmem:[#allocation66_spill] sm:$0xff] }
 0x545   : > { %5204 = vadd.xlane.f32.xlu1 %v5203_v51  ;;  %v4867_v16 = vpop.f32.mrf.mxu1 }
 0x546   : > { %v11629_v23 = vadd.f32 %v11425_v14, %v4873_v35  ;;  %v4868_v45 = vadd.f32 %v4867_v16, %v13318_v2  ;;  %v5200_v52 = vsel %vm1505_vm1, %v11623_v38, 0.0  ;;  %v13320_v16 = vld [vmem:[#allocation64_spill] sm:$0xff] }
 0x547   : > { %5201 = vadd.xlane.f32.xlu0 %v5200_v52 }
 0x548   : > { %v11635_v6 = vadd.f32 %v11425_v14, %v4868_v45  ;;  %v7796_v8 = vpop.f32.mrf.mxu1  ;;  %v5209_v60 = vsel %vm1505_vm1, %v11629_v23, 0.0 }
 0x549   : > { %v4883_v9 = vadd.f32 %v7796_v8, %v13319_v50  ;;  %5210 = vadd.xlane.f32.xlu1 %v5209_v60 }
 0x54a   : > { %v4877_v51 = vpop.f32.mrf.mxu1  ;;  %v5206_v35 = vsel %vm1505_vm1, %v11635_v6, 0.0 }
 0x54b   : > { %v11643_v2 = vadd.f32 %v11425_v14, %v4883_v9  ;;  %v4878_v61 = vadd.f32 %v4877_v51, %v13320_v16  ;;  %5207 = vadd.xlane.f32.xlu0 %v5206_v35  ;;  %v13323_v16 = vld [vmem:[#allocation90_spill] sm:$0xff] }
 0x54c   : > { %v7799_v52 = vpop.f32.mrf.mxu1 }
 0x54d   : > { %v11647_v45 = vadd.f32 %v11425_v14, %v4878_v61  ;;  %v4893_v41 = vadd.f32 %v7799_v52, %v13321_v30  ;;  %v5215_v8 = vsel %vm1505_vm1, %v11643_v2, 0.0 }
 0x54e   : > { %5216 = vadd.xlane.f32.xlu1 %v5215_v8  ;;  %v4887_v60 = vpop.f32.mrf.mxu1 }
 0x54f   : > { %v11653_v50 = vadd.f32 %v11425_v14, %v4893_v41  ;;  %v4888_v9 = vadd.f32 %v4887_v60, %v13322_v59  ;;  %v5212_v51 = vsel %vm1505_vm1, %v11647_v45, 0.0 }
 0x550   : > { %5213 = vadd.xlane.f32.xlu0 %v5212_v51  ;;  %v7802_v35 = vpop.f32.mrf.mxu1 }
 0x551   : > { %v11659_v61 = vadd.f32 %v11425_v14, %v4888_v9  ;;  %v4903_v30 = vadd.f32 %v7802_v35, %v13323_v16  ;;  %v5221_v52 = vsel %vm1505_vm1, %v11653_v50, 0.0 }
 0x552   : > { %5222 = vadd.xlane.f32.xlu1 %v5221_v52  ;;  %v4897_v8 = vpop.f32.mrf.mxu1  ;;  %v13325_v52 = vld [vmem:[#allocation8_spill] sm:$0xff] }
 0x553   : > { %v11665_v41 = vadd.f32 %v11425_v14, %v4903_v30  ;;  %v4898_v59 = vadd.f32 %v4897_v8, %v13324_v24  ;;  %v5218_v60 = vsel %vm1505_vm1, %v11659_v61, 0.0  ;;  %v13326_v8 = vld [vmem:[#allocation4_spill] sm:$0xff] }
 0x554   : > { %5219 = vadd.xlane.f32.xlu0 %v5218_v60 }
 0x555   : > { %v11671_v51 = vadd.f32 %v11425_v14, %v4898_v59  ;;  %v5227_v9 = vsel %vm1505_vm1, %v11665_v41, 0.0 }
 0x556   : > { %5228 = vadd.xlane.f32.xlu1 %v5227_v9  ;;  %v7805_v35 = vpop.f32.mrf.mxu1 }
 0x557   : > { %v5224_v16 = vsel %vm1505_vm1, %v11671_v51, 0.0  ;;  %v4913_v30 = vadd.f32 %v7805_v35, %v13325_v52  ;;  %v13327_v35 = vld [vmem:[#allocation20_spill] sm:$0xff] }
 0x558   : > { %5225 = vadd.xlane.f32.xlu0 %v5224_v16  ;;  %v4907_v46 = vpop.f32.mrf.mxu1 }
 0x559   : > { %v11679_v24 = vadd.f32 %v11425_v14, %v4913_v30  ;;  %v4908_v60 = vadd.f32 %v4907_v46, %v13326_v8 }
 0x55b   : > { %v11683_v59 = vadd.f32 %v11425_v14, %v4908_v60  ;;  %v5233_v18 = vsel %vm1505_vm1, %v11679_v24, 0.0 }
 0x55c   : > { %5234 = vadd.xlane.f32.xlu1 %v5233_v18 }
 0x55d   : > { %v5230_v9 = vsel %vm1505_vm1, %v11683_v59, 0.0 }
 0x55e   : > { %5231 = vadd.xlane.f32.xlu0 %v5230_v9  ;;  %v7808_v19 = vpop.f32.mrf.mxu1 }
 0x55f   : > { %v4923_v16 = vadd.f32 %v7808_v19, %v13327_v35 }
 0x560   : > { %v4917_v52 = vpop.f32.mrf.mxu1 }
 0x561   : > { %v11691_v30 = vadd.f32 %v11425_v14, %v4923_v16  ;;  %v4918_v46 = vadd.f32 %v4917_v52, %v13329_v62 }
 0x563   : > { %13328 = vst [vmem:[#allocation72_spill] sm:$0xff] %v11691_v30  ;;  %v11695_v8 = vadd.f32 %v11425_v14, %v4918_v46  ;;  %v5239_v60 = vsel %vm1505_vm1, %v11691_v30, 0.0 }
 0x564   : > { %5240 = vadd.xlane.f32.xlu1 %v5239_v60 }
 0x565   : > { %13330 = vst [vmem:[#allocation70_spill] sm:$0xff] %v11695_v8  ;;  %v5236_v18 = vsel %vm1505_vm1, %v11695_v8, 0.0 }
 0x566   : > { %5237 = vadd.xlane.f32.xlu0 %v5236_v18  ;;  %v7811_v9 = vpop.f32.mrf.mxu1 }
 0x567   : > { %v4933_v19 = vadd.f32 %v7811_v9, %v13331_v39 }
 0x568   : > { %v4927_v35 = vpop.f32.mrf.mxu1 }
 0x569   : > { %v11703_v16 = vadd.f32 %v11425_v14, %v4933_v19  ;;  %v4928_v62 = vadd.f32 %v4927_v35, %v13332_v33  ;;  %v5139_v52 = vpop.xlane.xlu1 %5138  ;;  %v13336_v35 = vld [vmem:[#allocation102_spill] sm:$0xff] }
 0x56a   : > { %v5327_v46 = vmul.f32 0.015625, %v5139_v52 }
 0x56b   : > { %v11707_v34 = vadd.f32 %v11425_v14, %v4928_v62  ;;  %v5136_v30 = vpop.xlane.xlu0 %5135  ;;  %v5245_v60 = vsel %vm1505_vm1, %v11703_v16, 0.0 }
 0x56c   : > { %v11712_v18 = vsub.f32 %v11436_v10, %v5327_v46  ;;  %v5326_v8 = vmul.f32 0.015625, %v5136_v30  ;;  %5246 = vadd.xlane.f32.xlu1 %v5245_v60 }
 0x56d   : > { %13333 = vst [vmem:[#allocation79_spill] sm:$0xff] %v11707_v34  ;;  %v5242_v39 = vsel %vm1505_vm1, %v11707_v34, 0.0 }
 0x56e   : > { %13334 = vst [vmem:[#allocation18_spill] sm:$0xff] %v11712_v18  ;;  %v11717_v9 = vsub.f32 %v11443_v47, %v5326_v8  ;;  %5243 = vadd.xlane.f32.xlu0 %v5242_v39  ;;  %v5455_v33 = vmul.f32 %v11712_v18, %v11712_v18  ;;  %v13337_v8 = vld [vmem:[#allocation38_spill] sm:$0xff] }
 0x56f   : > { %v7814_v19 = vpop.f32.mrf.mxu1 }
 0x570   : > { %13335 = vst [vmem:[#allocation21_spill] sm:$0xff] %v11717_v9  ;;  %v4943_v62 = vadd.f32 %v7814_v19, %v13336_v35  ;;  %v5521_v52 = vsel %vm1505_vm1, %v5455_v33, 0.0  ;;  %v5454_v10 = vmul.f32 %v11717_v9, %v11717_v9 }
 0x571   : > { %v5145_v30 = vpop.xlane.xlu1 %5144  ;;  %5522 = vadd.xlane.f32.xlu1 %v5521_v52  ;;  %v4937_v46 = vpop.f32.mrf.mxu1 }
 0x572   : > { %v11726_v60 = vadd.f32 %v11425_v14, %v4943_v62  ;;  %v5329_v47 = vmul.f32 0.015625, %v5145_v30  ;;  %v4938_v39 = vadd.f32 %v4937_v46, %v13337_v8  ;;  %v5518_v34 = vsel %vm1505_vm1, %v5454_v10, 0.0  ;;  %v13341_v46 = vld [vmem:[#allocation106_spill] sm:$0xff] }
 0x573   : > { %5519 = vadd.xlane.f32.xlu0 %v5518_v34 }
 0x574   : > { %v11731_v18 = vsub.f32 %v11461_v13, %v5329_v47  ;;  %v11734_v33 = vadd.f32 %v11425_v14, %v4938_v39  ;;  %v5142_v19 = vpop.xlane.xlu0 %5141  ;;  %v5251_v35 = vsel %vm1505_vm1, %v11726_v60, 0.0 }
 0x575   : > { %v5328_v52 = vmul.f32 0.015625, %v5142_v19  ;;  %5252 = vadd.xlane.f32.xlu1 %v5251_v35 }
 0x576   : > { %13338 = vst [vmem:[#allocation88_spill] sm:$0xff] %v11731_v18  ;;  %13339 = vst [vmem:[#allocation3_spill] sm:$0xff] %v11734_v33  ;;  %v5248_v62 = vsel %vm1505_vm1, %v11734_v33, 0.0  ;;  %v5457_v30 = vmul.f32 %v11731_v18, %v11731_v18  ;;  %v13342_v18 = vld [vmem:[#allocation104_spill] sm:$0xff] }
 0x577   : > { %v11743_v34 = vsub.f32 %v11469_v56, %v5328_v52  ;;  %5249 = vadd.xlane.f32.xlu0 %v5248_v62 }
 0x578   : > { %v7817_v13 = vpop.f32.mrf.mxu1  ;;  %v5527_v10 = vsel %vm1505_vm1, %v5457_v30, 0.0 }
 0x579   : > { %13340 = vst [vmem:[#allocation82_spill] sm:$0xff] %v11743_v34  ;;  %v4953_v47 = vadd.f32 %v7817_v13, %v13341_v46  ;;  %v5151_v8 = vpop.xlane.xlu1 %5150  ;;  %5528 = vadd.xlane.f32.xlu1 %v5527_v10  ;;  %v5456_v39 = vmul.f32 %v11743_v34, %v11743_v34 }
 0x57a   : > { %v5331_v19 = vmul.f32 0.015625, %v5151_v8  ;;  %v4947_v35 = vpop.f32.mrf.mxu1  ;;  %v13344_v8 = vld [vmem:[#allocation10_spill] sm:$0xff] }
 0x57b   : > { %v11750_v9 = vadd.f32 %v11425_v14, %v4953_v47  ;;  %v4948_v33 = vadd.f32 %v4947_v35, %v13342_v18  ;;  %v5524_v56 = vsel %vm1505_vm1, %v5456_v39, 0.0  ;;  %v5148_v52 = vpop.xlane.xlu0 %5147 }
 0x57c   : > { %v11755_v62 = vsub.f32 %v11484_v29, %v5331_v19  ;;  %5525 = vadd.xlane.f32.xlu0 %v5524_v56  ;;  %v5330_v30 = vmul.f32 0.015625, %v5148_v52  ;;  %v13345_v52 = vld [vmem:[#allocation91_spill] sm:$0xff] }
 0x57d   : > { %v11758_v13 = vadd.f32 %v11425_v14, %v4948_v33  ;;  %v5257_v10 = vsel %vm1505_vm1, %v11750_v9, 0.0 }
 0x57e   : > { %13343 = vst [vmem:[#allocation84_spill] sm:$0xff] %v11755_v62  ;;  %v11763_v46 = vsub.f32 %v11492_v0, %v5330_v30  ;;  %5258 = vadd.xlane.f32.xlu1 %v5257_v10  ;;  %v5459_v18 = vmul.f32 %v11755_v62, %v11755_v62 }
 0x57f   : > { %v7820_v47 = vpop.f32.mrf.mxu1  ;;  %v5254_v29 = vsel %vm1505_vm1, %v11758_v13, 0.0 }
 0x580   : > { %v4963_v39 = vadd.f32 %v7820_v47, %v13344_v8  ;;  %5255 = vadd.xlane.f32.xlu0 %v5254_v29  ;;  %v5533_v33 = vsel %vm1505_vm1, %v5459_v18, 0.0  ;;  %v5458_v19 = vmul.f32 %v11763_v46, %v11763_v46 }
 0x581   : > { %v4957_v35 = vpop.f32.mrf.mxu1 }
 0x582   : > { %v11774_v0 = vadd.f32 %v11425_v14, %v4963_v39  ;;  %v5157_v56 = vpop.xlane.xlu1 %5156  ;;  %5534 = vadd.xlane.f32.xlu1 %v5533_v33  ;;  %v4958_v30 = vadd.f32 %v4957_v35, %v13345_v52  ;;  %v5530_v10 = vsel %vm1505_vm1, %v5458_v19, 0.0 }
 0x583   : > { %v5333_v62 = vmul.f32 0.015625, %v5157_v56  ;;  %v13347_v56 = vld [vmem:[#allocation19_spill] sm:$0xff] }
 0x584   : > { %v11779_v34 = vadd.f32 %v11425_v14, %v4958_v30  ;;  %5531 = vadd.xlane.f32.xlu0 %v5530_v10  ;;  %v5154_v47 = vpop.xlane.xlu0 %5153  ;;  %v5263_v18 = vsel %vm1505_vm1, %v11774_v0, 0.0 }
 0x585   : > { %v11784_v29 = vsub.f32 %v11508_v11, %v5333_v62  ;;  %v5332_v8 = vmul.f32 0.015625, %v5154_v47 }
 0x586   : > { %5264 = vadd.xlane.f32.xlu1 %v5263_v18  ;;  %v5260_v39 = vsel %vm1505_vm1, %v11779_v34, 0.0  ;;  %v13348_v18 = vld [vmem:[#allocation13_spill] sm:$0xff] }
 0x587   : > { %13346 = vst [vmem:[#allocation55_spill] sm:$0xff] %v11784_v29  ;;  %v11789_v33 = vsub.f32 %v11516_v37, %v5332_v8  ;;  %v5461_v19 = vmul.f32 %v11784_v29, %v11784_v29 }
 0x588   : > { %v7823_v35 = vpop.f32.mrf.mxu1  ;;  %5261 = vadd.xlane.f32.xlu0 %v5260_v39 }
 0x589   : > { %v4973_v52 = vadd.f32 %v7823_v35, %v13347_v56  ;;  %v5539_v30 = vsel %vm1505_vm1, %v5461_v19, 0.0  ;;  %v5460_v11 = vmul.f32 %v11789_v33, %v11789_v33 }
 0x58a   : > { %v5163_v62 = vpop.xlane.xlu1 %5162  ;;  %5540 = vadd.xlane.f32.xlu1 %v5539_v30  ;;  %v4967_v10 = vpop.f32.mrf.mxu1 }
 0x58b   : > { %v11798_v47 = vadd.f32 %v11425_v14, %v4973_v52  ;;  %v5335_v37 = vmul.f32 0.015625, %v5163_v62  ;;  %v4968_v8 = vadd.f32 %v4967_v10, %v13348_v18  ;;  %v5536_v29 = vsel %vm1505_vm1, %v5460_v11, 0.0  ;;  %v6301_v52 = vld [vmem:[%s12829_s3 + $0x38] sm:$0xff]  ;;  %v6300_v62 = vld [vmem:[%s12829_s3 + $0x30] sm:$0xff] }
 0x58c   : > { %5537 = vadd.xlane.f32.xlu0 %v5536_v29  ;;  %v5160_v39 = vpop.xlane.xlu0 %5159  ;;  %7851 = vmatprep.subr.mxu0 %v6301_v52 }
 0x58d   : > { %v11803_v35 = vsub.f32 %v11531_v42, %v5335_v37  ;;  %v11806_v19 = vadd.f32 %v11425_v14, %v4968_v8  ;;  %v5334_v56 = vmul.f32 0.015625, %v5160_v39  ;;  %v5269_v30 = vsel %vm1505_vm1, %v11798_v47, 0.0  ;;  %7852 = vmatpush3.msra.mxu0 %v6301_v52  ;;  %v13351_v37 = vld [vmem:[#allocation28_spill] sm:$0xff]  ;;  %v6299_v39 = vld [vmem:[%s12829_s3 + $0x28] sm:$0xff] }
 0x58e   : > { %5270 = vadd.xlane.f32.xlu1 %v5269_v30  ;;  %7853 = vmatprep.subr.mxu0 %v6300_v62  ;;  %v6298_v30 = vld [vmem:[%s12829_s3 + $0x20] sm:$0xff] }
 0x58f   : > { %13349 = vst [vmem:[#allocation39_spill] sm:$0xff] %v11803_v35  ;;  %v11814_v11 = vsub.f32 %v11537_v49, %v5334_v56  ;;  %v5266_v42 = vsel %vm1505_vm1, %v11806_v19, 0.0  ;;  %v5463_v29 = vmul.f32 %v11803_v35, %v11803_v35  ;;  %7854 = vmatpush3.msra.mxu0 %v6300_v62  ;;  %v6297_v62 = vld [vmem:[%s12829_s3 + $0x18] sm:$0xff] }
 0x590   : > { %v7826_v10 = vpop.f32.mrf.mxu1  ;;  %5267 = vadd.xlane.f32.xlu0 %v5266_v42  ;;  %7855 = vmatprep.subr.mxu0 %v6299_v39  ;;  %v13352_v42 = vld [vmem:[#allocation12_spill] sm:$0xff] }
 0x591   : > { %13350 = vst [vmem:[#allocation33_spill] sm:$0xff] %v11814_v11  ;;  %v4983_v18 = vadd.f32 %v7826_v10, %v13351_v37  ;;  %v5545_v8 = vsel %vm1505_vm1, %v5463_v29, 0.0  ;;  %v5462_v49 = vmul.f32 %v11814_v11, %v11814_v11  ;;  %7856 = vmatpush3.msra.mxu0 %v6299_v39  ;;  %v6296_v39 = vld [vmem:[%s12829_s3 + $0x10] sm:$0xff] }
 0x592   : > { %5546 = vadd.xlane.f32.xlu1 %v5545_v8  ;;  %v4977_v56 = vpop.f32.mrf.mxu1  ;;  %7857 = vmatprep.subr.mxu0 %v6298_v30 }
 0x593   : > { %v11834_v52 = vadd.f32 %v11425_v14, %v4983_v18  ;;  %v4978_v29 = vadd.f32 %v4977_v56, %v13352_v42  ;;  %v5542_v10 = vsel %vm1505_vm1, %v5462_v49, 0.0  ;;  %7858 = vmatpush3.msra.mxu0 %v6298_v30  ;;  %v6295_v30 = vld [vmem:[%s12829_s3 + $0x8] sm:$0xff] }
 0x594   : > { %5543 = vadd.xlane.f32.xlu0 %v5542_v10  ;;  %7859 = vmatprep.subr.mxu0 %v6297_v62 }
 0x595   : > { %v11842_v37 = vadd.f32 %v11425_v14, %v4978_v29  ;;  %v5275_v8 = vsel %vm1505_vm1, %v11834_v52, 0.0  ;;  %7860 = vmatpush3.msra.mxu0 %v6297_v62  ;;  %v6294_v62 = vld [vmem:[%s12829_s3] sm:$0xff] }
 0x596   : > { %v5169_v18 = vpop.xlane.xlu1 %5168  ;;  %5276 = vadd.xlane.f32.xlu1 %v5275_v8  ;;  %7861 = vmatprep.subr.mxu0 %v6296_v39 }
 0x597   : > { %v5337_v56 = vmul.f32 0.015625, %v5169_v18  ;;  %v5272_v49 = vsel %vm1505_vm1, %v11842_v37, 0.0  ;;  %7862 = vmatpush3.msra.mxu0 %v6296_v39 }
 0x598   : > { %5273 = vadd.xlane.f32.xlu0 %v5272_v49  ;;  %v5166_v42 = vpop.xlane.xlu0 %5165  ;;  %7863 = vmatprep.subr.mxu0 %v6295_v30 }
 0x599   : > { %v11852_v29 = vsub.f32 %v11547_v12, %v5337_v56  ;;  %v5336_v10 = vmul.f32 0.015625, %v5166_v42  ;;  %7864 = vmatpush3.msra.mxu0 %v6295_v30 }
 0x59a   : > { %7865 = vmatprep.subr.mxu0 %v6294_v62 }
 0x59b   : > { %v11861_v8 = vsub.f32 %v11551_v7, %v5336_v10  ;;  %v7829_v18 = vpop.f32.mrf.mxu1  ;;  %v5465_v49 = vmul.f32 %v11852_v29, %v11852_v29  ;;  %7866 = vmatpush3.msra.mxu0 %v6294_v62  ;;  %v13354_v7 = vld [vmem:[#allocation43_spill] sm:$0xff] }
 0x59c   : > { %v4993_v12 = vadd.f32 %v7829_v18, %v11223_v4 }
 0x59d   : > { %13353 = vst [vmem:[#allocation95_spill] sm:$0xff] %v11861_v8  ;;  %v5551_v56 = vsel %vm1505_vm1, %v5465_v49, 0.0  ;;  %v4987_v39 = vpop.f32.mrf.mxu1  ;;  %v5464_v42 = vmul.f32 %v11861_v8, %v11861_v8 }
 0x59e   : > { %v11870_v11 = vadd.f32 %v11425_v14, %v4993_v12  ;;  %5552 = vadd.xlane.f32.xlu1 %v5551_v56  ;;  %v4988_v10 = vadd.f32 %v4987_v39, %v13354_v7 }
 0x59f   : > { %v5548_v35 = vsel %vm1505_vm1, %v5464_v42, 0.0 }
 0x5a0   : > { %v11875_v30 = vadd.f32 %v11425_v14, %v4988_v10  ;;  %v7832_v4 = vpop.f32.mrf.mxu1  ;;  %5549 = vadd.xlane.f32.xlu0 %v5548_v35  ;;  %v5281_v18 = vsel %vm1505_vm1, %v11870_v11, 0.0 }
 0x5a1   : > { %v5003_v49 = vadd.f32 %v7832_v4, %v11244_v17 }
 0x5a2   : > { %v5175_v8 = vpop.xlane.xlu1 %5174  ;;  %5282 = vadd.xlane.f32.xlu1 %v5281_v18  ;;  %v4997_v62 = vpop.f32.mrf.mxu1  ;;  %v5278_v12 = vsel %vm1505_vm1, %v11875_v30, 0.0 }
 0x5a3   : > { %v11883_v56 = vadd.f32 %v11425_v14, %v5003_v49  ;;  %v5339_v39 = vmul.f32 0.015625, %v5175_v8  ;;  %v4998_v42 = vadd.f32 %v4997_v62, %v11231_v55 }
 0x5a4   : > { %5279 = vadd.xlane.f32.xlu0 %v5278_v12  ;;  %v5172_v7 = vpop.xlane.xlu0 %5171 }
 0x5a5   : > { %v11887_v35 = vsub.f32 %v11559_v25, %v5339_v39  ;;  %v11890_v10 = vadd.f32 %v11425_v14, %v4998_v42  ;;  %v5338_v17 = vmul.f32 0.015625, %v5172_v7  ;;  %v5287_v4 = vsel %vm1505_vm1, %v11883_v56, 0.0 }
 0x5a6   : > { %5288 = vadd.xlane.f32.xlu1 %v5287_v4 }
 0x5a7   : > { %v11895_v18 = vsub.f32 %v11563_v1, %v5338_v17  ;;  %v5284_v8 = vsel %vm1505_vm1, %v11890_v10, 0.0  ;;  %v5467_v55 = vmul.f32 %v11887_v35, %v11887_v35 }
 0x5a8   : > { %v7835_v49 = vpop.f32.mrf.mxu1  ;;  %5285 = vadd.xlane.f32.xlu0 %v5284_v8 }
 0x5a9   : > { %v5013_v25 = vadd.f32 %v7835_v49, %v11284_v44  ;;  %v5557_v62 = vsel %vm1505_vm1, %v5467_v55, 0.0  ;;  %v5466_v12 = vmul.f32 %v11895_v18, %v11895_v18 }
 0x5aa   : > { %5558 = vadd.xlane.f32.xlu1 %v5557_v62  ;;  %v5007_v39 = vpop.f32.mrf.mxu1 }
 0x5ab   : > { %v11906_v1 = vadd.f32 %v11425_v14, %v5013_v25  ;;  %v5008_v42 = vadd.f32 %v5007_v39, %v11264_v26  ;;  %v5554_v7 = vsel %vm1505_vm1, %v5466_v12, 0.0 }
 0x5ac   : > { %v7838_v17 = vpop.f32.mrf.mxu1  ;;  %5555 = vadd.xlane.f32.xlu0 %v5554_v7 }
 0x5ad   : > { %v11911_v4 = vadd.f32 %v11425_v14, %v5008_v42  ;;  %v5023_v44 = vadd.f32 %v7838_v17, %v11316_v48  ;;  %v5293_v8 = vsel %vm1505_vm1, %v11906_v1, 0.0 }
 0x5ae   : > { %v5181_v55 = vpop.xlane.xlu1 %5180  ;;  %5294 = vadd.xlane.f32.xlu1 %v5293_v8  ;;  %v5017_v49 = vpop.f32.mrf.mxu1 }
 0x5af   : > { %v11917_v25 = vadd.f32 %v11425_v14, %v5023_v44  ;;  %v5341_v62 = vmul.f32 0.015625, %v5181_v55  ;;  %v5018_v26 = vadd.f32 %v5017_v49, %v11302_v57  ;;  %v5290_v12 = vsel %vm1505_vm1, %v11911_v4, 0.0 }
 0x5b0   : > { %5291 = vadd.xlane.f32.xlu0 %v5290_v12  ;;  %v5178_v39 = vpop.xlane.xlu0 %5177 }
 0x5b1   : > { %v11923_v42 = vsub.f32 %v11571_v36, %v5341_v62  ;;  %v11926_v48 = vadd.f32 %v11425_v14, %v5018_v26  ;;  %v5340_v7 = vmul.f32 0.015625, %v5178_v39  ;;  %v5299_v17 = vsel %vm1505_vm1, %v11917_v25, 0.0 }
 0x5b2   : > { %5300 = vadd.xlane.f32.xlu1 %v5299_v17 }
 0x5b3   : > { %v11931_v44 = vsub.f32 %v11575_v58, %v5340_v7  ;;  %v7841_v57 = vpop.f32.mrf.mxu1  ;;  %v5296_v8 = vsel %vm1505_vm1, %v11926_v48, 0.0  ;;  %v5469_v55 = vmul.f32 %v11923_v42, %v11923_v42 }
 0x5b4   : > { %v5033_v36 = vadd.f32 %v7841_v57, %v11339_v3  ;;  %5297 = vadd.xlane.f32.xlu0 %v5296_v8 }
 0x5b5   : > { %v5563_v49 = vsel %vm1505_vm1, %v5469_v55, 0.0  ;;  %v5027_v62 = vpop.f32.mrf.mxu1  ;;  %v5468_v26 = vmul.f32 %v11931_v44, %v11931_v44 }
 0x5b6   : > { %v11942_v12 = vadd.f32 %v11425_v14, %v5033_v36  ;;  %5564 = vadd.xlane.f32.xlu1 %v5563_v49  ;;  %v5028_v58 = vadd.f32 %v5027_v62, %v11328_v54 }
 0x5b7   : > { %v5560_v39 = vsel %vm1505_vm1, %v5468_v26, 0.0 }
 0x5b8   : > { %v11947_v7 = vadd.f32 %v11425_v14, %v5028_v58  ;;  %v7844_v17 = vpop.f32.mrf.mxu1  ;;  %5561 = vadd.xlane.f32.xlu0 %v5560_v39  ;;  %v5305_v3 = vsel %vm1505_vm1, %v11942_v12, 0.0 }
 0x5b9   : > { %v5043_v57 = vadd.f32 %v7844_v17, %v11363_v5 }
 0x5ba   : > { %v5187_v8 = vpop.xlane.xlu1 %5186  ;;  %5306 = vadd.xlane.f32.xlu1 %v5305_v3  ;;  %v5037_v55 = vpop.f32.mrf.mxu1  ;;  %v5302_v36 = vsel %vm1505_vm1, %v11947_v7, 0.0 }
 0x5bb   : > { %v11955_v54 = vadd.f32 %v11425_v14, %v5043_v57  ;;  %v5343_v49 = vmul.f32 0.015625, %v5187_v8  ;;  %v5038_v62 = vadd.f32 %v5037_v55, %v11351_v21 }
 0x5bc   : > { %5303 = vadd.xlane.f32.xlu0 %v5302_v36  ;;  %v5184_v26 = vpop.xlane.xlu0 %5183 }
 0x5bd   : > { %v11959_v58 = vsub.f32 %v11583_v22, %v5343_v49  ;;  %v11962_v39 = vadd.f32 %v11425_v14, %v5038_v62  ;;  %v5342_v5 = vmul.f32 0.015625, %v5184_v26  ;;  %v5311_v17 = vsel %vm1505_vm1, %v11955_v54, 0.0 }
 0x5be   : > { %5312 = vadd.xlane.f32.xlu1 %v5311_v17 }
 0x5bf   : > { %v11967_v3 = vsub.f32 %v11587_v31, %v5342_v5  ;;  %v7847_v57 = vpop.f32.mrf.mxu1  ;;  %v5308_v21 = vsel %vm1505_vm1, %v11962_v39, 0.0  ;;  %v5471_v8 = vmul.f32 %v11959_v58, %v11959_v58 }
 0x5c0   : > { %v5053_v22 = vadd.f32 %v7847_v57, %v11387_v53  ;;  %5309 = vadd.xlane.f32.xlu0 %v5308_v21 }
 0x5c1   : > { %v5569_v55 = vsel %vm1505_vm1, %v5471_v8, 0.0  ;;  %v5047_v36 = vpop.f32.mrf.mxu1  ;;  %v5470_v49 = vmul.f32 %v11967_v3, %v11967_v3 }
 0x5c2   : > { %v11978_v62 = vadd.f32 %v11425_v14, %v5053_v22  ;;  %5570 = vadd.xlane.f32.xlu1 %v5569_v55  ;;  %v5048_v31 = vadd.f32 %v5047_v36, %v11375_v63 }
 0x5c3   : > { %v7850_v26 = vpop.f32.mrf.mxu1  ;;  %v5566_v5 = vsel %vm1505_vm1, %v5470_v49, 0.0 }
 0x5c4   : > { %v11983_v17 = vadd.f32 %v11425_v14, %v5048_v31  ;;  %v5063_v53 = vadd.f32 %v7850_v26, %v11408_v15  ;;  %5567 = vadd.xlane.f32.xlu0 %v5566_v5  ;;  %v5317_v57 = vsel %vm1505_vm1, %v11978_v62, 0.0 }
 0x5c5   : > { %v5057_v21 = vpop.f32.mrf.mxu1 }
 0x5c6   : > { %v11989_v8 = vadd.f32 %v11425_v14, %v5063_v53  ;;  %v5193_v22 = vpop.xlane.xlu1 %5192  ;;  %5318 = vadd.xlane.f32.xlu1 %v5317_v57  ;;  %v5058_v63 = vadd.f32 %v5057_v21, %v11399_v43  ;;  %v5314_v55 = vsel %vm1505_vm1, %v11983_v17, 0.0 }
 0x5c7   : > { %v5345_v36 = vmul.f32 0.015625, %v5193_v22 }
 0x5c8   : > { %v11995_v49 = vadd.f32 %v11425_v14, %v5058_v63  ;;  %5315 = vadd.xlane.f32.xlu0 %v5314_v55  ;;  %v5190_v15 = vpop.xlane.xlu0 %5189  ;;  %v5323_v31 = vsel %vm1505_vm1, %v11989_v8, 0.0 }
 0x5c9   : > { %v12000_v26 = vsub.f32 %v11595_v32, %v5345_v36  ;;  %v5344_v5 = vmul.f32 0.015625, %v5190_v15 }
 0x5ca   : > { %v5199_v53 = vpop.xlane.xlu1 %5198  ;;  %5324 = vadd.xlane.f32.xlu1 %v5323_v31  ;;  %v5320_v43 = vsel %vm1505_vm1, %v11995_v49, 0.0 }
 0x5cb   : > { %v12005_v57 = vsub.f32 %v11599_v40, %v5344_v5  ;;  %v5347_v21 = vmul.f32 0.015625, %v5199_v53  ;;  %v5473_v14 = vmul.f32 %v12000_v26, %v12000_v26 }
 0x5cc   : > { %5321 = vadd.xlane.f32.xlu0 %v5320_v43  ;;  %v5196_v22 = vpop.xlane.xlu0 %5195 }
 0x5cd   : > { %v12010_v63 = vsub.f32 %v11605_v20, %v5347_v21  ;;  %v5346_v32 = vmul.f32 0.015625, %v5196_v22  ;;  %v5575_v55 = vsel %vm1505_vm1, %v5473_v14, 0.0  ;;  %v5472_v36 = vmul.f32 %v12005_v57, %v12005_v57 }
 0x5ce   : > { %v5205_v15 = vpop.xlane.xlu1 %5204  ;;  %5576 = vadd.xlane.f32.xlu1 %v5575_v55 }
 0x5cf   : > { %v12016_v40 = vsub.f32 %v11611_v27, %v5346_v32  ;;  %v5349_v31 = vmul.f32 0.015625, %v5205_v15  ;;  %v5572_v5 = vsel %vm1505_vm1, %v5472_v36, 0.0  ;;  %v5475_v53 = vmul.f32 %v12010_v63, %v12010_v63 }
 0x5d0   : > { %5573 = vadd.xlane.f32.xlu0 %v5572_v5  ;;  %v5202_v20 = vpop.xlane.xlu0 %5201 }
 0x5d1   : > { %v12022_v43 = vsub.f32 %v11617_v28, %v5349_v31  ;;  %v5348_v21 = vmul.f32 0.015625, %v5202_v20  ;;  %v5581_v14 = vsel %vm1505_vm1, %v5475_v53, 0.0  ;;  %v5474_v22 = vmul.f32 %v12016_v40, %v12016_v40 }
 0x5d2   : > { %v5211_v55 = vpop.xlane.xlu1 %5210  ;;  %5582 = vadd.xlane.f32.xlu1 %v5581_v14 }
 0x5d3   : > { %v12028_v27 = vsub.f32 %v11623_v38, %v5348_v21  ;;  %v5351_v32 = vmul.f32 0.015625, %v5211_v55  ;;  %v5578_v36 = vsel %vm1505_vm1, %v5474_v22, 0.0  ;;  %v5477_v15 = vmul.f32 %v12022_v43, %v12022_v43 }
 0x5d4   : > { %5579 = vadd.xlane.f32.xlu0 %v5578_v36  ;;  %v5208_v28 = vpop.xlane.xlu0 %5207 }
 0x5d5   : > { %v12034_v31 = vsub.f32 %v11629_v23, %v5351_v32  ;;  %v5350_v5 = vmul.f32 0.015625, %v5208_v28  ;;  %v5587_v53 = vsel %vm1505_vm1, %v5477_v15, 0.0  ;;  %v5476_v20 = vmul.f32 %v12028_v27, %v12028_v27 }
 0x5d6   : > { %5588 = vadd.xlane.f32.xlu1 %v5587_v53 }
 0x5d7   : > { %v12040_v38 = vsub.f32 %v11635_v6, %v5350_v5  ;;  %v5217_v21 = vpop.xlane.xlu1 %5216  ;;  %v5584_v14 = vsel %vm1505_vm1, %v5476_v20, 0.0  ;;  %v5479_v22 = vmul.f32 %v12034_v31, %v12034_v31 }
 0x5d8   : > { %v5353_v55 = vmul.f32 0.015625, %v5217_v21  ;;  %5585 = vadd.xlane.f32.xlu0 %v5584_v14 }
 0x5d9   : > { %13355 = vst [vmem:[#allocation92_spill] sm:$0xff] %v12040_v38  ;;  %v5214_v23 = vpop.xlane.xlu0 %5213  ;;  %v5593_v32 = vsel %vm1505_vm1, %v5479_v22, 0.0  ;;  %v5478_v36 = vmul.f32 %v12040_v38, %v12040_v38 }
 0x5da   : > { %v12049_v15 = vsub.f32 %v11643_v2, %v5353_v55  ;;  %v5352_v28 = vmul.f32 0.015625, %v5214_v23  ;;  %5594 = vadd.xlane.f32.xlu1 %v5593_v32 }
 0x5db   : > { %v5223_v6 = vpop.xlane.xlu1 %5222  ;;  %v5590_v5 = vsel %vm1505_vm1, %v5478_v36, 0.0 }
 0x5dc   : > { %v12053_v53 = vsub.f32 %v11647_v45, %v5352_v28  ;;  %v5355_v20 = vmul.f32 0.015625, %v5223_v6  ;;  %5591 = vadd.xlane.f32.xlu0 %v5590_v5  ;;  %v5481_v21 = vmul.f32 %v12049_v15, %v12049_v15 }
 0x5dd   : > { %v5220_v14 = vpop.xlane.xlu0 %5219 }
 0x5de   : > { %v12058_v22 = vsub.f32 %v11653_v50, %v5355_v20  ;;  %v5354_v38 = vmul.f32 0.015625, %v5220_v14  ;;  %v5599_v2 = vsel %vm1505_vm1, %v5481_v21, 0.0  ;;  %v5480_v55 = vmul.f32 %v12053_v53, %v12053_v53 }
 0x5df   : > { %v5229_v23 = vpop.xlane.xlu1 %5228  ;;  %5600 = vadd.xlane.f32.xlu1 %v5599_v2 }
 0x5e0   : > { %v12064_v45 = vsub.f32 %v11659_v61, %v5354_v38  ;;  %v5357_v32 = vmul.f32 0.015625, %v5229_v23  ;;  %v5596_v36 = vsel %vm1505_vm1, %v5480_v55, 0.0  ;;  %v5483_v28 = vmul.f32 %v12058_v22, %v12058_v22 }
 0x5e1   : > { %5597 = vadd.xlane.f32.xlu0 %v5596_v36  ;;  %v5226_v50 = vpop.xlane.xlu0 %5225 }
 0x5e2   : > { %v12070_v6 = vsub.f32 %v11665_v41, %v5357_v32  ;;  %v5356_v5 = vmul.f32 0.015625, %v5226_v50  ;;  %v5605_v20 = vsel %vm1505_vm1, %v5483_v28, 0.0  ;;  %v5482_v21 = vmul.f32 %v12064_v45, %v12064_v45 }
 0x5e3   : > { %5606 = vadd.xlane.f32.xlu1 %v5605_v20 }
 0x5e4   : > { %13356 = vst [vmem:[#allocation99_spill] sm:$0xff] %v12070_v6  ;;  %v12076_v61 = vsub.f32 %v11671_v51, %v5356_v5  ;;  %v5602_v38 = vsel %vm1505_vm1, %v5482_v21, 0.0  ;;  %v5485_v14 = vmul.f32 %v12070_v6, %v12070_v6 }
 0x5e5   : > { %5603 = vadd.xlane.f32.xlu0 %v5602_v38  ;;  %v5235_v2 = vpop.xlane.xlu1 %5234 }
 0x5e6   : > { %13357 = vst [vmem:[#allocation97_spill] sm:$0xff] %v12076_v61  ;;  %v5359_v55 = vmul.f32 0.015625, %v5235_v2  ;;  %v5611_v41 = vsel %vm1505_vm1, %v5485_v14, 0.0  ;;  %v5484_v23 = vmul.f32 %v12076_v61, %v12076_v61 }
 0x5e7   : > { %5612 = vadd.xlane.f32.xlu1 %v5611_v41  ;;  %v5232_v32 = vpop.xlane.xlu0 %5231 }
 0x5e8   : > { %v12085_v36 = vsub.f32 %v11679_v24, %v5359_v55  ;;  %v5608_v51 = vsel %vm1505_vm1, %v5484_v23, 0.0  ;;  %v5358_v28 = vmul.f32 0.015625, %v5232_v32  ;;  %v13360_v55 = vld [vmem:[#allocation72_spill] sm:$0xff]  ;;  %v13362_v23 = vld [vmem:[#allocation70_spill] sm:$0xff] }
 0x5e9   : > { %5609 = vadd.xlane.f32.xlu0 %v5608_v51 }
 0x5ea   : > { %13358 = vst [vmem:[#allocation7_spill] sm:$0xff] %v12085_v36  ;;  %v12089_v50 = vsub.f32 %v11683_v59, %v5358_v28  ;;  %v5487_v5 = vmul.f32 %v12085_v36, %v12085_v36 }
 0x5ec   : > { %13359 = vst [vmem:[#allocation87_spill] sm:$0xff] %v12089_v50  ;;  %v5617_v20 = vsel %vm1505_vm1, %v5487_v5, 0.0  ;;  %v5486_v21 = vmul.f32 %v12089_v50, %v12089_v50  ;;  %v13368_v50 = vld [vmem:[#allocation3_spill] sm:$0xff] }
 0x5ed   : > { %v5241_v38 = vpop.xlane.xlu1 %5240  ;;  %5618 = vadd.xlane.f32.xlu1 %v5617_v20 }
 0x5ee   : > { %v5361_v14 = vmul.f32 0.015625, %v5241_v38  ;;  %v5614_v24 = vsel %vm1505_vm1, %v5486_v21, 0.0 }
 0x5ef   : > { %5615 = vadd.xlane.f32.xlu0 %v5614_v24  ;;  %v5238_v2 = vpop.xlane.xlu0 %5237 }
 0x5f0   : > { %v12098_v41 = vsub.f32 %v13360_v55, %v5361_v14  ;;  %v5360_v59 = vmul.f32 0.015625, %v5238_v2  ;;  %v13365_v55 = vld [vmem:[#allocation79_spill] sm:$0xff] }
 0x5f2   : > { %13361 = vst [vmem:[#allocation40_spill] sm:$0xff] %v12098_v41  ;;  %v12101_v32 = vsub.f32 %v13362_v23, %v5360_v59  ;;  %v5489_v51 = vmul.f32 %v12098_v41, %v12098_v41 }
 0x5f4   : > { %13363 = vst [vmem:[#allocation22_spill] sm:$0xff] %v12101_v32  ;;  %v5623_v28 = vsel %vm1505_vm1, %v5489_v51, 0.0  ;;  %v5488_v5 = vmul.f32 %v12101_v32, %v12101_v32 }
 0x5f5   : > { %v5247_v20 = vpop.xlane.xlu1 %5246  ;;  %5624 = vadd.xlane.f32.xlu1 %v5623_v28 }
 0x5f6   : > { %v5363_v21 = vmul.f32 0.015625, %v5247_v20  ;;  %v5620_v38 = vsel %vm1505_vm1, %v5488_v5, 0.0 }
 0x5f7   : > { %5621 = vadd.xlane.f32.xlu0 %v5620_v38  ;;  %v5244_v14 = vpop.xlane.xlu0 %5243 }
 0x5f8   : > { %v12110_v24 = vsub.f32 %v11703_v16, %v5363_v21  ;;  %v5362_v2 = vmul.f32 0.015625, %v5244_v14 }
 0x5fa   : > { %13364 = vst [vmem:[#allocation44_spill] sm:$0xff] %v12110_v24  ;;  %v12113_v59 = vsub.f32 %v13365_v55, %v5362_v2  ;;  %v5523_v23 = vpop.xlane.xlu1 %5522  ;;  %v5491_v51 = vmul.f32 %v12110_v24, %v12110_v24 }
 0x5fb   : > { %v5711_v41 = vmul.f32 0.015625, %v5523_v23 }
 0x5fc   : > { %13366 = vst [vmem:[#allocation42_spill] sm:$0xff] %v12113_v59  ;;  %v5520_v32 = vpop.xlane.xlu0 %5519  ;;  %v5629_v28 = vsel %vm1505_vm1, %v5491_v51, 0.0  ;;  %v5490_v5 = vmul.f32 %v12113_v59, %v12113_v59 }
 0x5fd   : > { %v5775_v20 = vadd.f32 1e-05, %v5711_v41  ;;  %v5710_v38 = vmul.f32 0.015625, %v5520_v32  ;;  %5630 = vadd.xlane.f32.xlu1 %v5629_v28 }
 0x5fe   : > { %v5253_v16 = vpop.xlane.xlu1 %5252  ;;  %v5626_v21 = vsel %vm1505_vm1, %v5490_v5, 0.0 }
 0x5ff   : > { %8240 = vrsqrt.f32 %v5775_v20  ;;  %v5774_v14 = vadd.f32 1e-05, %v5710_v38  ;;  %v5365_v2 = vmul.f32 0.015625, %v5253_v16  ;;  %5627 = vadd.xlane.f32.xlu0 %v5626_v21 }
 0x600   : > { %v5250_v55 = vpop.xlane.xlu0 %5249 }
 0x601   : > { %8242 = vrsqrt.f32 %v5774_v14  ;;  %v12122_v23 = vsub.f32 %v11726_v60, %v5365_v2  ;;  %v5364_v24 = vmul.f32 0.015625, %v5250_v55 }
 0x602   : > { %v5529_v51 = vpop.xlane.xlu1 %5528 }
 0x603   : > { %13367 = vst [vmem:[#allocation49_spill] sm:$0xff] %v12122_v23  ;;  %v12125_v36 = vsub.f32 %v13368_v50, %v5364_v24  ;;  %v5713_v41 = vmul.f32 0.015625, %v5529_v51  ;;  %v5493_v32 = vmul.f32 %v12122_v23, %v12122_v23  ;;  %v8436_v51 = vld [vmem:[%s12830_s4 + $0x4] sm:$0x7] }
 0x605   : > { %13369 = vst [vmem:[#allocation47_spill] sm:$0xff] %v12125_v36  ;;  %v5777_v28 = vadd.f32 1e-05, %v5713_v41  ;;  %v5526_v5 = vpop.xlane.xlu0 %5525  ;;  %v5635_v20 = vsel %vm1505_vm1, %v5493_v32, 0.0  ;;  %v5492_v38 = vmul.f32 %v12125_v36, %v12125_v36  ;;  %v13371_v41 = vld [vmem:[#allocation2_spill] sm:$0xff] }
 0x606   : > { %v5712_v16 = vmul.f32 0.015625, %v5526_v5  ;;  %5636 = vadd.xlane.f32.xlu1 %v5635_v20  ;;  %v12140_v32 = vrot.slane %v8436_v51, %v13371_v41 }
 0x607   : > { %8244 = vrsqrt.f32 %v5777_v28  ;;  %v5259_v60 = vpop.xlane.xlu1 %5258  ;;  %v5632_v21 = vsel %vm1505_vm1, %v5492_v38, 0.0 }
 0x608   : > { %v5776_v14 = vadd.f32 1e-05, %v5712_v16  ;;  %v5367_v50 = vmul.f32 0.015625, %v5259_v60  ;;  %5633 = vadd.xlane.f32.xlu0 %v5632_v21  ;;  %v13373_v60 = vld [vmem:[#allocation18_spill] sm:$0xff] }
 0x609   : > { %v5256_v24 = vpop.xlane.xlu0 %5255 }
 0x60a   : > { %8246 = vrsqrt.f32 %v5776_v14  ;;  %v12134_v2 = vsub.f32 %v11750_v9, %v5367_v50  ;;  %v5366_v55 = vmul.f32 0.015625, %v5256_v24  ;;  %v8437_v14 = vld [vmem:[%s12830_s4 + $0x8] sm:$0x7] }
 0x60b   : > { %v5535_v28 = vpop.xlane.xlu1 %5534  ;;  %v12152_v50 = vrot.slane %v8437_v14, %v13371_v41 }
 0x60c   : > { %13370 = vst [vmem:[#allocation58_spill] sm:$0xff] %v12134_v2  ;;  %v8241_v5 = vpop.eup %8240  ;;  %v12143_v20 = vsub.f32 %v11758_v13, %v5366_v55  ;;  %v5715_v38 = vmul.f32 0.015625, %v5535_v28  ;;  %v5495_v16 = vmul.f32 %v12134_v2, %v12134_v2 }
 0x60d   : > { %v5903_v9 = vmul.f32 %v8241_v5, %v13373_v60  ;;  %v5532_v21 = vpop.xlane.xlu0 %5531  ;;  %v13374_v5 = vld [vmem:[#allocation21_spill] sm:$0xff] }
 0x60e   : > { %13372 = vst [vmem:[#allocation51_spill] sm:$0xff] %v12143_v20  ;;  %v8243_v24 = vpop.eup %8242  ;;  %v5779_v51 = vadd.f32 1e-05, %v5715_v38  ;;  %v5714_v36 = vmul.f32 0.015625, %v5532_v21  ;;  %v5641_v13 = vsel %vm1505_vm1, %v5495_v16, 0.0  ;;  %v5494_v55 = vmul.f32 %v12143_v20, %v12143_v20 }
 0x60f   : > { %v5971_v28 = vmul.f32 %v12140_v32, %v5903_v9  ;;  %v5265_v2 = vpop.xlane.xlu1 %5264  ;;  %5642 = vadd.xlane.f32.xlu1 %v5641_v13  ;;  %v5902_v60 = vmul.f32 %v8243_v24, %v13374_v5 }
 0x610   : > { %8248 = vrsqrt.f32 %v5779_v51  ;;  %v5778_v23 = vadd.f32 1e-05, %v5714_v36  ;;  %v5369_v59 = vmul.f32 0.015625, %v5265_v2  ;;  %v5638_v41 = vsel %vm1505_vm1, %v5494_v55, 0.0 }
 0x611   : > { %5639 = vadd.xlane.f32.xlu0 %v5638_v41  ;;  %v5262_v14 = vpop.xlane.xlu0 %5261  ;;  %v5970_v38 = vmul.f32 %v12140_v32, %v5902_v60  ;;  %v6039_v16 = vadd.f32 %v12152_v50, %v5971_v28  ;;  %v13376_v28 = vld [vmem:[#allocation88_spill] sm:$0xff] }
 0x612   : > { %8250 = vrsqrt.f32 %v5778_v23  ;;  %v12163_v21 = vsub.f32 %v11774_v0, %v5369_v59  ;;  %v5368_v9 = vmul.f32 0.015625, %v5262_v14 }
 0x613   : > { %v5541_v20 = vpop.xlane.xlu1 %5540  ;;  %v6038_v13 = vadd.f32 %v12152_v50, %v5970_v38  ;;  %v6167_v24 = vmul.f32 0.01, %v6039_v16  ;;  %vm6103_vm13 = vcmp.ge.f32.partialorder %v6039_v16, 0.0 }
 0x614   : > { %13375 = vst [vmem:[#allocation62_spill] sm:$0xff] %v12163_v21  ;;  %v8245_v51 = vpop.eup %8244  ;;  %v12167_v36 = vsub.f32 %v11779_v34, %v5368_v9  ;;  %v5717_v2 = vmul.f32 0.015625, %v5541_v20  ;;  %v5497_v55 = vmul.f32 %v12163_v21, %v12163_v21 }
 0x615   : > { %v5538_v5 = vpop.xlane.xlu0 %5537  ;;  %vm6102_vm14 = vcmp.ge.f32.partialorder %v6038_v13, 0.0  ;;  %v6166_v23 = vmul.f32 0.01, %v6038_v13  ;;  %v5905_v0 = vmul.f32 %v8245_v51, %v13376_v28  ;;  %v6231_v9 = vsel %vm6103_vm13, %v6039_v16, %v6167_v24 }
 0x616   : > { %v5781_v59 = vadd.f32 1e-05, %v5717_v2  ;;  %v5716_v60 = vmul.f32 0.015625, %v5538_v5  ;;  %v5647_v41 = vsel %vm1505_vm1, %v5497_v55, 0.0  ;;  %v5496_v14 = vmul.f32 %v12167_v36, %v12167_v36  ;;  %v13377_v55 = vld [vmem:[#allocation82_spill] sm:$0xff] }
 0x617   : > { %v8247_v38 = vpop.eup %8246  ;;  %v5271_v34 = vpop.xlane.xlu1 %5270  ;;  %5648 = vadd.xlane.f32.xlu1 %v5647_v41  ;;  %v6230_v20 = vsel %vm6102_vm14, %v6038_v13, %v6166_v23  ;;  %v5973_v21 = vmul.f32 %v12140_v32, %v5905_v0 }
 0x618   : > { %8252 = vrsqrt.f32 %v5781_v59  ;;  %v5780_v61 = vadd.f32 1e-05, %v5716_v60  ;;  %v5371_v6 = vmul.f32 0.015625, %v5271_v34  ;;  %7867 = vmatprep.mubr.msk.f32.mxu0 %vm1505_vm1, %v6230_v20  ;;  %v5644_v51 = vsel %vm1505_vm1, %v5496_v14, 0.0 }
 0x619   : > { %5645 = vadd.xlane.f32.xlu0 %v5644_v51  ;;  %v5268_v2 = vpop.xlane.xlu0 %5267  ;;  %7868 = vmatmul.mubr.msk.f32.vlgmr.msra.gmra.mxu0 %vm1505_vm1, %v6231_v9  ;;  %v5904_v5 = vmul.f32 %v8247_v38, %v13377_v55  ;;  %v6041_v28 = vadd.f32 %v12152_v50, %v5973_v21  ;;  %v13378_v51 = vld [vmem:[#allocation84_spill] sm:$0xff] }
 0x61a   : > { %8254 = vrsqrt.f32 %v5780_v61  ;;  %v12182_v16 = vsub.f32 %v11798_v47, %v5371_v6  ;;  %v5370_v13 = vmul.f32 0.015625, %v5268_v2 }
 0x61b   : > { %v5547_v24 = vpop.xlane.xlu1 %5546  ;;  %v5972_v23 = vmul.f32 %v12140_v32, %v5904_v5  ;;  %v6169_v21 = vmul.f32 0.01, %v6041_v28  ;;  %vm6105_vm2 = vcmp.ge.f32.partialorder %v6041_v28, 0.0 }
 0x61c   : > { %v12186_v0 = vsub.f32 %v11806_v19, %v5370_v13  ;;  %v5719_v59 = vmul.f32 0.015625, %v5547_v24  ;;  %v5499_v60 = vmul.f32 %v12182_v16, %v12182_v16 }
 0x61d   : > { %v8249_v41 = vpop.eup %8248  ;;  %v5544_v14 = vpop.xlane.xlu0 %5543  ;;  %v6040_v38 = vadd.f32 %v12152_v50, %v5972_v23 }
 0x61e   : > { %v5783_v61 = vadd.f32 1e-05, %v5719_v59  ;;  %v5718_v34 = vmul.f32 0.015625, %v5544_v14  ;;  %v5653_v47 = vsel %vm1505_vm1, %v5499_v60, 0.0  ;;  %v5498_v6 = vmul.f32 %v12186_v0, %v12186_v0 }
 0x61f   : > { %v8251_v20 = vpop.eup %8250  ;;  %v5277_v9 = vpop.xlane.xlu1 %5276  ;;  %5654 = vadd.xlane.f32.xlu1 %v5653_v47  ;;  %vm6104_vm15 = vcmp.ge.f32.partialorder %v6040_v38, 0.0  ;;  %v6168_v19 = vmul.f32 0.01, %v6040_v38  ;;  %v5907_v2 = vmul.f32 %v8249_v41, %v13378_v51  ;;  %v6233_v41 = vsel %vm6105_vm2, %v6041_v28, %v6169_v21  ;;  %v13379_v21 = vld [vmem:[#allocation55_spill] sm:$0xff] }
 0x620   : > { %8256 = vrsqrt.f32 %v5783_v61  ;;  %v5782_v55 = vadd.f32 1e-05, %v5718_v34  ;;  %v5373_v5 = vmul.f32 0.015625, %v5277_v9  ;;  %v5650_v13 = vsel %vm1505_vm1, %v5498_v6, 0.0 }
 0x621   : > { %v6232_v24 = vsel %vm6104_vm15, %v6040_v38, %v6168_v19  ;;  %5651 = vadd.xlane.f32.xlu0 %v5650_v13  ;;  %v5274_v23 = vpop.xlane.xlu0 %5273  ;;  %v5906_v59 = vmul.f32 %v8251_v20, %v11763_v46  ;;  %v5975_v60 = vmul.f32 %v12140_v32, %v5907_v2 }
 0x622   : > { %8258 = vrsqrt.f32 %v5782_v55  ;;  %v12199_v14 = vsub.f32 %v11834_v52, %v5373_v5  ;;  %7870 = vmatprep.mubr.msk.f32.mxu0 %vm1505_vm1, %v6232_v24  ;;  %v5372_v47 = vmul.f32 0.015625, %v5274_v23 }
 0x623   : > { %7871 = vmatmul.mubr.msk.f32.gmra.mxu0 %vm1505_vm1, %v6233_v41  ;;  %v5974_v61 = vmul.f32 %v12140_v32, %v5906_v59  ;;  %v6043_v38 = vadd.f32 %v12152_v50, %v5975_v60 }
 0x624   : > { %v12206_v34 = vsub.f32 %v11842_v37, %v5372_v47  ;;  %v5501_v46 = vmul.f32 %v12199_v14, %v12199_v14 }
 0x625   : > { %v8253_v6 = vpop.eup %8252  ;;  %v6042_v52 = vadd.f32 %v12152_v50, %v5974_v61  ;;  %v6171_v20 = vmul.f32 0.01, %v6043_v38  ;;  %vm6107_vm3 = vcmp.ge.f32.partialorder %v6043_v38, 0.0 }
 0x626   : > { %v5659_v9 = vsel %vm1505_vm1, %v5501_v46, 0.0  ;;  %v5500_v28 = vmul.f32 %v12206_v34, %v12206_v34  ;;  %v5909_v19 = vmul.f32 %v8253_v6, %v13379_v21 }
 0x627   : > { %v8255_v51 = vpop.eup %8254  ;;  %v5553_v2 = vpop.xlane.xlu1 %5552  ;;  %5660 = vadd.xlane.f32.xlu1 %v5659_v9  ;;  %vm6106_vm4 = vcmp.ge.f32.partialorder %v6042_v52, 0.0  ;;  %v6170_v37 = vmul.f32 0.01, %v6042_v52  ;;  %v6235_v60 = vsel %vm6107_vm3, %v6043_v38, %v6171_v20 }
 0x628   : > { %v5721_v55 = vmul.f32 0.015625, %v5553_v2  ;;  %v5656_v5 = vsel %vm1505_vm1, %v5500_v28, 0.0  ;;  %v5908_v13 = vmul.f32 %v8255_v51, %v11789_v33  ;;  %v5977_v24 = vmul.f32 %v12140_v32, %v5909_v19 }
 0x629   : > { %v6234_v23 = vsel %vm6106_vm4, %v6042_v52, %v6170_v37  ;;  %5657 = vadd.xlane.f32.xlu0 %v5656_v5  ;;  %v5550_v59 = vpop.xlane.xlu0 %5549 }
 0x62a   : > { %v5785_v47 = vadd.f32 1e-05, %v5721_v55  ;;  %7873 = vmatprep.mubr.msk.f32.mxu0 %vm1505_vm1, %v6234_v23  ;;  %v5720_v41 = vmul.f32 0.015625, %v5550_v59  ;;  %v5976_v61 = vmul.f32 %v12140_v32, %v5908_v13  ;;  %v6045_v46 = vadd.f32 %v12152_v50, %v5977_v24  ;;  %v13380_v55 = vld [vmem:[#allocation39_spill] sm:$0xff]  ;;  %v13381_v59 = vld [vmem:[#allocation33_spill] sm:$0xff] }
 0x62b   : > { %7874 = vmatmul.mubr.msk.f32.gmra.mxu0 %vm1505_vm1, %v6235_v60  ;;  %v5283_v6 = vpop.xlane.xlu1 %5282 }
 0x62c   : > { %8260 = vrsqrt.f32 %v5785_v47  ;;  %v5784_v9 = vadd.f32 1e-05, %v5720_v41  ;;  %v5375_v33 = vmul.f32 0.015625, %v5283_v6  ;;  %v6044_v28 = vadd.f32 %v12152_v50, %v5976_v61 }
 0x62d   : > { %v8257_v52 = vpop.eup %8256  ;;  %v5280_v21 = vpop.xlane.xlu0 %5279  ;;  %vm6109_vm5 = vcmp.ge.f32.partialorder %v6045_v46, 0.0  ;;  %v6173_v38 = vmul.f32 0.01, %v6045_v46 }
 0x62e   : > { %8262 = vrsqrt.f32 %v5784_v9  ;;  %v12224_v20 = vsub.f32 %v11870_v11, %v5375_v33  ;;  %v5374_v19 = vmul.f32 0.015625, %v5280_v21  ;;  %vm6108_vm6 = vcmp.ge.f32.partialorder %v6044_v28, 0.0 }
 0x62f   : > { %v8259_v51 = vpop.eup %8258  ;;  %v5289_v2 = vpop.xlane.xlu1 %5288  ;;  %v6172_v37 = vmul.f32 0.01, %v6044_v28  ;;  %v5911_v5 = vmul.f32 %v8257_v52, %v13380_v55  ;;  %v6237_v11 = vsel %vm6109_vm5, %v6045_v46, %v6173_v38 }
 0x630   : > { %v12228_v13 = vsub.f32 %v11875_v30, %v5374_v19  ;;  %v5377_v24 = vmul.f32 0.015625, %v5289_v2  ;;  %v5503_v23 = vmul.f32 %v12224_v20, %v12224_v20  ;;  %v5910_v60 = vmul.f32 %v8259_v51, %v13381_v59 }
 0x631   : > { %v6236_v47 = vsel %vm6108_vm6, %v6044_v28, %v6172_v37  ;;  %v5286_v41 = vpop.xlane.xlu0 %5285  ;;  %v5979_v61 = vmul.f32 %v12140_v32, %v5911_v5 }
 0x632   : > { %v12236_v6 = vsub.f32 %v11883_v56, %v5377_v24  ;;  %7876 = vmatprep.mubr.msk.f32.mxu0 %vm1505_vm1, %v6236_v47  ;;  %v5376_v9 = vmul.f32 0.015625, %v5286_v41  ;;  %v5665_v30 = vsel %vm1505_vm1, %v5503_v23, 0.0  ;;  %v5502_v33 = vmul.f32 %v12228_v13, %v12228_v13 }
 0x633   : > { %7877 = vmatmul.mubr.msk.f32.gmra.mxu0 %vm1505_vm1, %v6237_v11  ;;  %v5559_v52 = vpop.xlane.xlu1 %5558  ;;  %5666 = vadd.xlane.f32.xlu1 %v5665_v30  ;;  %v5978_v28 = vmul.f32 %v12140_v32, %v5910_v60  ;;  %v6047_v46 = vadd.f32 %v12152_v50, %v5979_v61 }
 0x634   : > { %v12246_v21 = vsub.f32 %v11890_v10, %v5376_v9  ;;  %v5723_v56 = vmul.f32 0.015625, %v5559_v52  ;;  %v5662_v38 = vsel %vm1505_vm1, %v5502_v33, 0.0  ;;  %v5505_v19 = vmul.f32 %v12236_v6, %v12236_v6 }
 0x635   : > { %5663 = vadd.xlane.f32.xlu0 %v5662_v38  ;;  %v5556_v51 = vpop.xlane.xlu0 %5555  ;;  %v6046_v2 = vadd.f32 %v12152_v50, %v5978_v28  ;;  %vm6111_vm7 = vcmp.ge.f32.partialorder %v6047_v46, 0.0  ;;  %v6175_v37 = vmul.f32 0.01, %v6047_v46 }
 0x636   : > { %v5787_v55 = vadd.f32 1e-05, %v5723_v56  ;;  %v5722_v5 = vmul.f32 0.015625, %v5556_v51  ;;  %v5671_v24 = vsel %vm1505_vm1, %v5505_v19, 0.0  ;;  %v5504_v10 = vmul.f32 %v12246_v21, %v12246_v21 }
 0x637   : > { %v5295_v23 = vpop.xlane.xlu1 %5294  ;;  %5672 = vadd.xlane.f32.xlu1 %v5671_v24  ;;  %vm6110_vm8 = vcmp.ge.f32.partialorder %v6046_v2, 0.0  ;;  %v6174_v59 = vmul.f32 0.01, %v6046_v2  ;;  %v6239_v30 = vsel %vm6111_vm7, %v6047_v46, %v6175_v37 }
 0x638   : > { %8264 = vrsqrt.f32 %v5787_v55  ;;  %v5786_v60 = vadd.f32 1e-05, %v5722_v5  ;;  %v5379_v47 = vmul.f32 0.015625, %v5295_v23  ;;  %v5668_v41 = vsel %vm1505_vm1, %v5504_v10, 0.0 }
 0x639   : > { %v8261_v11 = vpop.eup %8260  ;;  %v6238_v61 = vsel %vm6110_vm8, %v6046_v2, %v6174_v59  ;;  %5669 = vadd.xlane.f32.xlu0 %v5668_v41  ;;  %v5292_v9 = vpop.xlane.xlu0 %5291  ;;  %v13382_v2 = vld [vmem:[#allocation95_spill] sm:$0xff] }
 0x63a   : > { %8266 = vrsqrt.f32 %v5786_v60  ;;  %v12258_v33 = vsub.f32 %v11906_v1, %v5379_v47  ;;  %7879 = vmatprep.mubr.msk.f32.mxu0 %vm1505_vm1, %v6238_v61  ;;  %v5378_v52 = vmul.f32 0.015625, %v5292_v9  ;;  %v5913_v28 = vmul.f32 %v8261_v11, %v11852_v29 }
 0x63b   : > { %v8263_v56 = vpop.eup %8262  ;;  %7880 = vmatmul.mubr.msk.f32.gmra.mxu0 %vm1505_vm1, %v6239_v30  ;;  %v5301_v38 = vpop.xlane.xlu1 %5300 }
 0x63c   : > { %v12264_v19 = vsub.f32 %v11911_v4, %v5378_v52  ;;  %v5381_v51 = vmul.f32 0.015625, %v5301_v38  ;;  %v5507_v46 = vmul.f32 %v12258_v33, %v12258_v33  ;;  %v5912_v37 = vmul.f32 %v8263_v56, %v13382_v2 }
 0x63d   : > { %v5298_v1 = vpop.xlane.xlu0 %5297  ;;  %v5981_v55 = vmul.f32 %v12140_v32, %v5913_v28 }
 0x63e   : > { %v12271_v5 = vsub.f32 %v11917_v25, %v5381_v51  ;;  %v5380_v29 = vmul.f32 0.015625, %v5298_v1  ;;  %v5677_v24 = vsel %vm1505_vm1, %v5507_v46, 0.0  ;;  %v5506_v10 = vmul.f32 %v12264_v19, %v12264_v19 }
 0x63f   : > { %v5565_v4 = vpop.xlane.xlu1 %5564  ;;  %5678 = vadd.xlane.f32.xlu1 %v5677_v24  ;;  %v5980_v23 = vmul.f32 %v12140_v32, %v5912_v37  ;;  %v6049_v59 = vadd.f32 %v12152_v50, %v5981_v55 }
 0x640   : > { %v12279_v60 = vsub.f32 %v11926_v48, %v5380_v29  ;;  %v5725_v47 = vmul.f32 0.015625, %v5565_v4  ;;  %v5674_v41 = vsel %vm1505_vm1, %v5506_v10, 0.0  ;;  %v5509_v25 = vmul.f32 %v12271_v5, %v12271_v5 }
 0x641   : > { %5675 = vadd.xlane.f32.xlu0 %v5674_v41  ;;  %v5562_v11 = vpop.xlane.xlu0 %5561  ;;  %v6048_v61 = vadd.f32 %v12152_v50, %v5980_v23  ;;  %vm6113_vm9 = vcmp.ge.f32.partialorder %v6049_v59, 0.0  ;;  %v6177_v9 = vmul.f32 0.01, %v6049_v59 }
 0x642   : > { %v5789_v30 = vadd.f32 1e-05, %v5725_v47  ;;  %v5724_v52 = vmul.f32 0.015625, %v5562_v11  ;;  %v5683_v28 = vsel %vm1505_vm1, %v5509_v25, 0.0  ;;  %v5508_v48 = vmul.f32 %v12279_v60, %v12279_v60 }
 0x643   : > { %v5307_v56 = vpop.xlane.xlu1 %5306  ;;  %5684 = vadd.xlane.f32.xlu1 %v5683_v28  ;;  %vm6112_vm0 = vcmp.ge.f32.partialorder %v6048_v61, 0.0  ;;  %v6176_v38 = vmul.f32 0.01, %v6048_v61  ;;  %v6241_v29 = vsel %vm6113_vm9, %v6049_v59, %v6177_v9 }
 0x644   : > { %8268 = vrsqrt.f32 %v5789_v30  ;;  %v5788_v51 = vadd.f32 1e-05, %v5724_v52  ;;  %v5383_v46 = vmul.f32 0.015625, %v5307_v56  ;;  %v5680_v2 = vsel %vm1505_vm1, %v5508_v48, 0.0 }
 0x645   : > { %v8265_v37 = vpop.eup %8264  ;;  %v6240_v1 = vsel %vm6112_vm0, %v6048_v61, %v6176_v38  ;;  %5681 = vadd.xlane.f32.xlu0 %v5680_v2  ;;  %v5304_v55 = vpop.xlane.xlu0 %5303 }
 0x646   : > { %8270 = vrsqrt.f32 %v5788_v51  ;;  %v12291_v24 = vsub.f32 %v11942_v12, %v5383_v46  ;;  %7882 = vmatprep.mubr.msk.f32.mxu0 %vm1505_vm1, %v6240_v1  ;;  %v5382_v10 = vmul.f32 0.015625, %v5304_v55  ;;  %v5915_v4 = vmul.f32 %v8265_v37, %v11887_v35 }
 0x647   : > { %v8267_v23 = vpop.eup %8266  ;;  %7883 = vmatmul.mubr.msk.f32.gmra.mxu0 %vm1505_vm1, %v6241_v29  ;;  %v5313_v47 = vpop.xlane.xlu1 %5312 }
 0x648   : > { %v12297_v41 = vsub.f32 %v11947_v7, %v5382_v10  ;;  %v5385_v25 = vmul.f32 0.015625, %v5313_v47  ;;  %v5511_v59 = vmul.f32 %v12291_v24, %v12291_v24  ;;  %v5914_v11 = vmul.f32 %v8267_v23, %v11895_v18 }
 0x649   : > { %v5310_v12 = vpop.xlane.xlu0 %5309  ;;  %v5983_v61 = vmul.f32 %v12140_v32, %v5915_v4 }
 0x64a   : > { %v12304_v9 = vsub.f32 %v11955_v54, %v5385_v25  ;;  %v5384_v35 = vmul.f32 0.015625, %v5310_v12  ;;  %v5689_v30 = vsel %vm1505_vm1, %v5511_v59, 0.0  ;;  %v5510_v52 = vmul.f32 %v12297_v41, %v12297_v41 }
 0x64b   : > { %v5571_v7 = vpop.xlane.xlu1 %5570  ;;  %5690 = vadd.xlane.f32.xlu1 %v5689_v30  ;;  %v5982_v28 = vmul.f32 %v12140_v32, %v5914_v11  ;;  %v6051_v48 = vadd.f32 %v12152_v50, %v5983_v61 }
 0x64c   : > { %v12312_v18 = vsub.f32 %v11962_v39, %v5384_v35  ;;  %v5727_v56 = vmul.f32 0.015625, %v5571_v7  ;;  %v5686_v38 = vsel %vm1505_vm1, %v5510_v52, 0.0  ;;  %v5513_v54 = vmul.f32 %v12304_v9, %v12304_v9 }
 0x64d   : > { %5687 = vadd.xlane.f32.xlu0 %v5686_v38  ;;  %v5568_v51 = vpop.xlane.xlu0 %5567  ;;  %v6050_v46 = vadd.f32 %v12152_v50, %v5982_v28  ;;  %vm6115_vm10 = vcmp.ge.f32.partialorder %v6051_v48, 0.0  ;;  %v6179_v2 = vmul.f32 0.01, %v6051_v48 }
 0x64e   : > { %v5791_v37 = vadd.f32 1e-05, %v5727_v56  ;;  %v5726_v1 = vmul.f32 0.015625, %v5568_v51  ;;  %v5695_v55 = vsel %vm1505_vm1, %v5513_v54, 0.0  ;;  %v5512_v39 = vmul.f32 %v12312_v18, %v12312_v18 }
 0x64f   : > { %v5319_v29 = vpop.xlane.xlu1 %5318  ;;  %5696 = vadd.xlane.f32.xlu1 %v5695_v55  ;;  %vm6114_vm11 = vcmp.ge.f32.partialorder %v6050_v46, 0.0  ;;  %v6178_v10 = vmul.f32 0.01, %v6050_v46  ;;  %v6243_v12 = vsel %vm6115_vm10, %v6051_v48, %v6179_v2 }
 0x650   : > { %8272 = vrsqrt.f32 %v5791_v37  ;;  %v5790_v4 = vadd.f32 1e-05, %v5726_v1  ;;  %v5387_v23 = vmul.f32 0.015625, %v5319_v29  ;;  %v5692_v47 = vsel %vm1505_vm1, %v5512_v39, 0.0 }
 0x651   : > { %v8269_v25 = vpop.eup %8268  ;;  %v6242_v59 = vsel %vm6114_vm11, %v6050_v46, %v6178_v10  ;;  %5693 = vadd.xlane.f32.xlu0 %v5692_v47  ;;  %v5316_v11 = vpop.xlane.xlu0 %5315 }
 0x652   : > { %8274 = vrsqrt.f32 %v5790_v4  ;;  %v12324_v61 = vsub.f32 %v11978_v62, %v5387_v23  ;;  %7885 = vmatprep.mubr.msk.f32.mxu0 %vm1505_vm1, %v6242_v59  ;;  %v5386_v35 = vmul.f32 0.015625, %v5316_v11  ;;  %v5917_v30 = vmul.f32 %v8269_v25, %v11923_v42 }
 0x653   : > { %v8271_v52 = vpop.eup %8270  ;;  %7886 = vmatmul.mubr.msk.f32.gmra.mxu0 %vm1505_vm1, %v6243_v12  ;;  %v5325_v7 = vpop.xlane.xlu1 %5324 }
 0x654   : > { %v12330_v28 = vsub.f32 %v11983_v17, %v5386_v35  ;;  %v5389_v56 = vmul.f32 0.015625, %v5325_v7  ;;  %v5515_v48 = vmul.f32 %v12324_v61, %v12324_v61  ;;  %v5916_v38 = vmul.f32 %v8271_v52, %v11931_v44 }
 0x655   : > { %v5322_v62 = vpop.xlane.xlu0 %5321  ;;  %v5985_v54 = vmul.f32 %v12140_v32, %v5917_v30 }
 0x656   : > { %v12337_v51 = vsub.f32 %v11989_v8, %v5389_v56  ;;  %v5388_v42 = vmul.f32 0.015625, %v5322_v62  ;;  %v5701_v46 = vsel %vm1505_vm1, %v5515_v48, 0.0  ;;  %v5514_v2 = vmul.f32 %v12330_v28, %v12330_v28 }
 0x657   : > { %5702 = vadd.xlane.f32.xlu1 %v5701_v46  ;;  %v5577_v17 = vpop.xlane.xlu1 %5576  ;;  %v5984_v37 = vmul.f32 %v12140_v32, %v5916_v38  ;;  %v6053_v1 = vadd.f32 %v12152_v50, %v5985_v54 }
 0x658   : > { %v12345_v44 = vsub.f32 %v11995_v49, %v5388_v42  ;;  %v5729_v55 = vmul.f32 0.015625, %v5577_v17  ;;  %v5698_v39 = vsel %vm1505_vm1, %v5514_v2, 0.0  ;;  %v5517_v8 = vmul.f32 %v12337_v51, %v12337_v51 }
 0x659   : > { %5699 = vadd.xlane.f32.xlu0 %v5698_v39  ;;  %v5574_v29 = vpop.xlane.xlu0 %5573  ;;  %v6052_v10 = vadd.f32 %v12152_v50, %v5984_v37  ;;  %vm6117_vm12 = vcmp.ge.f32.partialorder %v6053_v1, 0.0  ;;  %v6181_v4 = vmul.f32 0.01, %v6053_v1 }
 0x65a   : > { %v5793_v23 = vadd.f32 1e-05, %v5729_v55  ;;  %v5728_v47 = vmul.f32 0.015625, %v5574_v29  ;;  %v5707_v25 = vsel %vm1505_vm1, %v5517_v8, 0.0  ;;  %v5516_v49 = vmul.f32 %v12345_v44, %v12345_v44 }
 0x65b   : > { %5708 = vadd.xlane.f32.xlu1 %v5707_v25  ;;  %v5583_v59 = vpop.xlane.xlu1 %5582  ;;  %vm6116_vm13 = vcmp.ge.f32.partialorder %v6052_v10, 0.0  ;;  %v6180_v11 = vmul.f32 0.01, %v6052_v10  ;;  %v6245_v48 = vsel %vm6117_vm12, %v6053_v1, %v6181_v4 }
 0x65c   : > { %8276 = vrsqrt.f32 %v5793_v23  ;;  %v5792_v12 = vadd.f32 1e-05, %v5728_v47  ;;  %v5731_v35 = vmul.f32 0.015625, %v5583_v59  ;;  %v5704_v30 = vsel %vm1505_vm1, %v5516_v49, 0.0 }
 0x65d   : > { %v8273_v52 = vpop.eup %8272  ;;  %v6244_v7 = vsel %vm6116_vm13, %v6052_v10, %v6180_v11  ;;  %5705 = vadd.xlane.f32.xlu0 %v5704_v30  ;;  %v5580_v56 = vpop.xlane.xlu0 %5579 }
 0x65e   : > { %8278 = vrsqrt.f32 %v5792_v12  ;;  %v5795_v38 = vadd.f32 1e-05, %v5731_v35  ;;  %7888 = vmatprep.mubr.msk.f32.mxu0 %vm1505_vm1, %v6244_v7  ;;  %v5730_v62 = vmul.f32 0.015625, %v5580_v56  ;;  %v5919_v54 = vmul.f32 %v8273_v52, %v11959_v58 }
 0x65f   : > { %v8275_v42 = vpop.eup %8274  ;;  %7889 = vmatmul.mubr.msk.f32.gmra.mxu0 %vm1505_vm1, %v6245_v48  ;;  %v5589_v46 = vpop.xlane.xlu1 %5588 }
 0x660   : > { %8280 = vrsqrt.f32 %v5795_v38  ;;  %v5794_v2 = vadd.f32 1e-05, %v5730_v62  ;;  %v5733_v17 = vmul.f32 0.015625, %v5589_v46  ;;  %v5918_v37 = vmul.f32 %v8275_v42, %v11967_v3 }
 0x661   : > { %v5586_v55 = vpop.xlane.xlu0 %5585  ;;  %v5987_v39 = vmul.f32 %v12140_v32, %v5919_v54 }
 0x662   : > { %8282 = vrsqrt.f32 %v5794_v2  ;;  %v5797_v1 = vadd.f32 1e-05, %v5733_v17  ;;  %v5732_v8 = vmul.f32 0.015625, %v5586_v55  ;;  %v5986_v29 = vmul.f32 %v12140_v32, %v5918_v37 }
 0x663   : > { %v5595_v10 = vpop.xlane.xlu1 %5594  ;;  %v6055_v58 = vadd.f32 %v12152_v50, %v5987_v39 }
 0x664   : > { %8284 = vrsqrt.f32 %v5797_v1  ;;  %v5796_v4 = vadd.f32 1e-05, %v5732_v8  ;;  %v5735_v23 = vmul.f32 0.015625, %v5595_v10  ;;  %v6054_v47 = vadd.f32 %v12152_v50, %v5986_v29 }
 0x665   : > { %v5592_v25 = vpop.xlane.xlu0 %5591  ;;  %v6183_v49 = vmul.f32 0.01, %v6055_v58  ;;  %vm6119_vm15 = vcmp.ge.f32.partialorder %v6055_v58, 0.0 }
 0x666   : > { %8286 = vrsqrt.f32 %v5796_v4  ;;  %v5799_v3 = vadd.f32 1e-05, %v5735_v23  ;;  %v5734_v59 = vmul.f32 0.015625, %v5592_v25  ;;  %vm6118_vm14 = vcmp.ge.f32.partialorder %v6054_v47, 0.0 }
 0x667   : > { %v6182_v11 = vmul.f32 0.01, %v6054_v47  ;;  %v6247_v48 = vsel %vm6119_vm15, %v6055_v58, %v6183_v49 }
 0x668   : > { %8288 = vrsqrt.f32 %v5799_v3  ;;  %v5798_v12 = vadd.f32 1e-05, %v5734_v59  ;;  %v5601_v35 = vpop.xlane.xlu1 %5600 }
 0x669   : > { %v8277_v30 = vpop.eup %8276  ;;  %v5737_v52 = vmul.f32 0.015625, %v5601_v35  ;;  %v6246_v7 = vsel %vm6118_vm14, %v6054_v47, %v6182_v11 }
 0x66a   : > { %8290 = vrsqrt.f32 %v5798_v12  ;;  %7891 = vmatprep.mubr.msk.f32.mxu0 %vm1505_vm1, %v6246_v7  ;;  %v5598_v56 = vpop.xlane.xlu0 %5597  ;;  %v5921_v38 = vmul.f32 %v8277_v30, %v12000_v26 }
 0x66b   : > { %v8279_v62 = vpop.eup %8278  ;;  %v5801_v54 = vadd.f32 1e-05, %v5737_v52  ;;  %v5736_v42 = vmul.f32 0.015625, %v5598_v56  ;;  %7892 = vmatmul.mubr.msk.f32.gmra.mxu0 %vm1505_vm1, %v6247_v48 }
 0x66c   : > { %v5607_v46 = vpop.xlane.xlu1 %5606  ;;  %v5920_v2 = vmul.f32 %v8279_v62, %v12005_v57  ;;  %v5989_v17 = vmul.f32 %v12140_v32, %v5921_v38 }
 0x66d   : > { %v8281_v37 = vpop.eup %8280  ;;  %8292 = vrsqrt.f32 %v5801_v54  ;;  %v5800_v55 = vadd.f32 1e-05, %v5736_v42  ;;  %v5739_v39 = vmul.f32 0.015625, %v5607_v46 }
 0x66e   : > { %v5604_v1 = vpop.xlane.xlu0 %5603  ;;  %v5988_v8 = vmul.f32 %v12140_v32, %v5920_v2  ;;  %v6057_v29 = vadd.f32 %v12152_v50, %v5989_v17  ;;  %v5923_v26 = vmul.f32 %v8281_v37, %v12010_v63 }
 0x66f   : > { %v8283_v10 = vpop.eup %8282  ;;  %8294 = vrsqrt.f32 %v5800_v55  ;;  %v5803_v58 = vadd.f32 1e-05, %v5739_v39  ;;  %v5738_v4 = vmul.f32 0.015625, %v5604_v1 }
 0x670   : > { %v5613_v23 = vpop.xlane.xlu1 %5612  ;;  %v6056_v57 = vadd.f32 %v12152_v50, %v5988_v8  ;;  %vm6121_vm2 = vcmp.ge.f32.partialorder %v6057_v29, 0.0  ;;  %v6185_v47 = vmul.f32 0.01, %v6057_v29  ;;  %v5922_v25 = vmul.f32 %v8283_v10, %v12016_v40 }
 0x671   : > { %v8285_v49 = vpop.eup %8284  ;;  %8296 = vrsqrt.f32 %v5803_v58  ;;  %v5802_v3 = vadd.f32 1e-05, %v5738_v4  ;;  %v5741_v59 = vmul.f32 0.015625, %v5613_v23  ;;  %v5991_v11 = vmul.f32 %v12140_v32, %v5923_v26  ;;  %v13383_v58 = vld [vmem:[#allocation92_spill] sm:$0xff] }
 0x672   : > { %v5610_v12 = vpop.xlane.xlu0 %5609  ;;  %vm6120_vm3 = vcmp.ge.f32.partialorder %v6056_v57, 0.0  ;;  %v6184_v63 = vmul.f32 0.01, %v6056_v57  ;;  %v6249_v35 = vsel %vm6121_vm2, %v6057_v29, %v6185_v47  ;;  %v5990_v30 = vmul.f32 %v12140_v32, %v5922_v25 }
 0x673   : > { %v8287_v52 = vpop.eup %8286  ;;  %8298 = vrsqrt.f32 %v5802_v3  ;;  %v5805_v7 = vadd.f32 1e-05, %v5741_v59  ;;  %v5740_v56 = vmul.f32 0.015625, %v5610_v12  ;;  %v6059_v48 = vadd.f32 %v12152_v50, %v5991_v11 }
 0x674   : > { %v6248_v38 = vsel %vm6120_vm3, %v6056_v57, %v6184_v63  ;;  %v6058_v40 = vadd.f32 %v12152_v50, %v5990_v30  ;;  %v5924_v62 = vmul.f32 %v8287_v52, %v12028_v27  ;;  %v5925_v54 = vmul.f32 %v8285_v49, %v12022_v43 }
 0x675   : > { %v8289_v42 = vpop.eup %8288  ;;  %8300 = vrsqrt.f32 %v5805_v7  ;;  %v5804_v46 = vadd.f32 1e-05, %v5740_v56  ;;  %7894 = vmatprep.mubr.msk.f32.mxu0 %vm1505_vm1, %v6248_v38  ;;  %vm6123_vm4 = vcmp.ge.f32.partialorder %v6059_v48, 0.0  ;;  %v6187_v2 = vmul.f32 0.01, %v6059_v48 }
 0x676   : > { %7895 = vmatmul.mubr.msk.f32.gmra.mxu0 %vm1505_vm1, %v6249_v35  ;;  %v5619_v17 = vpop.xlane.xlu1 %5618  ;;  %vm6122_vm5 = vcmp.ge.f32.partialorder %v6058_v40, 0.0  ;;  %v6186_v37 = vmul.f32 0.01, %v6058_v40  ;;  %v5992_v55 = vmul.f32 %v12140_v32, %v5924_v62  ;;  %v5993_v39 = vmul.f32 %v12140_v32, %v5925_v54 }
 0x677   : > { %v8291_v1 = vpop.eup %8290  ;;  %8302 = vrsqrt.f32 %v5804_v46  ;;  %v5743_v27 = vmul.f32 0.015625, %v5619_v17  ;;  %v5927_v43 = vmul.f32 %v8289_v42, %v12034_v31  ;;  %v6251_v47 = vsel %vm6123_vm4, %v6059_v48, %v6187_v2 }
 0x678   : > { %v6250_v8 = vsel %vm6122_vm5, %v6058_v40, %v6186_v37  ;;  %v5616_v29 = vpop.xlane.xlu0 %5615  ;;  %v6060_v26 = vadd.f32 %v12152_v50, %v5992_v55  ;;  %v6061_v10 = vadd.f32 %v12152_v50, %v5993_v39  ;;  %v5926_v4 = vmul.f32 %v8291_v1, %v13383_v58  ;;  %v13384_v58 = vld [vmem:[#allocation99_spill] sm:$0xff] }
 0x679   : > { %v5807_v23 = vadd.f32 1e-05, %v5743_v27  ;;  %7897 = vmatprep.mubr.msk.f32.mxu0 %vm1505_vm1, %v6250_v8  ;;  %v5742_v57 = vmul.f32 0.015625, %v5616_v29  ;;  %v5995_v25 = vmul.f32 %v12140_v32, %v5927_v43 }
 0x67a   : > { %v8293_v49 = vpop.eup %8292  ;;  %7898 = vmatmul.mubr.msk.f32.gmra.mxu0 %vm1505_vm1, %v6251_v47  ;;  %vm6124_vm6 = vcmp.ge.f32.partialorder %v6060_v26, 0.0  ;;  %v6188_v31 = vmul.f32 0.01, %v6060_v26  ;;  %vm6125_vm7 = vcmp.ge.f32.partialorder %v6061_v10, 0.0  ;;  %v6189_v3 = vmul.f32 0.01, %v6061_v10 }
 0x67b   : > { %8304 = vrsqrt.f32 %v5807_v23  ;;  %v5806_v59 = vadd.f32 1e-05, %v5742_v57  ;;  %v5994_v11 = vmul.f32 %v12140_v32, %v5926_v4  ;;  %v6063_v12 = vadd.f32 %v12152_v50, %v5995_v25  ;;  %v13385_v25 = vld [vmem:[#allocation97_spill] sm:$0xff] }
 0x67c   : > { %v8295_v63 = vpop.eup %8294  ;;  %v6252_v35 = vsel %vm6124_vm6, %v6060_v26, %v6188_v31  ;;  %v6253_v30 = vsel %vm6125_vm7, %v6061_v10, %v6189_v3  ;;  %v5929_v52 = vmul.f32 %v8293_v49, %v12049_v15 }
 0x67d   : > { %8306 = vrsqrt.f32 %v5806_v59  ;;  %7900 = vmatprep.mubr.msk.f32.mxu0 %vm1505_vm1, %v6252_v35  ;;  %v6062_v7 = vadd.f32 %v12152_v50, %v5994_v11  ;;  %vm6127_vm8 = vcmp.ge.f32.partialorder %v6063_v12, 0.0  ;;  %v6191_v56 = vmul.f32 0.01, %v6063_v12 }
 0x67e   : > { %v8297_v48 = vpop.eup %8296  ;;  %7901 = vmatmul.mubr.msk.f32.gmra.mxu0 %vm1505_vm1, %v6253_v30  ;;  %v5625_v38 = vpop.xlane.xlu1 %5624  ;;  %v5928_v40 = vmul.f32 %v8295_v63, %v12053_v53  ;;  %v5997_v62 = vmul.f32 %v12140_v32, %v5929_v52 }
 0x67f   : > { %v5745_v54 = vmul.f32 0.015625, %v5625_v38  ;;  %vm6126_vm9 = vcmp.ge.f32.partialorder %v6062_v7, 0.0  ;;  %v6190_v42 = vmul.f32 0.01, %v6062_v7  ;;  %v6255_v2 = vsel %vm6127_vm8, %v6063_v12, %v6191_v56 }
 0x680   : > { %v8299_v46 = vpop.eup %8298  ;;  %v5622_v15 = vpop.xlane.xlu0 %5621  ;;  %v5996_v17 = vmul.f32 %v12140_v32, %v5928_v40  ;;  %v6065_v37 = vadd.f32 %v12152_v50, %v5997_v62  ;;  %v5931_v55 = vmul.f32 %v8297_v48, %v12058_v22 }
 0x681   : > { %v5809_v39 = vadd.f32 1e-05, %v5745_v54  ;;  %v6254_v1 = vsel %vm6126_vm9, %v6062_v7, %v6190_v42  ;;  %v5744_v27 = vmul.f32 0.015625, %v5622_v15  ;;  %v5930_v43 = vmul.f32 %v8299_v46, %v12064_v45  ;;  %v13386_v15 = vld [vmem:[#allocation7_spill] sm:$0xff] }
 0x682   : > { %v8301_v53 = vpop.eup %8300  ;;  %7903 = vmatprep.mubr.msk.f32.mxu0 %vm1505_vm1, %v6254_v1  ;;  %v6064_v8 = vadd.f32 %v12152_v50, %v5996_v17  ;;  %vm6129_vm0 = vcmp.ge.f32.partialorder %v6065_v37, 0.0  ;;  %v6193_v29 = vmul.f32 0.01, %v6065_v37  ;;  %v5999_v26 = vmul.f32 %v12140_v32, %v5931_v55  ;;  %v13387_v55 = vld [vmem:[#allocation87_spill] sm:$0xff] }
 0x683   : > { %8308 = vrsqrt.f32 %v5809_v39  ;;  %v5808_v10 = vadd.f32 1e-05, %v5744_v27  ;;  %7904 = vmatmul.mubr.msk.f32.gmra.mxu0 %vm1505_vm1, %v6255_v2  ;;  %v5998_v22 = vmul.f32 %v12140_v32, %v5930_v43  ;;  %v5933_v4 = vmul.f32 %v8301_v53, %v13384_v58 }
 0x684   : > { %v8303_v23 = vpop.eup %8302  ;;  %vm6128_vm10 = vcmp.ge.f32.partialorder %v6064_v8, 0.0  ;;  %v6192_v45 = vmul.f32 0.01, %v6064_v8  ;;  %v6067_v57 = vadd.f32 %v12152_v50, %v5999_v26  ;;  %v6257_v59 = vsel %vm6129_vm0, %v6065_v37, %v6193_v29 }
 0x685   : > { %8310 = vrsqrt.f32 %v5808_v10  ;;  %v6066_v47 = vadd.f32 %v12152_v50, %v5998_v22  ;;  %v5932_v49 = vmul.f32 %v8303_v23, %v13385_v25  ;;  %v6001_v31 = vmul.f32 %v12140_v32, %v5933_v4  ;;  %v13388_v23 = vld [vmem:[#allocation40_spill] sm:$0xff] }
 0x686   : > { %v6256_v3 = vsel %vm6128_vm10, %v6064_v8, %v6192_v45  ;;  %v5631_v11 = vpop.xlane.xlu1 %5630  ;;  %vm6131_vm11 = vcmp.ge.f32.partialorder %v6067_v57, 0.0  ;;  %v6195_v12 = vmul.f32 0.01, %v6067_v57 }
 0x687   : > { %7906 = vmatprep.mubr.msk.f32.mxu0 %vm1505_vm1, %v6256_v3  ;;  %v5747_v63 = vmul.f32 0.015625, %v5631_v11  ;;  %vm6130_vm12 = vcmp.ge.f32.partialorder %v6066_v47, 0.0  ;;  %v6194_v35 = vmul.f32 0.01, %v6066_v47  ;;  %v6000_v30 = vmul.f32 %v12140_v32, %v5932_v49 }
 0x688   : > { %v8305_v52 = vpop.eup %8304  ;;  %7907 = vmatmul.mubr.msk.f32.gmra.mxu0 %vm1505_vm1, %v6257_v59  ;;  %v5628_v7 = vpop.xlane.xlu0 %5627  ;;  %v6069_v56 = vadd.f32 %v12152_v50, %v6001_v31  ;;  %v6259_v42 = vsel %vm6131_vm11, %v6067_v57, %v6195_v12  ;;  %v13389_v31 = vld [vmem:[#allocation22_spill] sm:$0xff] }
 0x689   : > { %v5811_v48 = vadd.f32 1e-05, %v5747_v63  ;;  %v6258_v38 = vsel %vm6130_vm12, %v6066_v47, %v6194_v35  ;;  %v5746_v40 = vmul.f32 0.015625, %v5628_v7  ;;  %v6068_v62 = vadd.f32 %v12152_v50, %v6000_v30 }
 0x68a   : > { %v8307_v54 = vpop.eup %8306  ;;  %7909 = vmatprep.mubr.msk.f32.mxu0 %vm1505_vm1, %v6258_v38  ;;  %v6197_v46 = vmul.f32 0.01, %v6069_v56  ;;  %v5935_v2 = vmul.f32 %v8305_v52, %v13386_v15  ;;  %vm6133_vm14 = vcmp.ge.f32.partialorder %v6069_v56, 0.0 }
 0x68b   : > { %8312 = vrsqrt.f32 %v5811_v48  ;;  %v5810_v17 = vadd.f32 1e-05, %v5746_v40  ;;  %vm6132_vm13 = vcmp.ge.f32.partialorder %v6068_v62, 0.0  ;;  %v6196_v37 = vmul.f32 0.01, %v6068_v62 }
 0x68c   : > { %7910 = vmatmul.mubr.msk.f32.gmra.mxu0 %vm1505_vm1, %v6259_v42  ;;  %v5934_v39 = vmul.f32 %v8307_v54, %v13387_v55  ;;  %v6003_v1 = vmul.f32 %v12140_v32, %v5935_v2  ;;  %v6261_v8 = vsel %vm6133_vm14, %v6069_v56, %v6197_v46  ;;  %v13390_v42 = vld [vmem:[#allocation44_spill] sm:$0xff] }
 0x68d   : > { %8314 = vrsqrt.f32 %v5810_v17  ;;  %v6260_v27 = vsel %vm6132_vm13, %v6068_v62, %v6196_v37  ;;  %v13391_v37 = vld [vmem:[#allocation42_spill] sm:$0xff] }
 0x68e   : > { %7912 = vmatprep.mubr.msk.f32.mxu0 %vm1505_vm1, %v6260_v27  ;;  %v6002_v43 = vmul.f32 %v12140_v32, %v5934_v39  ;;  %v6071_v53 = vadd.f32 %v12152_v50, %v6003_v1 }
 0x68f   : > { %v5637_v29 = vpop.xlane.xlu1 %5636 }
 0x690   : > { %v8309_v26 = vpop.eup %8308  ;;  %7913 = vmatmul.mubr.msk.f32.gmra.mxu0 %vm1505_vm1, %v6261_v8  ;;  %v5749_v10 = vmul.f32 0.015625, %v5637_v29  ;;  %v6070_v22 = vadd.f32 %v12152_v50, %v6002_v43  ;;  %vm6135_vm15 = vcmp.ge.f32.partialorder %v6071_v53, 0.0  ;;  %v6199_v4 = vmul.f32 0.01, %v6071_v53 }
 0x691   : > { %v5634_v58 = vpop.xlane.xlu0 %5633  ;;  %v5937_v45 = vmul.f32 %v8309_v26, %v13388_v23  ;;  %v13392_v23 = vld [vmem:[#allocation49_spill] sm:$0xff] }
 0x692   : > { %v8311_v57 = vpop.eup %8310  ;;  %v5813_v47 = vadd.f32 1e-05, %v5749_v10  ;;  %v5748_v25 = vmul.f32 0.015625, %v5634_v58  ;;  %vm6134_vm2 = vcmp.ge.f32.partialorder %v6070_v22, 0.0  ;;  %v6198_v49 = vmul.f32 0.01, %v6070_v22 }
 0x693   : > { %v5936_v3 = vmul.f32 %v8311_v57, %v13389_v31  ;;  %v6005_v59 = vmul.f32 %v12140_v32, %v5937_v45  ;;  %v6263_v63 = vsel %vm6135_vm15, %v6071_v53, %v6199_v4 }
 0x694   : > { %8316 = vrsqrt.f32 %v5813_v47  ;;  %v5812_v11 = vadd.f32 1e-05, %v5748_v25  ;;  %v6262_v12 = vsel %vm6134_vm2, %v6070_v22, %v6198_v49 }
 0x695   : > { %7915 = vmatprep.mubr.msk.f32.mxu0 %vm1505_vm1, %v6262_v12  ;;  %v6004_v35 = vmul.f32 %v12140_v32, %v5936_v3  ;;  %v6073_v30 = vadd.f32 %v12152_v50, %v6005_v59  ;;  %v13393_v3 = vld [vmem:[#allocation47_spill] sm:$0xff] }
 0x696   : > { %8318 = vrsqrt.f32 %v5812_v11  ;;  %7916 = vmatmul.mubr.msk.f32.gmra.mxu0 %vm1505_vm1, %v6263_v63 }
 0x697   : > { %v6072_v52 = vadd.f32 %v12152_v50, %v6004_v35  ;;  %v6201_v48 = vmul.f32 0.01, %v6073_v30  ;;  %vm6137_vm4 = vcmp.ge.f32.partialorder %v6073_v30, 0.0 }
 0x698   : > { %v8313_v7 = vpop.eup %8312  ;;  %v5643_v56 = vpop.xlane.xlu1 %5642 }
 0x699   : > { %v5751_v38 = vmul.f32 0.015625, %v5643_v56  ;;  %vm6136_vm3 = vcmp.ge.f32.partialorder %v6072_v52, 0.0  ;;  %v6200_v40 = vmul.f32 0.01, %v6072_v52  ;;  %v5939_v46 = vmul.f32 %v8313_v7, %v13390_v42  ;;  %v13394_v42 = vld [vmem:[#allocation58_spill] sm:$0xff] }
 0x69a   : > { %v8315_v62 = vpop.eup %8314  ;;  %v5640_v54 = vpop.xlane.xlu0 %5639  ;;  %v6265_v39 = vsel %vm6137_vm4, %v6073_v30, %v6201_v48  ;;  %vm6950_vm4 = vcmask 130048  }
 0x69b   : > { %v5815_v15 = vadd.f32 1e-05, %v5751_v38  ;;  %v5750_v2 = vmul.f32 0.015625, %v5640_v54  ;;  %v6264_v17 = vsel %vm6136_vm3, %v6072_v52, %v6200_v40  ;;  %v5938_v55 = vmul.f32 %v8315_v62, %v13391_v37 }
 0x69c   : > { %7918 = vmatprep.mubr.msk.f32.mxu0 %vm1505_vm1, %v6264_v17  ;;  %v6007_v1 = vmul.f32 %v12140_v32, %v5939_v46 }
 0x69d   : > { %8320 = vrsqrt.f32 %v5815_v15  ;;  %v5814_v27 = vadd.f32 1e-05, %v5750_v2  ;;  %7919 = vmatmul.mubr.msk.f32.gmra.mxu0 %vm1505_vm1, %v6265_v39  ;;  %v6006_v43 = vmul.f32 %v12140_v32, %v5938_v55  ;;  %v13395_v55 = vld [vmem:[#allocation51_spill] sm:$0xff] }
 0x69e   : > { %v6075_v53 = vadd.f32 %v12152_v50, %v6007_v1 }
 0x69f   : > { %8322 = vrsqrt.f32 %v5814_v27  ;;  %v6074_v8 = vadd.f32 %v12152_v50, %v6006_v43 }
 0x6a0   : > { %v5649_v29 = vpop.xlane.xlu1 %5648  ;;  %v6203_v26 = vmul.f32 0.01, %v6075_v53  ;;  %vm6139_vm6 = vcmp.ge.f32.partialorder %v6075_v53, 0.0 }
 0x6a1   : > { %v8317_v10 = vpop.eup %8316  ;;  %v5753_v22 = vmul.f32 0.015625, %v5649_v29  ;;  %vm6138_vm5 = vcmp.ge.f32.partialorder %v6074_v8, 0.0  ;;  %v6202_v58 = vmul.f32 0.01, %v6074_v8 }
 0x6a2   : > { %v5646_v4 = vpop.xlane.xlu0 %5645  ;;  %v5941_v45 = vmul.f32 %v8317_v10, %v13392_v23  ;;  %v6267_v31 = vsel %vm6139_vm6, %v6075_v53, %v6203_v26 }
 0x6a3   : > { %v8319_v57 = vpop.eup %8318  ;;  %v5817_v47 = vadd.f32 1e-05, %v5753_v22  ;;  %v5752_v25 = vmul.f32 0.015625, %v5646_v4  ;;  %v6266_v49 = vsel %vm6138_vm5, %v6074_v8, %v6202_v58 }
 0x6a4   : > { %7921 = vmatprep.mubr.msk.f32.mxu0 %vm1505_vm1, %v6266_v49  ;;  %v5940_v59 = vmul.f32 %v8319_v57, %v13393_v3  ;;  %v6009_v11 = vmul.f32 %v12140_v32, %v5941_v45  ;;  %v13396_v57 = vld [vmem:[#allocation62_spill] sm:$0xff] }
 0x6a5   : > { %8324 = vrsqrt.f32 %v5817_v47  ;;  %v5816_v12 = vadd.f32 1e-05, %v5752_v25  ;;  %7922 = vmatmul.mubr.msk.f32.gmra.mxu0 %vm1505_vm1, %v6267_v31 }
 0x6a6   : > { %v6008_v63 = vmul.f32 %v12140_v32, %v5940_v59  ;;  %v6077_v35 = vadd.f32 %v12152_v50, %v6009_v11 }
 0x6a7   : > { %8326 = vrsqrt.f32 %v5816_v12 }
 0x6a8   : > { %v5655_v30 = vpop.xlane.xlu1 %5654  ;;  %v6076_v52 = vadd.f32 %v12152_v50, %v6008_v63  ;;  %v6205_v7 = vmul.f32 0.01, %v6077_v35  ;;  %vm6141_vm7 = vcmp.ge.f32.partialorder %v6077_v35, 0.0 }
 0x6a9   : > { %v5755_v56 = vmul.f32 0.015625, %v5655_v30 }
 0x6aa   : > { %v8321_v48 = vpop.eup %8320  ;;  %v5652_v38 = vpop.xlane.xlu0 %5651  ;;  %vm6140_vm8 = vcmp.ge.f32.partialorder %v6076_v52, 0.0  ;;  %v6204_v40 = vmul.f32 0.01, %v6076_v52  ;;  %v6269_v17 = vsel %vm6141_vm7, %v6077_v35, %v6205_v7 }
 0x6ab   : > { %v5819_v62 = vadd.f32 1e-05, %v5755_v56  ;;  %v5754_v54 = vmul.f32 0.015625, %v5652_v38  ;;  %v5943_v46 = vmul.f32 %v8321_v48, %v13394_v42 }
 0x6ac   : > { %v8323_v15 = vpop.eup %8322  ;;  %v6268_v2 = vsel %vm6140_vm8, %v6076_v52, %v6204_v40 }
 0x6ad   : > { %8328 = vrsqrt.f32 %v5819_v62  ;;  %v5818_v37 = vadd.f32 1e-05, %v5754_v54  ;;  %7924 = vmatprep.mubr.msk.f32.mxu0 %vm1505_vm1, %v6268_v2  ;;  %v5942_v39 = vmul.f32 %v8323_v15, %v13395_v55  ;;  %v6011_v1 = vmul.f32 %v12140_v32, %v5943_v46 }
 0x6ae   : > { %7925 = vmatmul.mubr.msk.f32.gmra.mxu0 %vm1505_vm1, %v6269_v17 }
 0x6af   : > { %8330 = vrsqrt.f32 %v5818_v37  ;;  %v6010_v27 = vmul.f32 %v12140_v32, %v5942_v39  ;;  %v6079_v43 = vadd.f32 %v12152_v50, %v6011_v1 }
 0x6b0   : > { %v5661_v53 = vpop.xlane.xlu1 %5660 }
 0x6b1   : > { %v5757_v8 = vmul.f32 0.015625, %v5661_v53  ;;  %v6078_v29 = vadd.f32 %v12152_v50, %v6010_v27  ;;  %vm6143_vm9 = vcmp.ge.f32.partialorder %v6079_v43, 0.0  ;;  %v6207_v22 = vmul.f32 0.01, %v6079_v43 }
 0x6b2   : > { %v8325_v26 = vpop.eup %8324  ;;  %v5658_v10 = vpop.xlane.xlu0 %5657 }
 0x6b3   : > { %v5821_v58 = vadd.f32 1e-05, %v5757_v8  ;;  %v5756_v4 = vmul.f32 0.015625, %v5658_v10  ;;  %vm6142_vm0 = vcmp.ge.f32.partialorder %v6078_v29, 0.0  ;;  %v6206_v23 = vmul.f32 0.01, %v6078_v29 }
 0x6b4   : > { %v8327_v45 = vpop.eup %8326  ;;  %v5945_v47 = vmul.f32 %v8325_v26, %v13396_v57  ;;  %v6271_v3 = vsel %vm6143_vm9, %v6079_v43, %v6207_v22 }
 0x6b5   : > { %8332 = vrsqrt.f32 %v5821_v58  ;;  %v5820_v25 = vadd.f32 1e-05, %v5756_v4  ;;  %v6270_v49 = vsel %vm6142_vm0, %v6078_v29, %v6206_v23  ;;  %v5944_v31 = vmul.f32 %v8327_v45, %v12167_v36 }
 0x6b6   : > { %7927 = vmatprep.mubr.msk.f32.mxu0 %vm1505_vm1, %v6270_v49  ;;  %v6013_v59 = vmul.f32 %v12140_v32, %v5945_v47 }
 0x6b7   : > { %8334 = vrsqrt.f32 %v5820_v25  ;;  %7928 = vmatmul.mubr.msk.f32.gmra.mxu0 %vm1505_vm1, %v6271_v3  ;;  %v6012_v11 = vmul.f32 %v12140_v32, %v5944_v31 }
 0x6b8   : > { %v6081_v12 = vadd.f32 %v12152_v50, %v6013_v59 }
 0x6b9   : > { %v6080_v63 = vadd.f32 %v12152_v50, %v6012_v11 }
 0x6ba   : > { %v8329_v35 = vpop.eup %8328  ;;  %v6209_v30 = vmul.f32 0.01, %v6081_v12  ;;  %vm6145_vm11 = vcmp.ge.f32.partialorder %v6081_v12, 0.0 }
 0x6bb   : > { %vm6144_vm10 = vcmp.ge.f32.partialorder %v6080_v63, 0.0  ;;  %v6208_v52 = vmul.f32 0.01, %v6080_v63  ;;  %v5947_v36 = vmul.f32 %v8329_v35, %v12182_v16 }
 0x6bc   : > { %v8331_v7 = vpop.eup %8330  ;;  %v5667_v56 = vpop.xlane.xlu1 %5666  ;;  %v6273_v42 = vsel %vm6145_vm11, %v6081_v12, %v6209_v30 }
 0x6bd   : > { %v5759_v48 = vmul.f32 0.015625, %v5667_v56  ;;  %v6272_v38 = vsel %vm6144_vm10, %v6080_v63, %v6208_v52  ;;  %v5946_v40 = vmul.f32 %v8331_v7, %v12186_v0  ;;  %v6015_v62 = vmul.f32 %v12140_v32, %v5947_v36 }
 0x6be   : > { %7930 = vmatprep.mubr.msk.f32.mxu0 %vm1505_vm1, %v6272_v38  ;;  %v5664_v54 = vpop.xlane.xlu0 %5663 }
 0x6bf   : > { %v5823_v46 = vadd.f32 1e-05, %v5759_v48  ;;  %v5758_v15 = vmul.f32 0.015625, %v5664_v54  ;;  %7931 = vmatmul.mubr.msk.f32.gmra.mxu0 %vm1505_vm1, %v6273_v42  ;;  %v6014_v2 = vmul.f32 %v12140_v32, %v5946_v40  ;;  %v6083_v16 = vadd.f32 %v12152_v50, %v6015_v62 }
 0x6c0   : > { %v5673_v17 = vpop.xlane.xlu1 %5672 }
 0x6c1   : > { %8336 = vrsqrt.f32 %v5823_v46  ;;  %v5822_v37 = vadd.f32 1e-05, %v5758_v15  ;;  %v5761_v55 = vmul.f32 0.015625, %v5673_v17  ;;  %v6082_v0 = vadd.f32 %v12152_v50, %v6014_v2 }
 0x6c2   : > { %v8333_v39 = vpop.eup %8332  ;;  %v5670_v1 = vpop.xlane.xlu0 %5669  ;;  %v6211_v27 = vmul.f32 0.01, %v6083_v16  ;;  %vm6147_vm13 = vcmp.ge.f32.partialorder %v6083_v16, 0.0 }
 0x6c3   : > { %8338 = vrsqrt.f32 %v5822_v37  ;;  %v5825_v43 = vadd.f32 1e-05, %v5761_v55  ;;  %v5760_v53 = vmul.f32 0.015625, %v5670_v1  ;;  %vm6146_vm12 = vcmp.ge.f32.partialorder %v6082_v0, 0.0 }
 0x6c4   : > { %v8335_v8 = vpop.eup %8334  ;;  %v6210_v29 = vmul.f32 0.01, %v6082_v0  ;;  %v5949_v26 = vmul.f32 %v8333_v39, %v12199_v14  ;;  %v6275_v23 = vsel %vm6147_vm13, %v6083_v16, %v6211_v27 }
 0x6c5   : > { %8340 = vrsqrt.f32 %v5825_v43  ;;  %v5824_v10 = vadd.f32 1e-05, %v5760_v53  ;;  %v5948_v22 = vmul.f32 %v8335_v8, %v12206_v34 }
 0x6c6   : > { %v6274_v58 = vsel %vm6146_vm12, %v6082_v0, %v6210_v29  ;;  %v6017_v4 = vmul.f32 %v12140_v32, %v5949_v26 }
 0x6c7   : > { %8342 = vrsqrt.f32 %v5824_v10  ;;  %7933 = vmatprep.mubr.msk.f32.mxu0 %vm1505_vm1, %v6274_v58  ;;  %v6016_v45 = vmul.f32 %v12140_v32, %v5948_v22 }
 0x6c8   : > { %7934 = vmatmul.mubr.msk.f32.gmra.mxu0 %vm1505_vm1, %v6275_v23  ;;  %v5679_v57 = vpop.xlane.xlu1 %5678  ;;  %v6085_v47 = vadd.f32 %v12152_v50, %v6017_v4  ;;  %v13397_v23 = vld [vmem:[#allocation15_spill] sm:$0xff] }
 0x6c9   : > { %v5763_v25 = vmul.f32 0.015625, %v5679_v57  ;;  %v6084_v14 = vadd.f32 %v12152_v50, %v6016_v45 }
 0x6ca   : > { %v5676_v49 = vpop.xlane.xlu0 %5675  ;;  %vm6149_vm14 = vcmp.ge.f32.partialorder %v6085_v47, 0.0  ;;  %v6213_v34 = vmul.f32 0.01, %v6085_v47 }
 0x6cb   : > { %v5827_v31 = vadd.f32 1e-05, %v5763_v25  ;;  %v5762_v3 = vmul.f32 0.015625, %v5676_v49  ;;  %vm6148_vm15 = vcmp.ge.f32.partialorder %v6084_v14, 0.0  ;;  %v6212_v59 = vmul.f32 0.01, %v6084_v14 }
 0x6cc   : > { %v5685_v11 = vpop.xlane.xlu1 %5684  ;;  %v6277_v36 = vsel %vm6149_vm14, %v6085_v47, %v6213_v34 }
 0x6cd   : > { %8344 = vrsqrt.f32 %v5827_v31  ;;  %v5826_v12 = vadd.f32 1e-05, %v5762_v3  ;;  %v5765_v63 = vmul.f32 0.015625, %v5685_v11  ;;  %v6276_v35 = vsel %vm6148_vm15, %v6084_v14, %v6212_v59  ;;  %v13398_v11 = vld [vmem:[#allocation73_spill] sm:$0xff] }
 0x6ce   : > { %v8337_v30 = vpop.eup %8336  ;;  %7936 = vmatprep.mubr.msk.f32.mxu0 %vm1505_vm1, %v6276_v35  ;;  %v5682_v52 = vpop.xlane.xlu0 %5681 }
 0x6cf   : > { %8346 = vrsqrt.f32 %v5826_v12  ;;  %v5829_v7 = vadd.f32 1e-05, %v5765_v63  ;;  %v5764_v56 = vmul.f32 0.015625, %v5682_v52  ;;  %7937 = vmatmul.mubr.msk.f32.gmra.mxu0 %vm1505_vm1, %v6277_v36  ;;  %v5951_v48 = vmul.f32 %v8337_v30, %v12224_v20 }
 0x6d0   : > { %v8339_v38 = vpop.eup %8338 }
 0x6d1   : > { %8348 = vrsqrt.f32 %v5829_v7  ;;  %v5828_v40 = vadd.f32 1e-05, %v5764_v56  ;;  %v5950_v62 = vmul.f32 %v8339_v38, %v12228_v13  ;;  %v6019_v54 = vmul.f32 %v12140_v32, %v5951_v48 }
 0x6d2   : > { %v8341_v42 = vpop.eup %8340 }
 0x6d3   : > { %8350 = vrsqrt.f32 %v5828_v40  ;;  %v6018_v46 = vmul.f32 %v12140_v32, %v5950_v62  ;;  %v6087_v15 = vadd.f32 %v12152_v50, %v6019_v54  ;;  %v5953_v2 = vmul.f32 %v8341_v42, %v12236_v6 }
 0x6d4   : > { %v8343_v16 = vpop.eup %8342  ;;  %v5691_v17 = vpop.xlane.xlu1 %5690 }
 0x6d5   : > { %v5767_v37 = vmul.f32 0.015625, %v5691_v17  ;;  %v6086_v20 = vadd.f32 %v12152_v50, %v6018_v46  ;;  %vm6151_vm2 = vcmp.ge.f32.partialorder %v6087_v15, 0.0  ;;  %v6215_v55 = vmul.f32 0.01, %v6087_v15 }
 0x6d6   : > { %v5688_v0 = vpop.xlane.xlu0 %5687  ;;  %v5952_v13 = vmul.f32 %v8343_v16, %v12246_v21  ;;  %v6021_v39 = vmul.f32 %v12140_v32, %v5953_v2  ;;  %v12503_v21 = vld [vmem:[%s12831_s5] ss:$0 sm:$0xff] }
 0x6d7   : > { %v5831_v1 = vadd.f32 1e-05, %v5767_v37  ;;  %v5766_v27 = vmul.f32 0.015625, %v5688_v0  ;;  %vm6150_vm3 = vcmp.ge.f32.partialorder %v6086_v20, 0.0  ;;  %v6214_v43 = vmul.f32 0.01, %v6086_v20 }
 0x6d8   : > { %v5697_v53 = vpop.xlane.xlu1 %5696  ;;  %v6279_v8 = vsel %vm6151_vm2, %v6087_v15, %v6215_v55  ;;  %v6020_v6 = vmul.f32 %v12140_v32, %v5952_v13  ;;  %v6089_v29 = vadd.f32 %v12152_v50, %v6021_v39  ;;  %v13399_v55 = vld [vmem:[#allocation75_spill] sm:$0xff] }
 0x6d9   : > { %8352 = vrsqrt.f32 %v5831_v1  ;;  %v5830_v26 = vadd.f32 1e-05, %v5766_v27  ;;  %v5769_v10 = vmul.f32 0.015625, %v5697_v53  ;;  %v7869_v22 = vpop.f32.mrf.mxu0  ;;  %v6278_v58 = vsel %vm6150_vm3, %v6086_v20, %v6214_v43 }
 0x6da   : > { %v8345_v4 = vpop.eup %8344  ;;  %v6566_v45 = vadd.f32 %v7869_v22, %v13397_v23  ;;  %7939 = vmatprep.mubr.msk.f32.mxu0 %vm1505_vm1, %v6278_v58  ;;  %v5694_v57 = vpop.xlane.xlu0 %5693  ;;  %v6088_v47 = vadd.f32 %v12152_v50, %v6020_v6  ;;  %vm6153_vm5 = vcmp.ge.f32.partialorder %v6089_v29, 0.0  ;;  %v6217_v25 = vmul.f32 0.01, %v6089_v29 }
 0x6db   : > { %8354 = vrsqrt.f32 %v5830_v26  ;;  %v5833_v14 = vadd.f32 1e-05, %v5769_v10  ;;  %v5768_v49 = vmul.f32 0.015625, %v5694_v57  ;;  %7940 = vmatmul.mubr.msk.f32.gmra.mxu0 %vm1505_vm1, %v6279_v8  ;;  %v6560_v34 = vpop.f32.mrf.mxu0  ;;  %v5955_v31 = vmul.f32 %v8345_v4, %v12258_v33  ;;  %v13400_v26 = vld [vmem:[#allocation76_spill] sm:$0xff] }
 0x6dc   : > { %v8347_v3 = vpop.eup %8346  ;;  %v6887_v59 = vadd.f32 %v12503_v21, %v6566_v45  ;;  %v6561_v12 = vadd.f32 %v6560_v34, %v13398_v11  ;;  %vm6152_vm6 = vcmp.ge.f32.partialorder %v6088_v47, 0.0  ;;  %v6216_v63 = vmul.f32 0.01, %v6088_v47 }
 0x6dd   : > { %8356 = vrsqrt.f32 %v5833_v14  ;;  %v5832_v35 = vadd.f32 1e-05, %v5768_v49  ;;  %v5954_v30 = vmul.f32 %v8347_v3, %v12264_v19  ;;  %v6023_v33 = vmul.f32 %v12140_v32, %v5955_v31 }
 0x6de   : > { %v8349_v52 = vpop.eup %8348  ;;  %6952 = vst.msk [vmem:[%s12513_s19 + $0x8] sm:$0xff] %vm6950_vm4, %v6887_v59  ;;  %v6886_v36 = vadd.f32 %v12503_v21, %v6561_v12  ;;  %v6280_v7 = vsel %vm6152_vm6, %v6088_v47, %v6216_v63  ;;  %v6281_v56 = vsel %vm6153_vm5, %v6089_v29, %v6217_v25 }
 0x6df   : > { %8358 = vrsqrt.f32 %v5832_v35  ;;  %7942 = vmatprep.mubr.msk.f32.mxu0 %vm1505_vm1, %v6280_v7  ;;  %v6022_v48 = vmul.f32 %v12140_v32, %v5954_v30  ;;  %v5957_v38 = vmul.f32 %v8349_v52, %v12271_v5  ;;  %v6091_v62 = vadd.f32 %v12152_v50, %v6023_v33  ;;  %v13401_v30 = vld [vmem:[#allocation24_spill] sm:$0xff] }
 0x6e0   : > { %v8351_v40 = vpop.eup %8350  ;;  %6951 = vst.msk [vmem:[%s12513_s19] sm:$0xff] %vm6950_vm4, %v6886_v36  ;;  %7943 = vmatmul.mubr.msk.f32.gmra.mxu0 %vm1505_vm1, %v6281_v56  ;;  %v5703_v19 = vpop.xlane.xlu1 %5702 }
 0x6e1   : > { %v5771_v54 = vmul.f32 0.015625, %v5703_v19  ;;  %v6090_v42 = vadd.f32 %v12152_v50, %v6022_v48  ;;  %v5956_v46 = vmul.f32 %v8351_v40, %v12279_v60  ;;  %v6025_v15 = vmul.f32 %v12140_v32, %v5957_v38  ;;  %v13402_v38 = vld [vmem:[#allocation78_spill] sm:$0xff] }
 0x6e2   : > { %v5700_v2 = vpop.xlane.xlu0 %5699  ;;  %vm6155_vm7 = vcmp.ge.f32.partialorder %v6091_v62, 0.0  ;;  %v6219_v16 = vmul.f32 0.01, %v6091_v62 }
 0x6e3   : > { %v5835_v17 = vadd.f32 1e-05, %v5771_v54  ;;  %v7872_v5 = vpop.f32.mrf.mxu0  ;;  %v5770_v37 = vmul.f32 0.015625, %v5700_v2  ;;  %vm6154_vm8 = vcmp.ge.f32.partialorder %v6090_v42, 0.0  ;;  %v6218_v20 = vmul.f32 0.01, %v6090_v42 }
 0x6e4   : > { %v6576_v0 = vadd.f32 %v7872_v5, %v13399_v55  ;;  %v5709_v13 = vpop.xlane.xlu1 %5708  ;;  %v6283_v39 = vsel %vm6155_vm7, %v6091_v62, %v6219_v16  ;;  %v6024_v1 = vmul.f32 %v12140_v32, %v5956_v46  ;;  %v6093_v27 = vadd.f32 %v12152_v50, %v6025_v15  ;;  %v13403_v55 = vld [vmem:[#allocation27_spill] sm:$0xff] }
 0x6e5   : > { %8360 = vrsqrt.f32 %v5835_v17  ;;  %v5834_v60 = vadd.f32 1e-05, %v5770_v37  ;;  %v5773_v43 = vmul.f32 0.015625, %v5709_v13  ;;  %v6570_v53 = vpop.f32.mrf.mxu0  ;;  %v6282_v8 = vsel %vm6154_vm8, %v6090_v42, %v6218_v20 }
 0x6e6   : > { %v8353_v6 = vpop.eup %8352  ;;  %v6889_v29 = vadd.f32 %v12503_v21, %v6576_v0  ;;  %v6571_v10 = vadd.f32 %v6570_v53, %v13400_v26  ;;  %7945 = vmatprep.mubr.msk.f32.mxu0 %vm1505_vm1, %v6282_v8  ;;  %v5706_v22 = vpop.xlane.xlu0 %5705  ;;  %v6092_v58 = vadd.f32 %v12152_v50, %v6024_v1  ;;  %vm6157_vm9 = vcmp.ge.f32.partialorder %v6093_v27, 0.0  ;;  %v13404_v53 = vld [vmem:[#allocation30_spill] sm:$0xff] }
 0x6e7   : > { %8362 = vrsqrt.f32 %v5834_v60  ;;  %v5837_v4 = vadd.f32 1e-05, %v5773_v43  ;;  %v5772_v23 = vmul.f32 0.015625, %v5706_v22  ;;  %7946 = vmatmul.mubr.msk.f32.gmra.mxu0 %vm1505_vm1, %v6283_v39  ;;  %v6221_v45 = vmul.f32 0.01, %v6093_v27 }
 0x6e8   : > { %v8355_v57 = vpop.eup %8354  ;;  %6954 = vst.msk [vmem:[%s12513_s19 + $0x18] sm:$0xff] %vm6950_vm4, %v6889_v29  ;;  %v6888_v47 = vadd.f32 %v12503_v21, %v6571_v10  ;;  %vm6156_vm0 = vcmp.ge.f32.partialorder %v6092_v58, 0.0  ;;  %v6220_v25 = vmul.f32 0.01, %v6092_v58  ;;  %v5959_v14 = vmul.f32 %v8353_v6, %v12291_v24 }
 0x6e9   : > { %8364 = vrsqrt.f32 %v5837_v4  ;;  %v5836_v49 = vadd.f32 1e-05, %v5772_v23  ;;  %v5958_v34 = vmul.f32 %v8355_v57, %v12297_v41  ;;  %v6285_v12 = vsel %vm6157_vm9, %v6093_v27, %v6221_v45 }
 0x6ea   : > { %v8357_v31 = vpop.eup %8356  ;;  %6953 = vst.msk [vmem:[%s12513_s19 + $0x10] sm:$0xff] %vm6950_vm4, %v6888_v47  ;;  %v6284_v3 = vsel %vm6156_vm0, %v6092_v58, %v6220_v25  ;;  %v6027_v59 = vmul.f32 %v12140_v32, %v5959_v14  ;;  %v13405_v47 = vld [vmem:[#allocation89_spill] sm:$0xff] }
 0x6eb   : > { %8366 = vrsqrt.f32 %v5836_v49  ;;  %v7875_v11 = vpop.f32.mrf.mxu0  ;;  %7948 = vmatprep.mubr.msk.f32.mxu0 %vm1505_vm1, %v6284_v3  ;;  %v6026_v63 = vmul.f32 %v12140_v32, %v5958_v34  ;;  %v5961_v24 = vmul.f32 %v8357_v31, %v12304_v9  ;;  %v13406_v3 = vld [vmem:[#allocation36_spill] sm:$0xff] }
 0x6ec   : > { %v8359_v35 = vpop.eup %8358  ;;  %v6586_v41 = vadd.f32 %v7875_v11, %v13401_v30  ;;  %7949 = vmatmul.mubr.msk.f32.gmra.mxu0 %vm1505_vm1, %v6285_v12  ;;  %v6095_v52 = vadd.f32 %v12152_v50, %v6027_v59  ;;  %v13407_v30 = vld [vmem:[#allocation83_spill] sm:$0xff] }
 0x6ed   : > { %v6580_v36 = vpop.f32.mrf.mxu0  ;;  %v6094_v7 = vadd.f32 %v12152_v50, %v6026_v63  ;;  %v5960_v33 = vmul.f32 %v8359_v35, %v12312_v18  ;;  %v6029_v56 = vmul.f32 %v12140_v32, %v5961_v24 }
 0x6ee   : > { %v6891_v48 = vadd.f32 %v12503_v21, %v6586_v41  ;;  %v6581_v9 = vadd.f32 %v6580_v36, %v13402_v38  ;;  %vm6159_vm10 = vcmp.ge.f32.partialorder %v6095_v52, 0.0  ;;  %v6223_v40 = vmul.f32 0.01, %v6095_v52  ;;  %v13409_v38 = vld [vmem:[#allocation67_spill] sm:$0xff] }
 0x6ef   : > { %vm6158_vm11 = vcmp.ge.f32.partialorder %v6094_v7, 0.0  ;;  %v6222_v19 = vmul.f32 0.01, %v6094_v7  ;;  %v6028_v62 = vmul.f32 %v12140_v32, %v5960_v33  ;;  %v6097_v54 = vadd.f32 %v12152_v50, %v6029_v56 }
 0x6f0   : > { %6956 = vst.msk [vmem:[%s12513_s19 + $0x28] sm:$0xff] %vm6950_vm4, %v6891_v48  ;;  %v6890_v42 = vadd.f32 %v12503_v21, %v6581_v9  ;;  %v6287_v2 = vsel %vm6159_vm10, %v6095_v52, %v6223_v40 }
 0x6f1   : > { %v6286_v46 = vsel %vm6158_vm11, %v6094_v7, %v6222_v19  ;;  %v6096_v18 = vadd.f32 %v12152_v50, %v6028_v62  ;;  %v6225_v16 = vmul.f32 0.01, %v6097_v54  ;;  %vm6161_vm13 = vcmp.ge.f32.partialorder %v6097_v54, 0.0  ;;  %v13408_v7 = vld [vmem:[#allocation94_spill] sm:$0xff]  ;;  %v13410_v62 = vld [vmem:[#allocation69_spill] sm:$0xff] }
 0x6f2   : > { %v8361_v15 = vpop.eup %8360  ;;  %6955 = vst.msk [vmem:[%s12513_s19 + $0x20] sm:$0xff] %vm6950_vm4, %v6890_v42  ;;  %7951 = vmatprep.mubr.msk.f32.mxu0 %vm1505_vm1, %v6286_v46 }
 0x6f3   : > { %v7878_v17 = vpop.f32.mrf.mxu0  ;;  %7952 = vmatmul.mubr.msk.f32.gmra.mxu0 %vm1505_vm1, %v6287_v2  ;;  %vm6160_vm12 = vcmp.ge.f32.partialorder %v6096_v18, 0.0  ;;  %v6224_v5 = vmul.f32 0.01, %v6096_v18  ;;  %v5963_v37 = vmul.f32 %v8361_v15, %v12324_v61  ;;  %v6289_v6 = vsel %vm6161_vm13, %v6097_v54, %v6225_v16 }
 0x6f4   : > { %v8363_v20 = vpop.eup %8362  ;;  %v6596_v0 = vadd.f32 %v7878_v17, %v13403_v55  ;;  %v13412_v17 = vld [vmem:[#allocation5_spill] sm:$0xff] }
 0x6f5   : > { %v6590_v13 = vpop.f32.mrf.mxu0  ;;  %v6288_v39 = vsel %vm6160_vm12, %v6096_v18, %v6224_v5  ;;  %v5962_v1 = vmul.f32 %v8363_v20, %v12330_v28  ;;  %v6031_v27 = vmul.f32 %v12140_v32, %v5963_v37  ;;  %v13411_v18 = vld [vmem:[#allocation16_spill] sm:$0xff]  ;;  %v13413_v55 = vld [vmem:[#allocation37_spill] sm:$0xff] }
 0x6f6   : > { %v8365_v60 = vpop.eup %8364  ;;  %v6893_v43 = vadd.f32 %v12503_v21, %v6596_v0  ;;  %v6591_v8 = vadd.f32 %v6590_v13, %v13404_v53  ;;  %7954 = vmatprep.mubr.msk.f32.mxu0 %vm1505_vm1, %v6288_v39  ;;  %v13415_v53 = vld [vmem:[#allocation46_spill] sm:$0xff] }
 0x6f7   : > { %7955 = vmatmul.mubr.msk.f32.gmra.mxu0 %vm1505_vm1, %v6289_v6  ;;  %v6030_v61 = vmul.f32 %v12140_v32, %v5962_v1  ;;  %v6099_v29 = vadd.f32 %v12152_v50, %v6031_v27  ;;  %v5965_v26 = vmul.f32 %v8365_v60, %v12337_v51  ;;  %v13414_v1 = vld [vmem:[#allocation25_spill] sm:$0xff] }
 0x6f8   : > { %v8367_v28 = vpop.eup %8366  ;;  %6958 = vst.msk [vmem:[%s12513_s19 + $0x38] sm:$0xff] %vm6950_vm4, %v6893_v43  ;;  %v6892_v10 = vadd.f32 %v12503_v21, %v6591_v8 }
 0x6f9   : > { %v6098_v22 = vadd.f32 %v12152_v50, %v6030_v61  ;;  %v5964_v58 = vmul.f32 %v8367_v28, %v12345_v44  ;;  %v6227_v4 = vmul.f32 0.01, %v6099_v29  ;;  %v6033_v23 = vmul.f32 %v12140_v32, %v5965_v26 }
 0x6fa   : > { %6957 = vst.msk [vmem:[%s12513_s19 + $0x30] sm:$0xff] %vm6950_vm4, %v6892_v10  ;;  %vm6163_vm15 = vcmp.ge.f32.partialorder %v6099_v29, 0.0 }
 0x6fb   : > { %v7881_v45 = vpop.f32.mrf.mxu0  ;;  %vm6162_vm14 = vcmp.ge.f32.partialorder %v6098_v22, 0.0  ;;  %v6226_v57 = vmul.f32 0.01, %v6098_v22  ;;  %v6032_v51 = vmul.f32 %v12140_v32, %v5964_v58  ;;  %v6101_v14 = vadd.f32 %v12152_v50, %v6033_v23 }
 0x6fc   : > { %v6606_v25 = vadd.f32 %v7881_v45, %v13405_v47  ;;  %v6291_v11 = vsel %vm6163_vm15, %v6099_v29, %v6227_v4  ;;  %v13416_v29 = vld [vmem:[#allocation41_spill] sm:$0xff]  ;;  %v13418_v45 = vld [vmem:[#allocation50_spill] sm:$0xff] }
 0x6fd   : > { %v6600_v49 = vpop.f32.mrf.mxu0  ;;  %v6290_v34 = vsel %vm6162_vm14, %v6098_v22, %v6226_v57  ;;  %v6100_v44 = vadd.f32 %v12152_v50, %v6032_v51  ;;  %v6229_v12 = vmul.f32 0.01, %v6101_v14  ;;  %vm6165_vm3 = vcmp.ge.f32.partialorder %v6101_v14, 0.0  ;;  %v13417_v22 = vld [vmem:[#allocation52_spill] sm:$0xff] }
 0x6fe   : > { %v6895_v31 = vadd.f32 %v12503_v21, %v6606_v25  ;;  %v6601_v59 = vadd.f32 %v6600_v49, %v13406_v3  ;;  %7957 = vmatprep.mubr.msk.f32.mxu0 %vm1505_vm1, %v6290_v34  ;;  %v13419_v25 = vld [vmem:[#allocation57_spill] sm:$0xff] }
 0x6ff   : > { %7958 = vmatmul.mubr.msk.f32.gmra.mxu0 %vm1505_vm1, %v6291_v11  ;;  %vm6164_vm2 = vcmp.ge.f32.partialorder %v6100_v44, 0.0  ;;  %v6228_v32 = vmul.f32 0.01, %v6100_v44  ;;  %v6293_v24 = vsel %vm6165_vm3, %v6101_v14, %v6229_v12  ;;  %v13421_v11 = vld [vmem:[#allocation61_spill] sm:$0xff] }
 0x700   : > { %6960 = vst.msk [vmem:[%s12513_s19 + $0x48] sm:$0xff] %vm6950_vm4, %v6895_v31  ;;  %v6894_v63 = vadd.f32 %v12503_v21, %v6601_v59 }
 0x701   : > { %v6292_v50 = vsel %vm6164_vm2, %v6100_v44, %v6228_v32  ;;  %v13420_v44 = vld [vmem:[#allocation53_spill] sm:$0xff] }
 0x702   : > { %6959 = vst.msk [vmem:[%s12513_s19 + $0x40] sm:$0xff] %vm6950_vm4, %v6894_v63  ;;  %7960 = vmatprep.mubr.msk.f32.mxu0 %vm1505_vm1, %v6292_v50  ;;  %v13422_v50 = vld [vmem:[#allocation59_spill] sm:$0xff] }
 0x703   : > { %7961 = vmatmul.mubr.msk.f32.gmra.mxu0 %vm1505_vm1, %v6293_v24 }
 0x707   : > { %v7884_v35 = vpop.f32.mrf.mxu0 }
 0x708   : > { %v6616_v41 = vadd.f32 %v7884_v35, %v13407_v30 }
 0x709   : > { %v6610_v52 = vpop.f32.mrf.mxu0 }
 0x70a   : > { %v6897_v36 = vadd.f32 %v12503_v21, %v6616_v41  ;;  %v6611_v33 = vadd.f32 %v6610_v52, %v13408_v7  ;;  %v13423_v41 = vld [vmem:[#allocation65_spill] sm:$0xff] }
 0x70c   : > { %6962 = vst.msk [vmem:[%s12513_s19 + $0x58] sm:$0xff] %vm6950_vm4, %v6897_v36  ;;  %v6896_v56 = vadd.f32 %v12503_v21, %v6611_v33  ;;  %v13424_v33 = vld [vmem:[#allocation63_spill] sm:$0xff] }
 0x70e   : > { %6961 = vst.msk [vmem:[%s12513_s19 + $0x50] sm:$0xff] %vm6950_vm4, %v6896_v56 }
 0x713   : > { %v7887_v48 = vpop.f32.mrf.mxu0 }
 0x714   : > { %v6626_v9 = vadd.f32 %v7887_v48, %v13409_v38 }
 0x715   : > { %v6620_v40 = vpop.f32.mrf.mxu0 }
 0x716   : > { %v6899_v19 = vadd.f32 %v12503_v21, %v6626_v9  ;;  %v6621_v54 = vadd.f32 %v6620_v40, %v13410_v62  ;;  %v13425_v9 = vld [vmem:[#allocation74_spill] sm:$0xff] }
 0x718   : > { %6964 = vst.msk [vmem:[%s12513_s19 + $0x68] sm:$0xff] %vm6950_vm4, %v6899_v19  ;;  %v6898_v42 = vadd.f32 %v12503_v21, %v6621_v54  ;;  %v13426_v54 = vld [vmem:[#allocation68_spill] sm:$0xff] }
 0x71a   : > { %6963 = vst.msk [vmem:[%s12513_s19 + $0x60] sm:$0xff] %vm6950_vm4, %v6898_v42 }
 0x71f   : > { %v7890_v46 = vpop.f32.mrf.mxu0 }
 0x720   : > { %v6636_v15 = vadd.f32 %v7890_v46, %v13411_v18 }
 0x721   : > { %v6630_v2 = vpop.f32.mrf.mxu0 }
 0x722   : > { %v6901_v16 = vadd.f32 %v12503_v21, %v6636_v15  ;;  %v6631_v5 = vadd.f32 %v6630_v2, %v13412_v17  ;;  %v13427_v15 = vld [vmem:[#allocation6_spill] sm:$0xff] }
 0x724   : > { %6966 = vst.msk [vmem:[%s12513_s19 + $0x78] sm:$0xff] %vm6950_vm4, %v6901_v16  ;;  %v6900_v37 = vadd.f32 %v12503_v21, %v6631_v5  ;;  %v13428_v5 = vld [vmem:[#allocation81_spill] sm:$0xff] }
 0x726   : > { %6965 = vst.msk [vmem:[%s12513_s19 + $0x70] sm:$0xff] %vm6950_vm4, %v6900_v37 }
 0x72b   : > { %v7893_v20 = vpop.f32.mrf.mxu0 }
 0x72c   : > { %v6646_v0 = vadd.f32 %v7893_v20, %v13413_v55 }
 0x72d   : > { %v6640_v13 = vpop.f32.mrf.mxu0 }
 0x72e   : > { %v6903_v39 = vadd.f32 %v12503_v21, %v6646_v0  ;;  %v6641_v27 = vadd.f32 %v6640_v13, %v13414_v1  ;;  %v13429_v0 = vld [vmem:[#allocation17_spill] sm:$0xff] }
 0x730   : > { %6968 = vst.msk [vmem:[%s12513_s19 + $0x88] sm:$0xff] %vm6950_vm4, %v6903_v39  ;;  %v6902_v60 = vadd.f32 %v12503_v21, %v6641_v27  ;;  %v13430_v27 = vld [vmem:[#allocation11_spill] sm:$0xff] }
 0x732   : > { %6967 = vst.msk [vmem:[%s12513_s19 + $0x80] sm:$0xff] %vm6950_vm4, %v6902_v60 }
 0x736   : > { %v7896_v43 = vpop.f32.mrf.mxu0 }
 0x737   : > { %v6656_v8 = vadd.f32 %v7896_v43, %v13415_v53 }
 0x738   : > { %v6650_v6 = vpop.f32.mrf.mxu0 }
 0x739   : > { %v6905_v61 = vadd.f32 %v12503_v21, %v6656_v8  ;;  %v6651_v26 = vadd.f32 %v6650_v6, %v13416_v29  ;;  %v13431_v8 = vld [vmem:[#allocation29_spill] sm:$0xff] }
 0x73a   : > { %v7899_v28 = vpop.f32.mrf.mxu0 }
 0x73b   : > { %6970 = vst.msk [vmem:[%s12513_s19 + $0x98] sm:$0xff] %vm6950_vm4, %v6905_v61  ;;  %v6904_v10 = vadd.f32 %v12503_v21, %v6651_v26  ;;  %v6666_v58 = vadd.f32 %v7899_v28, %v13417_v22  ;;  %v13432_v26 = vld [vmem:[#allocation23_spill] sm:$0xff] }
 0x73c   : > { %v6660_v4 = vpop.f32.mrf.mxu0 }
 0x73d   : > { %6969 = vst.msk [vmem:[%s12513_s19 + $0x90] sm:$0xff] %vm6950_vm4, %v6904_v10  ;;  %v6907_v23 = vadd.f32 %v12503_v21, %v6666_v58  ;;  %v6661_v57 = vadd.f32 %v6660_v4, %v13418_v45  ;;  %v13433_v58 = vld [vmem:[#allocation80_spill] sm:$0xff] }
 0x73e   : > { %v7902_v51 = vpop.f32.mrf.mxu0 }
 0x73f   : > { %6972 = vst.msk [vmem:[%s12513_s19 + $0xa8] sm:$0xff] %vm6950_vm4, %v6907_v23  ;;  %v6906_v47 = vadd.f32 %v12503_v21, %v6661_v57  ;;  %v6676_v14 = vadd.f32 %v7902_v51, %v13419_v25  ;;  %v13434_v57 = vld [vmem:[#allocation35_spill] sm:$0xff] }
 0x740   : > { %v6670_v49 = vpop.f32.mrf.mxu0 }
 0x741   : > { %6971 = vst.msk [vmem:[%s12513_s19 + $0xa0] sm:$0xff] %vm6950_vm4, %v6906_v47  ;;  %v6909_v34 = vadd.f32 %v12503_v21, %v6676_v14  ;;  %v6671_v31 = vadd.f32 %v6670_v49, %v13420_v44  ;;  %v13435_v14 = vld [vmem:[#allocation103_spill] sm:$0xff] }
 0x743   : > { %6974 = vst.msk [vmem:[%s12513_s19 + $0xb8] sm:$0xff] %vm6950_vm4, %v6909_v34  ;;  %v6908_v3 = vadd.f32 %v12503_v21, %v6671_v31  ;;  %v7905_v59 = vpop.f32.mrf.mxu0  ;;  %v13436_v31 = vld [vmem:[#allocation100_spill] sm:$0xff] }
 0x744   : > { %v6686_v12 = vadd.f32 %v7905_v59, %v13421_v11 }
 0x745   : > { %6973 = vst.msk [vmem:[%s12513_s19 + $0xb0] sm:$0xff] %vm6950_vm4, %v6908_v3  ;;  %v6680_v32 = vpop.f32.mrf.mxu0 }
 0x746   : > { %v6911_v63 = vadd.f32 %v12503_v21, %v6686_v12  ;;  %v6681_v24 = vadd.f32 %v6680_v32, %v13422_v50  ;;  %v13437_v12 = vld [vmem:[#allocation98_spill] sm:$0xff] }
 0x748   : > { %6976 = vst.msk [vmem:[%s12513_s19 + $0xc8] sm:$0xff] %vm6950_vm4, %v6911_v63  ;;  %v6910_v35 = vadd.f32 %v12503_v21, %v6681_v24  ;;  %v7908_v30 = vpop.f32.mrf.mxu0  ;;  %v13438_v24 = vld [vmem:[#allocation105_spill] sm:$0xff] }
 0x749   : > { %v6696_v52 = vadd.f32 %v7908_v30, %v13423_v41 }
 0x74a   : > { %6975 = vst.msk [vmem:[%s12513_s19 + $0xc0] sm:$0xff] %vm6950_vm4, %v6910_v35  ;;  %v6690_v36 = vpop.f32.mrf.mxu0 }
 0x74b   : > { %v6913_v7 = vadd.f32 %v12503_v21, %v6696_v52  ;;  %v6691_v56 = vadd.f32 %v6690_v36, %v13424_v33  ;;  %v13439_v52 = vld [vmem:[#allocation96_spill] sm:$0xff] }
 0x74c   : > { %v7911_v48 = vpop.f32.mrf.mxu0 }
 0x74d   : > { %6978 = vst.msk [vmem:[%s12513_s19 + $0xd8] sm:$0xff] %vm6950_vm4, %v6913_v7  ;;  %v6912_v38 = vadd.f32 %v12503_v21, %v6691_v56  ;;  %v6706_v40 = vadd.f32 %v7911_v48, %v13425_v9  ;;  %v13440_v56 = vld [vmem:[#allocation93_spill] sm:$0xff] }
 0x74e   : > { %v6700_v19 = vpop.f32.mrf.mxu0 }
 0x74f   : > { %6977 = vst.msk [vmem:[%s12513_s19 + $0xd0] sm:$0xff] %vm6950_vm4, %v6912_v38  ;;  %v6915_v62 = vadd.f32 %v12503_v21, %v6706_v40  ;;  %v6701_v42 = vadd.f32 %v6700_v19, %v13426_v54  ;;  %v13441_v40 = vld [vmem:[#allocation34_spill] sm:$0xff] }
 0x750   : > { %v7914_v46 = vpop.f32.mrf.mxu0 }
 0x751   : > { %6980 = vst.msk [vmem:[%s12513_s19 + $0xe8] sm:$0xff] %vm6950_vm4, %v6915_v62  ;;  %v6914_v18 = vadd.f32 %v12503_v21, %v6701_v42  ;;  %v6716_v2 = vadd.f32 %v7914_v46, %v13427_v15  ;;  %v13442_v42 = vld [vmem:[#allocation9_spill] sm:$0xff] }
 0x752   : > { %v6710_v16 = vpop.f32.mrf.mxu0 }
 0x753   : > { %6979 = vst.msk [vmem:[%s12513_s19 + $0xe0] sm:$0xff] %vm6950_vm4, %v6914_v18  ;;  %v6917_v17 = vadd.f32 %v12503_v21, %v6716_v2  ;;  %v6711_v37 = vadd.f32 %v6710_v16, %v13428_v5  ;;  %v13443_v2 = vld [vmem:[#allocation31_spill] sm:$0xff] }
 0x755   : > { %6982 = vst.msk [vmem:[%s12513_s19 + $0xf8] sm:$0xff] %vm6950_vm4, %v6917_v17  ;;  %v6916_v20 = vadd.f32 %v12503_v21, %v6711_v37  ;;  %v13444_v37 = vld [vmem:[#allocation48_spill] sm:$0xff] }
 0x756   : > { %v7917_v55 = vpop.f32.mrf.mxu0 }
 0x757   : > { %6981 = vst.msk [vmem:[%s12513_s19 + $0xf0] sm:$0xff] %vm6950_vm4, %v6916_v20  ;;  %v6726_v13 = vadd.f32 %v7917_v55, %v13429_v0 }
 0x758   : > { %v6720_v39 = vpop.f32.mrf.mxu0 }
 0x759   : > { %v6919_v1 = vadd.f32 %v12503_v21, %v6726_v13  ;;  %v6721_v60 = vadd.f32 %v6720_v39, %v13430_v27  ;;  %v13445_v13 = vld [vmem:[#allocation54_spill] sm:$0xff] }
 0x75b   : > { %6984 = vst.msk [vmem:[%s12513_s19 + $0x108] sm:$0xff] %vm6950_vm4, %v6919_v1  ;;  %v6918_v43 = vadd.f32 %v12503_v21, %v6721_v60  ;;  %v13446_v60 = vld [vmem:[#allocation45_spill] sm:$0xff] }
 0x75d   : > { %6983 = vst.msk [vmem:[%s12513_s19 + $0x100] sm:$0xff] %vm6950_vm4, %v6918_v43  ;;  %v7920_v53 = vpop.f32.mrf.mxu0 }
 0x75e   : > { %v6736_v6 = vadd.f32 %v7920_v53, %v13431_v8 }
 0x75f   : > { %v6730_v61 = vpop.f32.mrf.mxu0 }
 0x760   : > { %v6921_v29 = vadd.f32 %v12503_v21, %v6736_v6  ;;  %v6731_v28 = vadd.f32 %v6730_v61, %v13432_v26  ;;  %v13447_v6 = vld [vmem:[#allocation107_spill] sm:$0xff] }
 0x762   : > { %6986 = vst.msk [vmem:[%s12513_s19 + $0x118] sm:$0xff] %vm6950_vm4, %v6921_v29  ;;  %v6920_v10 = vadd.f32 %v12503_v21, %v6731_v28  ;;  %v13448_v28 = vld [vmem:[#allocation56_spill] sm:$0xff] }
 0x764   : > { %6985 = vst.msk [vmem:[%s12513_s19 + $0x110] sm:$0xff] %vm6950_vm4, %v6920_v10 }
 0x765   : > { %v7923_v22 = vpop.f32.mrf.mxu0 }
 0x766   : > { %v6746_v4 = vadd.f32 %v7923_v22, %v13433_v58 }
 0x767   : > { %v6740_v23 = vpop.f32.mrf.mxu0 }
 0x768   : > { %v6923_v45 = vadd.f32 %v12503_v21, %v6746_v4  ;;  %v6741_v51 = vadd.f32 %v6740_v23, %v13434_v57  ;;  %v13449_v4 = vld [vmem:[#allocation109_spill] sm:$0xff] }
 0x76a   : > { %6988 = vst.msk [vmem:[%s12513_s19 + $0x128] sm:$0xff] %vm6950_vm4, %v6923_v45  ;;  %v6922_v47 = vadd.f32 %v12503_v21, %v6741_v51  ;;  %v13450_v51 = vld [vmem:[#allocation108_spill] sm:$0xff] }
 0x76c   : > { %6987 = vst.msk [vmem:[%s12513_s19 + $0x120] sm:$0xff] %vm6950_vm4, %v6922_v47 }
 0x76e   : > { %v7926_v25 = vpop.f32.mrf.mxu0 }
 0x76f   : > { %v6756_v49 = vadd.f32 %v7926_v25, %v13435_v14 }
 0x770   : > { %v6750_v34 = vpop.f32.mrf.mxu0 }
 0x771   : > { %v6925_v44 = vadd.f32 %v12503_v21, %v6756_v49  ;;  %v6751_v3 = vadd.f32 %v6750_v34, %v13436_v31  ;;  %v13451_v49 = vld [vmem:[#allocation111_spill] sm:$0xff] }
 0x773   : > { %6990 = vst.msk [vmem:[%s12513_s19 + $0x138] sm:$0xff] %vm6950_vm4, %v6925_v44  ;;  %v6924_v59 = vadd.f32 %v12503_v21, %v6751_v3  ;;  %v13452_v3 = vld [vmem:[#allocation110_spill] sm:$0xff] }
 0x775   : > { %6989 = vst.msk [vmem:[%s12513_s19 + $0x130] sm:$0xff] %vm6950_vm4, %v6924_v59 }
 0x777   : > { %v7929_v11 = vpop.f32.mrf.mxu0 }
 0x778   : > { %v6766_v32 = vadd.f32 %v7929_v11, %v13437_v12 }
 0x779   : > { %v6760_v63 = vpop.f32.mrf.mxu0 }
 0x77a   : > { %v6927_v50 = vadd.f32 %v12503_v21, %v6766_v32  ;;  %v6761_v35 = vadd.f32 %v6760_v63, %v13438_v24  ;;  %v13453_v32 = vld [vmem:[#allocation113_spill] sm:$0xff] }
 0x77c   : > { %6992 = vst.msk [vmem:[%s12513_s19 + $0x148] sm:$0xff] %vm6950_vm4, %v6927_v50  ;;  %v6926_v30 = vadd.f32 %v12503_v21, %v6761_v35  ;;  %v13454_v35 = vld [vmem:[#allocation112_spill] sm:$0xff] }
 0x77e   : > { %6991 = vst.msk [vmem:[%s12513_s19 + $0x140] sm:$0xff] %vm6950_vm4, %v6926_v30 }
 0x77f   : > { %v7932_v41 = vpop.f32.mrf.mxu0 }
 0x780   : > { %v6776_v36 = vadd.f32 %v7932_v41, %v13439_v52 }
 0x781   : > { %v6770_v7 = vpop.f32.mrf.mxu0 }
 0x782   : > { %v6929_v33 = vadd.f32 %v12503_v21, %v6776_v36  ;;  %v6771_v48 = vadd.f32 %v6770_v7, %v13440_v56  ;;  %v13455_v36 = vld [vmem:[#allocation101_spill] sm:$0xff] }
 0x784   : > { %6994 = vst.msk [vmem:[%s12513_s19 + $0x158] sm:$0xff] %vm6950_vm4, %v6929_v33  ;;  %v6928_v38 = vadd.f32 %v12503_v21, %v6771_v48  ;;  %v13456_v48 = vld [vmem:[#allocation86_spill] sm:$0xff] }
 0x786   : > { %6993 = vst.msk [vmem:[%s12513_s19 + $0x150] sm:$0xff] %vm6950_vm4, %v6928_v38 }
 0x788   : > { %v7935_v9 = vpop.f32.mrf.mxu0 }
 0x789   : > { %v6786_v19 = vadd.f32 %v7935_v9, %v13441_v40 }
 0x78a   : > { %v6780_v62 = vpop.f32.mrf.mxu0 }
 0x78b   : > { %v6931_v54 = vadd.f32 %v12503_v21, %v6786_v19  ;;  %v6781_v46 = vadd.f32 %v6780_v62, %v13442_v42  ;;  %v13457_v19 = vld [vmem:[#allocation115_spill] sm:$0xff] }
 0x78d   : > { %6996 = vst.msk [vmem:[%s12513_s19 + $0x168] sm:$0xff] %vm6950_vm4, %v6931_v54  ;;  %v6930_v18 = vadd.f32 %v12503_v21, %v6781_v46  ;;  %v13458_v46 = vld [vmem:[#allocation114_spill] sm:$0xff] }
 0x78f   : > { %6995 = vst.msk [vmem:[%s12513_s19 + $0x160] sm:$0xff] %vm6950_vm4, %v6930_v18  ;;  %v7938_v15 = vpop.f32.mrf.mxu0 }
 0x790   : > { %v6796_v16 = vadd.f32 %v7938_v15, %v13443_v2 }
 0x791   : > { %v6790_v17 = vpop.f32.mrf.mxu0 }
 0x792   : > { %v6933_v5 = vadd.f32 %v12503_v21, %v6796_v16  ;;  %v6791_v20 = vadd.f32 %v6790_v17, %v13444_v37  ;;  %v13459_v16 = vld [vmem:[#allocation117_spill] sm:$0xff] }
 0x794   : > { %6998 = vst.msk [vmem:[%s12513_s19 + $0x178] sm:$0xff] %vm6950_vm4, %v6933_v5  ;;  %v6932_v55 = vadd.f32 %v12503_v21, %v6791_v20  ;;  %v13460_v20 = vld [vmem:[#allocation116_spill] sm:$0xff] }
 0x796   : > { %6997 = vst.msk [vmem:[%s12513_s19 + $0x170] sm:$0xff] %vm6950_vm4, %v6932_v55 }
 0x79b   : > { %v7941_v0 = vpop.f32.mrf.mxu0 }
 0x79c   : > { %v6806_v39 = vadd.f32 %v7941_v0, %v13445_v13 }
 0x79d   : > { %v6800_v1 = vpop.f32.mrf.mxu0 }
 0x79e   : > { %v6935_v27 = vadd.f32 %v12503_v21, %v6806_v39  ;;  %v6801_v43 = vadd.f32 %v6800_v1, %v13446_v60 }
 0x7a0   : > { %7000 = vst.msk [vmem:[%s12513_s19 + $0x188] sm:$0xff] %vm6950_vm4, %v6935_v27  ;;  %v6934_v53 = vadd.f32 %v12503_v21, %v6801_v43  ;;  %v7944_v8 = vpop.f32.mrf.mxu0 }
 0x7a1   : > { %v6816_v61 = vadd.f32 %v7944_v8, %v13447_v6 }
 0x7a2   : > { %6999 = vst.msk [vmem:[%s12513_s19 + $0x180] sm:$0xff] %vm6950_vm4, %v6934_v53  ;;  %v6810_v29 = vpop.f32.mrf.mxu0 }
 0x7a3   : > { %v6937_v26 = vadd.f32 %v12503_v21, %v6816_v61  ;;  %v6811_v10 = vadd.f32 %v6810_v29, %v13448_v28 }
 0x7a5   : > { %7002 = vst.msk [vmem:[%s12513_s19 + $0x198] sm:$0xff] %vm6950_vm4, %v6937_v26  ;;  %v6936_v22 = vadd.f32 %v12503_v21, %v6811_v10 }
 0x7a7   : > { %7001 = vst.msk [vmem:[%s12513_s19 + $0x190] sm:$0xff] %vm6950_vm4, %v6936_v22  ;;  %v7947_v58 = vpop.f32.mrf.mxu0 }
 0x7a8   : > { %v6826_v23 = vadd.f32 %v7947_v58, %v13449_v4 }
 0x7a9   : > { %v6820_v45 = vpop.f32.mrf.mxu0 }
 0x7aa   : > { %v6939_v57 = vadd.f32 %v12503_v21, %v6826_v23  ;;  %v6821_v47 = vadd.f32 %v6820_v45, %v13450_v51 }
 0x7ac   : > { %7004 = vst.msk [vmem:[%s12513_s19 + $0x1a8] sm:$0xff] %vm6950_vm4, %v6939_v57  ;;  %v6938_v25 = vadd.f32 %v12503_v21, %v6821_v47  ;;  %v7950_v14 = vpop.f32.mrf.mxu0 }
 0x7ad   : > { %v6836_v34 = vadd.f32 %v7950_v14, %v13451_v49 }
 0x7ae   : > { %7003 = vst.msk [vmem:[%s12513_s19 + $0x1a0] sm:$0xff] %vm6950_vm4, %v6938_v25  ;;  %v6830_v44 = vpop.f32.mrf.mxu0 }
 0x7af   : > { %v6941_v31 = vadd.f32 %v12503_v21, %v6836_v34  ;;  %v6831_v59 = vadd.f32 %v6830_v44, %v13452_v3 }
 0x7b1   : > { %7006 = vst.msk [vmem:[%s12513_s19 + $0x1b8] sm:$0xff] %vm6950_vm4, %v6941_v31  ;;  %v6940_v11 = vadd.f32 %v12503_v21, %v6831_v59 }
 0x7b3   : > { %7005 = vst.msk [vmem:[%s12513_s19 + $0x1b0] sm:$0xff] %vm6950_vm4, %v6940_v11  ;;  %v7953_v12 = vpop.f32.mrf.mxu0 }
 0x7b4   : > { %v6846_v63 = vadd.f32 %v7953_v12, %v13453_v32 }
 0x7b5   : > { %v6840_v50 = vpop.f32.mrf.mxu0 }
 0x7b6   : > { %v6943_v24 = vadd.f32 %v12503_v21, %v6846_v63  ;;  %v6841_v30 = vadd.f32 %v6840_v50, %v13454_v35 }
 0x7b7   : > { %v7956_v41 = vpop.f32.mrf.mxu0 }
 0x7b8   : > { %7008 = vst.msk [vmem:[%s12513_s19 + $0x1c8] sm:$0xff] %vm6950_vm4, %v6943_v24  ;;  %v6942_v52 = vadd.f32 %v12503_v21, %v6841_v30  ;;  %v6856_v7 = vadd.f32 %v7956_v41, %v13455_v36 }
 0x7b9   : > { %v6850_v33 = vpop.f32.mrf.mxu0 }
 0x7ba   : > { %7007 = vst.msk [vmem:[%s12513_s19 + $0x1c0] sm:$0xff] %vm6950_vm4, %v6942_v52  ;;  %v6945_v56 = vadd.f32 %v12503_v21, %v6856_v7  ;;  %v6851_v38 = vadd.f32 %v6850_v33, %v13456_v48 }
 0x7bc   : > { %7010 = vst.msk [vmem:[%s12513_s19 + $0x1d8] sm:$0xff] %vm6950_vm4, %v6945_v56  ;;  %v6944_v9 = vadd.f32 %v12503_v21, %v6851_v38 }
 0x7be   : > { %7009 = vst.msk [vmem:[%s12513_s19 + $0x1d0] sm:$0xff] %vm6950_vm4, %v6944_v9 }
 0x7bf   : > { %v7959_v40 = vpop.f32.mrf.mxu0 }
 0x7c0   : > { %v6866_v62 = vadd.f32 %v7959_v40, %v13457_v19 }
 0x7c1   : > { %v6860_v54 = vpop.f32.mrf.mxu0 }
 0x7c2   : > { %v6947_v42 = vadd.f32 %v12503_v21, %v6866_v62  ;;  %v6861_v18 = vadd.f32 %v6860_v54, %v13458_v46 }
 0x7c3   : > { %v7962_v15 = vpop.f32.mrf.mxu0 }
 0x7c4   : > { %7012 = vst.msk [vmem:[%s12513_s19 + $0x1e8] sm:$0xff] %vm6950_vm4, %v6947_v42  ;;  %v6946_v2 = vadd.f32 %v12503_v21, %v6861_v18  ;;  %v6876_v17 = vadd.f32 %v7962_v15, %v13459_v16 }
 0x7c5   : > { %v6870_v5 = vpop.f32.mrf.mxu0 }
 0x7c6   : > { %7011 = vst.msk [vmem:[%s12513_s19 + $0x1e0] sm:$0xff] %vm6950_vm4, %v6946_v2  ;;  %v6949_v37 = vadd.f32 %v12503_v21, %v6876_v17  ;;  %v6871_v55 = vadd.f32 %v6870_v5, %v13460_v20 }
 0x7c8   : > { %7014 = vst.msk [vmem:[%s12513_s19 + $0x1f8] sm:$0xff] %vm6950_vm4, %v6949_v37  ;;  %v6948_v0 = vadd.f32 %v12503_v21, %v6871_v55 }
 0x7ca   : > { %7013 = vst.msk [vmem:[%s12513_s19 + $0x1f0] sm:$0xff] %vm6950_vm4, %v6948_v0 }
 0x7cb PF: > { %s16_s21 = sadd.s32 1, %s8444_s21  }
 0x7cc   : > { %p13_p4 = scmp.ge.s32.totalorder %s16_s21, 4  }
 0x7ce   :  { %15 = sbr.rel (!%p13_p4) target bundleno = 1 (0x1), region = 75 }

</bundles_post_ra>
